<compile_context>
chip_gen: v5e
topology: v5e:2x2
jax: 0.10.0
libtpu: 0.0.40
codegen_flags: <defaults>
</compile_context>

<pallas_src>
import functools
import math

import jax
import jax.numpy as jnp
from jax.experimental import pallas as pl
from jax.experimental.pallas import tpu as pltpu

LAYER = 128            # self.layer_size
HIDDEN = LAYER * 5     # self.hidden_size = 640
NBLOCKS_USED = 4       # basicblock5/6 are unused in forward()
ATT_H = LAYER // 16    # 8

# Ordered kernel parameter names (must match the kernel signature after x).
PARAM_ORDER = (
    "w_in", "sh_in",
    "w1s", "sh1s",
    "w2s", "sh2s",
    "w3s", "sh3s",
    "w4s", "sh4s",
    "wa1a", "ba1a", "wa1b", "ba1b",
    "wa2a", "ba2a", "wa2b", "ba2b",
    "w_out_row", "b_out",
)
# Parameters stacked over the 4 basic blocks -> streamed along the block grid axis.
STACKED = frozenset(("w1s", "sh1s", "w2s", "sh2s", "w3s", "sh3s", "w4s", "sh4s"))
MATMUL_WEIGHT_NAMES = ("w_in", "w1s", "w2s", "w3s", "w4s",
                       "wa1a", "wa1b", "wa2a", "wa2b")


def _kernel(x_ref,
            w_in, sh_in,
            w1, sh1, w2, sh2, w3, sh3, w4, sh4,
            wa1a, ba1a, wa1b, ba1b,
            wa2a, ba2a, wa2b, ba2b,
            w_out_row, b_out,
            o_ref,
            h_scratch):
    f32 = jnp.float32
    bf16 = jnp.bfloat16
    blk = pl.program_id(1)
    last = pl.num_programs(1) - 1

    def ldot(h, w):
        # bf16 x bf16 MXU matmul with f32 accumulation.
        return jnp.dot(h.astype(bf16), w, preferred_element_type=f32)

    # inputblock: Linear -> BN -> ReLU (BN scale folded into W, bias into shift).
    @pl.when(blk == 0)
    def _():
        h_scratch[...] = jax.nn.relu(ldot(x_ref[...], w_in[...]) + sh_in[...])

    h = h_scratch[...]                                            # (TB, 128) f32

    # One basic block per grid step along axis 1 (weights streamed per step).
    o = jax.nn.relu(ldot(h, w1[0]) + sh1[0])                      # (TB, 640)
    o = jax.nn.relu(ldot(o, w2[0]) + sh2[0])                      # (TB, 640)
    o = jax.nn.relu(ldot(o, w3[0]) + sh3[0])                      # (TB, 640)
    o = ldot(o, w4[0]) + sh4[0]                                   # (TB, 128)
    h = jax.nn.relu(o + h)

    def attention(hh, wa, ba, wb, bb):
        a = jax.nn.relu(ldot(hh, wa[...]) + ba[...])              # (TB, 8)
        return jax.nn.sigmoid(ldot(a, wb[...]) + bb[...])         # (TB, 128)

    @pl.when((blk == 0) | (blk == 2))
    def _():
        h_scratch[...] = h

    @pl.when(blk == 1)
    def _():
        h_scratch[...] = h * attention(h, wa1a, ba1a, wa1b, ba1b)

    @pl.when(blk == last)
    def _():
        # TODO(synk): nn.Dropout(0.1) is identity in eval mode; train-mode stochastic dropout not implemented.
        hg = h * attention(h, wa2a, ba2a, wa2b, ba2b)
        # Output head as a lane-dense (1, TB) MXU matvec: (1,128) . (TB,128)^T.
        head = jax.lax.dot_general(
            w_out_row[...].astype(bf16), hg.astype(bf16),
            dimension_numbers=(((1,), (1,)), ((), ())),
            preferred_element_type=f32)                            # (1, TB)
        o_ref[...] = (head + b_out[...]).reshape(o_ref.shape)


def _const_map(i, b, *, nd):
    return (0,) * nd


def _pick_tb(n):
    # 256 fills the v6e/v7x 256-wide MXU M dim; only use it when >= 2 batch
    # tiles remain so v7x's two TensorCores both get work.  Otherwise 128
    # (matches v5e's 128x128 MXU).
    if n % 256 == 0 and n // 256 >= 2:
        return 256
    if n % 128 == 0:
        return 128
    return n


def myresnet_forward(x, kparams, *, tb=None):
    """Fused MyResnet forward. Returns (n, 1) f32."""
    n, f = x.shape
    tb = _pick_tb(n) if tb is None else min(tb, n)
    assert n % tb == 0, "batch must be a multiple of the batch tile"
    nb = n // tb

    weight_args = [kparams[name] for name in PARAM_ORDER]

    in_specs = [pl.BlockSpec((tb, f), lambda i, b: (i, 0))]
    for name in PARAM_ORDER:
        w = kparams[name]
        if name in STACKED:
            # Streamed per basic block along grid axis 1 (double-buffered DMA
            # overlaps the previous block's matmuls).
            in_specs.append(
                pl.BlockSpec((1,) + tuple(w.shape[1:]), lambda i, b: (b, 0, 0)))
        else:
            # Small constant-index weights stay resident in VMEM.
            in_specs.append(
                pl.BlockSpec(tuple(w.shape), functools.partial(_const_map, nd=w.ndim)))

    # Lane-dense output: one (1, tb) row per batch tile.
    out_spec = pl.BlockSpec((1, 1, tb), lambda i, b: (i, 0, 0))

    matmul_params = sum(int(kparams[name].size) for name in MATMUL_WEIGHT_NAMES) + LAYER
    streamed_bytes = sum(int(kparams[name].nbytes) for name in STACKED)
    const_bytes = sum(int(kparams[name].nbytes)
                      for name in PARAM_ORDER if name not in STACKED)
    cost = pl.CostEstimate(
        flops=int(2 * n * matmul_params),
        transcendentals=int(2 * LAYER * n),          # sigmoid exp in the two attentions
        bytes_accessed=int(x.nbytes + n * 4 + nb * streamed_bytes + const_bytes),
    )

    out = pl.pallas_call(
        _kernel,
        out_shape=jax.ShapeDtypeStruct((nb, 1, tb), jnp.float32),
        grid_spec=pltpu.PrefetchScalarGridSpec(
            num_scalar_prefetch=0,
            grid=(nb, NBLOCKS_USED),
            in_specs=in_specs,
            out_specs=out_spec,
            scratch_shapes=[pltpu.VMEM((tb, LAYER), jnp.float32)],  # h carried across blocks
        ),
        compiler_params=pltpu.CompilerParams(
            dimension_semantics=("parallel", "arbitrary"),
            vmem_limit_bytes=32 * 1024 * 1024,
        ),
        cost_estimate=cost,
    )(x, *weight_args)
    return out.reshape(n, 1)


# ---------------------------------------------------------------------------
# Deterministic parameter construction (mirrors nn.Linear / nn.BatchNorm1d init,
# BN evaluated with deterministic "running" stats and reduced to scale/shift).
# ---------------------------------------------------------------------------
def _linear(key, fan_in, fan_out):
    kw, kb = jax.random.split(key)
    bound = 1.0 / math.sqrt(fan_in)
    w = jax.random.uniform(kw, (fan_in, fan_out), jnp.float32, -bound, bound)
    b = jax.random.uniform(kb, (1, fan_out), jnp.float32, -bound, bound)
    return w, b


def _bn_fold(key, bias, dim, eps=1e-5):
    kg, kb, km, kv = jax.random.split(key, 4)
    gamma = jax.random.uniform(kg, (1, dim), jnp.float32, 0.8, 1.2)
    beta = jax.random.uniform(kb, (1, dim), jnp.float32, -0.1, 0.1)
    r_mean = jax.random.uniform(km, (1, dim), jnp.float32, -0.5, 0.5)
    r_var = jax.random.uniform(kv, (1, dim), jnp.float32, 0.5, 1.5)
    scale = gamma / jnp.sqrt(r_var + eps)
    shift = scale * (bias - r_mean) + beta
    return scale, shift


def make_params(key, input_size):
    keys = iter(jax.random.split(key, 64))
    p = {}

    w, b = _linear(next(keys), input_size, LAYER)
    sc, sh = _bn_fold(next(keys), b, LAYER)
    p["w_in"], p["sc_in"], p["sh_in"] = w, sc, sh

    def block_layer(k, fi, fo):
        k1, k2 = jax.random.split(k)
        w, b = _linear(k1, fi, fo)
        sc, sh = _bn_fold(k2, b, fo)
        return w, sc, sh

    stacks = {name: [] for name in
              ("w1s", "sc1s", "sh1s", "w2s", "sc2s", "sh2s",
               "w3s", "sc3s", "sh3s", "w4s", "sc4s", "sh4s")}
    dims = [(LAYER, HIDDEN), (HIDDEN, HIDDEN), (HIDDEN, HIDDEN), (HIDDEN, LAYER)]
    for _ in range(NBLOCKS_USED):
        for li, (fi, fo) in enumerate(dims, start=1):
            w, sc, sh = block_layer(next(keys), fi, fo)
            stacks[f"w{li}s"].append(w)
            stacks[f"sc{li}s"].append(sc)
            stacks[f"sh{li}s"].append(sh)
    for name, lst in stacks.items():
        p[name] = jnp.stack(lst, axis=0)

    p["wa1a"], p["ba1a"] = _linear(next(keys), LAYER, ATT_H)
    p["wa1b"], p["ba1b"] = _linear(next(keys), ATT_H, LAYER)
    p["wa2a"], p["ba2a"] = _linear(next(keys), LAYER, ATT_H)
    p["wa2b"], p["ba2b"] = _linear(next(keys), ATT_H, LAYER)

    p["w_out"], p["b_out"] = _linear(next(keys), LAYER, 1)
    return p


def fold_and_cast(p):
    """Fold BN scale into W (exact) and cast matmul weights to bf16 for the kernel."""
    bf16 = jnp.bfloat16
    kp = {}
    kp["w_in"] = (p["w_in"] * p["sc_in"]).astype(bf16)
    kp["sh_in"] = p["sh_in"]
    for li in (1, 2, 3, 4):
        kp[f"w{li}s"] = (p[f"w{li}s"] * p[f"sc{li}s"]).astype(bf16)
        kp[f"sh{li}s"] = p[f"sh{li}s"]
    for name in ("wa1a", "wa1b", "wa2a", "wa2b"):
        kp[name] = p[name].astype(bf16)
    for name in ("ba1a", "ba1b", "ba2a", "ba2b"):
        kp[name] = p[name]
    kp["w_out_row"] = p["w_out"].T.astype(bf16)   # (1, 128) bf16 — MXU head
    kp["b_out"] = p["b_out"]                      # (1, 1)   f32
    return kp


# ---------------------------------------------------------------------------
# References.
# ---------------------------------------------------------------------------
def reference_mixed(x, kp):
    """Plain-JAX mirror of the kernel's mixed-precision math."""
    f32 = jnp.float32
    bf16 = jnp.bfloat16
    dot = functools.partial(jnp.dot, preferred_element_type=f32,
                            precision=jax.lax.Precision.HIGHEST)

    def ldot(h, w):
        return dot(h.astype(bf16), w)

    h = jax.nn.relu(ldot(x, kp["w_in"]) + kp["sh_in"])

    def block(h, i):
        o = jax.nn.relu(ldot(h, kp["w1s"][i]) + kp["sh1s"][i])
        o = jax.nn.relu(ldot(o, kp["w2s"][i]) + kp["sh2s"][i])
        o = jax.nn.relu(ldot(o, kp["w3s"][i]) + kp["sh3s"][i])
        o = ldot(o, kp["w4s"][i]) + kp["sh4s"][i]
        return jax.nn.relu(o + h)

    def attn(h, wa, ba, wb, bb):
        return jax.nn.sigmoid(ldot(jax.nn.relu(ldot(h, wa) + ba), wb) + bb)

    h = block(h, 0)
    h = block(h, 1)
    h = h * attn(h, kp["wa1a"], kp["ba1a"], kp["wa1b"], kp["ba1b"])
    h = block(h, 2)
    h = block(h, 3)
    h = h * attn(h, kp["wa2a"], kp["ba2a"], kp["wa2b"], kp["ba2b"])
    return ldot(h, kp["w_out_row"].T) + kp["b_out"]


def reference_f32(x, p):
    """Full-f32 reference with the original (unfolded) scale/shift math."""
    dot = functools.partial(jnp.dot, precision=jax.lax.Precision.HIGHEST)
    h = jax.nn.relu(dot(x, p["w_in"]) * p["sc_in"] + p["sh_in"])

    def block(h, i):
        o = jax.nn.relu(dot(h, p["w1s"][i]) * p["sc1s"][i] + p["sh1s"][i])
        o = jax.nn.relu(dot(o, p["w2s"][i]) * p["sc2s"][i] + p["sh2s"][i])
        o = jax.nn.relu(dot(o, p["w3s"][i]) * p["sc3s"][i] + p["sh3s"][i])
        o = dot(o, p["w4s"][i]) * p["sc4s"][i] + p["sh4s"][i]
        return jax.nn.relu(o + h)

    def attn(h, wa, ba, wb, bb):
        return jax.nn.sigmoid(dot(jax.nn.relu(dot(h, wa) + ba), wb) + bb)

    h = block(h, 0)
    h = block(h, 1)
    h = h * attn(h, p["wa1a"], p["ba1a"], p["wa1b"], p["ba1b"])
    h = block(h, 2)
    h = block(h, 3)
    h = h * attn(h, p["wa2a"], p["ba2a"], p["wa2b"], p["ba2b"])  # dropout = identity (eval)
    return dot(h, p["w_out"]) + p["b_out"]


if __name__ == "__main__":
    INPUT_SIZE = 32
    BATCH = 256    # tb auto-selects 128 -> grid (2, 4): both v7x TensorCores get work

    key = jax.random.PRNGKey(0)
    kx, kp = jax.random.split(key)
    x = jax.random.normal(kx, (BATCH, INPUT_SIZE), jnp.float32)

    params = make_params(kp, INPUT_SIZE)
    kparams = fold_and_cast(params)

    out = jax.block_until_ready(myresnet_forward(x, kparams))
    assert out.shape == (BATCH, 1), out.shape

    # Tight check against the mixed-precision mirror (same math as the kernel).
    ref_mx = jax.block_until_ready(reference_mixed(x, kparams))
    assert bool(jnp.allclose(out, ref_mx, rtol=1e-2, atol=1e-2)), (
        f"mixed ref max abs diff {float(jnp.max(jnp.abs(out - ref_mx)))}")

    # Loose sanity check vs the full-f32 original math (bf16 quantization noise only).
    ref32 = jax.block_until_ready(reference_f32(x, params))
    assert bool(jnp.allclose(out, ref32, rtol=2e-1, atol=2e-1)), (
        f"f32 ref max abs diff {float(jnp.max(jnp.abs(out - ref32)))}")

    print("KERNEL_OK")
</pallas_src>

<mosaic_0001>
module attributes {stable_mosaic.version = 11 : i64} {
  func.func @_kernel(%arg0: i32, %arg1: i32, %arg2: memref<128x32xf32, #tpu.memory_space<vmem>>, %arg3: memref<32x128xbf16, #tpu.memory_space<vmem>>, %arg4: memref<1x128xf32, #tpu.memory_space<vmem>>, %arg5: memref<1x128x640xbf16, #tpu.memory_space<vmem>>, %arg6: memref<1x1x640xf32, #tpu.memory_space<vmem>>, %arg7: memref<1x640x640xbf16, #tpu.memory_space<vmem>>, %arg8: memref<1x1x640xf32, #tpu.memory_space<vmem>>, %arg9: memref<1x640x640xbf16, #tpu.memory_space<vmem>>, %arg10: memref<1x1x640xf32, #tpu.memory_space<vmem>>, %arg11: memref<1x640x128xbf16, #tpu.memory_space<vmem>>, %arg12: memref<1x1x128xf32, #tpu.memory_space<vmem>>, %arg13: memref<128x8xbf16, #tpu.memory_space<vmem>>, %arg14: memref<1x8xf32, #tpu.memory_space<vmem>>, %arg15: memref<8x128xbf16, #tpu.memory_space<vmem>>, %arg16: memref<1x128xf32, #tpu.memory_space<vmem>>, %arg17: memref<128x8xbf16, #tpu.memory_space<vmem>>, %arg18: memref<1x8xf32, #tpu.memory_space<vmem>>, %arg19: memref<8x128xbf16, #tpu.memory_space<vmem>>, %arg20: memref<1x128xf32, #tpu.memory_space<vmem>>, %arg21: memref<1x128xbf16, #tpu.memory_space<vmem>>, %arg22: memref<1x1xf32, #tpu.memory_space<vmem>>, %arg23: memref<1x1x128xf32, #tpu.memory_space<vmem>>, %arg24: memref<128x128xf32, #tpu.memory_space<vmem>>) attributes {dimension_semantics = [#tpu.dimension_semantics<parallel>, #tpu.dimension_semantics<arbitrary>], iteration_bounds = array<i64: 2, 4>, scalar_prefetch = 0 : i64, scratch_operands = 1 : i64, tpu.core_type = #tpu.core_type<tc>, window_params = [{transform_indices = @transform_0, window_bounds = array<i64: 128, 32>}, {pipeline_mode = #tpu.pipeline_mode<synchronous>, transform_indices = @transform_1, window_bounds = array<i64: 32, 128>}, {pipeline_mode = #tpu.pipeline_mode<synchronous>, transform_indices = @transform_2, window_bounds = array<i64: 1, 128>}, {transform_indices = @transform_3, window_bounds = array<i64: 1, 128, 640>}, {transform_indices = @transform_4, window_bounds = array<i64: 1, 1, 640>}, {transform_indices = @transform_5, window_bounds = array<i64: 1, 640, 640>}, {transform_indices = @transform_6, window_bounds = array<i64: 1, 1, 640>}, {transform_indices = @transform_7, window_bounds = array<i64: 1, 640, 640>}, {transform_indices = @transform_8, window_bounds = array<i64: 1, 1, 640>}, {transform_indices = @transform_9, window_bounds = array<i64: 1, 640, 128>}, {transform_indices = @transform_10, window_bounds = array<i64: 1, 1, 128>}, {pipeline_mode = #tpu.pipeline_mode<synchronous>, transform_indices = @transform_11, window_bounds = array<i64: 128, 8>}, {pipeline_mode = #tpu.pipeline_mode<synchronous>, transform_indices = @transform_12, window_bounds = array<i64: 1, 8>}, {pipeline_mode = #tpu.pipeline_mode<synchronous>, transform_indices = @transform_13, window_bounds = array<i64: 8, 128>}, {pipeline_mode = #tpu.pipeline_mode<synchronous>, transform_indices = @transform_14, window_bounds = array<i64: 1, 128>}, {pipeline_mode = #tpu.pipeline_mode<synchronous>, transform_indices = @transform_15, window_bounds = array<i64: 128, 8>}, {pipeline_mode = #tpu.pipeline_mode<synchronous>, transform_indices = @transform_16, window_bounds = array<i64: 1, 8>}, {pipeline_mode = #tpu.pipeline_mode<synchronous>, transform_indices = @transform_17, window_bounds = array<i64: 8, 128>}, {pipeline_mode = #tpu.pipeline_mode<synchronous>, transform_indices = @transform_18, window_bounds = array<i64: 1, 128>}, {pipeline_mode = #tpu.pipeline_mode<synchronous>, transform_indices = @transform_19, window_bounds = array<i64: 1, 128>}, {pipeline_mode = #tpu.pipeline_mode<synchronous>, transform_indices = @transform_20, window_bounds = array<i64: 1, 1>}, {transform_indices = @transform_21, window_bounds = array<i64: 1, 1, 128>}]} {
    %c0_i32 = arith.constant 0 : i32
    %0 = arith.cmpi eq, %arg1, %c0_i32 : i32
    %1 = arith.extui %0 : i1 to i32
    %c0_i32_0 = arith.constant 0 : i32
    %2 = arith.cmpi ne, %1, %c0_i32_0 : i32
    scf.if %2 {
      %c0_37 = arith.constant 0 : index
      %c0_38 = arith.constant 0 : index
      %56 = vector.load %arg2[%c0_37, %c0_38] : memref<128x32xf32, #tpu.memory_space<vmem>>, vector<128x32xf32>
      %c0_39 = arith.constant 0 : index
      %c0_40 = arith.constant 0 : index
      %57 = vector.load %arg3[%c0_39, %c0_40] : memref<32x128xbf16, #tpu.memory_space<vmem>>, vector<32x128xbf16>
      %58 = arith.truncf %56 : vector<128x32xf32> to vector<128x32xbf16>
      %cst_41 = arith.constant dense<0.000000e+00> : vector<128x128xf32>
      %59 = tpu.matmul %58, %57, %cst_41 {dimension_numbers = #tpu.dot_dimension_numbers<[1], [0], [0], [1], [0, 0, 1, 1], [], []>} : vector<128x32xbf16>, vector<32x128xbf16>, vector<128x128xf32> -> vector<128x128xf32>
      %c0_42 = arith.constant 0 : index
      %c0_43 = arith.constant 0 : index
      %60 = vector.load %arg4[%c0_42, %c0_43] : memref<1x128xf32, #tpu.memory_space<vmem>>, vector<1x128xf32>
      %61 = vector.broadcast %60 : vector<1x128xf32> to vector<128x128xf32>
      %62 = arith.addf %59, %61 : vector<128x128xf32>
      %cst_44 = arith.constant 0.000000e+00 : f32
      %63 = vector.broadcast %cst_44 : f32 to vector<128x128xf32>
      %64 = arith.maximumf %62, %63 : vector<128x128xf32>
      %c0_45 = arith.constant 0 : index
      %c0_46 = arith.constant 0 : index
      %65 = vector.load %arg24[%c0_45, %c0_46] : memref<128x128xf32, #tpu.memory_space<vmem>>, vector<128x128xf32>
      tpu.vector_store %arg24[%c0_45, %c0_46], %64 {strides = array<i32>} : memref<128x128xf32, #tpu.memory_space<vmem>>, vector<128x128xf32>,
    } else {
    }
    %c0 = arith.constant 0 : index
    %c0_1 = arith.constant 0 : index
    %3 = vector.load %arg24[%c0, %c0_1] : memref<128x128xf32, #tpu.memory_space<vmem>>, vector<128x128xf32>
    %c0_2 = arith.constant 0 : index
    %c0_3 = arith.constant 0 : index
    %c0_4 = arith.constant 0 : index
    %4 = vector.load %arg5[%c0_2, %c0_3, %c0_4] : memref<1x128x640xbf16, #tpu.memory_space<vmem>>, vector<1x128x640xbf16>
    %5 = vector.shape_cast %4 : vector<1x128x640xbf16> to vector<128x640xbf16>
    %6 = arith.truncf %3 : vector<128x128xf32> to vector<128x128xbf16>
    %cst = arith.constant dense<0.000000e+00> : vector<128x640xf32>
    %7 = tpu.matmul %6, %5, %cst {dimension_numbers = #tpu.dot_dimension_numbers<[1], [0], [0], [1], [0, 0, 1, 1], [], []>} : vector<128x128xbf16>, vector<128x640xbf16>, vector<128x640xf32> -> vector<128x640xf32>
    %c0_5 = arith.constant 0 : index
    %c0_6 = arith.constant 0 : index
    %c0_7 = arith.constant 0 : index
    %8 = vector.load %arg6[%c0_5, %c0_6, %c0_7] : memref<1x1x640xf32, #tpu.memory_space<vmem>>, vector<1x1x640xf32>
    %9 = vector.shape_cast %8 : vector<1x1x640xf32> to vector<1x640xf32>
    %10 = vector.broadcast %9 : vector<1x640xf32> to vector<128x640xf32>
    %11 = arith.addf %7, %10 : vector<128x640xf32>
    %cst_8 = arith.constant 0.000000e+00 : f32
    %12 = vector.broadcast %cst_8 : f32 to vector<128x640xf32>
    %13 = arith.maximumf %11, %12 : vector<128x640xf32>
    %c0_9 = arith.constant 0 : index
    %c0_10 = arith.constant 0 : index
    %c0_11 = arith.constant 0 : index
    %14 = vector.load %arg7[%c0_9, %c0_10, %c0_11] : memref<1x640x640xbf16, #tpu.memory_space<vmem>>, vector<1x640x640xbf16>
    %15 = vector.shape_cast %14 : vector<1x640x640xbf16> to vector<640x640xbf16>
    %16 = arith.truncf %13 : vector<128x640xf32> to vector<128x640xbf16>
    %cst_12 = arith.constant dense<0.000000e+00> : vector<128x640xf32>
    %17 = tpu.matmul %16, %15, %cst_12 {dimension_numbers = #tpu.dot_dimension_numbers<[1], [0], [0], [1], [0, 0, 1, 1], [], []>} : vector<128x640xbf16>, vector<640x640xbf16>, vector<128x640xf32> -> vector<128x640xf32>
    %c0_13 = arith.constant 0 : index
    %c0_14 = arith.constant 0 : index
    %c0_15 = arith.constant 0 : index
    %18 = vector.load %arg8[%c0_13, %c0_14, %c0_15] : memref<1x1x640xf32, #tpu.memory_space<vmem>>, vector<1x1x640xf32>
    %19 = vector.shape_cast %18 : vector<1x1x640xf32> to vector<1x640xf32>
    %20 = vector.broadcast %19 : vector<1x640xf32> to vector<128x640xf32>
    %21 = arith.addf %17, %20 : vector<128x640xf32>
    %cst_16 = arith.constant 0.000000e+00 : f32
    %22 = vector.broadcast %cst_16 : f32 to vector<128x640xf32>
    %23 = arith.maximumf %21, %22 : vector<128x640xf32>
    %c0_17 = arith.constant 0 : index
    %c0_18 = arith.constant 0 : index
    %c0_19 = arith.constant 0 : index
    %24 = vector.load %arg9[%c0_17, %c0_18, %c0_19] : memref<1x640x640xbf16, #tpu.memory_space<vmem>>, vector<1x640x640xbf16>
    %25 = vector.shape_cast %24 : vector<1x640x640xbf16> to vector<640x640xbf16>
    %26 = arith.truncf %23 : vector<128x640xf32> to vector<128x640xbf16>
    %cst_20 = arith.constant dense<0.000000e+00> : vector<128x640xf32>
    %27 = tpu.matmul %26, %25, %cst_20 {dimension_numbers = #tpu.dot_dimension_numbers<[1], [0], [0], [1], [0, 0, 1, 1], [], []>} : vector<128x640xbf16>, vector<640x640xbf16>, vector<128x640xf32> -> vector<128x640xf32>
    %c0_21 = arith.constant 0 : index
    %c0_22 = arith.constant 0 : index
    %c0_23 = arith.constant 0 : index
    %28 = vector.load %arg10[%c0_21, %c0_22, %c0_23] : memref<1x1x640xf32, #tpu.memory_space<vmem>>, vector<1x1x640xf32>
    %29 = vector.shape_cast %28 : vector<1x1x640xf32> to vector<1x640xf32>
    %30 = vector.broadcast %29 : vector<1x640xf32> to vector<128x640xf32>
    %31 = arith.addf %27, %30 : vector<128x640xf32>
    %cst_24 = arith.constant 0.000000e+00 : f32
    %32 = vector.broadcast %cst_24 : f32 to vector<128x640xf32>
    %33 = arith.maximumf %31, %32 : vector<128x640xf32>
    %c0_25 = arith.constant 0 : index
    %c0_26 = arith.constant 0 : index
    %c0_27 = arith.constant 0 : index
    %34 = vector.load %arg11[%c0_25, %c0_26, %c0_27] : memref<1x640x128xbf16, #tpu.memory_space<vmem>>, vector<1x640x128xbf16>
    %35 = vector.shape_cast %34 : vector<1x640x128xbf16> to vector<640x128xbf16>
    %36 = arith.truncf %33 : vector<128x640xf32> to vector<128x640xbf16>
    %cst_28 = arith.constant dense<0.000000e+00> : vector<128x128xf32>
    %37 = tpu.matmul %36, %35, %cst_28 {dimension_numbers = #tpu.dot_dimension_numbers<[1], [0], [0], [1], [0, 0, 1, 1], [], []>} : vector<128x640xbf16>, vector<640x128xbf16>, vector<128x128xf32> -> vector<128x128xf32>
    %c0_29 = arith.constant 0 : index
    %c0_30 = arith.constant 0 : index
    %c0_31 = arith.constant 0 : index
    %38 = vector.load %arg12[%c0_29, %c0_30, %c0_31] : memref<1x1x128xf32, #tpu.memory_space<vmem>>, vector<1x1x128xf32>
    %39 = vector.shape_cast %38 : vector<1x1x128xf32> to vector<1x128xf32>
    %40 = vector.broadcast %39 : vector<1x128xf32> to vector<128x128xf32>
    %41 = arith.addf %37, %40 : vector<128x128xf32>
    %42 = arith.addf %41, %3 : vector<128x128xf32>
    %cst_32 = arith.constant 0.000000e+00 : f32
    %43 = vector.broadcast %cst_32 : f32 to vector<128x128xf32>
    %44 = arith.maximumf %42, %43 : vector<128x128xf32>
    %c0_i32_33 = arith.constant 0 : i32
    %45 = arith.cmpi eq, %arg1, %c0_i32_33 : i32
    %c2_i32 = arith.constant 2 : i32
    %46 = arith.cmpi eq, %arg1, %c2_i32 : i32
    %47 = arith.ori %45, %46 : i1
    %48 = arith.extui %47 : i1 to i32
    %c0_i32_34 = arith.constant 0 : i32
    %49 = arith.cmpi ne, %48, %c0_i32_34 : i32
    scf.if %49 {
      %c0_37 = arith.constant 0 : index
      %c0_38 = arith.constant 0 : index
      %56 = vector.load %arg24[%c0_37, %c0_38] : memref<128x128xf32, #tpu.memory_space<vmem>>, vector<128x128xf32>
      tpu.vector_store %arg24[%c0_37, %c0_38], %44 {strides = array<i32>} : memref<128x128xf32, #tpu.memory_space<vmem>>, vector<128x128xf32>,
    } else {
    }
    %c1_i32 = arith.constant 1 : i32
    %50 = arith.cmpi eq, %arg1, %c1_i32 : i32
    %51 = arith.extui %50 : i1 to i32
    %c0_i32_35 = arith.constant 0 : i32
    %52 = arith.cmpi ne, %51, %c0_i32_35 : i32
    scf.if %52 {
      %c0_37 = arith.constant 0 : index
      %c0_38 = arith.constant 0 : index
      %56 = vector.load %arg13[%c0_37, %c0_38] : memref<128x8xbf16, #tpu.memory_space<vmem>>, vector<128x8xbf16>
      %57 = arith.truncf %44 : vector<128x128xf32> to vector<128x128xbf16>
      %cst_39 = arith.constant dense<0.000000e+00> : vector<128x8xf32>
      %58 = tpu.matmul %57, %56, %cst_39 {dimension_numbers = #tpu.dot_dimension_numbers<[1], [0], [0], [1], [0, 0, 1, 1], [], []>} : vector<128x128xbf16>, vector<128x8xbf16>, vector<128x8xf32> -> vector<128x8xf32>
      %c0_40 = arith.constant 0 : index
      %c0_41 = arith.constant 0 : index
      %59 = vector.load %arg14[%c0_40, %c0_41] : memref<1x8xf32, #tpu.memory_space<vmem>>, vector<1x8xf32>
      %60 = vector.broadcast %59 : vector<1x8xf32> to vector<128x8xf32>
      %61 = arith.addf %58, %60 : vector<128x8xf32>
      %cst_42 = arith.constant 0.000000e+00 : f32
      %62 = vector.broadcast %cst_42 : f32 to vector<128x8xf32>
      %63 = arith.maximumf %61, %62 : vector<128x8xf32>
      %c0_43 = arith.constant 0 : index
      %c0_44 = arith.constant 0 : index
      %64 = vector.load %arg15[%c0_43, %c0_44] : memref<8x128xbf16, #tpu.memory_space<vmem>>, vector<8x128xbf16>
      %65 = arith.truncf %63 : vector<128x8xf32> to vector<128x8xbf16>
      %cst_45 = arith.constant dense<0.000000e+00> : vector<128x128xf32>
      %66 = tpu.matmul %65, %64, %cst_45 {dimension_numbers = #tpu.dot_dimension_numbers<[1], [0], [0], [1], [0, 0, 1, 1], [], []>} : vector<128x8xbf16>, vector<8x128xbf16>, vector<128x128xf32> -> vector<128x128xf32>
      %c0_46 = arith.constant 0 : index
      %c0_47 = arith.constant 0 : index
      %67 = vector.load %arg16[%c0_46, %c0_47] : memref<1x128xf32, #tpu.memory_space<vmem>>, vector<1x128xf32>
      %68 = vector.broadcast %67 : vector<1x128xf32> to vector<128x128xf32>
      %69 = arith.addf %66, %68 : vector<128x128xf32>
      %70 = arith.negf %69 : vector<128x128xf32>
      %71 = math.exp %70 : vector<128x128xf32>
      %cst_48 = arith.constant 1.000000e+00 : f32
      %72 = vector.broadcast %cst_48 : f32 to vector<128x128xf32>
      %73 = arith.addf %72, %71 : vector<128x128xf32>
      %74 = arith.divf %72, %73 : vector<128x128xf32>
      %75 = arith.mulf %44, %74 : vector<128x128xf32>
      %c0_49 = arith.constant 0 : index
      %c0_50 = arith.constant 0 : index
      %76 = vector.load %arg24[%c0_49, %c0_50] : memref<128x128xf32, #tpu.memory_space<vmem>>, vector<128x128xf32>
      tpu.vector_store %arg24[%c0_49, %c0_50], %75 {strides = array<i32>} : memref<128x128xf32, #tpu.memory_space<vmem>>, vector<128x128xf32>,
    } else {
    }
    %c3_i32 = arith.constant 3 : i32
    %53 = arith.cmpi eq, %arg1, %c3_i32 : i32
    %54 = arith.extui %53 : i1 to i32
    %c0_i32_36 = arith.constant 0 : i32
    %55 = arith.cmpi ne, %54, %c0_i32_36 : i32
    scf.if %55 {
      %c0_37 = arith.constant 0 : index
      %c0_38 = arith.constant 0 : index
      %56 = vector.load %arg17[%c0_37, %c0_38] : memref<128x8xbf16, #tpu.memory_space<vmem>>, vector<128x8xbf16>
      %57 = arith.truncf %44 : vector<128x128xf32> to vector<128x128xbf16>
      %cst_39 = arith.constant dense<0.000000e+00> : vector<128x8xf32>
      %58 = tpu.matmul %57, %56, %cst_39 {dimension_numbers = #tpu.dot_dimension_numbers<[1], [0], [0], [1], [0, 0, 1, 1], [], []>} : vector<128x128xbf16>, vector<128x8xbf16>, vector<128x8xf32> -> vector<128x8xf32>
      %c0_40 = arith.constant 0 : index
      %c0_41 = arith.constant 0 : index
      %59 = vector.load %arg18[%c0_40, %c0_41] : memref<1x8xf32, #tpu.memory_space<vmem>>, vector<1x8xf32>
      %60 = vector.broadcast %59 : vector<1x8xf32> to vector<128x8xf32>
      %61 = arith.addf %58, %60 : vector<128x8xf32>
      %cst_42 = arith.constant 0.000000e+00 : f32
      %62 = vector.broadcast %cst_42 : f32 to vector<128x8xf32>
      %63 = arith.maximumf %61, %62 : vector<128x8xf32>
      %c0_43 = arith.constant 0 : index
      %c0_44 = arith.constant 0 : index
      %64 = vector.load %arg19[%c0_43, %c0_44] : memref<8x128xbf16, #tpu.memory_space<vmem>>, vector<8x128xbf16>
      %65 = arith.truncf %63 : vector<128x8xf32> to vector<128x8xbf16>
      %cst_45 = arith.constant dense<0.000000e+00> : vector<128x128xf32>
      %66 = tpu.matmul %65, %64, %cst_45 {dimension_numbers = #tpu.dot_dimension_numbers<[1], [0], [0], [1], [0, 0, 1, 1], [], []>} : vector<128x8xbf16>, vector<8x128xbf16>, vector<128x128xf32> -> vector<128x128xf32>
      %c0_46 = arith.constant 0 : index
      %c0_47 = arith.constant 0 : index
      %67 = vector.load %arg20[%c0_46, %c0_47] : memref<1x128xf32, #tpu.memory_space<vmem>>, vector<1x128xf32>
      %68 = vector.broadcast %67 : vector<1x128xf32> to vector<128x128xf32>
      %69 = arith.addf %66, %68 : vector<128x128xf32>
      %70 = arith.negf %69 : vector<128x128xf32>
      %71 = math.exp %70 : vector<128x128xf32>
      %cst_48 = arith.constant 1.000000e+00 : f32
      %72 = vector.broadcast %cst_48 : f32 to vector<128x128xf32>
      %73 = arith.addf %72, %71 : vector<128x128xf32>
      %74 = arith.divf %72, %73 : vector<128x128xf32>
      %75 = arith.mulf %44, %74 : vector<128x128xf32>
      %c0_49 = arith.constant 0 : index
      %c0_50 = arith.constant 0 : index
      %76 = vector.load %arg21[%c0_49, %c0_50] : memref<1x128xbf16, #tpu.memory_space<vmem>>, vector<1x128xbf16>
      %77 = arith.truncf %75 : vector<128x128xf32> to vector<128x128xbf16>
      %cst_51 = arith.constant dense<0.000000e+00> : vector<1x128xf32>
      %78 = tpu.matmul %76, %77, %cst_51 {dimension_numbers = #tpu.dot_dimension_numbers<[1], [1], [0], [0], [0, 0, 1, 0], [], []>} : vector<1x128xbf16>, vector<128x128xbf16>, vector<1x128xf32> -> vector<1x128xf32>
      %c0_52 = arith.constant 0 : index
      %c0_53 = arith.constant 0 : index
      %79 = vector.load %arg22[%c0_52, %c0_53] : memref<1x1xf32, #tpu.memory_space<vmem>>, vector<1x1xf32>
      %80 = vector.broadcast %79 : vector<1x1xf32> to vector<1x128xf32>
      %81 = arith.addf %78, %80 : vector<1x128xf32>
      %82 = vector.shape_cast %81 : vector<1x128xf32> to vector<1x1x128xf32>
      %c0_54 = arith.constant 0 : index
      %c0_55 = arith.constant 0 : index
      %c0_56 = arith.constant 0 : index
      %83 = vector.load %arg23[%c0_54, %c0_55, %c0_56] : memref<1x1x128xf32, #tpu.memory_space<vmem>>, vector<1x1x128xf32>
      tpu.vector_store %arg23[%c0_54, %c0_55, %c0_56], %82 {strides = array<i32>} : memref<1x1x128xf32, #tpu.memory_space<vmem>>, vector<1x1x128xf32>,
    } else {
    }
    return
  }
  func.func @transform_0(%arg0: i32, %arg1: i32) -> (i32, i32) {
    %c0_i32 = arith.constant 0 : i32
    %c0_i32_0 = arith.constant 0 : i32
    return %arg0, %c0_i32 : i32, i32
  }
  func.func @transform_1(%arg0: i32, %arg1: i32) -> (i32, i32) {
    %c0_i32 = arith.constant 0 : i32
    %c0_i32_0 = arith.constant 0 : i32
    %c0_i32_1 = arith.constant 0 : i32
    return %c0_i32, %c0_i32_0 : i32, i32
  }
  func.func @transform_2(%arg0: i32, %arg1: i32) -> (i32, i32) {
    %c0_i32 = arith.constant 0 : i32
    %c0_i32_0 = arith.constant 0 : i32
    %c0_i32_1 = arith.constant 0 : i32
    return %c0_i32, %c0_i32_0 : i32, i32
  }
  func.func @transform_3(%arg0: i32, %arg1: i32) -> (i32, i32, i32) {
    %c0_i32 = arith.constant 0 : i32
    %c0_i32_0 = arith.constant 0 : i32
    %c0_i32_1 = arith.constant 0 : i32
    return %arg1, %c0_i32, %c0_i32_0 : i32, i32, i32
  }
  func.func @transform_4(%arg0: i32, %arg1: i32) -> (i32, i32, i32) {
    %c0_i32 = arith.constant 0 : i32
    %c0_i32_0 = arith.constant 0 : i32
    %c0_i32_1 = arith.constant 0 : i32
    return %arg1, %c0_i32, %c0_i32_0 : i32, i32, i32
  }
  func.func @transform_5(%arg0: i32, %arg1: i32) -> (i32, i32, i32) {
    %c0_i32 = arith.constant 0 : i32
    %c0_i32_0 = arith.constant 0 : i32
    %c0_i32_1 = arith.constant 0 : i32
    return %arg1, %c0_i32, %c0_i32_0 : i32, i32, i32
  }
  func.func @transform_6(%arg0: i32, %arg1: i32) -> (i32, i32, i32) {
    %c0_i32 = arith.constant 0 : i32
    %c0_i32_0 = arith.constant 0 : i32
    %c0_i32_1 = arith.constant 0 : i32
    return %arg1, %c0_i32, %c0_i32_0 : i32, i32, i32
  }
  func.func @transform_7(%arg0: i32, %arg1: i32) -> (i32, i32, i32) {
    %c0_i32 = arith.constant 0 : i32
    %c0_i32_0 = arith.constant 0 : i32
    %c0_i32_1 = arith.constant 0 : i32
    return %arg1, %c0_i32, %c0_i32_0 : i32, i32, i32
  }
  func.func @transform_8(%arg0: i32, %arg1: i32) -> (i32, i32, i32) {
    %c0_i32 = arith.constant 0 : i32
    %c0_i32_0 = arith.constant 0 : i32
    %c0_i32_1 = arith.constant 0 : i32
    return %arg1, %c0_i32, %c0_i32_0 : i32, i32, i32
  }
  func.func @transform_9(%arg0: i32, %arg1: i32) -> (i32, i32, i32) {
    %c0_i32 = arith.constant 0 : i32
    %c0_i32_0 = arith.constant 0 : i32
    %c0_i32_1 = arith.constant 0 : i32
    return %arg1, %c0_i32, %c0_i32_0 : i32, i32, i32
  }
  func.func @transform_10(%arg0: i32, %arg1: i32) -> (i32, i32, i32) {
    %c0_i32 = arith.constant 0 : i32
    %c0_i32_0 = arith.constant 0 : i32
    %c0_i32_1 = arith.constant 0 : i32
    return %arg1, %c0_i32, %c0_i32_0 : i32, i32, i32
  }
  func.func @transform_11(%arg0: i32, %arg1: i32) -> (i32, i32) {
    %c0_i32 = arith.constant 0 : i32
    %c0_i32_0 = arith.constant 0 : i32
    %c0_i32_1 = arith.constant 0 : i32
    return %c0_i32, %c0_i32_0 : i32, i32
  }
  func.func @transform_12(%arg0: i32, %arg1: i32) -> (i32, i32) {
    %c0_i32 = arith.constant 0 : i32
    %c0_i32_0 = arith.constant 0 : i32
    %c0_i32_1 = arith.constant 0 : i32
    return %c0_i32, %c0_i32_0 : i32, i32
  }
  func.func @transform_13(%arg0: i32, %arg1: i32) -> (i32, i32) {
    %c0_i32 = arith.constant 0 : i32
    %c0_i32_0 = arith.constant 0 : i32
    %c0_i32_1 = arith.constant 0 : i32
    return %c0_i32, %c0_i32_0 : i32, i32
  }
  func.func @transform_14(%arg0: i32, %arg1: i32) -> (i32, i32) {
    %c0_i32 = arith.constant 0 : i32
    %c0_i32_0 = arith.constant 0 : i32
    %c0_i32_1 = arith.constant 0 : i32
    return %c0_i32, %c0_i32_0 : i32, i32
  }
  func.func @transform_15(%arg0: i32, %arg1: i32) -> (i32, i32) {
    %c0_i32 = arith.constant 0 : i32
    %c0_i32_0 = arith.constant 0 : i32
    %c0_i32_1 = arith.constant 0 : i32
    return %c0_i32, %c0_i32_0 : i32, i32
  }
  func.func @transform_16(%arg0: i32, %arg1: i32) -> (i32, i32) {
    %c0_i32 = arith.constant 0 : i32
    %c0_i32_0 = arith.constant 0 : i32
    %c0_i32_1 = arith.constant 0 : i32
    return %c0_i32, %c0_i32_0 : i32, i32
  }
  func.func @transform_17(%arg0: i32, %arg1: i32) -> (i32, i32) {
    %c0_i32 = arith.constant 0 : i32
    %c0_i32_0 = arith.constant 0 : i32
    %c0_i32_1 = arith.constant 0 : i32
    return %c0_i32, %c0_i32_0 : i32, i32
  }
  func.func @transform_18(%arg0: i32, %arg1: i32) -> (i32, i32) {
    %c0_i32 = arith.constant 0 : i32
    %c0_i32_0 = arith.constant 0 : i32
    %c0_i32_1 = arith.constant 0 : i32
    return %c0_i32, %c0_i32_0 : i32, i32
  }
  func.func @transform_19(%arg0: i32, %arg1: i32) -> (i32, i32) {
    %c0_i32 = arith.constant 0 : i32
    %c0_i32_0 = arith.constant 0 : i32
    %c0_i32_1 = arith.constant 0 : i32
    return %c0_i32, %c0_i32_0 : i32, i32
  }
  func.func @transform_20(%arg0: i32, %arg1: i32) -> (i32, i32) {
    %c0_i32 = arith.constant 0 : i32
    %c0_i32_0 = arith.constant 0 : i32
    %c0_i32_1 = arith.constant 0 : i32
    return %c0_i32, %c0_i32_0 : i32, i32
  }
  func.func @transform_21(%arg0: i32, %arg1: i32) -> (i32, i32, i32) {
    %c0_i32 = arith.constant 0 : i32
    %c0_i32_0 = arith.constant 0 : i32
    %c0_i32_1 = arith.constant 0 : i32
    return %arg0, %c0_i32, %c0_i32_0 : i32, i32, i32
  }
}

</mosaic_0001>

<bundles_post_ra>
// kernel: tpu_custom_call.1
= control target key start
LH: loop header
LB: loop body
LE: loop exit
PB: predicated region body
PF: predicated region fallthrough
CT: control target
= control target key end

     0   :  { %s16468_s0 = inlined_call_operand.vmem [shape: f32[256,32], index: 0, kind: input, shape index: {}]   ;;  %s16469_s1 = inlined_call_operand.hbm [shape: bf16[32,128], index: 1, kind: input, shape index: {}]   ;;  %s16470_s2 = inlined_call_operand.hbm [shape: f32[1,128], index: 2, kind: input, shape index: {}]   ;;  %s16471_s3 = inlined_call_operand.hbm [shape: bf16[4,128,640], index: 3, kind: input, shape index: {}]   ;;  %s16472_s4 = inlined_call_operand.hbm [shape: f32[4,1,640], index: 4, kind: input, shape index: {}]   ;;  %s16473_s5 = inlined_call_operand.hbm [shape: bf16[4,640,640], index: 5, kind: input, shape index: {}]   ;;  %s16474_s6 = inlined_call_operand.hbm [shape: f32[4,1,640], index: 6, kind: input, shape index: {}]   ;;  %s16475_s7 = inlined_call_operand.hbm [shape: bf16[4,640,640], index: 7, kind: input, shape index: {}]   ;;  %s16476_s8 = inlined_call_operand.hbm [shape: f32[4,1,640], index: 8, kind: input, shape index: {}]   ;;  %s16477_s9 = inlined_call_operand.hbm [shape: bf16[4,640,128], index: 9, kind: input, shape index: {}]   ;;  %s16478_s10 = inlined_call_operand.hbm [shape: f32[4,1,128], index: 10, kind: input, shape index: {}]   ;;  %s16479_s11 = inlined_call_operand.vmem [shape: bf16[128,8], index: 11, kind: input, shape index: {}]   ;;  %s16480_s12 = inlined_call_operand.hbm [shape: f32[1,8], index: 12, kind: input, shape index: {}]   ;;  %s16481_s13 = inlined_call_operand.hbm [shape: bf16[8,128], index: 13, kind: input, shape index: {}]   ;;  %s16482_s14 = inlined_call_operand.hbm [shape: f32[1,128], index: 14, kind: input, shape index: {}]   ;;  %s16483_s15 = inlined_call_operand.vmem [shape: bf16[128,8], index: 15, kind: input, shape index: {}]   ;;  %s16484_s16 = inlined_call_operand.hbm [shape: f32[1,8], index: 16, kind: input, shape index: {}]   ;;  %s16485_s17 = inlined_call_operand.hbm [shape: bf16[8,128], index: 17, kind: input, shape index: {}]   ;;  %s16486_s18 = inlined_call_operand.hbm [shape: f32[1,128], index: 18, kind: input, shape index: {}]   ;;  %s16487_s19 = inlined_call_operand.hbm [shape: bf16[1,128], index: 19, kind: input, shape index: {}]   ;;  %s16488_s20 = inlined_call_operand.<no memory space> [shape: f32[1,1], index: 20, kind: input, shape index: {}]   ;;  %s16489_s21 = inlined_call_operand.hbm [shape: f32[2,1,128], index: 21, kind: output, shape index: {}]  }
   0x1   :  { %16616 = sst [smem:[#allocation86_spill]] %s16468_s0  ;;  %v26_v0 = vstv %s16488_s20 }
   0x2   :  { %16617 = sst [smem:[#allocation87_spill]] %s16469_s1  ;;  %27 = vst [vmem:[#allocation3] sm:$0x1] %v26_v0 }
   0x3   :  { %16618 = sst [smem:[#allocation88_spill]] %s16470_s2 }
   0x4   :  { %16619 = sst [smem:[#allocation89_spill]] %s16471_s3 }
   0x5   :  { %16620 = sst [smem:[#allocation90_spill]] %s16472_s4 }
   0x6   :  { %16621 = sst [smem:[#allocation91_spill]] %s16473_s5 }
   0x7   :  { %16622 = sst [smem:[#allocation92_spill]] %s16478_s10 }
   0x8   :  { %16623 = sst [smem:[#allocation93_spill]] %s16479_s11 }
   0x9   :  { %16624 = sst [smem:[#allocation94_spill]] %s16482_s14 }
   0xa   :  { %16625 = sst [smem:[#allocation95_spill]] %s16483_s15 }
   0xb   :  { %16626 = sst [smem:[#allocation96_spill]] %s16485_s17 }
   0xc   :  { %16627 = sst [smem:[#allocation97_spill]] %s16487_s19 }
   0xd   :  { %16628 = sst [smem:[#allocation98_spill]] %s16489_s21 }
   0xe   :  { %28 = vsyncpa [#allocation5], 0 }
   0xf   :  { %29 = vsyncpa [#allocation8], 0 }
  0x10   :  { %30 = vsyncpa [#allocation19], 0 }
  0x11   :  { %31 = vsyncpa [#allocation22], 0 }
  0x12   :  { %32 = vsyncpa [#allocation25], 0 }
  0x13   :  { %33 = vsyncpa [#allocation6], 0 }
  0x14   :  { %35 = vsyncpa [#allocation6 + $0x1], 0  ;;  %s13081_s26 = smov 0   ;;  %s13083_s27 = smov 0  }
  0x15   :  { %s13085_s3 = smov 0   ;;  %s13087_s28 = smov 0  }
  0x16   :  { %s13089_s29 = smov 0   ;;  %s13091_s0 = smov 0  }
  0x17   :  { %s13093_s20 = smov 0   ;;  %s13095_s4 = smov 0  }
  0x18   :  { %s13097_s30 = smov 0   ;;  %s13099_s5 = smov 0  }
  0x19   :  { %s13101_s22 = smov 0  }
  0x1a LB: > { %16629 = sst [smem:[#allocation36_spill]] %s12912_s26  ;;  %s13137_s23 = sadd.s32 4294967295, %s12952_s22   ;;  %s12952_s22 = sphi %s13101_s22, %s41_s22   ;;  %s12948_s5 = sphi %s13099_s5, %s16876_s5   ;;  %s12944_s30 = sphi %s13097_s30, %s16875_s30   ;;  %s12940_s4 = sphi %s13095_s4, %s16871_s4   ;;  %s12936_s20 = sphi %s13093_s20, %s16874_s20   ;;  %s12932_s0 = sphi %s13091_s0, %s16870_s0   ;;  %s12928_s29 = sphi %s13089_s29, %s16869_s29   ;;  %s12924_s28 = sphi %s13087_s28, %s16868_s28   ;;  %s12920_s3 = sphi %s13085_s3, %s16867_s3   ;;  %s12916_s27 = sphi %s13083_s27, %s16866_s27   ;;  %s12912_s26 = sphi %s13081_s26, %s16865_s26  }
  0x1b   : > { %16630 = sst [smem:[#allocation37_spill]] %s12916_s27  ;;  %p9290_p0 = scmp.ge.s32.totalorder %s12952_s22, 1 }
  0x1c   : > { %16631 = sst [smem:[#allocation38_spill]] %s12920_s3  ;;  %p142_p1 = scmp.eq.s32.totalorder %s13137_s23, 0 }
  0x1d   : > { %16632 = sst [smem:[#allocation39_spill]] %s12928_s29  ;;  %p570_p2 = scmp.lt.s32.totalorder %s12952_s22, 9 }
  0x1e   : > { %16633 = sst [smem:[#allocation40_spill]] %s12932_s0  ;;  %s12954_s15 = smov [#allocation4]  }
  0x1f   : > { %16634 = sst [smem:[#allocation41_spill]] %s12936_s20  ;;  %p13145_p3 = pnand %p9290_p0, %p570_p2 }
  0x20   : > { %16635 = sst [smem:[#allocation42_spill]] %s12940_s4  ;;  %s583_s11 = sshll.u32 %s12954_s15, 4  ;;  %s584_s11 = int_to_ptr.vmem [resolvable:$true] %s583_s11 }
  0x21   : > { %16636 = sst [smem:[#allocation43_spill]] %s12948_s5  ;;  %p11962_p4 = pneg %p13145_p3 }
  0x22   : > { %16637 = sst [smem:[#allocation44_spill]] %s12952_s22  ;;  %s16496_s24 = smov 64  }
  0x23   : > { %16638 = sst [smem:[#allocation45_spill]] %s13137_s23  ;;  %p13153_p5 = pnand %p11962_p4, %p142_p1 }
  0x24   : > { %s16639_s2 = sld [smem:[#allocation87_spill]]  ;;  %s9289_s20 = sadd.s32 4294967294, %s12952_s22  }
  0x25   : > { %s16640_s21 = scalar_select %p13145_p3, 1, 0 }
  0x26   : > { %s50_s15 = sadd.s32 1, %s12944_s30  ;;  %s53_s4 = sadd.s32 1, %s12948_s5 }
  0x27   : > { %16641 = sst [smem:[#allocation46_spill]] %s16640_s21  ;;  %p51_p6 = scmp.ge.s32.totalorder %s50_s15, 4 }
  0x28   : > { %s128_s21 = sadd.s32 1, %s12932_s0  ;;  %p135_p7 = scmp.ne.s32.totalorder %s12932_s0, %s12928_s29 }
  0x29   : > { %p136_p8 = scmp.eq.s32.totalorder %s12952_s22, 0  ;;  %s16878_s15 = smov (%p51_p6, %s50_s15), 0 }
  0x2a   : > { %s581_s25 = sshll.u32 %s16639_s2, 4  ;;  %s16497_s2 = smov 4   ;;  %s582_s25 = int_to_ptr.hbm [resolvable:$true] %s581_s25 }
  0x2b   : > { %11965 = dma.hbm_to_vmem [thread:$0]  (!%p13153_p5), %s582_s25, 256, %s584_s11, [#allocation5], %s16496_s24, %s16496_s24, %s16497_s2  }
  0x2c   : > { %16643 = sst [smem:[#allocation47_spill]] %s16878_s15  ;;  %s16880_s4 = smov (!%p51_p6, %s53_s4), %s12948_s5 }
  0x2d   : > { %s125_s11 = ssub.s32 %s12944_s30, %s16878_s15  ;;  %p13174_p9 = por %p136_p8, %p135_p7 }
  0x2e   : > { %p55_p10 = scmp.ge.s32.totalorder %s16880_s4, 2  ;;  %p126_p11 = scmp.eq.s32.totalorder %s125_s11, 0 }
  0x2f   : > { %p141_p12 = scmp.ne.s32.totalorder %s12928_s29, %s12924_s28  ;;  %s546_s24 = sadd.s32 1, %s12920_s3 }
  0x30   : > { %s16882_s4 = smov (%p55_p10, %s16880_s4), 0  ;;  %p556_p2 = scmp.ne.s32.totalorder %s12920_s3, %s12916_s27 }
  0x31   : > { %16645 = sst [smem:[#allocation48_spill]] %s16882_s4  ;;  %p13188_p13 = por %p142_p1, %p141_p12 }
  0x32   : > { %s13184_s2 = scalar_select %p126_p11, %s12932_s0, %s128_s21  }
  0x33   : > { %s16647_s15 = scalar_select %p13188_p13, 1, 0 }
  0x34   : > { %16646 = sst [smem:[#allocation49_spill]] %s13184_s2  ;;  %s543_s10 = ssub.s32 %s12948_s5, %s16882_s4 }
  0x35   : > { %16648 = sst [smem:[#allocation50_spill]] %s16647_s15  ;;  %p544_p0 = scmp.eq.s32.totalorder %s543_s10, 0 }
  0x36   : > { %p557_p4 = scmp.eq.s32.totalorder %s13137_s23, 7  ;;  %p562_p6 = scmp.ne.s32.totalorder %s12916_s27, %s12912_s26 }
  0x37   : > { %s13200_s28 = scalar_select %p544_p0, %s12920_s3, %s546_s24  }
  0x38   : > { %p13202_p7 = por %p557_p4, %p556_p2  ;;  %p563_p8 = scmp.eq.s32.totalorder %s9289_s20, 7 }
  0x39   : > { %16649 = sst [smem:[#allocation51_spill]] %s13200_s28  ;;  %p12028_p10 = scmp.lt.s32.totalorder %s12952_s22, 8 }
  0x3a   : > { %s16650_s11 = scalar_select %p13202_p7, 1, 0 }
  0x3b   : > { %s711_s21 = sand.u32 1, %s12952_s22   ;;  %p13208_p11 = por %p563_p8, %p562_p6 }
  0x3c   : > { %16651 = sst [smem:[#allocation52_spill]] %s16650_s11  ;;  %s13213_s15 = sand.u32 1, %s12932_s0  }
  0x3d   : > { %s16652_s2 = scalar_select %p13208_p11, 1, 0 }
  0x3e   : > { %s16514_s10 = smul.u32 320, %s12944_s30  ;;  %p13219_p12 = pnand %p12028_p10, %p13174_p9 }
  0x3f   : > { %16653 = sst [smem:[#allocation53_spill]] %s16652_s2  ;;  %s16513_s24 = smul.u32 320, %s13213_s15 }
  0x40   : > { %s16655_s28 = sld [smem:[#allocation89_spill]]  ;;  %s13231_s25 = smul.u32 5, %s13213_s15 }
  0x41   : > { %s715_s0 = scalar_lea.vmem [#allocation9], %s16513_s24  ;;  %s13233_s22 = scalar_lea.sflag [#allocation5], %s711_s21 }
  0x42   : > { %s723_s26 = sshll.u32 %s715_s0, 4  ;;  %s16516_s11 = smov 320   ;;  %s724_s26 = int_to_ptr.vmem [resolvable:$true] %s723_s26 }
  0x43   : > { %s16518_s27 = smov 20   ;;  %s737_s0 = scalar_lea.vmem [#allocation10], %s13231_s25 }
  0x44   : > { %s745_s5 = sshll.u32 %s737_s0, 4  ;;  %s16656_s24 = sld [smem:[#allocation90_spill]]  ;;  %s746_s5 = int_to_ptr.vmem [resolvable:$true] %s745_s5 }
  0x45   : > { %s12960_s21 = smov [#allocation18]  }
  0x46   : > { %s720_s3 = scalar_lea.hbm %s16655_s28, %s16514_s10  ;;  %s11895_s28 = smul.u32 1600, %s13213_s15 }
  0x47   : > { %s721_s2 = sshll.u32 %s720_s3, 4  ;;  %s13242_s3 = smul.u32 5, %s12944_s30  ;;  %s722_s2 = int_to_ptr.hbm [resolvable:$true] %s721_s2 }
  0x48   : > { %11993 = dma.hbm_to_vmem [thread:$0]  (!%p13219_p12), %s722_s2, 5120, %s724_s26, %s13233_s22, %s16516_s11, %s16516_s11, %s16518_s27  }
  0x49   : > { %s11896_s26 = smul.u32 1600, %s12944_s30  ;;  %s16657_s27 = sld [smem:[#allocation91_spill]] }
  0x4a   : > { %s741_s10 = scalar_lea.hbm %s16656_s24, %s13242_s3  ;;  %s756_s19 = scalar_lea.vmem [#allocation11], %s11895_s28 }
  0x4b   : > { %s743_s29 = sshll.u32 %s741_s10, 4  ;;  %s764_s0 = sshll.u32 %s756_s19, 4  ;;  %s744_s29 = int_to_ptr.hbm [resolvable:$true] %s743_s29  ;;  %s765_s0 = int_to_ptr.vmem [resolvable:$true] %s764_s0 }
  0x4c   : > { %11996 = dma.hbm_to_vmem [thread:$0]  (!%p13219_p12), %s744_s29, 80, %s746_s5, %s13233_s22  }
  0x4d   : > { %s16658_s24 = smov 20   ;;  %s16659_s10 = smov 320  }
  0x4e   : > { %s782_s29 = scalar_lea.hbm %s16474_s6, %s13242_s3  ;;  %s778_s11 = scalar_lea.vmem [#allocation12], %s13231_s25 }
  0x4f   : > { %s761_s23 = scalar_lea.hbm %s16657_s27, %s11896_s26  ;;  %s786_s27 = sshll.u32 %s778_s11, 4  ;;  %s787_s27 = int_to_ptr.vmem [resolvable:$true] %s786_s27 }
  0x50   : > { %s762_s17 = sshll.u32 %s761_s23, 4  ;;  %s784_s5 = sshll.u32 %s782_s29, 4  ;;  %s763_s17 = int_to_ptr.hbm [resolvable:$true] %s762_s17  ;;  %s785_s5 = int_to_ptr.hbm [resolvable:$true] %s784_s5 }
  0x51   : > { %11999 = dma.hbm_to_vmem [thread:$0]  (!%p13219_p12), %s763_s17, 25600, %s765_s0, %s13233_s22, %s16659_s10, %s16659_s10, %s16658_s24  }
  0x52   : > { %12002 = dma.hbm_to_vmem [thread:$0]  (!%p13219_p12), %s785_s5, 80, %s787_s27, %s13233_s22  }
  0x53   : > { %s802_s2 = scalar_lea.hbm %s16475_s7, %s11896_s26  ;;  %s797_s14 = scalar_lea.vmem [#allocation13], %s11895_s28 }
  0x54   : > { %s805_s17 = sshll.u32 %s797_s14, 4  ;;  %s803_s0 = sshll.u32 %s802_s2, 4  ;;  %s806_s17 = int_to_ptr.vmem [resolvable:$true] %s805_s17  ;;  %s804_s0 = int_to_ptr.hbm [resolvable:$true] %s803_s0 }
  0x55   : > { %12005 = dma.hbm_to_vmem [thread:$0]  (!%p13219_p12), %s804_s0, 25600, %s806_s17, %s13233_s22, %s16659_s10, %s16659_s10, %s16658_s24  }
  0x56   : > { %s823_s29 = scalar_lea.hbm %s16476_s8, %s13242_s3  ;;  %s819_s11 = scalar_lea.vmem [#allocation14], %s13231_s25 }
  0x57   : > { %s827_s27 = sshll.u32 %s819_s11, 4  ;;  %s825_s5 = sshll.u32 %s823_s29, 4  ;;  %s828_s27 = int_to_ptr.vmem [resolvable:$true] %s827_s27  ;;  %s826_s5 = int_to_ptr.hbm [resolvable:$true] %s825_s5 }
  0x58   : > { %s16660_s26 = sld [smem:[#allocation88_spill]]  ;;  %s12959_s23 = smov [#allocation7]  }
  0x59   : > { %12008 = dma.hbm_to_vmem [thread:$0]  (!%p13219_p12), %s826_s5, 80, %s828_s27, %s13233_s22  }
  0x5a   : > { %s598_s2 = sshll.u32 %s12959_s23, 4  ;;  %s623_s3 = sshll.u32 %s16481_s13, 4  ;;  %s599_s2 = int_to_ptr.vmem [resolvable:$true] %s598_s2  ;;  %s624_s3 = int_to_ptr.hbm [resolvable:$true] %s623_s3 }
  0x5b   : > { %s650_s0 = sshll.u32 %s16484_s16, 4  ;;  %s625_s20 = sshll.u32 %s12960_s21, 4  ;;  %s651_s0 = int_to_ptr.hbm [resolvable:$true] %s650_s0  ;;  %s626_s20 = int_to_ptr.vmem [resolvable:$true] %s625_s20 }
  0x5c   : > { %11974 = dma.hbm_to_vmem [thread:$0]  (!%p13153_p5), %s624_s3, 64, %s626_s20, [#allocation19]  }
  0x5d   : > { %s12961_s29 = smov [#allocation21]   ;;  %s674_s14 = sshll.u32 %s16486_s18, 4  ;;  %s675_s14 = int_to_ptr.hbm [resolvable:$true] %s674_s14 }
  0x5e   : > { %s596_s19 = sshll.u32 %s16660_s26, 4  ;;  %s652_s11 = sshll.u32 %s12961_s29, 4  ;;  %s597_s19 = int_to_ptr.hbm [resolvable:$true] %s596_s19  ;;  %s653_s11 = int_to_ptr.vmem [resolvable:$true] %s652_s11 }
  0x5f   : > { %11968 = dma.hbm_to_vmem [thread:$0]  (!%p13153_p5), %s597_s19, 16, %s599_s2, [#allocation8]  }
  0x60   : > { %11980 = dma.hbm_to_vmem [thread:$0]  (!%p13153_p5), %s651_s0, 16, %s653_s11, [#allocation22]  }
  0x61   : > { %s12962_s28 = smov [#allocation24]   ;;  %s16661_s19 = smul.u32 320, %s12944_s30 }
  0x62   : > { %s676_s26 = sshll.u32 %s12962_s28, 4  ;;  %s16662_s3 = smul.u32 320, %s13213_s15  ;;  %s677_s26 = int_to_ptr.vmem [resolvable:$true] %s676_s26 }
  0x63   : > { %s843_s24 = scalar_lea.hbm %s16477_s9, %s16661_s19  ;;  %s611_s20 = sshll.u32 %s16480_s12, 4  ;;  %s612_s20 = int_to_ptr.hbm [resolvable:$true] %s611_s20 }
  0x64   : > { %s844_s10 = sshll.u32 %s843_s24, 4  ;;  %s838_s25 = scalar_lea.vmem [#allocation15], %s16662_s3  ;;  %s845_s10 = int_to_ptr.hbm [resolvable:$true] %s844_s10 }
  0x65   : > { %11986 = dma.hbm_to_vmem [thread:$0]  (!%p13153_p5), %s675_s14, 16, %s677_s26, [#allocation25]  }
  0x66   : > { %s846_s17 = sshll.u32 %s838_s25, 4  ;;  %s16663_s29 = smov 4   ;;  %s847_s17 = int_to_ptr.vmem [resolvable:$true] %s846_s17 }
  0x67   : > { %s16664_s11 = smov 64   ;;  %s12963_s27 = smov [#allocation17]  }
  0x68   : > { %12011 = dma.hbm_to_vmem [thread:$0]  (!%p13219_p12), %s845_s10, 5120, %s847_s17, %s13233_s22, %s16664_s11, %s16664_s11, %s16663_s29  }
  0x69   : > { %s613_s5 = sshll.u32 %s12963_s27, 4  ;;  %s16665_s26 = sld [smem:[#allocation94_spill]]  ;;  %s614_s5 = int_to_ptr.vmem [resolvable:$true] %s613_s5 }
  0x6a   : > { %11971 = dma.hbm_to_vmem [thread:$0]  (!%p13153_p5), %s612_s20, 16, %s614_s5, [#allocation8]  }
  0x6b   : > { %s16666_s24 = sld [smem:[#allocation96_spill]]  ;;  %s12964_s25 = smov [#allocation20]  }
  0x6c   : > { %s637_s10 = sshll.u32 %s12964_s25, 4  ;;  %s12965_s17 = smov [#allocation23]   ;;  %s638_s10 = int_to_ptr.vmem [resolvable:$true] %s637_s10 }
  0x6d   : > { %s664_s21 = sshll.u32 %s12965_s17, 4  ;;  %s16667_s11 = sld [smem:[#allocation97_spill]]  ;;  %s665_s21 = int_to_ptr.vmem [resolvable:$true] %s664_s21 }
  0x6e   : > { %s12966_s27 = smov [#allocation26]   ;;  %s859_s2 = scalar_lea.vmem [#allocation16], %s13213_s15 }
  0x6f   : > { %s635_s19 = sshll.u32 %s16665_s26, 4  ;;  %s688_s5 = sshll.u32 %s12966_s27, 4  ;;  %s636_s19 = int_to_ptr.hbm [resolvable:$true] %s635_s19  ;;  %s689_s5 = int_to_ptr.vmem [resolvable:$true] %s688_s5 }
  0x70   : > { %11977 = dma.hbm_to_vmem [thread:$0]  (!%p13153_p5), %s636_s19, 16, %s638_s10, [#allocation19]  }
  0x71   : > { %s662_s3 = sshll.u32 %s16666_s24, 4  ;;  %s16668_s26 = sld [smem:[#allocation92_spill]]  ;;  %s663_s3 = int_to_ptr.hbm [resolvable:$true] %s662_s3 }
  0x72   : > { %11983 = dma.hbm_to_vmem [thread:$0]  (!%p13153_p5), %s663_s3, 64, %s665_s21, [#allocation22]  }
  0x73   : > { %s686_s20 = sshll.u32 %s16667_s11, 4  ;;  %s866_s24 = sshll.u32 %s859_s2, 4  ;;  %s687_s20 = int_to_ptr.hbm [resolvable:$true] %s686_s20  ;;  %s867_s24 = int_to_ptr.vmem [resolvable:$true] %s866_s24 }
  0x74   : > { %11989 = dma.hbm_to_vmem [thread:$0]  (!%p13153_p5), %s687_s20, 16, %s689_s5, [#allocation25]  }
  0x75   : > { %875 = sbr.rel (%p13145_p3) target bundleno = 3568 (0xdf0), region = 104 }
  0x77   : > { %s862_s23 = scalar_lea.hbm %s16668_s26, %s12944_s30 }
  0x78   : > { %s864_s19 = sshll.u32 %s862_s23, 4  ;;  %s865_s19 = int_to_ptr.hbm [resolvable:$true] %s864_s19 }
  0x79   : > { %12014 = dma.hbm_to_vmem [thread:$0]  (!%p13219_p12), %s865_s19, 16, %s867_s24, %s13233_s22  }
  0x7a   : > { %s16670_s3 = sld [smem:[#allocation45_spill]] }
  0x7b   : > { %12879 = dma.done.wait (%p142_p1), [#allocation5], 256  }
  0x7c   : > { %12881 = vsyncadd (%p142_p1), [#allocation5], 4294967040 }
  0x7d   : > { %12883 = dma.done.wait (%p142_p1), [#allocation8], 16  }
  0x7e   : > { %12885 = vsyncadd (%p142_p1), [#allocation8], 4294967280  ;;  %s16671_s1 = sld [smem:[#allocation39_spill]] }
  0x80   : > { %s887_s4 = sand.u32 1, %s16670_s3  }
  0x81   : > { %s888_s17 = scalar_lea.sflag [#allocation5], %s887_s4 }
  0x84   : > { %s13361_s22 = sand.u32 1, %s16671_s1  }
  0x85   : > { %s11905_s10 = smul.u32 320, %s13361_s22 }
  0x87   : > { %s13364_s21 = scalar_lea.vmem [#allocation9], %s11905_s10 }
  0x88   : > { %12887 = dma.done.wait (%p13188_p13), %s888_s17, 61696  }
  0x89   : > { %12889 = vsyncadd (%p13188_p13), %s888_s17, 4294905600  ;;  %s13371_s0 = smul.u32 5, %s13361_s22  ;;  %s13385_s14 = scalar_lea.vmem [#allocation15], %s11905_s10 }
  0x8a   : > { %s11907_s29 = smul.u32 1600, %s13361_s22  ;;  %s960_s26 = scalar_lea.vmem [#allocation16], %s13361_s22 }
  0x8b   : > { %s901_s11 = scalar_lea.vmem [#allocation10], %s13371_s0  ;;  %s13378_s27 = scalar_lea.vmem [#allocation12], %s13371_s0 }
  0x8c   : > { %s13375_s20 = scalar_lea.vmem [#allocation11], %s11907_s29  ;;  %s13380_s5 = scalar_lea.vmem [#allocation13], %s11907_s29 }
  0x8d   : > { %s13383_s28 = scalar_lea.vmem [#allocation14], %s13371_s0 }
  0x8e   : > { %12891 = dma.done.wait (%p142_p1), [#allocation8], 16  }
  0x8f   : > { %12893 = vsyncadd (%p142_p1), [#allocation8], 4294967280 }
  0x90   : > { %12895 = dma.done.wait (%p142_p1), [#allocation19], 80  }
  0x91   : > { %12897 = vsyncadd (%p142_p1), [#allocation19], 4294967216 }
  0x92   : > { %12899 = dma.done.wait (%p142_p1), [#allocation22], 80  }
  0x93   : > { %12901 = vsyncadd (%p142_p1), [#allocation22], 4294967216 }
  0x94   : > { %12903 = dma.done.wait (%p142_p1), [#allocation25], 32  }
  0x95   : > { %12905 = vsyncadd (%p142_p1), [#allocation25], 4294967264  ;;  %s16673_s23 = sld [smem:[#allocation37_spill]] }
  0x96   : > { %s16674_s19 = sld [smem:[#allocation42_spill]] }
  0x97   : > { %s16675_s2 = sld [smem:[#allocation41_spill]] }
  0x98   : > { %s16676_s10 = sld [smem:[#allocation86_spill]] }
  0x9b   : > { %s1091_s24 = sand.u32 1, %s16673_s23  }
  0x9c   : > { %s9315_s25 = sshll.u32 %s16674_s19, 4  ;;  %s13414_s29 = scalar_lea.vmem [#allocation27], %s1091_s24 }
  0x9d   : > { %p1094_p3 = scmp.lt.s32.totalorder %s9315_s25, 31  ;;  %p1100_p5 = scmp.eq.s32.totalorder %s16675_s2, 0 }
  0x9e   : > { %p9317_p1 = scmp.ne.s32.totalorder %s16675_s2, 0 }
  0x9f   : > { %s16884_s25 = smov (!%p1094_p3, %s9315_s25), 31 }
  0xa0   : > { %s9316_s1 = sshll.u32 %s16884_s25, 3  ;;  %1103 = sbr.rel (%p9317_p1) target bundleno = 336 (0x150), region = 176 }
  0xa1   : > { %s13410_s17 = scalar_lea.vmem %s16676_s10, %s9316_s1 }
  0xa5   : > { %v11371_v1 = vld [vmem:[#allocation4 + $0x8] sm:$0xff]  ;;  %v11370_v2 = vld [vmem:[#allocation4] sm:$0xff]  ;;  %vm1148_vm0 = vcmask 261120   ;;  %v1107_v16 = vld [vmem:[%s13410_s17 + $0x18] sm:$0xff] }
  0xa6   : > { %v1104_v3 = vld [vmem:[%s13410_s17] sm:$0xff]  ;;  %v1105_v4 = vld [vmem:[%s13410_s17 + $0x8] sm:$0xff]  ;;  %1179 = vmatpush.bf16.msra.mxu0 %v11371_v1  ;;  %11868 = vmatpush.bf16.msra.mxu1 %v11371_v1  ;;  %v1106_v15 = vld [vmem:[%s13410_s17 + $0x10] sm:$0xff] }
  0xa7   : > { %v1108_v5 = vld [vmem:[%s13410_s17 + $0x20] sm:$0xff]  ;;  %v1109_v6 = vld [vmem:[%s13410_s17 + $0x28] sm:$0xff]  ;;  %11869 = vmatpush.bf16.msra.mxu2 %v11371_v1  ;;  %11870 = vmatpush.bf16.msra.mxu3 %v11371_v1  ;;  %v1124_v11 = vpack.c.bf16 %v1105_v4, %v1104_v3  ;;  %v1110_v17 = vld [vmem:[%s13410_s17 + $0x30] sm:$0xff]  ;;  %v1125_v23 = vpack.c.bf16 %v1107_v16, %v1106_v15 }
  0xa8   : > { %v1112_v7 = vld [vmem:[%s13410_s17 + $0x40] sm:$0xff]  ;;  %v1113_v8 = vld [vmem:[%s13410_s17 + $0x48] sm:$0xff]  ;;  %v1126_v12 = vpack.c.bf16 %v1109_v6, %v1108_v5  ;;  %v1111_v18 = vld [vmem:[%s13410_s17 + $0x38] sm:$0xff] }
  0xa9   : > { %v1116_v9 = vld [vmem:[%s13410_s17 + $0x60] sm:$0xff]  ;;  %v1117_v10 = vld [vmem:[%s13410_s17 + $0x68] sm:$0xff]  ;;  %v1128_v13 = vpack.c.bf16 %v1113_v8, %v1112_v7  ;;  %v1114_v19 = vld [vmem:[%s13410_s17 + $0x50] sm:$0xff]  ;;  %v1127_v24 = vpack.c.bf16 %v1111_v18, %v1110_v17 }
  0xaa   : > { %1180 = vmatpush.bf16.msra.mxu0 %v11370_v2  ;;  %11871 = vmatpush.bf16.msra.mxu1 %v11370_v2  ;;  %v1130_v14 = vpack.c.bf16 %v1117_v10, %v1116_v9  ;;  %v1115_v20 = vld [vmem:[%s13410_s17 + $0x58] sm:$0xff]  ;;  %v1118_v21 = vld [vmem:[%s13410_s17 + $0x70] sm:$0xff] }
  0xab   : > { %11872 = vmatpush.bf16.msra.mxu2 %v11370_v2  ;;  %11873 = vmatpush.bf16.msra.mxu3 %v11370_v2  ;;  %v1119_v22 = vld [vmem:[%s13410_s17 + $0x78] sm:$0xff]  ;;  %v1129_v25 = vpack.c.bf16 %v1115_v20, %v1114_v19  ;;  %v12141_v27 = vld [vmem:[#allocation7] ss:$0 sm:$0xff] }
  0xac   : > { %v1131_v26 = vpack.c.bf16 %v1119_v22, %v1118_v21 }
  0xad   : > { %9326 = vmatmul.msk.bf16.vlgmr.msra.gmra.mxu0 %vm1148_vm0, %v1124_v11  ;;  %9328 = vmatmul.msk.bf16.vlgmr.msra.gmra.mxu1 %vm1148_vm0, %v1126_v12 }
  0xae   : > { %9330 = vmatmul.msk.bf16.vlgmr.msra.gmra.mxu2 %vm1148_vm0, %v1128_v13  ;;  %9332 = vmatmul.msk.bf16.vlgmr.msra.gmra.mxu3 %vm1148_vm0, %v1130_v14 }
  0xbd   : > { %9327 = vmatmul.msk.bf16.gmra.mxu0 %vm1148_vm0, %v1125_v23  ;;  %9329 = vmatmul.msk.bf16.gmra.mxu1 %vm1148_vm0, %v1127_v24 }
  0xbe   : > { %9331 = vmatmul.msk.bf16.gmra.mxu2 %vm1148_vm0, %v1129_v25  ;;  %9333 = vmatmul.msk.bf16.gmra.mxu3 %vm1148_vm0, %v1131_v26 }
 0x12a   : > { %v1182_v28 = vpop.f32.mrf.mxu0  ;;  %v1192_v29 = vpop.f32.mrf.mxu1 }
 0x12b   : > { %v1183_v30 = vadd.f32 %v12141_v27, %v1182_v28  ;;  %v1193_v31 = vadd.f32 %v12141_v27, %v1192_v29 }
 0x12d   : > { %v1222_v32 = vmax.f32 %v1183_v30, 0.0  ;;  %v1226_v33 = vmax.f32 %v1193_v31, 0.0 }
 0x12f   : > { %1238 = vst [vmem:[#allocation2 + $0x30] sm:$0xff] %v1222_v32 }
 0x130   : > { %1242 = vst [vmem:[#allocation2 + $0x50] sm:$0xff] %v1226_v33 }
 0x131   : > { %v1202_v34 = vpop.f32.mrf.mxu2  ;;  %v1212_v35 = vpop.f32.mrf.mxu3 }
 0x132   : > { %v1203_v36 = vadd.f32 %v12141_v27, %v1202_v34  ;;  %v1213_v37 = vadd.f32 %v12141_v27, %v1212_v35  ;;  %v1184_v38 = vpop.f32.mrf.mxu0  ;;  %v1194_v39 = vpop.f32.mrf.mxu1 }
 0x133   : > { %v1185_v40 = vadd.f32 %v12141_v27, %v1184_v38  ;;  %v1195_v41 = vadd.f32 %v12141_v27, %v1194_v39 }
 0x134   : > { %v1230_v42 = vmax.f32 %v1203_v36, 0.0  ;;  %v1234_v43 = vmax.f32 %v1213_v37, 0.0 }
 0x135   : > { %v1223_v44 = vmax.f32 %v1185_v40, 0.0  ;;  %v1227_v45 = vmax.f32 %v1195_v41, 0.0 }
 0x136   : > { %1246 = vst [vmem:[#allocation2 + $0x40] sm:$0xff] %v1230_v42 }
 0x137   : > { %1250 = vst [vmem:[#allocation2 + $0x60] sm:$0xff] %v1234_v43 }
 0x138   : > { %1239 = vst [vmem:[#allocation2] sm:$0xff] %v1223_v44 }
 0x139   : > { %1243 = vst [vmem:[#allocation2 + $0x68] sm:$0xff] %v1227_v45  ;;  %v1204_v46 = vpop.f32.mrf.mxu2  ;;  %v1214_v47 = vpop.f32.mrf.mxu3 }
 0x13a   : > { %v1205_v48 = vadd.f32 %v12141_v27, %v1204_v46  ;;  %v1215_v49 = vadd.f32 %v12141_v27, %v1214_v47  ;;  %v1187_v50 = vpop.f32.mrf.mxu0  ;;  %v1197_v51 = vpop.f32.mrf.mxu1 }
 0x13b   : > { %v1188_v52 = vadd.f32 %v12141_v27, %v1187_v50  ;;  %v1198_v53 = vadd.f32 %v12141_v27, %v1197_v51 }
 0x13c   : > { %v1231_v54 = vmax.f32 %v1205_v48, 0.0  ;;  %v1235_v55 = vmax.f32 %v1215_v49, 0.0 }
 0x13d   : > { %v1224_v56 = vmax.f32 %v1188_v52, 0.0  ;;  %v1228_v57 = vmax.f32 %v1198_v53, 0.0 }
 0x13e   : > { %1247 = vst [vmem:[#allocation2 + $0x20] sm:$0xff] %v1231_v54 }
 0x13f   : > { %1251 = vst [vmem:[#allocation2 + $0x70] sm:$0xff] %v1235_v55 }
 0x140   : > { %1240 = vst [vmem:[#allocation2 + $0x58] sm:$0xff] %v1224_v56 }
 0x141   : > { %1244 = vst [vmem:[#allocation2 + $0x8] sm:$0xff] %v1228_v57  ;;  %v1207_v58 = vpop.f32.mrf.mxu2  ;;  %v1217_v59 = vpop.f32.mrf.mxu3 }
 0x142   : > { %v1208_v60 = vadd.f32 %v12141_v27, %v1207_v58  ;;  %v1218_v61 = vadd.f32 %v12141_v27, %v1217_v59  ;;  %v1189_v62 = vpop.f32.mrf.mxu0  ;;  %v1199_v63 = vpop.f32.mrf.mxu1 }
 0x143   : > { %v1190_v0 = vadd.f32 %v12141_v27, %v1189_v62  ;;  %v1200_v1 = vadd.f32 %v12141_v27, %v1199_v63 }
 0x144   : > { %v1232_v2 = vmax.f32 %v1208_v60, 0.0  ;;  %v1236_v3 = vmax.f32 %v1218_v61, 0.0 }
 0x145   : > { %v1225_v4 = vmax.f32 %v1190_v0, 0.0  ;;  %v1229_v5 = vmax.f32 %v1200_v1, 0.0 }
 0x146   : > { %1248 = vst [vmem:[#allocation2 + $0x10] sm:$0xff] %v1232_v2 }
 0x147   : > { %1252 = vst [vmem:[#allocation2 + $0x78] sm:$0xff] %v1236_v3 }
 0x148   : > { %1241 = vst [vmem:[#allocation2 + $0x18] sm:$0xff] %v1225_v4 }
 0x149   : > { %1245 = vst [vmem:[#allocation2 + $0x48] sm:$0xff] %v1229_v5  ;;  %v1209_v6 = vpop.f32.mrf.mxu2  ;;  %v1219_v7 = vpop.f32.mrf.mxu3 }
 0x14a   : > { %v1210_v8 = vadd.f32 %v12141_v27, %v1209_v6  ;;  %v1220_v9 = vadd.f32 %v12141_v27, %v1219_v7 }
 0x14c   : > { %v1233_v10 = vmax.f32 %v1210_v8, 0.0  ;;  %v1237_v11 = vmax.f32 %v1220_v9, 0.0 }
 0x14e   : > { %1249 = vst [vmem:[#allocation2 + $0x38] sm:$0xff] %v1233_v10 }
 0x14f   : > { %1253 = vst [vmem:[#allocation2 + $0x28] sm:$0xff] %v1237_v11 }
 0x150 PF: > { %v9476_v12 = vld [vmem:[%s13364_s21 + $0x118] sm:$0xf]  ;;  %v11409_v13 = vld [vmem:[%s13364_s21 + $0x128] sm:$0xf0]  ;;  %v11407_v14 = vld [vmem:[%s13364_s21 + $0x11c] sm:$0xf] }
 0x151   : > { %v9477_v15 = vor.u32 %v11409_v13, %v9476_v12  ;;  %v9478_v16 = vld [vmem:[%s13364_s21 + $0x12c] sm:$0xf0]  ;;  %v9484_v17 = vld [vmem:[%s13364_s21 + $0x120] sm:$0xf]  ;;  %v11410_v18 = vld [vmem:[%s13364_s21 + $0x130] sm:$0xf0] }
 0x152   : > { %v9481_v19 = vor.u32 %v11407_v14, %v9478_v16  ;;  %v9485_v20 = vor.u32 %v11410_v18, %v9484_v17  ;;  %v9456_v21 = vld [vmem:[%s13364_s21 + $0xf0] sm:$0xf]  ;;  %v11404_v22 = vld [vmem:[%s13364_s21 + $0x100] sm:$0xf0]  ;;  %v11402_v23 = vld [vmem:[%s13364_s21 + $0xf4] sm:$0xf] }
 0x153   : > { %1546 = vmatpush.bf16.msra.mxu0 %v9477_v15  ;;  %v9457_v24 = vor.u32 %v11404_v22, %v9456_v21  ;;  %v9458_v25 = vld [vmem:[%s13364_s21 + $0x104] sm:$0xf0]  ;;  %v9464_v26 = vld [vmem:[%s13364_s21 + $0xf8] sm:$0xf]  ;;  %v11405_v27 = vld [vmem:[%s13364_s21 + $0x108] sm:$0xf0] }
 0x154   : > { %1595 = vmatpush.bf16.msra.mxu1 %v9481_v19  ;;  %1644 = vmatpush.bf16.msra.mxu2 %v9485_v20  ;;  %v9461_v28 = vor.u32 %v11402_v23, %v9458_v25  ;;  %v9465_v29 = vor.u32 %v11405_v27, %v9464_v26  ;;  %v9436_v30 = vld [vmem:[%s13364_s21 + $0xc8] sm:$0xf]  ;;  %v11399_v31 = vld [vmem:[%s13364_s21 + $0xd8] sm:$0xf0]  ;;  %v11397_v32 = vld [vmem:[%s13364_s21 + $0xcc] sm:$0xf] }
 0x155   : > { %v9438_v33 = vld [vmem:[%s13364_s21 + $0xdc] sm:$0xf0]  ;;  %v9444_v34 = vld [vmem:[%s13364_s21 + $0xd0] sm:$0xf]  ;;  %v11400_v35 = vld [vmem:[%s13364_s21 + $0xe0] sm:$0xf0]  ;;  %v9437_v36 = vor.u32 %v11399_v31, %v9436_v30 }
 0x156   : > { %v9441_v37 = vor.u32 %v11397_v32, %v9438_v33  ;;  %v9445_v38 = vor.u32 %v11400_v35, %v9444_v34  ;;  %v9416_v39 = vld [vmem:[%s13364_s21 + $0xa0] sm:$0xf]  ;;  %v11394_v40 = vld [vmem:[%s13364_s21 + $0xb0] sm:$0xf0]  ;;  %v11392_v41 = vld [vmem:[%s13364_s21 + $0xa4] sm:$0xf] }
 0x157   : > { %1547 = vmatpush.bf16.msra.mxu0 %v9457_v24  ;;  %v9418_v42 = vld [vmem:[%s13364_s21 + $0xb4] sm:$0xf0]  ;;  %v9424_v43 = vld [vmem:[%s13364_s21 + $0xa8] sm:$0xf]  ;;  %v11395_v44 = vld [vmem:[%s13364_s21 + $0xb8] sm:$0xf0]  ;;  %v9417_v47 = vor.u32 %v11394_v40, %v9416_v39 }
 0x158   : > { %1596 = vmatpush.bf16.msra.mxu1 %v9461_v28  ;;  %1645 = vmatpush.bf16.msra.mxu2 %v9465_v29  ;;  %v11408_v45 = vld [vmem:[%s13364_s21 + $0x124] sm:$0xf]  ;;  %v9486_v46 = vld [vmem:[%s13364_s21 + $0x134] sm:$0xf0]  ;;  %v11389_v49 = vld [vmem:[%s13364_s21 + $0x88] sm:$0xf0]  ;;  %v9421_v51 = vor.u32 %v11392_v41, %v9418_v42  ;;  %v9425_v52 = vor.u32 %v11395_v44, %v9424_v43 }
 0x159   : > { %v9396_v48 = vld [vmem:[%s13364_s21 + $0x78] sm:$0xf]  ;;  %v9489_v50 = vor.u32 %v11408_v45, %v9486_v46  ;;  %v11387_v53 = vld [vmem:[%s13364_s21 + $0x7c] sm:$0xf]  ;;  %v9398_v54 = vld [vmem:[%s13364_s21 + $0x8c] sm:$0xf0] }
 0x15a   : > { %v11403_v55 = vld [vmem:[%s13364_s21 + $0xfc] sm:$0xf]  ;;  %v9404_v56 = vld [vmem:[%s13364_s21 + $0x80] sm:$0xf]  ;;  %v11390_v57 = vld [vmem:[%s13364_s21 + $0x90] sm:$0xf0]  ;;  %v9397_v60 = vor.u32 %v11389_v49, %v9396_v48  ;;  %v9401_v63 = vor.u32 %v11387_v53, %v9398_v54 }
 0x15b   : > { %1548 = vmatpush.bf16.msra.mxu0 %v9437_v36  ;;  %1693 = vmatpush.bf16.msra.mxu3 %v9489_v50  ;;  %v9466_v58 = vld [vmem:[%s13364_s21 + $0x10c] sm:$0xf0]  ;;  %v11398_v61 = vld [vmem:[%s13364_s21 + $0xd4] sm:$0xf]  ;;  %v9446_v62 = vld [vmem:[%s13364_s21 + $0xe4] sm:$0xf0]  ;;  %v9405_v0 = vor.u32 %v11390_v57, %v9404_v56 }
 0x15c   : > { %1597 = vmatpush.bf16.msra.mxu1 %v9441_v37  ;;  %1646 = vmatpush.bf16.msra.mxu2 %v9445_v38  ;;  %v9469_v59 = vor.u32 %v11403_v55, %v9466_v58  ;;  %v9376_v1 = vld [vmem:[%s13364_s21 + $0x50] sm:$0xf]  ;;  %v11384_v2 = vld [vmem:[%s13364_s21 + $0x60] sm:$0xf0]  ;;  %v11382_v3 = vld [vmem:[%s13364_s21 + $0x54] sm:$0xf]  ;;  %v9449_v7 = vor.u32 %v11398_v61, %v9446_v62 }
 0x15d   : > { %v9378_v4 = vld [vmem:[%s13364_s21 + $0x64] sm:$0xf0]  ;;  %v9384_v5 = vld [vmem:[%s13364_s21 + $0x58] sm:$0xf]  ;;  %v11385_v6 = vld [vmem:[%s13364_s21 + $0x68] sm:$0xf0]  ;;  %v9377_v10 = vor.u32 %v11384_v2, %v9376_v1 }
 0x15e   : > { %v11393_v8 = vld [vmem:[%s13364_s21 + $0xac] sm:$0xf]  ;;  %v9426_v9 = vld [vmem:[%s13364_s21 + $0xbc] sm:$0xf0]  ;;  %v9381_v11 = vor.u32 %v11382_v3, %v9378_v4  ;;  %v9385_v12 = vor.u32 %v11385_v6, %v9384_v5  ;;  %v9356_v13 = vld [vmem:[%s13364_s21 + $0x28] sm:$0xf] }
 0x15f   : > { %1549 = vmatpush.bf16.msra.mxu0 %v9417_v47  ;;  %1694 = vmatpush.bf16.msra.mxu3 %v9469_v59  ;;  %v11379_v14 = vld [vmem:[%s13364_s21 + $0x38] sm:$0xf0]  ;;  %v11377_v15 = vld [vmem:[%s13364_s21 + $0x2c] sm:$0xf]  ;;  %v9358_v16 = vld [vmem:[%s13364_s21 + $0x3c] sm:$0xf0]  ;;  %v9429_v19 = vor.u32 %v11393_v8, %v9426_v9 }
 0x160   : > { %1598 = vmatpush.bf16.msra.mxu1 %v9421_v51  ;;  %1647 = vmatpush.bf16.msra.mxu2 %v9425_v52  ;;  %v9364_v17 = vld [vmem:[%s13364_s21 + $0x30] sm:$0xf]  ;;  %v11380_v18 = vld [vmem:[%s13364_s21 + $0x40] sm:$0xf0]  ;;  %v9406_v21 = vld [vmem:[%s13364_s21 + $0x94] sm:$0xf0]  ;;  %v9357_v22 = vor.u32 %v11379_v14, %v9356_v13  ;;  %v9361_v26 = vor.u32 %v11377_v15, %v9358_v16 }
 0x161   : > { %v11388_v20 = vld [vmem:[%s13364_s21 + $0x84] sm:$0xf]  ;;  %v9336_v23 = vld [vmem:[%s13364_s21] sm:$0xf]  ;;  %v11374_v24 = vld [vmem:[%s13364_s21 + $0x10] sm:$0xf0]  ;;  %v9365_v27 = vor.u32 %v11380_v18, %v9364_v17 }
 0x162   : > { %v11372_v25 = vld [vmem:[%s13364_s21 + $0x4] sm:$0xf]  ;;  %v9338_v28 = vld [vmem:[%s13364_s21 + $0x14] sm:$0xf0]  ;;  %v9344_v29 = vld [vmem:[%s13364_s21 + $0x8] sm:$0xf]  ;;  %v9409_v34 = vor.u32 %v11388_v20, %v9406_v21  ;;  %v9337_v37 = vor.u32 %v11374_v24, %v9336_v23 }
 0x163   : > { %1550 = vmatpush.bf16.msra.mxu0 %v9397_v60  ;;  %1695 = vmatpush.bf16.msra.mxu3 %v9449_v7  ;;  %v11375_v30 = vld [vmem:[%s13364_s21 + $0x18] sm:$0xf0]  ;;  %v9492_v32 = vld [vmem:[%s13364_s21 + $0x128] sm:$0xf]  ;;  %v9386_v36 = vld [vmem:[%s13364_s21 + $0x6c] sm:$0xf0]  ;;  %v9341_v41 = vor.u32 %v11372_v25, %v9338_v28 }
 0x164   : > { %1599 = vmatpush.bf16.msra.mxu1 %v9401_v63  ;;  %1648 = vmatpush.bf16.msra.mxu2 %v9405_v0  ;;  %v1254_v31 = vld [vmem:[#allocation2 + $0x30] sm:$0xff]  ;;  %v1255_v38 = vld [vmem:[#allocation2] sm:$0xff]  ;;  %v11449_v40 = vld [vmem:[%s13375_s20 + $0x128] sm:$0xf0]  ;;  %v9345_v42 = vor.u32 %v11375_v30, %v9344_v29  ;;  %s16830_s3 = sld [smem:[#allocation41_spill]] }
 0x165   : > { %v11411_v33 = vld [vmem:[%s13364_s21 + $0x138] sm:$0xf0]  ;;  %v9636_v39 = vld [vmem:[%s13375_s20 + $0x118] sm:$0xf]  ;;  %v11378_v45 = vld [vmem:[%s13364_s21 + $0x34] sm:$0xf]  ;;  %v13508_v48 = vpack.c.bf16 %v1255_v38, %v1254_v31 }
 0x166   : > { %v11383_v35 = vld [vmem:[%s13364_s21 + $0x5c] sm:$0xf]  ;;  %v9493_v43 = vor.u32 %v11411_v33, %v9492_v32  ;;  %v9796_v46 = vld [vmem:[%s13375_s20 + $0x258] sm:$0xf]  ;;  %v11489_v47 = vld [vmem:[%s13375_s20 + $0x268] sm:$0xf0]  ;;  %v9637_v50 = vor.u32 %v11449_v40, %v9636_v39 }
 0x167   : > { %1551 = vmatpush.bf16.msra.mxu0 %v9377_v10  ;;  %1696 = vmatpush.bf16.msra.mxu3 %v9429_v19  ;;  %v9389_v44 = vor.u32 %v11383_v35, %v9386_v36  ;;  %v9366_v49 = vld [vmem:[%s13364_s21 + $0x44] sm:$0xf0]  ;;  %v9472_v51 = vld [vmem:[%s13364_s21 + $0x100] sm:$0xf]  ;;  %v11406_v52 = vld [vmem:[%s13364_s21 + $0x110] sm:$0xf0]  ;;  %v9797_v55 = vor.u32 %v11489_v47, %v9796_v46 }
 0x168   : > { %1600 = vmatpush.bf16.msra.mxu1 %v9381_v11  ;;  %1649 = vmatpush.bf16.msra.mxu2 %v9385_v12  ;;  %v9616_v53 = vld [vmem:[%s13375_s20 + $0xf0] sm:$0xf]  ;;  %v11444_v54 = vld [vmem:[%s13375_s20 + $0x100] sm:$0xf0]  ;;  %v9369_v56 = vor.u32 %v11378_v45, %v9366_v49  ;;  %v9473_v57 = vor.u32 %v11406_v52, %v9472_v51  ;;  %v9346_v59 = vld [vmem:[%s13364_s21 + $0x1c] sm:$0xf0] }
 0x169   : > { %v11373_v58 = vld [vmem:[%s13364_s21 + $0xc] sm:$0xf]  ;;  %v9617_v60 = vor.u32 %v11444_v54, %v9616_v53  ;;  %v9452_v61 = vld [vmem:[%s13364_s21 + $0xd8] sm:$0xf]  ;;  %v9956_v1 = vld [vmem:[%s13375_s20 + $0x398] sm:$0xf] }
 0x16a   : > { %v11401_v62 = vld [vmem:[%s13364_s21 + $0xe8] sm:$0xf0]  ;;  %v9776_v63 = vld [vmem:[%s13375_s20 + $0x230] sm:$0xf]  ;;  %v11529_v2 = vld [vmem:[%s13375_s20 + $0x3a8] sm:$0xf0]  ;;  %v9349_v3 = vor.u32 %v11373_v58, %v9346_v59 }
 0x16b   : > { %1552 = vmatpush.bf16.msra.mxu0 %v9357_v22  ;;  %1697 = vmatpush.bf16.msra.mxu3 %v9409_v34  ;;  %v11484_v0 = vld [vmem:[%s13375_s20 + $0x240] sm:$0xf0]  ;;  %v9453_v4 = vor.u32 %v11401_v62, %v9452_v61  ;;  %v9596_v6 = vld [vmem:[%s13375_s20 + $0xc8] sm:$0xf]  ;;  %v11439_v7 = vld [vmem:[%s13375_s20 + $0xd8] sm:$0xf0]  ;;  %v9957_v8 = vor.u32 %v11529_v2, %v9956_v1 }
 0x16c   : > { %1601 = vmatpush.bf16.msra.mxu1 %v9361_v26  ;;  %1650 = vmatpush.bf16.msra.mxu2 %v9365_v27  ;;  %v9777_v5 = vor.u32 %v11484_v0, %v9776_v63  ;;  %v9597_v9 = vor.u32 %v11439_v7, %v9596_v6  ;;  %v1256_v10 = vld [vmem:[#allocation2 + $0x58] sm:$0xff]  ;;  %v9432_v13 = vld [vmem:[%s13364_s21 + $0xb0] sm:$0xf]  ;;  %v9936_v18 = vld [vmem:[%s13375_s20 + $0x370] sm:$0xf]  ;;  %p7786_p9 = scmp.eq.s32.totalorder %s16830_s3, 2 }
 0x16d   : > { %v1257_v11 = vld [vmem:[#allocation2 + $0x18] sm:$0xff]  ;;  %v9756_v15 = vld [vmem:[%s13375_s20 + $0x208] sm:$0xf]  ;;  %v11524_v19 = vld [vmem:[%s13375_s20 + $0x380] sm:$0xf0] }
 0x16e   : > { %v13529_v12 = vpack.c.bf16 %v1257_v11, %v1256_v10  ;;  %v11396_v14 = vld [vmem:[%s13364_s21 + $0xc0] sm:$0xf0]  ;;  %v9937_v21 = vor.u32 %v11524_v19, %v9936_v18  ;;  %v9576_v22 = vld [vmem:[%s13375_s20 + $0xa0] sm:$0xf]  ;;  %v11434_v23 = vld [vmem:[%s13375_s20 + $0xb0] sm:$0xf0]  ;;  %p15915_p13 = por %p7786_p9, %p1100_p5 }
 0x16f   : > { %1553 = vmatpush.bf16.msra.mxu0 %v9337_v37  ;;  %1698 = vmatpush.bf16.msra.mxu3 %v9389_v44  ;;  %v9433_v16 = vor.u32 %v11396_v14, %v9432_v13  ;;  %v11479_v17 = vld [vmem:[%s13375_s20 + $0x218] sm:$0xf0]  ;;  %v9577_v24 = vor.u32 %v11434_v23, %v9576_v22  ;;  %v1258_v25 = vld [vmem:[#allocation2 + $0x50] sm:$0xff]  ;;  %v1259_v26 = vld [vmem:[#allocation2 + $0x68] sm:$0xff] }
 0x170   : > { %1602 = vmatpush.bf16.msra.mxu1 %v9341_v41  ;;  %1651 = vmatpush.bf16.msra.mxu2 %v9345_v42  ;;  %v9757_v20 = vor.u32 %v11479_v17, %v9756_v15  ;;  %v13543_v27 = vpack.c.bf16 %v1259_v26, %v1258_v25  ;;  %v9412_v28 = vld [vmem:[%s13364_s21 + $0x88] sm:$0xf]  ;;  %v11391_v29 = vld [vmem:[%s13364_s21 + $0x98] sm:$0xf0]  ;;  %v9916_v33 = vld [vmem:[%s13375_s20 + $0x348] sm:$0xf] }
 0x171   : > { %v9736_v30 = vld [vmem:[%s13375_s20 + $0x1e0] sm:$0xf]  ;;  %v9413_v31 = vor.u32 %v11391_v29, %v9412_v28  ;;  %v11474_v32 = vld [vmem:[%s13375_s20 + $0x1f0] sm:$0xf0]  ;;  %v11519_v34 = vld [vmem:[%s13375_s20 + $0x358] sm:$0xf0] }
 0x172   : > { %1554 = vmatmul.bf16.vlgmr.msra.gmra.mxu0 %v13508_v48  ;;  %v9737_v35 = vor.u32 %v11474_v32, %v9736_v30  ;;  %v9917_v36 = vor.u32 %v11519_v34, %v9916_v33  ;;  %v9556_v37 = vld [vmem:[%s13375_s20 + $0x78] sm:$0xf]  ;;  %v11429_v38 = vld [vmem:[%s13375_s20 + $0x88] sm:$0xf0]  ;;  %v9896_v49 = vld [vmem:[%s13375_s20 + $0x320] sm:$0xf] }
 0x173   : > { %1742 = vmatpush.bf16.msrb.mxu0 %v9493_v43  ;;  %1603 = vmatmul.bf16.vlgmr.msra.gmra.mxu1 %v13508_v48  ;;  %v9557_v39 = vor.u32 %v11429_v38, %v9556_v37  ;;  %v1260_v40 = vld [vmem:[#allocation2 + $0x8] sm:$0xff]  ;;  %v9392_v43 = vld [vmem:[%s13364_s21 + $0x60] sm:$0xf]  ;;  %v11424_v54 = vld [vmem:[%s13375_s20 + $0x60] sm:$0xf0] }
 0x174   : > { %3203 = vmatpush.bf16.msrb.mxu1 %v9637_v50  ;;  %1652 = vmatmul.bf16.vlgmr.msra.gmra.mxu2 %v13508_v48  ;;  %v1261_v41 = vld [vmem:[#allocation2 + $0x48] sm:$0xff]  ;;  %v9716_v45 = vld [vmem:[%s13375_s20 + $0x1b8] sm:$0xf]  ;;  %v11514_v50 = vld [vmem:[%s13375_s20 + $0x330] sm:$0xf0] }
 0x175   : > { %3252 = vmatpush.bf16.msrb.mxu2 %v9797_v55  ;;  %1699 = vmatpush.bf16.msra.mxu3 %v9369_v56  ;;  %v13557_v42 = vpack.c.bf16 %v1261_v41, %v1260_v40  ;;  %v11386_v44 = vld [vmem:[%s13364_s21 + $0x70] sm:$0xf0]  ;;  %v9897_v52 = vor.u32 %v11514_v50, %v9896_v49  ;;  %v9536_v53 = vld [vmem:[%s13375_s20 + $0x50] sm:$0xf]  ;;  %v11464_v63 = vld [vmem:[%s13375_s20 + $0x1a0] sm:$0xf0] }
 0x176   : > { %v9393_v46 = vor.u32 %v11386_v44, %v9392_v43  ;;  %v11469_v47 = vld [vmem:[%s13375_s20 + $0x1c8] sm:$0xf0]  ;;  %v9537_v55 = vor.u32 %v11424_v54, %v9536_v53  ;;  %v1262_v56 = vld [vmem:[#allocation2 + $0x40] sm:$0xff]  ;;  %v9696_v61 = vld [vmem:[%s13375_s20 + $0x190] sm:$0xf] }
 0x177   : > { %1743 = vmatpush.bf16.msrb.mxu0 %v9473_v57  ;;  %v9717_v51 = vor.u32 %v11469_v47, %v9716_v45  ;;  %v1263_v57 = vld [vmem:[#allocation2 + $0x20] sm:$0xff]  ;;  %v9372_v59 = vld [vmem:[%s13364_s21 + $0x38] sm:$0xf]  ;;  %v9876_v0 = vld [vmem:[%s13375_s20 + $0x2f8] sm:$0xf]  ;;  %v9697_v2 = vor.u32 %v11464_v63, %v9696_v61 }
 0x178   : > { %3204 = vmatpush.bf16.msrb.mxu1 %v9617_v60  ;;  %v13571_v58 = vpack.c.bf16 %v1263_v57, %v1262_v56  ;;  %v11381_v60 = vld [vmem:[%s13364_s21 + $0x48] sm:$0xf0]  ;;  %v11509_v1 = vld [vmem:[%s13375_s20 + $0x308] sm:$0xf0]  ;;  %v1264_v7 = vld [vmem:[#allocation2 + $0x10] sm:$0xff] }
 0x179   : > { %3253 = vmatpush.bf16.msrb.mxu2 %v9777_v5  ;;  %1700 = vmatpush.bf16.msra.mxu3 %v9349_v3  ;;  %v9373_v62 = vor.u32 %v11381_v60, %v9372_v59  ;;  %v9877_v3 = vor.u32 %v11509_v1, %v9876_v0  ;;  %v11419_v5 = vld [vmem:[%s13375_s20 + $0x38] sm:$0xf0]  ;;  %v9352_v10 = vld [vmem:[%s13364_s21 + $0x10] sm:$0xf]  ;;  %v9656_v26 = vld [vmem:[%s13375_s20 + $0x140] sm:$0xf] }
 0x17a   : > { %v11376_v11 = vld [vmem:[%s13364_s21 + $0x20] sm:$0xf0]  ;;  %v9676_v13 = vld [vmem:[%s13375_s20 + $0x168] sm:$0xf]  ;;  %v11504_v17 = vld [vmem:[%s13375_s20 + $0x2e0] sm:$0xf0] }
 0x17b   : > { %1744 = vmatpush.bf16.msrb.mxu0 %v9453_v4  ;;  %v9516_v4 = vld [vmem:[%s13375_s20 + $0x28] sm:$0xf]  ;;  %v9353_v14 = vor.u32 %v11376_v11, %v9352_v10  ;;  %v11459_v15 = vld [vmem:[%s13375_s20 + $0x178] sm:$0xf0]  ;;  %v11454_v28 = vld [vmem:[%s13375_s20 + $0x150] sm:$0xf0] }
 0x17c   : > { %3205 = vmatpush.bf16.msrb.mxu1 %v9597_v9  ;;  %1701 = vmatmul.bf16.vlgmr.msra.gmra.mxu3 %v13508_v48  ;;  %v9517_v6 = vor.u32 %v11419_v5, %v9516_v4  ;;  %v9677_v18 = vor.u32 %v11459_v15, %v9676_v13  ;;  %v1266_v23 = vld [vmem:[#allocation2 + $0x60] sm:$0xff]  ;;  %v1268_v29 = vld [vmem:[#allocation2 + $0x78] sm:$0xff]  ;;  %v9657_v30 = vor.u32 %v11454_v28, %v9656_v26  ;;  %v11494_v40 = vld [vmem:[%s13375_s20 + $0x290] sm:$0xf0] }
 0x17d   : > { %3301 = vmatpush.bf16.msrb.mxu3 %v9957_v8  ;;  %3254 = vmatpush.bf16.msrb.mxu2 %v9757_v20  ;;  %v1265_v8 = vld [vmem:[#allocation2 + $0x38] sm:$0xff]  ;;  %v9836_v32 = vld [vmem:[%s13375_s20 + $0x2a8] sm:$0xf]  ;;  %v11609_v44 = vld [vmem:[%s13375_s20 + $0x628] sm:$0xf0] }
 0x17e   : > { %v13585_v9 = vpack.c.bf16 %v1265_v8, %v1264_v7  ;;  %v9496_v20 = vld [vmem:[%s13375_s20] sm:$0xf]  ;;  %v11499_v33 = vld [vmem:[%s13375_s20 + $0x2b8] sm:$0xf0]  ;;  %v10276_v43 = vld [vmem:[%s13375_s20 + $0x618] sm:$0xf] }
 0x17f   : > { %1745 = vmatpush.bf16.msrb.mxu0 %v9433_v16  ;;  %v9856_v16 = vld [vmem:[%s13375_s20 + $0x2d0] sm:$0xf]  ;;  %v9837_v34 = vor.u32 %v11499_v33, %v9836_v32  ;;  %v10277_v45 = vor.u32 %v11609_v44, %v10276_v43  ;;  %v11604_v60 = vld [vmem:[%s13375_s20 + $0x600] sm:$0xf0]  ;;  %v9618_v15 = vld [vmem:[%s13375_s20 + $0x104] sm:$0xf0] }
 0x180   : > { %3206 = vmatpush.bf16.msrb.mxu1 %v9577_v24  ;;  %v9857_v19 = vor.u32 %v11504_v17, %v9856_v16  ;;  %v1267_v24 = vld [vmem:[#allocation2 + $0x70] sm:$0xff]  ;;  %v10076_v16 = vld [vmem:[%s13375_s20 + $0x488] sm:$0xf] }
 0x181   : > { %3302 = vmatpush.bf16.msrb.mxu3 %v9937_v21  ;;  %3255 = vmatpush.bf16.msrb.mxu2 %v9737_v35  ;;  %v11414_v21 = vld [vmem:[%s13375_s20 + $0x10] sm:$0xf0]  ;;  %v13599_v25 = vpack.c.bf16 %v1267_v24, %v1266_v23  ;;  %v10116_v35 = vld [vmem:[%s13375_s20 + $0x4d8] sm:$0xf]  ;;  %v9638_v47 = vld [vmem:[%s13375_s20 + $0x12c] sm:$0xf0] }
 0x182   : > { %1559 = vmatmul.bf16.gmra.mxu0 %v13529_v12  ;;  %v9497_v22 = vor.u32 %v11414_v21, %v9496_v20  ;;  %v10096_v50 = vld [vmem:[%s13375_s20 + $0x4b0] sm:$0xf]  ;;  %v11487_v20 = vld [vmem:[%s13375_s20 + $0x25c] sm:$0xf] }
 0x183   : > { %1608 = vmatmul.bf16.gmra.mxu1 %v13529_v12  ;;  %1746 = vmatpush.bf16.msrb.mxu0 %v9413_v31  ;;  %v1269_v31 = vld [vmem:[#allocation2 + $0x28] sm:$0xff] }
 0x184   : > { %1657 = vmatmul.bf16.gmra.mxu2 %v13529_v12  ;;  %3207 = vmatpush.bf16.msrb.mxu1 %v9557_v39  ;;  %v13611_v37 = vpack.c.bf16 %v1269_v31, %v1268_v29  ;;  %v9816_v39 = vld [vmem:[%s13375_s20 + $0x280] sm:$0xf]  ;;  %v10256_v59 = vld [vmem:[%s13375_s20 + $0x5f0] sm:$0xf] }
 0x185   : > { %3303 = vmatpush.bf16.msrb.mxu3 %v9917_v36  ;;  %3256 = vmatpush.bf16.msrb.mxu2 %v9717_v51  ;;  %v11569_v36 = vld [vmem:[%s13375_s20 + $0x4e8] sm:$0xf0]  ;;  %v9817_v41 = vor.u32 %v11494_v40, %v9816_v39  ;;  %v11564_v51 = vld [vmem:[%s13375_s20 + $0x4c0] sm:$0xf0]  ;;  %v10257_v61 = vor.u32 %v11604_v60, %v10256_v59  ;;  %v9798_v21 = vld [vmem:[%s13375_s20 + $0x26c] sm:$0xf0] }
 0x186   : > { %v10117_v38 = vor.u32 %v11569_v36, %v10116_v35  ;;  %v10097_v54 = vor.u32 %v11564_v51, %v10096_v50  ;;  %v9801_v29 = vor.u32 %v11487_v20, %v9798_v21  ;;  %v11599_v35 = vld [vmem:[%s13375_s20 + $0x5d8] sm:$0xf0]  ;;  %v10216_v20 = vld [vmem:[%s13375_s20 + $0x5a0] sm:$0xf]  ;;  %v11594_v21 = vld [vmem:[%s13375_s20 + $0x5b0] sm:$0xf0] }
 0x187   : > { %1747 = vmatpush.bf16.msrb.mxu0 %v9393_v46  ;;  %v11447_v46 = vld [vmem:[%s13375_s20 + $0x11c] sm:$0xf] }
 0x188   : > { %3208 = vmatpush.bf16.msrb.mxu1 %v9537_v55  ;;  %v9641_v49 = vor.u32 %v11447_v46, %v9638_v47 }
 0x189   : > { %3304 = vmatpush.bf16.msrb.mxu3 %v9897_v52  ;;  %3257 = vmatpush.bf16.msrb.mxu2 %v9697_v2  ;;  %v13627_v52 = vld [vmem:[%s901_s11] sm:$0x1f] }
 0x18a   : > { %v13630_v56 = vperm.slane %v13627_v52, 1  ;;  %v13633_v57 = vperm.slane %v13627_v52, 0  ;;  %v13641_v1 = vperm.slane %v13627_v52, 2  ;;  %v13660_v31 = vperm.slane %v13627_v52, 3 }
 0x18b   : > { %1748 = vmatpush.bf16.msrb.mxu0 %v9373_v62 }
 0x18c   : > { %1706 = vmatmul.bf16.gmra.mxu3 %v13529_v12  ;;  %3209 = vmatpush.bf16.msrb.mxu1 %v9517_v6 }
 0x18d   : > { %3305 = vmatpush.bf16.msrb.mxu3 %v9877_v3  ;;  %3258 = vmatpush.bf16.msrb.mxu2 %v9677_v18 }
 0x18f   : > { %1749 = vmatpush.bf16.msrb.mxu0 %v9353_v14  ;;  %v11442_v14 = vld [vmem:[%s13375_s20 + $0xf4] sm:$0xf] }
 0x190   : > { %3210 = vmatpush.bf16.msrb.mxu1 %v9497_v22  ;;  %v9621_v18 = vor.u32 %v11442_v14, %v9618_v15 }
 0x191   : > { %3306 = vmatpush.bf16.msrb.mxu3 %v9857_v19  ;;  %3259 = vmatpush.bf16.msrb.mxu2 %v9657_v30  ;;  %v11559_v19 = vld [vmem:[%s13375_s20 + $0x498] sm:$0xf0] }
 0x192   : > { %1564 = vmatmul.bf16.gmra.mxu0 %v13543_v27  ;;  %v10077_v28 = vor.u32 %v11559_v19, %v10076_v16 }
 0x193   : > { %1613 = vmatmul.bf16.gmra.mxu1 %v13543_v27  ;;  %3350 = vmatpush.bf16.msra.mxu0 %v10117_v38 }
 0x194   : > { %1662 = vmatmul.bf16.gmra.mxu2 %v13543_v27  ;;  %3399 = vmatpush.bf16.msra.mxu1 %v10277_v45 }
 0x195   : > { %3307 = vmatpush.bf16.msrb.mxu3 %v9837_v34  ;;  %3448 = vmatpush.bf16.msra.mxu2 %v9641_v49  ;;  %v10236_v34 = vld [vmem:[%s13375_s20 + $0x5c8] sm:$0xf] }
 0x196   : > { %v10237_v38 = vor.u32 %v11599_v35, %v10236_v34 }
 0x197   : > { %3351 = vmatpush.bf16.msra.mxu0 %v10097_v54 }
 0x198   : > { %3400 = vmatpush.bf16.msra.mxu1 %v10257_v61 }
 0x199   : > { %3308 = vmatpush.bf16.msrb.mxu3 %v9817_v41  ;;  %3449 = vmatpush.bf16.msra.mxu2 %v9621_v18 }
 0x19b   : > { %3352 = vmatpush.bf16.msra.mxu0 %v10077_v28 }
 0x19c   : > { %1711 = vmatmul.bf16.gmra.mxu3 %v13543_v27  ;;  %3401 = vmatpush.bf16.msra.mxu1 %v10237_v38 }
 0x19d   : > { %3497 = vmatpush.bf16.msra.mxu3 %v9801_v29 }
 0x1a2   : > { %1569 = vmatmul.bf16.gmra.mxu0 %v13557_v42 }
 0x1a3   : > { %1618 = vmatmul.bf16.gmra.mxu1 %v13557_v42 }
 0x1a4   : > { %1667 = vmatmul.bf16.gmra.mxu2 %v13557_v42 }
 0x1ac   : > { %1716 = vmatmul.bf16.gmra.mxu3 %v13557_v42 }
 0x1b2   : > { %1574 = vmatmul.bf16.gmra.mxu0 %v13571_v58 }
 0x1b3   : > { %1623 = vmatmul.bf16.gmra.mxu1 %v13571_v58 }
 0x1b4   : > { %1672 = vmatmul.bf16.gmra.mxu2 %v13571_v58 }
 0x1bc   : > { %1721 = vmatmul.bf16.gmra.mxu3 %v13571_v58 }
 0x1c2   : > { %1579 = vmatmul.bf16.gmra.mxu0 %v13585_v9 }
 0x1c3   : > { %1628 = vmatmul.bf16.gmra.mxu1 %v13585_v9 }
 0x1c4   : > { %1677 = vmatmul.bf16.gmra.mxu2 %v13585_v9 }
 0x1cc   : > { %1726 = vmatmul.bf16.gmra.mxu3 %v13585_v9 }
 0x1d2   : > { %1584 = vmatmul.bf16.gmra.mxu0 %v13599_v25 }
 0x1d3   : > { %1633 = vmatmul.bf16.gmra.mxu1 %v13599_v25 }
 0x1d4   : > { %1682 = vmatmul.bf16.gmra.mxu2 %v13599_v25 }
 0x1dc   : > { %1731 = vmatmul.bf16.gmra.mxu3 %v13599_v25 }
 0x1e2   : > { %1589 = vmatmul.bf16.gmra.mxu0 %v13611_v37 }
 0x1e3   : > { %1638 = vmatmul.bf16.gmra.mxu1 %v13611_v37 }
 0x1e4   : > { %1687 = vmatmul.bf16.gmra.mxu2 %v13611_v37 }
 0x1ec   : > { %1736 = vmatmul.bf16.gmra.mxu3 %v13611_v37 }
 0x1ef   : > { %v1555_v53 = vpop.f32.mrf.mxu0 }
 0x1f0   : > { %v1604_v55 = vpop.f32.mrf.mxu1  ;;  %v1556_v63 = vadd.f32 %v1555_v53, %v13633_v57 }
 0x1f1   : > { %v1605_v62 = vadd.f32 %v1604_v55, %v13630_v56 }
 0x1f2   : > { %1750 = vmatmul.bf16.vlgmr.msrb.gmra.mxu0 %v13508_v48  ;;  %v1791_v6 = vmax.f32 %v1556_v63, 0.0  ;;  %v11437_v63 = vld [vmem:[%s13375_s20 + $0xcc] sm:$0xf] }
 0x1f3   : > { %v1792_v4 = vmax.f32 %v1605_v62, 0.0 }
 0x1f7   : > { %v1653_v0 = vpop.f32.mrf.mxu2  ;;  %v1557_v2 = vpop.f32.mrf.mxu0 }
 0x1f8   : > { %v1558_v3 = vadd.f32 %v1557_v2, %v13633_v57  ;;  %v1606_v48 = vpop.f32.mrf.mxu1  ;;  %v1654_v8 = vadd.f32 %v1653_v0, %v13641_v1  ;;  %v9598_v0 = vld [vmem:[%s13375_s20 + $0xdc] sm:$0xf0] }
 0x1f9   : > { %v1607_v5 = vadd.f32 %v1606_v48, %v13630_v56  ;;  %v10056_v2 = vld [vmem:[%s13375_s20 + $0x460] sm:$0xf]  ;;  %v9601_v48 = vor.u32 %v11437_v63, %v9598_v0 }
 0x1fa   : > { %v1796_v7 = vmax.f32 %v1558_v3, 0.0  ;;  %v1793_v22 = vmax.f32 %v1654_v8, 0.0 }
 0x1fb   : > { %v1797_v10 = vmax.f32 %v1607_v5, 0.0  ;;  %v11482_v5 = vld [vmem:[%s13375_s20 + $0x234] sm:$0xf]  ;;  %3450 = vmatpush.bf16.msra.mxu2 %v9601_v48 }
 0x1fc   : > { %v13646_v11 = vpack.c.bf16 %v1796_v7, %v1791_v6  ;;  %v9778_v6 = vld [vmem:[%s13375_s20 + $0x244] sm:$0xf0] }
 0x1fd   : > { %v13648_v13 = vpack.c.bf16 %v1797_v10, %v1792_v4  ;;  %v11554_v4 = vld [vmem:[%s13375_s20 + $0x470] sm:$0xf0]  ;;  %v9781_v16 = vor.u32 %v11482_v5, %v9778_v6 }
 0x1fe   : > { %3211 = vmatmul.bf16.vlgmr.msrb.gmra.mxu1 %v13646_v11  ;;  %v10057_v15 = vor.u32 %v11554_v4, %v10056_v2 }
 0x1ff   : > { %16677 = vst [vmem:[#allocation54_spill] sm:$0xff] %v13648_v13  ;;  %v1655_v17 = vpop.f32.mrf.mxu2  ;;  %3260 = vmatmul.bf16.vlgmr.msrb.gmra.mxu2 %v13648_v13  ;;  %v1560_v24 = vpop.f32.mrf.mxu0  ;;  %3498 = vmatpush.bf16.msra.mxu3 %v9781_v16 }
 0x200   : > { %v1656_v23 = vadd.f32 %v1655_v17, %v13641_v1  ;;  %v1702_v26 = vpop.f32.mrf.mxu3  ;;  %v1609_v30 = vpop.f32.mrf.mxu1  ;;  %v1561_v40 = vadd.f32 %v1560_v24, %v13633_v57  ;;  %3353 = vmatpush.bf16.msra.mxu0 %v10057_v15 }
 0x201   : > { %v1703_v36 = vadd.f32 %v1702_v26, %v13660_v31  ;;  %v1610_v39 = vadd.f32 %v1609_v30, %v13630_v56 }
 0x202   : > { %v1798_v32 = vmax.f32 %v1656_v23, 0.0  ;;  %1755 = vmatmul.bf16.gmra.mxu0 %v13529_v12  ;;  %v1801_v51 = vmax.f32 %v1561_v40, 0.0  ;;  %v10217_v23 = vor.u32 %v11594_v21, %v10216_v20 }
 0x203   : > { %v1794_v46 = vmax.f32 %v1703_v36, 0.0  ;;  %v1802_v49 = vmax.f32 %v1610_v39, 0.0 }
 0x204   : > { %v13663_v33 = vpack.c.bf16 %v1798_v32, %v1793_v22  ;;  %3402 = vmatpush.bf16.msra.mxu1 %v10217_v23 }
 0x206   : > { %16678 = vst [vmem:[#allocation55_spill] sm:$0xff] %v13663_v33  ;;  %3309 = vmatmul.bf16.vlgmr.msrb.gmra.mxu3 %v13663_v33 }
 0x207   : > { %v1658_v41 = vpop.f32.mrf.mxu2  ;;  %v1562_v43 = vpop.f32.mrf.mxu0 }
 0x208   : > { %v1704_v44 = vpop.f32.mrf.mxu3  ;;  %v1563_v12 = vadd.f32 %v1562_v43, %v13633_v57  ;;  %v1611_v45 = vpop.f32.mrf.mxu1  ;;  %v1659_v55 = vadd.f32 %v1658_v41, %v13641_v1 }
 0x209   : > { %v1705_v47 = vadd.f32 %v1704_v44, %v13660_v31  ;;  %v1612_v50 = vadd.f32 %v1611_v45, %v13630_v56 }
 0x20a   : > { %v1806_v53 = vmax.f32 %v1563_v12, 0.0  ;;  %v1803_v7 = vmax.f32 %v1659_v55, 0.0  ;;  %v11477_v55 = vld [vmem:[%s13375_s20 + $0x20c] sm:$0xf] }
 0x20b   : > { %v1799_v54 = vmax.f32 %v1705_v47, 0.0  ;;  %v1807_v59 = vmax.f32 %v1612_v50, 0.0  ;;  %v11432_v47 = vld [vmem:[%s13375_s20 + $0xa4] sm:$0xf]  ;;  %v10036_v50 = vld [vmem:[%s13375_s20 + $0x438] sm:$0xf] }
 0x20c   : > { %v13675_v60 = vpack.c.bf16 %v1806_v53, %v1801_v51 }
 0x20d   : > { %v13677_v61 = vpack.c.bf16 %v1799_v54, %v1794_v46  ;;  %v13679_v62 = vpack.c.bf16 %v1807_v59, %v1802_v49  ;;  %v9578_v49 = vld [vmem:[%s13375_s20 + $0xb4] sm:$0xf0]  ;;  %v11549_v54 = vld [vmem:[%s13375_s20 + $0x448] sm:$0xf0]  ;;  %v9758_v59 = vld [vmem:[%s13375_s20 + $0x21c] sm:$0xf0] }
 0x20e   : > { %3216 = vmatmul.bf16.gmra.mxu1 %v13675_v60  ;;  %v9581_v53 = vor.u32 %v11432_v47, %v9578_v49  ;;  %v10037_v48 = vor.u32 %v11549_v54, %v10036_v50  ;;  %v9761_v4 = vor.u32 %v11477_v55, %v9758_v59  ;;  %v11544_v47 = vld [vmem:[%s13375_s20 + $0x420] sm:$0xf0]  ;;  %v9738_v50 = vld [vmem:[%s13375_s20 + $0x1f4] sm:$0xf0] }
 0x20f   : > { %16679 = vst [vmem:[#allocation56_spill] sm:$0xff] %v13679_v62  ;;  %v1660_v3 = vpop.f32.mrf.mxu2  ;;  %3265 = vmatmul.bf16.gmra.mxu2 %v13679_v62  ;;  %v1565_v10 = vpop.f32.mrf.mxu0  ;;  %v11472_v49 = vld [vmem:[%s13375_s20 + $0x1e4] sm:$0xf] }
 0x210   : > { %v1661_v8 = vadd.f32 %v1660_v3, %v13641_v1  ;;  %v1707_v14 = vpop.f32.mrf.mxu3  ;;  %v1614_v17 = vpop.f32.mrf.mxu1  ;;  %v1566_v26 = vadd.f32 %v1565_v10, %v13633_v57  ;;  %3451 = vmatpush.bf16.msra.mxu2 %v9581_v53  ;;  %3354 = vmatpush.bf16.msra.mxu0 %v10037_v48  ;;  %v11589_v10 = vld [vmem:[%s13375_s20 + $0x588] sm:$0xf0]  ;;  %v10176_v48 = vld [vmem:[%s13375_s20 + $0x550] sm:$0xf] }
 0x211   : > { %v1708_v22 = vadd.f32 %v1707_v14, %v13660_v31  ;;  %v1615_v24 = vadd.f32 %v1614_v17, %v13630_v56  ;;  %3499 = vmatpush.bf16.msra.mxu3 %v9761_v4  ;;  %v11584_v4 = vld [vmem:[%s13375_s20 + $0x560] sm:$0xf0] }
 0x212   : > { %v1808_v18 = vmax.f32 %v1661_v8, 0.0  ;;  %1760 = vmatmul.bf16.gmra.mxu0 %v13543_v27  ;;  %v1811_v39 = vmax.f32 %v1566_v26, 0.0  ;;  %v10196_v8 = vld [vmem:[%s13375_s20 + $0x578] sm:$0xf] }
 0x213   : > { %v1804_v34 = vmax.f32 %v1708_v22, 0.0  ;;  %v1812_v36 = vmax.f32 %v1615_v24, 0.0  ;;  %v10197_v15 = vor.u32 %v11589_v10, %v10196_v8 }
 0x214   : > { %v13691_v19 = vpack.c.bf16 %v1808_v18, %v1803_v7 }
 0x215   : > { %3403 = vmatpush.bf16.msra.mxu1 %v10197_v15 }
 0x216   : > { %3314 = vmatmul.bf16.gmra.mxu3 %v13691_v19 }
 0x217   : > { %v1663_v28 = vpop.f32.mrf.mxu2  ;;  %v1567_v29 = vpop.f32.mrf.mxu0 }
 0x218   : > { %v1709_v30 = vpop.f32.mrf.mxu3  ;;  %v1568_v27 = vadd.f32 %v1567_v29, %v13633_v57  ;;  %v1616_v32 = vpop.f32.mrf.mxu1  ;;  %v1664_v43 = vadd.f32 %v1663_v28, %v13641_v1 }
 0x219   : > { %v1710_v35 = vadd.f32 %v1709_v30, %v13660_v31  ;;  %v1617_v38 = vadd.f32 %v1616_v32, %v13630_v56 }
 0x21a   : > { %v1816_v40 = vmax.f32 %v1568_v27, 0.0  ;;  %v1813_v63 = vmax.f32 %v1664_v43, 0.0 }
 0x21b   : > { %v1809_v41 = vmax.f32 %v1710_v35, 0.0  ;;  %v1817_v44 = vmax.f32 %v1617_v38, 0.0 }
 0x21c   : > { %v13703_v12 = vpack.c.bf16 %v1816_v40, %v1811_v39  ;;  %v11427_v39 = vld [vmem:[%s13375_s20 + $0x7c] sm:$0xf]  ;;  %v9558_v40 = vld [vmem:[%s13375_s20 + $0x8c] sm:$0xf0] }
 0x21d   : > { %v13705_v45 = vpack.c.bf16 %v1809_v41, %v1804_v34  ;;  %v13707_v46 = vpack.c.bf16 %v1817_v44, %v1812_v36  ;;  %v10016_v41 = vld [vmem:[%s13375_s20 + $0x410] sm:$0xf]  ;;  %v9561_v44 = vor.u32 %v11427_v39, %v9558_v40  ;;  %v9996_v39 = vld [vmem:[%s13375_s20 + $0x3e8] sm:$0xf] }
 0x21e   : > { %3221 = vmatmul.bf16.gmra.mxu1 %v13703_v12  ;;  %v10017_v59 = vor.u32 %v11544_v47, %v10016_v41  ;;  %v9718_v47 = vld [vmem:[%s13375_s20 + $0x1cc] sm:$0xf0] }
 0x21f   : > { %16680 = vst [vmem:[#allocation57_spill] sm:$0xff] %v13707_v46  ;;  %v1665_v51 = vpop.f32.mrf.mxu2  ;;  %3270 = vmatmul.bf16.gmra.mxu2 %v13707_v46  ;;  %v1570_v2 = vpop.f32.mrf.mxu0 }
 0x220   : > { %v1666_v0 = vadd.f32 %v1665_v51, %v13641_v1  ;;  %v1712_v3 = vpop.f32.mrf.mxu3  ;;  %v1619_v5 = vpop.f32.mrf.mxu1  ;;  %v1571_v17 = vadd.f32 %v1570_v2, %v13633_v57  ;;  %3452 = vmatpush.bf16.msra.mxu2 %v9561_v44  ;;  %3355 = vmatpush.bf16.msra.mxu0 %v10017_v59  ;;  %v11467_v44 = vld [vmem:[%s13375_s20 + $0x1bc] sm:$0xf] }
 0x221   : > { %v1713_v14 = vadd.f32 %v1712_v3, %v13660_v31  ;;  %v1620_v16 = vadd.f32 %v1619_v5, %v13630_v56 }
 0x222   : > { %v1818_v6 = vmax.f32 %v1666_v0, 0.0  ;;  %1765 = vmatmul.bf16.gmra.mxu0 %v13557_v42  ;;  %v1821_v29 = vmax.f32 %v1571_v17, 0.0 }
 0x223   : > { %v1814_v23 = vmax.f32 %v1713_v14, 0.0  ;;  %v1822_v26 = vmax.f32 %v1620_v16, 0.0 }
 0x224   : > { %v13719_v7 = vpack.c.bf16 %v1818_v6, %v1813_v63  ;;  %v9741_v63 = vor.u32 %v11472_v49, %v9738_v50  ;;  %v10177_v6 = vor.u32 %v11584_v4, %v10176_v48  ;;  %v11579_v48 = vld [vmem:[%s13375_s20 + $0x538] sm:$0xf0] }
 0x226   : > { %3319 = vmatmul.bf16.gmra.mxu3 %v13719_v7  ;;  %3404 = vmatpush.bf16.msra.mxu1 %v10177_v6 }
 0x227   : > { %v1668_v18 = vpop.f32.mrf.mxu2  ;;  %v1572_v20 = vpop.f32.mrf.mxu0  ;;  %3500 = vmatpush.bf16.msra.mxu3 %v9741_v63 }
 0x228   : > { %v1714_v21 = vpop.f32.mrf.mxu3  ;;  %v1573_v42 = vadd.f32 %v1572_v20, %v13633_v57  ;;  %v1621_v22 = vpop.f32.mrf.mxu1  ;;  %v1669_v32 = vadd.f32 %v1668_v18, %v13641_v1 }
 0x229   : > { %v1715_v24 = vadd.f32 %v1714_v21, %v13660_v31  ;;  %v1622_v28 = vadd.f32 %v1621_v22, %v13630_v56 }
 0x22a   : > { %v1826_v30 = vmax.f32 %v1573_v42, 0.0  ;;  %v1823_v51 = vmax.f32 %v1669_v32, 0.0  ;;  %v11422_v32 = vld [vmem:[%s13375_s20 + $0x54] sm:$0xf] }
 0x22b   : > { %v1819_v27 = vmax.f32 %v1715_v24, 0.0  ;;  %v1827_v34 = vmax.f32 %v1622_v28, 0.0 }
 0x22c   : > { %v13731_v35 = vpack.c.bf16 %v1826_v30, %v1821_v29 }
 0x22d   : > { %v13733_v36 = vpack.c.bf16 %v1819_v27, %v1814_v23  ;;  %v13735_v38 = vpack.c.bf16 %v1827_v34, %v1822_v26  ;;  %v9538_v34 = vld [vmem:[%s13375_s20 + $0x64] sm:$0xf0] }
 0x22e   : > { %16681 = vst [vmem:[#allocation58_spill] sm:$0xff] %v13731_v35  ;;  %3226 = vmatmul.bf16.gmra.mxu1 %v13731_v35  ;;  %v9541_v41 = vor.u32 %v11422_v32, %v9538_v34  ;;  %v11417_v34 = vld [vmem:[%s13375_s20 + $0x2c] sm:$0xf] }
 0x22f   : > { %16682 = vst [vmem:[#allocation59_spill] sm:$0xff] %v13735_v38  ;;  %v1670_v43 = vpop.f32.mrf.mxu2  ;;  %3275 = vmatmul.bf16.gmra.mxu2 %v13735_v38  ;;  %v1575_v54 = vpop.f32.mrf.mxu0 }
 0x230   : > { %v1671_v53 = vadd.f32 %v1670_v43, %v13641_v1  ;;  %v1717_v55 = vpop.f32.mrf.mxu3  ;;  %v1624_v0 = vpop.f32.mrf.mxu1  ;;  %v1576_v10 = vadd.f32 %v1575_v54, %v13633_v57  ;;  %v11539_v43 = vld [vmem:[%s13375_s20 + $0x3f8] sm:$0xf0]  ;;  %3453 = vmatpush.bf16.msra.mxu2 %v9541_v41 }
 0x231   : > { %v1718_v5 = vadd.f32 %v1717_v55, %v13660_v31  ;;  %v1625_v8 = vadd.f32 %v1624_v0, %v13630_v56  ;;  %v9997_v54 = vor.u32 %v11539_v43, %v9996_v39  ;;  %v9721_v55 = vor.u32 %v11467_v44, %v9718_v47  ;;  %v9518_v39 = vld [vmem:[%s13375_s20 + $0x3c] sm:$0xf0]  ;;  %v11534_v44 = vld [vmem:[%s13375_s20 + $0x3d0] sm:$0xf0] }
 0x232   : > { %v1828_v2 = vmax.f32 %v1671_v53, 0.0  ;;  %1770 = vmatmul.bf16.gmra.mxu0 %v13571_v58  ;;  %v1831_v22 = vmax.f32 %v1576_v10, 0.0  ;;  %v9521_v43 = vor.u32 %v11417_v34, %v9518_v39  ;;  %v11462_v47 = vld [vmem:[%s13375_s20 + $0x194] sm:$0xf] }
 0x233   : > { %v1824_v18 = vmax.f32 %v1718_v5, 0.0  ;;  %v1832_v21 = vmax.f32 %v1625_v8, 0.0  ;;  %3356 = vmatpush.bf16.msra.mxu0 %v9997_v54  ;;  %3501 = vmatpush.bf16.msra.mxu3 %v9721_v55 }
 0x234   : > { %v13747_v3 = vpack.c.bf16 %v1828_v2, %v1823_v51  ;;  %v10156_v2 = vld [vmem:[%s13375_s20 + $0x528] sm:$0xf]  ;;  %3454 = vmatpush.bf16.msra.mxu2 %v9521_v43  ;;  %v11457_v43 = vld [vmem:[%s13375_s20 + $0x16c] sm:$0xf] }
 0x235   : > { %v10157_v5 = vor.u32 %v11579_v48, %v10156_v2 }
 0x236   : > { %3324 = vmatmul.bf16.gmra.mxu3 %v13747_v3 }
 0x237   : > { %v1673_v14 = vpop.f32.mrf.mxu2  ;;  %v1577_v15 = vpop.f32.mrf.mxu0  ;;  %3405 = vmatpush.bf16.msra.mxu1 %v10157_v5  ;;  %v11574_v5 = vld [vmem:[%s13375_s20 + $0x510] sm:$0xf0] }
 0x238   : > { %v1719_v16 = vpop.f32.mrf.mxu3  ;;  %v1578_v58 = vadd.f32 %v1577_v15, %v13633_v57  ;;  %v1626_v17 = vpop.f32.mrf.mxu1  ;;  %v1674_v26 = vadd.f32 %v1673_v14, %v13641_v1 }
 0x239   : > { %v1720_v20 = vadd.f32 %v1719_v16, %v13660_v31  ;;  %v1627_v42 = vadd.f32 %v1626_v17, %v13630_v56 }
 0x23a   : > { %v1836_v23 = vmax.f32 %v1578_v58, 0.0  ;;  %v1833_v49 = vmax.f32 %v1674_v26, 0.0 }
 0x23b   : > { %v1829_v24 = vmax.f32 %v1720_v20, 0.0  ;;  %v1837_v28 = vmax.f32 %v1627_v42, 0.0 }
 0x23c   : > { %v13759_v29 = vpack.c.bf16 %v1836_v23, %v1831_v22 }
 0x23d   : > { %v13761_v30 = vpack.c.bf16 %v1829_v24, %v1824_v18  ;;  %v13763_v27 = vpack.c.bf16 %v1837_v28, %v1832_v21 }
 0x23e   : > { %16683 = vst [vmem:[#allocation60_spill] sm:$0xff] %v13759_v29  ;;  %3231 = vmatmul.bf16.gmra.mxu1 %v13759_v29 }
 0x23f   : > { %16684 = vst [vmem:[#allocation61_spill] sm:$0xff] %v13763_v27  ;;  %v1675_v40 = vpop.f32.mrf.mxu2  ;;  %3280 = vmatmul.bf16.gmra.mxu2 %v13763_v27  ;;  %v1580_v51 = vpop.f32.mrf.mxu0 }
 0x240   : > { %v1676_v50 = vadd.f32 %v1675_v40, %v13641_v1  ;;  %v1722_v53 = vpop.f32.mrf.mxu3  ;;  %v1629_v59 = vpop.f32.mrf.mxu1  ;;  %v1581_v8 = vadd.f32 %v1580_v51, %v13633_v57  ;;  %v9976_v40 = vld [vmem:[%s13375_s20 + $0x3c0] sm:$0xf] }
 0x241   : > { %v1723_v4 = vadd.f32 %v1722_v53, %v13660_v31  ;;  %v1630_v6 = vadd.f32 %v1629_v59, %v13630_v56  ;;  %v9977_v55 = vor.u32 %v11534_v44, %v9976_v40  ;;  %v9678_v44 = vld [vmem:[%s13375_s20 + $0x17c] sm:$0xf0] }
 0x242   : > { %v1838_v63 = vmax.f32 %v1676_v50, 0.0  ;;  %1775 = vmatmul.bf16.gmra.mxu0 %v13585_v9  ;;  %v1841_v21 = vmax.f32 %v1581_v8, 0.0 }
 0x243   : > { %v1834_v58 = vmax.f32 %v1723_v4, 0.0  ;;  %v1842_v18 = vmax.f32 %v1630_v6, 0.0  ;;  %3357 = vmatpush.bf16.msra.mxu0 %v9977_v55  ;;  %v10136_v4 = vld [vmem:[%s13375_s20 + $0x500] sm:$0xf] }
 0x244   : > { %v13775_v0 = vpack.c.bf16 %v1838_v63, %v1833_v49  ;;  %v9698_v49 = vld [vmem:[%s13375_s20 + $0x1a4] sm:$0xf0]  ;;  %v10137_v8 = vor.u32 %v11574_v5, %v10136_v4 }
 0x245   : > { %v9701_v59 = vor.u32 %v11462_v47, %v9698_v49 }
 0x246   : > { %3329 = vmatmul.bf16.gmra.mxu3 %v13775_v0  ;;  %3406 = vmatpush.bf16.msra.mxu1 %v10137_v8  ;;  %v10118_v8 = vld [vmem:[%s13375_s20 + $0x4ec] sm:$0xf0] }
 0x247   : > { %v1678_v10 = vpop.f32.mrf.mxu2  ;;  %v1582_v14 = vpop.f32.mrf.mxu0  ;;  %3502 = vmatpush.bf16.msra.mxu3 %v9701_v59 }
 0x248   : > { %v1724_v15 = vpop.f32.mrf.mxu3  ;;  %v1583_v9 = vadd.f32 %v1582_v14, %v13633_v57  ;;  %v1631_v16 = vpop.f32.mrf.mxu1  ;;  %v1679_v23 = vadd.f32 %v1678_v10, %v13641_v1 }
 0x249   : > { %v1725_v17 = vadd.f32 %v1724_v15, %v13660_v31  ;;  %v1632_v20 = vadd.f32 %v1631_v16, %v13630_v56 }
 0x24a   : > { %v1846_v42 = vmax.f32 %v1583_v9, 0.0  ;;  %v1843_v50 = vmax.f32 %v1679_v23, 0.0  ;;  %v9498_v23 = vld [vmem:[%s13375_s20 + $0x14] sm:$0xf0] }
 0x24b   : > { %v1839_v22 = vmax.f32 %v1725_v17, 0.0  ;;  %v1847_v24 = vmax.f32 %v1632_v20, 0.0 }
 0x24c   : > { %v13787_v26 = vpack.c.bf16 %v1846_v42, %v1841_v21 }
 0x24d   : > { %v13789_v28 = vpack.c.bf16 %v1839_v22, %v1834_v58  ;;  %v13791_v32 = vpack.c.bf16 %v1847_v24, %v1842_v18  ;;  %v11412_v22 = vld [vmem:[%s13375_s20 + $0x4] sm:$0xf] }
 0x24e   : > { %16685 = vst [vmem:[#allocation62_spill] sm:$0xff] %v13787_v26  ;;  %3236 = vmatmul.bf16.gmra.mxu1 %v13787_v26  ;;  %v9501_v40 = vor.u32 %v11412_v22, %v9498_v23 }
 0x24f   : > { %16686 = vst [vmem:[#allocation63_spill] sm:$0xff] %v13791_v32  ;;  %v1680_v41 = vpop.f32.mrf.mxu2  ;;  %3285 = vmatmul.bf16.gmra.mxu2 %v13791_v32  ;;  %v1585_v53 = vpop.f32.mrf.mxu0 }
 0x250   : > { %v1681_v51 = vadd.f32 %v1680_v41, %v13641_v1  ;;  %v1727_v54 = vpop.f32.mrf.mxu3  ;;  %v1634_v63 = vpop.f32.mrf.mxu1  ;;  %v1586_v10 = vadd.f32 %v1585_v53, %v13633_v57  ;;  %3455 = vmatpush.bf16.msra.mxu2 %v9501_v40  ;;  %v9958_v53 = vld [vmem:[%s13375_s20 + $0x3ac] sm:$0xf0] }
 0x251   : > { %v1728_v6 = vadd.f32 %v1727_v54, %v13660_v31  ;;  %v1635_v14 = vadd.f32 %v1634_v63, %v13630_v56 }
 0x252   : > { %v1848_v2 = vmax.f32 %v1681_v51, 0.0  ;;  %1780 = vmatmul.bf16.gmra.mxu0 %v13599_v25  ;;  %v1851_v20 = vmax.f32 %v1586_v10, 0.0  ;;  %v11527_v51 = vld [vmem:[%s13375_s20 + $0x39c] sm:$0xf]  ;;  %v11452_v10 = vld [vmem:[%s13375_s20 + $0x144] sm:$0xf] }
 0x253   : > { %v1844_v17 = vmax.f32 %v1728_v6, 0.0  ;;  %v1852_v21 = vmax.f32 %v1635_v14, 0.0  ;;  %v9961_v55 = vor.u32 %v11527_v51, %v9958_v53  ;;  %v11567_v6 = vld [vmem:[%s13375_s20 + $0x4dc] sm:$0xf] }
 0x254   : > { %v13803_v48 = vpack.c.bf16 %v1848_v2, %v1843_v50  ;;  %v9681_v50 = vor.u32 %v11457_v43, %v9678_v44 }
 0x255   : > { %3546 = vmatpush.bf16.msrb.mxu0 %v9961_v55 }
 0x256   : > { %3334 = vmatmul.bf16.gmra.mxu3 %v13803_v48 }
 0x257   : > { %v1683_v15 = vpop.f32.mrf.mxu2  ;;  %v1587_v9 = vpop.f32.mrf.mxu0  ;;  %3503 = vmatpush.bf16.msra.mxu3 %v9681_v50 }
 0x258   : > { %v1729_v25 = vpop.f32.mrf.mxu3  ;;  %v1588_v16 = vadd.f32 %v1587_v9, %v13633_v57  ;;  %v1636_v58 = vpop.f32.mrf.mxu1  ;;  %v1684_v24 = vadd.f32 %v1683_v15, %v13641_v1  ;;  %v10121_v15 = vor.u32 %v11567_v6, %v10118_v8  ;;  %v9658_v9 = vld [vmem:[%s13375_s20 + $0x154] sm:$0xf0] }
 0x259   : > { %v1730_v18 = vadd.f32 %v1729_v25, %v13660_v31  ;;  %v1637_v42 = vadd.f32 %v1636_v58, %v13630_v56 }
 0x25a   : > { %v1856_v34 = vmax.f32 %v1588_v16, 0.0  ;;  %v1853_v59 = vmax.f32 %v1684_v24, 0.0  ;;  %v9661_v16 = vor.u32 %v11452_v10, %v9658_v9  ;;  %3595 = vmatpush.bf16.msrb.mxu1 %v10121_v15  ;;  %v11562_v9 = vld [vmem:[%s13375_s20 + $0x4b4] sm:$0xf] }
 0x25b   : > { %v1849_v39 = vmax.f32 %v1730_v18, 0.0  ;;  %v1857_v41 = vmax.f32 %v1637_v42, 0.0 }
 0x25c   : > { %v13819_v47 = vpack.c.bf16 %v1856_v34, %v1851_v20  ;;  %3504 = vmatpush.bf16.msra.mxu3 %v9661_v16 }
 0x25d   : > { %v13821_v49 = vpack.c.bf16 %v1849_v39, %v1844_v17  ;;  %v13825_v54 = vpack.c.bf16 %v1857_v41, %v1852_v21 }
 0x25e   : > { %16687 = vst [vmem:[#allocation64_spill] sm:$0xff] %v13819_v47  ;;  %3241 = vmatmul.bf16.gmra.mxu1 %v13819_v47 }
 0x25f   : > { %16688 = vst [vmem:[#allocation65_spill] sm:$0xff] %v13825_v54  ;;  %v1685_v63 = vpop.f32.mrf.mxu2  ;;  %3290 = vmatmul.bf16.gmra.mxu2 %v13825_v54  ;;  %v1590_v4 = vpop.f32.mrf.mxu0 }
 0x260   : > { %v1686_v2 = vadd.f32 %v1685_v63, %v13641_v1  ;;  %v1732_v5 = vpop.f32.mrf.mxu3  ;;  %v1639_v14 = vpop.f32.mrf.mxu1  ;;  %v1591_v20 = vadd.f32 %v1590_v4, %v13633_v57  ;;  %v11522_v63 = vld [vmem:[%s13375_s20 + $0x374] sm:$0xf] }
 0x261   : > { %v1733_v17 = vadd.f32 %v1732_v5, %v13660_v31  ;;  %v1640_v18 = vadd.f32 %v1639_v14, %v13630_v56  ;;  %v9938_v5 = vld [vmem:[%s13375_s20 + $0x384] sm:$0xf0] }
 0x262   : > { %v1858_v25 = vmax.f32 %v1686_v2, 0.0  ;;  %1785 = vmatmul.bf16.gmra.mxu0 %v13611_v37  ;;  %v1861_v41 = vmax.f32 %v1591_v20, 0.0  ;;  %v9941_v6 = vor.u32 %v11522_v63, %v9938_v5  ;;  %v9644_v5 = vld [vmem:[%s13375_s20 + $0x120] sm:$0xf] }
 0x263   : > { %v1854_v24 = vmax.f32 %v1733_v17, 0.0  ;;  %v1862_v39 = vmax.f32 %v1640_v18, 0.0  ;;  %v13861_v18 = vperm.slane %v13627_v52, 4 }
 0x264   : > { %v13835_v58 = vpack.c.bf16 %v1858_v25, %v1853_v59  ;;  %v10278_v59 = vld [vmem:[%s13375_s20 + $0x62c] sm:$0xf0]  ;;  %v10098_v25 = vld [vmem:[%s13375_s20 + $0x4c4] sm:$0xf0]  ;;  %3547 = vmatpush.bf16.msrb.mxu0 %v9941_v6 }
 0x265   : > { %v10101_v16 = vor.u32 %v11562_v9, %v10098_v25 }
 0x266   : > { %3339 = vmatmul.bf16.gmra.mxu3 %v13835_v58 }
 0x267   : > { %v1688_v21 = vpop.f32.mrf.mxu2  ;;  %v1592_v42 = vpop.f32.mrf.mxu0  ;;  %3596 = vmatpush.bf16.msrb.mxu1 %v10101_v16 }
 0x268   : > { %v1734_v22 = vpop.f32.mrf.mxu3  ;;  %v1593_v37 = vadd.f32 %v1592_v42, %v13633_v57  ;;  %v1641_v23 = vpop.f32.mrf.mxu1  ;;  %v1689_v50 = vadd.f32 %v1688_v21, %v13641_v1  ;;  %v11607_v57 = vld [vmem:[%s13375_s20 + $0x61c] sm:$0xf] }
 0x269   : > { %v1735_v34 = vadd.f32 %v1734_v22, %v13660_v31  ;;  %v1642_v40 = vadd.f32 %v1641_v23, %v13630_v56  ;;  %v10281_v4 = vor.u32 %v11607_v57, %v10278_v59  ;;  %v13871_v23 = vld [vmem:[%s13378_s27] sm:$0x1f]  ;;  %v11517_v59 = vld [vmem:[%s13375_s20 + $0x34c] sm:$0xf] }
 0x26a   : > { %v1866_v43 = vmax.f32 %v1593_v37, 0.0  ;;  %v1863_v8 = vmax.f32 %v1689_v50, 0.0  ;;  %v10258_v57 = vld [vmem:[%s13375_s20 + $0x604] sm:$0xf0] }
 0x26b   : > { %v1859_v44 = vmax.f32 %v1735_v34, 0.0  ;;  %v1867_v51 = vmax.f32 %v1642_v40, 0.0  ;;  %3644 = vmatpush.bf16.msrb.mxu2 %v10281_v4  ;;  %v9918_v4 = vld [vmem:[%s13375_s20 + $0x35c] sm:$0xf0] }
 0x26c   : > { %v13845_v53 = vpack.c.bf16 %v1866_v43, %v1861_v41  ;;  %v13875_v41 = vperm.slane %v13871_v23, 0 }
 0x26d   : > { %v13847_v55 = vpack.c.bf16 %v1859_v44, %v1854_v24  ;;  %v13852_v2 = vpack.c.bf16 %v1867_v51, %v1862_v39  ;;  %v11602_v51 = vld [vmem:[%s13375_s20 + $0x5f4] sm:$0xf] }
 0x26e   : > { %16689 = vst [vmem:[#allocation66_spill] sm:$0xff] %v13845_v53  ;;  %3246 = vmatmul.bf16.gmra.mxu1 %v13845_v53  ;;  %v10261_v63 = vor.u32 %v11602_v51, %v10258_v57  ;;  %v11597_v57 = vld [vmem:[%s13375_s20 + $0x5cc] sm:$0xf] }
 0x26f   : > { %16690 = vst [vmem:[#allocation67_spill] sm:$0xff] %v13852_v2  ;;  %v1690_v56 = vpop.f32.mrf.mxu2  ;;  %3295 = vmatmul.bf16.gmra.mxu2 %v13852_v2  ;;  %v1751_v14 = vpop.f32.mrf.mxu0 }
 0x270   : > { %v1691_v10 = vadd.f32 %v1690_v56, %v13641_v1  ;;  %v1737_v15 = vpop.f32.mrf.mxu3  ;;  %v1752_v21 = vadd.f32 %v1751_v14, %v13861_v18  ;;  %v9921_v56 = vor.u32 %v11517_v59, %v9918_v4  ;;  %v10078_v14 = vld [vmem:[%s13375_s20 + $0x49c] sm:$0xf0]  ;;  %3645 = vmatpush.bf16.msrb.mxu2 %v10261_v63  ;;  %v11512_v63 = vld [vmem:[%s13375_s20 + $0x324] sm:$0xf] }
 0x271   : > { %v1738_v1 = vadd.f32 %v1737_v15, %v13660_v31  ;;  %v10238_v59 = vld [vmem:[%s13375_s20 + $0x5dc] sm:$0xf0] }
 0x272   : > { %v1868_v17 = vmax.f32 %v1691_v10, 0.0  ;;  %3358 = vmatmul.bf16.vlgmr.msra.gmra.mxu0 %v13677_v61  ;;  %v1795_v34 = vmax.f32 %v1752_v21, 0.0  ;;  %v11557_v10 = vld [vmem:[%s13375_s20 + $0x48c] sm:$0xf]  ;;  %v10241_v4 = vor.u32 %v11597_v57, %v10238_v59 }
 0x273   : > { %v1864_v37 = vmax.f32 %v1738_v1, 0.0  ;;  %3548 = vmatpush.bf16.msrb.mxu0 %v9921_v56  ;;  %v10081_v15 = vor.u32 %v11557_v10, %v10078_v14  ;;  %v11445_v56 = vld [vmem:[%s13375_s20 + $0x108] sm:$0xf0]  ;;  %v11552_v14 = vld [vmem:[%s13375_s20 + $0x464] sm:$0xf] }
 0x274   : > { %v13864_v20 = vpack.c.bf16 %v1868_v17, %v1863_v8  ;;  %3646 = vmatpush.bf16.msrb.mxu2 %v10241_v4 }
 0x275   : > { %3597 = vmatpush.bf16.msrb.mxu1 %v10081_v15  ;;  %v10058_v15 = vld [vmem:[%s13375_s20 + $0x474] sm:$0xf0] }
 0x276   : > { %16691 = vst [vmem:[#allocation68_spill] sm:$0xff] %v13864_v20  ;;  %3344 = vmatmul.bf16.gmra.mxu3 %v13864_v20  ;;  %v11415_v20 = vld [vmem:[%s13375_s20 + $0x18] sm:$0xf0] }
 0x277   : > { %v1753_v42 = vpop.f32.mrf.mxu0 }
 0x278   : > { %v1739_v22 = vpop.f32.mrf.mxu3  ;;  %v1754_v52 = vadd.f32 %v1753_v42, %v13861_v18 }
 0x279   : > { %v1740_v24 = vadd.f32 %v1739_v22, %v13660_v31  ;;  %v11450_v31 = vld [vmem:[%s13375_s20 + $0x130] sm:$0xf0] }
 0x27a   : > { %v1800_v39 = vmax.f32 %v1754_v52, 0.0  ;;  %v9645_v6 = vor.u32 %v11450_v31, %v9644_v5  ;;  %v9898_v5 = vld [vmem:[%s13375_s20 + $0x334] sm:$0xf0] }
 0x27b   : > { %v1869_v40 = vmax.f32 %v1740_v24, 0.0  ;;  %v3212_v43 = vpop.f32.mrf.mxu1  ;;  %v9624_v31 = vld [vmem:[%s13375_s20 + $0xf8] sm:$0xf] }
 0x27c   : > { %v13877_v44 = vpack.c.bf16 %v1800_v39, %v1795_v34  ;;  %v3213_v9 = vadd.f32 %v3212_v43, %v13875_v41  ;;  %3693 = vmatpush.bf16.msrb.mxu3 %v9645_v6  ;;  %v9901_v6 = vor.u32 %v11512_v63, %v9898_v5 }
 0x27d   : > { %v13879_v50 = vpack.c.bf16 %v1869_v40, %v1864_v37 }
 0x27e   : > { %3407 = vmatmul.bf16.vlgmr.msra.gmra.mxu1 %v13877_v44  ;;  %3549 = vmatpush.bf16.msrb.mxu0 %v9901_v6  ;;  %v11507_v6 = vld [vmem:[%s13375_s20 + $0x2fc] sm:$0xf] }
 0x27f   : > { %3456 = vmatmul.bf16.vlgmr.msra.gmra.mxu2 %v13646_v11  ;;  %v1756_v8 = vpop.f32.mrf.mxu0 }
 0x280   : > { %v1757_v1 = vadd.f32 %v1756_v8, %v13861_v18  ;;  %v9625_v8 = vor.u32 %v11445_v56, %v9624_v31  ;;  %v11592_v31 = vld [vmem:[%s13375_s20 + $0x5a4] sm:$0xf]  ;;  %v10218_v56 = vld [vmem:[%s13375_s20 + $0x5b4] sm:$0xf0] }
 0x282   : > { %v3261_v25 = vpop.f32.mrf.mxu2  ;;  %3363 = vmatmul.bf16.gmra.mxu0 %v13705_v45  ;;  %v1805_v24 = vmax.f32 %v1757_v1, 0.0  ;;  %3694 = vmatpush.bf16.msrb.mxu3 %v9625_v8  ;;  %v10221_v8 = vor.u32 %v11592_v31, %v10218_v56 }
 0x283   : > { %v3262_v16 = vadd.f32 %v3261_v25, %v3213_v9  ;;  %v3214_v17 = vpop.f32.mrf.mxu1  ;;  %v10061_v25 = vor.u32 %v11552_v14, %v10058_v15  ;;  %v9604_v14 = vld [vmem:[%s13375_s20 + $0xd0] sm:$0xf]  ;;  %v11440_v15 = vld [vmem:[%s13375_s20 + $0xe0] sm:$0xf0] }
 0x284   : > { %v3215_v37 = vadd.f32 %v3214_v17, %v13875_v41  ;;  %3647 = vmatpush.bf16.msrb.mxu2 %v10221_v8 }
 0x285   : > { %3598 = vmatpush.bf16.msrb.mxu1 %v10061_v25  ;;  %v9605_v25 = vor.u32 %v11440_v15, %v9604_v14 }
 0x286   : > { %3505 = vmatmul.bf16.vlgmr.msra.gmra.mxu3 %v13648_v13 }
 0x287   : > { %v1758_v21 = vpop.f32.mrf.mxu0  ;;  %3695 = vmatpush.bf16.msrb.mxu3 %v9605_v25  ;;  %v11587_v25 = vld [vmem:[%s13375_s20 + $0x57c] sm:$0xf] }
 0x288   : > { %v1759_v42 = vadd.f32 %v1758_v21, %v13861_v18 }
 0x289   : > { %v3310_v22 = vpop.f32.mrf.mxu3 }
 0x28a   : > { %v13897_v52 = vadd.f32 %v3310_v22, %v3262_v16  ;;  %v1810_v34 = vmax.f32 %v1759_v42, 0.0  ;;  %v3263_v39 = vpop.f32.mrf.mxu2 }
 0x28b   : > { %v3264_v40 = vadd.f32 %v3263_v39, %v3215_v37  ;;  %v3217_v43 = vpop.f32.mrf.mxu1 }
 0x28c   : > { %v13899_v51 = vpack.c.bf16 %v1810_v34, %v1805_v24  ;;  %v3218_v16 = vadd.f32 %v3217_v43, %v13875_v41 }
 0x28e   : > { %16692 = vst [vmem:[#allocation69_spill] sm:$0xff] %v13899_v51  ;;  %3412 = vmatmul.bf16.gmra.mxu1 %v13899_v51 }
 0x28f   : > { %3461 = vmatmul.bf16.gmra.mxu2 %v13675_v60  ;;  %v1761_v10 = vpop.f32.mrf.mxu0 }
 0x290   : > { %v1762_v22 = vadd.f32 %v1761_v10, %v13861_v18  ;;  %v9878_v10 = vld [vmem:[%s13375_s20 + $0x30c] sm:$0xf0] }
 0x291   : > { %v3312_v9 = vpop.f32.mrf.mxu3 }
 0x292   : > { %v13912_v17 = vadd.f32 %v3312_v9, %v3264_v40  ;;  %v3266_v1 = vpop.f32.mrf.mxu2  ;;  %3368 = vmatmul.bf16.gmra.mxu0 %v13733_v36  ;;  %v1815_v43 = vmax.f32 %v1762_v22, 0.0  ;;  %v9881_v9 = vor.u32 %v11507_v6, %v9878_v10 }
 0x293   : > { %v3267_v21 = vadd.f32 %v3266_v1, %v3218_v16  ;;  %v3219_v42 = vpop.f32.mrf.mxu1  ;;  %v11547_v1 = vld [vmem:[%s13375_s20 + $0x43c] sm:$0xf] }
 0x294   : > { %v3220_v39 = vadd.f32 %v3219_v42, %v13875_v41  ;;  %3550 = vmatpush.bf16.msrb.mxu0 %v9881_v9 }
 0x296   : > { %3510 = vmatmul.bf16.gmra.mxu3 %v13679_v62  ;;  %v11425_v62 = vld [vmem:[%s13375_s20 + $0x68] sm:$0xf0] }
 0x297   : > { %v1763_v37 = vpop.f32.mrf.mxu0 }
 0x298   : > { %v1764_v24 = vadd.f32 %v1763_v37, %v13861_v18 }
 0x299   : > { %v3315_v34 = vpop.f32.mrf.mxu3 }
 0x29a   : > { %v13919_v40 = vadd.f32 %v3315_v34, %v3267_v21  ;;  %v1820_v57 = vmax.f32 %v1764_v24, 0.0  ;;  %v3268_v59 = vpop.f32.mrf.mxu2  ;;  %v10038_v21 = vld [vmem:[%s13375_s20 + $0x44c] sm:$0xf0] }
 0x29b   : > { %v3269_v63 = vadd.f32 %v3268_v59, %v3220_v39  ;;  %v3222_v4 = vpop.f32.mrf.mxu1  ;;  %v10041_v22 = vor.u32 %v11547_v1, %v10038_v21  ;;  %v11502_v1 = vld [vmem:[%s13375_s20 + $0x2d4] sm:$0xf] }
 0x29c   : > { %v13921_v5 = vpack.c.bf16 %v1820_v57, %v1815_v43  ;;  %v3223_v37 = vadd.f32 %v3222_v4, %v13875_v41 }
 0x29d   : > { %3599 = vmatpush.bf16.msrb.mxu1 %v10041_v22  ;;  %v9584_v22 = vld [vmem:[%s13375_s20 + $0xa8] sm:$0xf] }
 0x29e   : > { %16693 = vst [vmem:[#allocation70_spill] sm:$0xff] %v13921_v5  ;;  %3417 = vmatmul.bf16.gmra.mxu1 %v13921_v5 }
 0x29f   : > { %3466 = vmatmul.bf16.gmra.mxu2 %v13703_v12  ;;  %v1766_v16 = vpop.f32.mrf.mxu0 }
 0x2a0   : > { %v1767_v57 = vadd.f32 %v1766_v16, %v13861_v18  ;;  %v10198_v16 = vld [vmem:[%s13375_s20 + $0x58c] sm:$0xf0] }
 0x2a1   : > { %v3317_v42 = vpop.f32.mrf.mxu3  ;;  %v10201_v21 = vor.u32 %v11587_v25, %v10198_v16 }
 0x2a2   : > { %v13934_v24 = vadd.f32 %v3317_v42, %v3269_v63  ;;  %v3271_v34 = vpop.f32.mrf.mxu2  ;;  %3373 = vmatmul.bf16.gmra.mxu0 %v13761_v30  ;;  %v1825_v6 = vmax.f32 %v1767_v57, 0.0  ;;  %v9858_v42 = vld [vmem:[%s13375_s20 + $0x2e4] sm:$0xf0]  ;;  %v11542_v57 = vld [vmem:[%s13375_s20 + $0x414] sm:$0xf] }
 0x2a3   : > { %v3272_v39 = vadd.f32 %v3271_v34, %v3223_v37  ;;  %v3224_v43 = vpop.f32.mrf.mxu1  ;;  %v11435_v37 = vld [vmem:[%s13375_s20 + $0xb8] sm:$0xf0]  ;;  %v9861_v34 = vor.u32 %v11502_v1, %v9858_v42  ;;  %3648 = vmatpush.bf16.msrb.mxu2 %v10201_v21 }
 0x2a4   : > { %v3225_v31 = vadd.f32 %v3224_v43, %v13875_v41 }
 0x2a5   : > { %3551 = vmatpush.bf16.msrb.mxu0 %v9861_v34 }
 0x2a6   : > { %3515 = vmatmul.bf16.gmra.mxu3 %v13707_v46  ;;  %v9544_v46 = vld [vmem:[%s13375_s20 + $0x58] sm:$0xf] }
 0x2a7   : > { %v1768_v59 = vpop.f32.mrf.mxu0 }
 0x2a8   : > { %v1769_v63 = vadd.f32 %v1768_v59, %v13861_v18  ;;  %v10018_v59 = vld [vmem:[%s13375_s20 + $0x424] sm:$0xf0] }
 0x2a9   : > { %v3320_v4 = vpop.f32.mrf.mxu3 }
 0x2aa   : > { %v13941_v56 = vadd.f32 %v3320_v4, %v3272_v39  ;;  %v1830_v8 = vmax.f32 %v1769_v63, 0.0  ;;  %v3273_v10 = vpop.f32.mrf.mxu2  ;;  %v9585_v39 = vor.u32 %v11435_v37, %v9584_v22  ;;  %v10021_v4 = vor.u32 %v11542_v57, %v10018_v59 }
 0x2ab   : > { %v3274_v14 = vadd.f32 %v3273_v10, %v3225_v31  ;;  %v3227_v15 = vpop.f32.mrf.mxu1 }
 0x2ac   : > { %v13943_v9 = vpack.c.bf16 %v1830_v8, %v1825_v6  ;;  %v3228_v31 = vadd.f32 %v3227_v15, %v13875_v41  ;;  %3696 = vmatpush.bf16.msrb.mxu3 %v9585_v39  ;;  %3600 = vmatpush.bf16.msrb.mxu1 %v10021_v4  ;;  %v11497_v4 = vld [vmem:[%s13375_s20 + $0x2ac] sm:$0xf] }
 0x2ae   : > { %16694 = vst [vmem:[#allocation71_spill] sm:$0xff] %v13943_v9  ;;  %3422 = vmatmul.bf16.gmra.mxu1 %v13943_v9 }
 0x2af   : > { %3471 = vmatmul.bf16.gmra.mxu2 %v13731_v35  ;;  %v1771_v43 = vpop.f32.mrf.mxu0 }
 0x2b0   : > { %v1772_v16 = vadd.f32 %v1771_v43, %v13861_v18  ;;  %v11582_v43 = vld [vmem:[%s13375_s20 + $0x554] sm:$0xf] }
 0x2b1   : > { %v3322_v63 = vpop.f32.mrf.mxu3 }
 0x2b2   : > { %v13956_v6 = vadd.f32 %v3322_v63, %v3274_v14  ;;  %v3276_v8 = vpop.f32.mrf.mxu2  ;;  %3378 = vmatmul.bf16.gmra.mxu0 %v13789_v28  ;;  %v1835_v22 = vmax.f32 %v1772_v16, 0.0  ;;  %v10178_v63 = vld [vmem:[%s13375_s20 + $0x564] sm:$0xf0] }
 0x2b3   : > { %v3277_v10 = vadd.f32 %v3276_v8, %v3228_v31  ;;  %v3229_v25 = vpop.f32.mrf.mxu1  ;;  %v10181_v31 = vor.u32 %v11582_v43, %v10178_v63  ;;  %v9838_v8 = vld [vmem:[%s13375_s20 + $0x2bc] sm:$0xf0] }
 0x2b4   : > { %v3230_v21 = vadd.f32 %v3229_v25, %v13875_v41 }
 0x2b5   : > { %3649 = vmatpush.bf16.msrb.mxu2 %v10181_v31 }
 0x2b6   : > { %3520 = vmatmul.bf16.gmra.mxu3 %v13735_v38  ;;  %v11430_v38 = vld [vmem:[%s13375_s20 + $0x90] sm:$0xf0] }
 0x2b7   : > { %v1773_v1 = vpop.f32.mrf.mxu0 }
 0x2b8   : > { %v1774_v14 = vadd.f32 %v1773_v1, %v13861_v18  ;;  %v9564_v1 = vld [vmem:[%s13375_s20 + $0x80] sm:$0xf] }
 0x2b9   : > { %v3325_v15 = vpop.f32.mrf.mxu3  ;;  %v9565_v25 = vor.u32 %v11430_v38, %v9564_v1 }
 0x2ba   : > { %v13963_v42 = vadd.f32 %v3325_v15, %v3277_v10  ;;  %v1840_v37 = vmax.f32 %v1774_v14, 0.0  ;;  %v3278_v34 = vpop.f32.mrf.mxu2  ;;  %v9841_v10 = vor.u32 %v11497_v4, %v9838_v8  ;;  %v11537_v14 = vld [vmem:[%s13375_s20 + $0x3ec] sm:$0xf]  ;;  %v9998_v15 = vld [vmem:[%s13375_s20 + $0x3fc] sm:$0xf0] }
 0x2bb   : > { %v3279_v39 = vadd.f32 %v3278_v34, %v3230_v21  ;;  %v3232_v57 = vpop.f32.mrf.mxu1  ;;  %3697 = vmatpush.bf16.msrb.mxu3 %v9565_v25 }
 0x2bc   : > { %v13965_v59 = vpack.c.bf16 %v1840_v37, %v1835_v22  ;;  %3552 = vmatpush.bf16.msrb.mxu0 %v9841_v10  ;;  %v10001_v22 = vor.u32 %v11537_v14, %v9998_v15  ;;  %v3233_v37 = vadd.f32 %v3232_v57, %v13875_v41 }
 0x2be   : > { %16695 = vst [vmem:[#allocation72_spill] sm:$0xff] %v13965_v59  ;;  %3427 = vmatmul.bf16.gmra.mxu1 %v13965_v59 }
 0x2bf   : > { %3476 = vmatmul.bf16.gmra.mxu2 %v13759_v29  ;;  %v1776_v16 = vpop.f32.mrf.mxu0  ;;  %3601 = vmatpush.bf16.msrb.mxu1 %v10001_v22 }
 0x2c0   : > { %v1777_v4 = vadd.f32 %v1776_v16, %v13861_v18  ;;  %v11577_v16 = vld [vmem:[%s13375_s20 + $0x52c] sm:$0xf] }
 0x2c1   : > { %v3327_v21 = vpop.f32.mrf.mxu3 }
 0x2c2   : > { %v13978_v34 = vadd.f32 %v3327_v21, %v3279_v39  ;;  %v3281_v43 = vpop.f32.mrf.mxu2  ;;  %3383 = vmatmul.bf16.gmra.mxu0 %v13821_v49  ;;  %v1845_v10 = vmax.f32 %v1777_v4, 0.0 }
 0x2c3   : > { %v3282_v38 = vadd.f32 %v3281_v43, %v3233_v37  ;;  %v3234_v63 = vpop.f32.mrf.mxu1  ;;  %v10158_v37 = vld [vmem:[%s13375_s20 + $0x53c] sm:$0xf0]  ;;  %v11492_v43 = vld [vmem:[%s13375_s20 + $0x284] sm:$0xf] }
 0x2c4   : > { %v3235_v8 = vadd.f32 %v3234_v63, %v13875_v41  ;;  %v9545_v63 = vor.u32 %v11425_v62, %v9544_v46 }
 0x2c6   : > { %3525 = vmatmul.bf16.gmra.mxu3 %v13763_v27  ;;  %v10161_v27 = vor.u32 %v11577_v16, %v10158_v37 }
 0x2c7   : > { %v1778_v31 = vpop.f32.mrf.mxu0  ;;  %3698 = vmatpush.bf16.msrb.mxu3 %v9545_v63  ;;  %v10138_v63 = vld [vmem:[%s13375_s20 + $0x514] sm:$0xf0] }
 0x2c8   : > { %v1779_v39 = vadd.f32 %v1778_v31, %v13861_v18  ;;  %v9818_v31 = vld [vmem:[%s13375_s20 + $0x294] sm:$0xf0]  ;;  %3650 = vmatpush.bf16.msrb.mxu2 %v10161_v27 }
 0x2c9   : > { %v3330_v57 = vpop.f32.mrf.mxu3 }
 0x2ca   : > { %v13985_v1 = vadd.f32 %v3330_v57, %v3282_v38  ;;  %v1850_v25 = vmax.f32 %v1779_v39, 0.0  ;;  %v3283_v14 = vpop.f32.mrf.mxu2  ;;  %v9821_v38 = vor.u32 %v11492_v43, %v9818_v31  ;;  %v11532_v39 = vld [vmem:[%s13375_s20 + $0x3c4] sm:$0xf]  ;;  %v9978_v57 = vld [vmem:[%s13375_s20 + $0x3d4] sm:$0xf0] }
 0x2cb   : > { %v3284_v15 = vadd.f32 %v3283_v14, %v3235_v8  ;;  %v3237_v21 = vpop.f32.mrf.mxu1 }
 0x2cc   : > { %v13987_v22 = vpack.c.bf16 %v1850_v25, %v1845_v10  ;;  %3553 = vmatpush.bf16.msrb.mxu0 %v9821_v38  ;;  %v9981_v10 = vor.u32 %v11532_v39, %v9978_v57  ;;  %v3238_v25 = vadd.f32 %v3237_v21, %v13875_v41  ;;  %v11572_v38 = vld [vmem:[%s13375_s20 + $0x504] sm:$0xf] }
 0x2ce   : > { %16696 = vst [vmem:[#allocation73_spill] sm:$0xff] %v13987_v22  ;;  %3432 = vmatmul.bf16.gmra.mxu1 %v13987_v22 }
 0x2cf   : > { %3481 = vmatmul.bf16.gmra.mxu2 %v13787_v26  ;;  %v1781_v4 = vpop.f32.mrf.mxu0  ;;  %3602 = vmatpush.bf16.msrb.mxu1 %v9981_v10  ;;  %v10141_v10 = vor.u32 %v11572_v38, %v10138_v63  ;;  %v9964_v38 = vld [vmem:[%s13375_s20 + $0x3a0] sm:$0xf]  ;;  %v9504_v63 = vld [vmem:[%s13375_s20 + $0x8] sm:$0xf] }
 0x2d0   : > { %v1782_v27 = vadd.f32 %v1781_v4, %v13861_v18 }
 0x2d1   : > { %v3332_v8 = vpop.f32.mrf.mxu3  ;;  %3651 = vmatpush.bf16.msrb.mxu2 %v10141_v10  ;;  %v9505_v10 = vor.u32 %v11415_v20, %v9504_v63 }
 0x2d2   : > { %v14000_v14 = vadd.f32 %v3332_v8, %v3284_v15  ;;  %v3286_v16 = vpop.f32.mrf.mxu2  ;;  %3388 = vmatmul.bf16.gmra.mxu0 %v13847_v55  ;;  %v1855_v39 = vmax.f32 %v1782_v27, 0.0  ;;  %v11490_v27 = vld [vmem:[%s13375_s20 + $0x270] sm:$0xf0] }
 0x2d3   : > { %v3287_v62 = vadd.f32 %v3286_v16, %v3238_v25  ;;  %v3239_v46 = vpop.f32.mrf.mxu1  ;;  %v9524_v16 = vld [vmem:[%s13375_s20 + $0x30] sm:$0xf] }
 0x2d4   : > { %v3240_v15 = vadd.f32 %v3239_v46, %v13875_v41  ;;  %v9804_v46 = vld [vmem:[%s13375_s20 + $0x260] sm:$0xf] }
 0x2d6   : > { %3530 = vmatmul.bf16.gmra.mxu3 %v13791_v32 }
 0x2d7   : > { %v1783_v37 = vpop.f32.mrf.mxu0 }
 0x2d8   : > { %v1784_v43 = vadd.f32 %v1783_v37, %v13861_v18  ;;  %v11420_v37 = vld [vmem:[%s13375_s20 + $0x40] sm:$0xf0] }
 0x2d9   : > { %v3335_v21 = vpop.f32.mrf.mxu3 }
 0x2da   : > { %v14007_v31 = vadd.f32 %v3335_v21, %v3287_v62  ;;  %v1860_v57 = vmax.f32 %v1784_v43, 0.0  ;;  %v3288_v8 = vpop.f32.mrf.mxu2  ;;  %v9525_v62 = vor.u32 %v11420_v37, %v9524_v16  ;;  %v9805_v21 = vor.u32 %v11490_v27, %v9804_v46 }
 0x2db   : > { %v3289_v25 = vadd.f32 %v3288_v8, %v3240_v15  ;;  %v3242_v4 = vpop.f32.mrf.mxu1  ;;  %v11530_v15 = vld [vmem:[%s13375_s20 + $0x3b0] sm:$0xf0] }
 0x2dc   : > { %v14013_v32 = vpack.c.bf16 %v1860_v57, %v1855_v39  ;;  %3699 = vmatpush.bf16.msrb.mxu3 %v9525_v62  ;;  %v9965_v13 = vor.u32 %v11530_v15, %v9964_v38  ;;  %v3243_v39 = vadd.f32 %v3242_v4, %v13875_v41  ;;  %3742 = vmatpush.bf16.msra.mxu0 %v9805_v21 }
 0x2de   : > { %16697 = vst [vmem:[#allocation74_spill] sm:$0xff] %v14013_v32  ;;  %3437 = vmatmul.bf16.gmra.mxu1 %v14013_v32 }
 0x2df   : > { %3486 = vmatmul.bf16.gmra.mxu2 %v13819_v47  ;;  %v1786_v43 = vpop.f32.mrf.mxu0  ;;  %3791 = vmatpush.bf16.msra.mxu1 %v9965_v13 }
 0x2e0   : > { %3700 = vmatpush.bf16.msrb.mxu3 %v9505_v10  ;;  %v1787_v46 = vadd.f32 %v1786_v43, %v13861_v18  ;;  %v11570_v10 = vld [vmem:[%s13375_s20 + $0x4f0] sm:$0xf0] }
 0x2e1   : > { %v3337_v8 = vpop.f32.mrf.mxu3 }
 0x2e2   : > { %v14024_v57 = vadd.f32 %v3337_v8, %v3289_v25  ;;  %v3291_v16 = vpop.f32.mrf.mxu2  ;;  %3393 = vmatmul.bf16.gmra.mxu0 %v13879_v50  ;;  %v1865_v13 = vmax.f32 %v1787_v46, 0.0  ;;  %v9944_v46 = vld [vmem:[%s13375_s20 + $0x378] sm:$0xf] }
 0x2e3   : > { %v3292_v37 = vadd.f32 %v3291_v16, %v3243_v39  ;;  %v3244_v62 = vpop.f32.mrf.mxu1  ;;  %v10124_v39 = vld [vmem:[%s13375_s20 + $0x4e0] sm:$0xf] }
 0x2e4   : > { %v3245_v20 = vadd.f32 %v3244_v62, %v13875_v41  ;;  %v10125_v16 = vor.u32 %v11570_v10, %v10124_v39 }
 0x2e6   : > { %3535 = vmatmul.bf16.gmra.mxu3 %v13825_v54  ;;  %3840 = vmatpush.bf16.msra.mxu2 %v10125_v16 }
 0x2e7   : > { %v1788_v27 = vpop.f32.mrf.mxu0 }
 0x2e8   : > { %v1789_v25 = vadd.f32 %v1788_v27, %v13861_v18  ;;  %v9784_v18 = vld [vmem:[%s13375_s20 + $0x238] sm:$0xf]  ;;  %v11485_v27 = vld [vmem:[%s13375_s20 + $0x248] sm:$0xf0] }
 0x2e9   : > { %v3340_v4 = vpop.f32.mrf.mxu3  ;;  %v9785_v62 = vor.u32 %v11485_v27, %v9784_v18 }
 0x2ea   : > { %v14031_v21 = vadd.f32 %v3340_v4, %v3292_v37  ;;  %v1870_v38 = vmax.f32 %v1789_v25, 0.0  ;;  %v3293_v15 = vpop.f32.mrf.mxu2  ;;  %v11525_v25 = vld [vmem:[%s13375_s20 + $0x388] sm:$0xf0] }
 0x2eb   : > { %v3294_v63 = vadd.f32 %v3293_v15, %v3245_v20  ;;  %v3247_v8 = vpop.f32.mrf.mxu1  ;;  %v9945_v15 = vor.u32 %v11525_v25, %v9944_v46  ;;  %3743 = vmatpush.bf16.msra.mxu0 %v9785_v62  ;;  %v11565_v46 = vld [vmem:[%s13375_s20 + $0x4c8] sm:$0xf0] }
 0x2ec   : > { %v14035_v43 = vpack.c.bf16 %v1870_v38, %v1865_v13  ;;  %v3248_v54 = vadd.f32 %v3247_v8, %v13875_v41 }
 0x2ed   : > { %3792 = vmatpush.bf16.msra.mxu1 %v9945_v15  ;;  %v9764_v15 = vld [vmem:[%s13375_s20 + $0x210] sm:$0xf] }
 0x2ee   : > { %16698 = vst [vmem:[#allocation75_spill] sm:$0xff] %v14035_v43  ;;  %3442 = vmatmul.bf16.gmra.mxu1 %v14035_v43 }
 0x2ef   : > { %3491 = vmatmul.bf16.gmra.mxu2 %v13845_v53  ;;  %v3359_v37 = vpop.f32.mrf.mxu0 }
 0x2f0   : > { %v3360_v20 = vadd.f32 %v3359_v37, %v13897_v52 }
 0x2f1   : > { %v3342_v4 = vpop.f32.mrf.mxu3 }
 0x2f2   : > { %v14045_v13 = vadd.f32 %v3342_v4, %v3294_v63  ;;  %v3296_v38 = vpop.f32.mrf.mxu2  ;;  %3554 = vmatmul.bf16.vlgmr.msrb.gmra.mxu0 %v13663_v33 }
 0x2f3   : > { %v3297_v39 = vadd.f32 %v3296_v38, %v3248_v54  ;;  %v3249_v10 = vpop.f32.mrf.mxu1  ;;  %v10104_v54 = vld [vmem:[%s13375_s20 + $0x4b8] sm:$0xf] }
 0x2f4   : > { %v3250_v63 = vadd.f32 %v3249_v10, %v13875_v41  ;;  %v10105_v4 = vor.u32 %v11565_v46, %v10104_v54  ;;  %v11610_v10 = vld [vmem:[%s13375_s20 + $0x630] sm:$0xf0]  ;;  %v14068_v54 = vperm.slane %v13871_v23, 1 }
 0x2f6   : > { %3540 = vmatmul.bf16.gmra.mxu3 %v13852_v2  ;;  %3841 = vmatpush.bf16.msra.mxu2 %v10105_v4  ;;  %v11520_v2 = vld [vmem:[%s13375_s20 + $0x360] sm:$0xf0] }
 0x2f7   : > { %v3361_v16 = vpop.f32.mrf.mxu0 }
 0x2f8   : > { %v3362_v18 = vadd.f32 %v3361_v16, %v13912_v17  ;;  %v11480_v17 = vld [vmem:[%s13375_s20 + $0x220] sm:$0xf0]  ;;  %v9924_v16 = vld [vmem:[%s13375_s20 + $0x350] sm:$0xf] }
 0x2f9   : > { %v3345_v52 = vpop.f32.mrf.mxu3  ;;  %v9765_v38 = vor.u32 %v11480_v17, %v9764_v15 }
 0x2fa   : > { %v14051_v8 = vadd.f32 %v3345_v52, %v3297_v39  ;;  %v3298_v27 = vpop.f32.mrf.mxu2  ;;  %v10284_v39 = vld [vmem:[%s13375_s20 + $0x620] sm:$0xf] }
 0x2fb   : > { %v3299_v37 = vadd.f32 %v3298_v27, %v3250_v63  ;;  %v3408_v62 = vpop.f32.mrf.mxu1  ;;  %v10285_v27 = vor.u32 %v11610_v10, %v10284_v39  ;;  %3744 = vmatpush.bf16.msra.mxu0 %v9765_v38  ;;  %v10084_v10 = vld [vmem:[%s13375_s20 + $0x490] sm:$0xf] }
 0x2fc   : > { %v3409_v25 = vadd.f32 %v3408_v62, %v3360_v20  ;;  %v9925_v20 = vor.u32 %v11520_v2, %v9924_v16 }
 0x2fd   : > { %3889 = vmatpush.bf16.msra.mxu3 %v10285_v27  ;;  %v9744_v27 = vld [vmem:[%s13375_s20 + $0x1e8] sm:$0xf] }
 0x2fe   : > { %3603 = vmatmul.bf16.vlgmr.msrb.gmra.mxu1 %v13677_v61 }
 0x2ff   : > { %3652 = vmatmul.bf16.vlgmr.msrb.gmra.mxu2 %v13877_v44  ;;  %v3364_v41 = vpop.f32.mrf.mxu0  ;;  %3793 = vmatpush.bf16.msra.mxu1 %v9925_v20  ;;  %v11475_v20 = vld [vmem:[%s13375_s20 + $0x1f8] sm:$0xf0] }
 0x300   : > { %v3365_v63 = vadd.f32 %v3364_v41, %v13919_v40  ;;  %v4428_v40 = vmax.f32 %v3409_v25, 0.0  ;;  %v11560_v25 = vld [vmem:[%s13375_s20 + $0x4a0] sm:$0xf0] }
 0x301   : > { %v3347_v52 = vpop.f32.mrf.mxu3 }
 0x302   : > { %v14064_v33 = vadd.f32 %v3347_v52, %v3299_v37  ;;  %v3457_v62 = vpop.f32.mrf.mxu2  ;;  %3559 = vmatmul.bf16.gmra.mxu0 %v13691_v19  ;;  %v10085_v52 = vor.u32 %v11560_v25, %v10084_v10 }
 0x303   : > { %v3410_v46 = vpop.f32.mrf.mxu1  ;;  %v3458_v2 = vadd.f32 %v3457_v62, %v14068_v54 }
 0x304   : > { %v3411_v4 = vadd.f32 %v3410_v46, %v3362_v18  ;;  %3842 = vmatpush.bf16.msra.mxu2 %v10085_v52  ;;  %v9745_v46 = vor.u32 %v11475_v20, %v9744_v27 }
 0x306   : > { %3701 = vmatmul.bf16.vlgmr.msrb.gmra.mxu3 %v13646_v11  ;;  %v4433_v37 = vmax.f32 %v3411_v4, 0.0  ;;  %v10264_v4 = vld [vmem:[%s13375_s20 + $0x5f8] sm:$0xf]  ;;  %3745 = vmatpush.bf16.msra.mxu0 %v9745_v46 }
 0x307   : > { %v3366_v15 = vpop.f32.mrf.mxu0 }
 0x308   : > { %v14072_v17 = vpack.c.bf16 %v4433_v37, %v4428_v40  ;;  %v3367_v41 = vadd.f32 %v3366_v15, %v13934_v24  ;;  %v11605_v40 = vld [vmem:[%s13375_s20 + $0x608] sm:$0xf0]  ;;  %v9904_v37 = vld [vmem:[%s13375_s20 + $0x328] sm:$0xf] }
 0x309   : > { %v3506_v38 = vpop.f32.mrf.mxu3 }
 0x30a   : > { %16699 = vst [vmem:[#allocation76_spill] sm:$0xff] %v14072_v17  ;;  %v14075_v23 = vadd.f32 %v3506_v38, %v3458_v2  ;;  %v3459_v39 = vpop.f32.mrf.mxu2  ;;  %v11515_v38 = vld [vmem:[%s13375_s20 + $0x338] sm:$0xf0]  ;;  %v16707_v17 = vld [vmem:[#allocation54_spill] sm:$0xff] }
 0x30b   : > { %v3413_v18 = vpop.f32.mrf.mxu1  ;;  %v3460_v24 = vadd.f32 %v3459_v39, %v14068_v54  ;;  %v9905_v10 = vor.u32 %v11515_v38, %v9904_v37 }
 0x30c   : > { %v3414_v16 = vadd.f32 %v3413_v18, %v3365_v63  ;;  %v10265_v63 = vor.u32 %v11605_v40, %v10264_v4 }
 0x30d   : > { %3794 = vmatpush.bf16.msra.mxu1 %v9905_v10  ;;  %v9724_v10 = vld [vmem:[%s13375_s20 + $0x1c0] sm:$0xf] }
 0x30e   : > { %3608 = vmatmul.bf16.gmra.mxu1 %v13705_v45  ;;  %3890 = vmatpush.bf16.msra.mxu3 %v10265_v63  ;;  %v4438_v27 = vmax.f32 %v3414_v16, 0.0  ;;  %v11555_v16 = vld [vmem:[%s13375_s20 + $0x478] sm:$0xf0] }
 0x30f   : > { %3657 = vmatmul.bf16.gmra.mxu2 %v13899_v51  ;;  %v3369_v62 = vpop.f32.mrf.mxu0 }
 0x310   : > { %v3370_v2 = vadd.f32 %v3369_v62, %v13941_v56 }
 0x311   : > { %v3508_v15 = vpop.f32.mrf.mxu3 }
 0x312   : > { %v14089_v18 = vadd.f32 %v3508_v15, %v3460_v24  ;;  %v3462_v25 = vpop.f32.mrf.mxu2  ;;  %3564 = vmatmul.bf16.gmra.mxu0 %v13719_v7  ;;  %v10064_v15 = vld [vmem:[%s13375_s20 + $0x468] sm:$0xf] }
 0x313   : > { %v3415_v39 = vpop.f32.mrf.mxu1  ;;  %v3463_v20 = vadd.f32 %v3462_v25, %v14068_v54  ;;  %v10065_v38 = vor.u32 %v11555_v16, %v10064_v15  ;;  %v11470_v25 = vld [vmem:[%s13375_s20 + $0x1d0] sm:$0xf0] }
 0x314   : > { %v3416_v52 = vadd.f32 %v3415_v39, %v3367_v41 }
 0x315   : > { %3843 = vmatpush.bf16.msra.mxu2 %v10065_v38 }
 0x316   : > { %3706 = vmatmul.bf16.gmra.mxu3 %v13675_v60  ;;  %v4443_v56 = vmax.f32 %v3416_v52, 0.0  ;;  %v9725_v52 = vor.u32 %v11470_v25, %v9724_v10 }
 0x317   : > { %v3371_v24 = vpop.f32.mrf.mxu0 }
 0x318   : > { %v14094_v62 = vpack.c.bf16 %v4443_v56, %v4438_v27  ;;  %v3372_v46 = vadd.f32 %v3371_v24, %v13956_v6  ;;  %v10244_v27 = vld [vmem:[%s13375_s20 + $0x5d0] sm:$0xf]  ;;  %v11600_v56 = vld [vmem:[%s13375_s20 + $0x5e0] sm:$0xf0]  ;;  %3746 = vmatpush.bf16.msra.mxu0 %v9725_v52 }
 0x319   : > { %v3511_v4 = vpop.f32.mrf.mxu3 }
 0x31a   : > { %16700 = vst [vmem:[#allocation77_spill] sm:$0xff] %v14094_v62  ;;  %v14097_v40 = vadd.f32 %v3511_v4, %v3463_v20  ;;  %v3464_v37 = vpop.f32.mrf.mxu2  ;;  %v9884_v20 = vld [vmem:[%s13375_s20 + $0x300] sm:$0xf] }
 0x31b   : > { %v3418_v41 = vpop.f32.mrf.mxu1  ;;  %v3465_v6 = vadd.f32 %v3464_v37, %v14068_v54 }
 0x31c   : > { %v3419_v63 = vadd.f32 %v3418_v41, %v3370_v2  ;;  %v10245_v2 = vor.u32 %v11600_v56, %v10244_v27  ;;  %v11510_v41 = vld [vmem:[%s13375_s20 + $0x310] sm:$0xf0] }
 0x31d   : > { %v9885_v16 = vor.u32 %v11510_v41, %v9884_v20 }
 0x31e   : > { %3613 = vmatmul.bf16.gmra.mxu1 %v13733_v36  ;;  %3891 = vmatpush.bf16.msra.mxu3 %v10245_v2  ;;  %v4448_v25 = vmax.f32 %v3419_v63, 0.0  ;;  %v10044_v2 = vld [vmem:[%s13375_s20 + $0x440] sm:$0xf]  ;;  %v11550_v63 = vld [vmem:[%s13375_s20 + $0x450] sm:$0xf0] }
 0x31f   : > { %3662 = vmatmul.bf16.gmra.mxu2 %v13921_v5  ;;  %v3374_v39 = vpop.f32.mrf.mxu0  ;;  %3795 = vmatpush.bf16.msra.mxu1 %v9885_v16  ;;  %v10045_v16 = vor.u32 %v11550_v63, %v10044_v2 }
 0x320   : > { %v3375_v24 = vadd.f32 %v3374_v39, %v13963_v42 }
 0x321   : > { %v3513_v4 = vpop.f32.mrf.mxu3  ;;  %3844 = vmatpush.bf16.msra.mxu2 %v10045_v16 }
 0x322   : > { %v14111_v15 = vadd.f32 %v3513_v4, %v3465_v6  ;;  %v3467_v38 = vpop.f32.mrf.mxu2  ;;  %3569 = vmatmul.bf16.gmra.mxu0 %v13747_v3 }
 0x323   : > { %v3420_v37 = vpop.f32.mrf.mxu1  ;;  %v3468_v6 = vadd.f32 %v3467_v38, %v14068_v54  ;;  %v9704_v38 = vld [vmem:[%s13375_s20 + $0x198] sm:$0xf] }
 0x324   : > { %v3421_v10 = vadd.f32 %v3420_v37, %v3372_v46  ;;  %v11465_v37 = vld [vmem:[%s13375_s20 + $0x1a8] sm:$0xf0] }
 0x326   : > { %3711 = vmatmul.bf16.gmra.mxu3 %v13703_v12  ;;  %v4453_v42 = vmax.f32 %v3421_v10, 0.0 }
 0x327   : > { %v3376_v39 = vpop.f32.mrf.mxu0 }
 0x328   : > { %v14116_v52 = vpack.c.bf16 %v4453_v42, %v4448_v25  ;;  %v3377_v27 = vadd.f32 %v3376_v39, %v13978_v34  ;;  %v9705_v25 = vor.u32 %v11465_v37, %v9704_v38  ;;  %v10224_v42 = vld [vmem:[%s13375_s20 + $0x5a8] sm:$0xf]  ;;  %v9864_v39 = vld [vmem:[%s13375_s20 + $0x2d8] sm:$0xf] }
 0x329   : > { %v3516_v56 = vpop.f32.mrf.mxu3 }
 0x32a   : > { %16701 = vst [vmem:[#allocation78_spill] sm:$0xff] %v14116_v52  ;;  %v14119_v20 = vadd.f32 %v3516_v56, %v3468_v6  ;;  %v3469_v4 = vpop.f32.mrf.mxu2  ;;  %v11595_v6 = vld [vmem:[%s13375_s20 + $0x5b8] sm:$0xf0]  ;;  %3747 = vmatpush.bf16.msra.mxu0 %v9705_v25 }
 0x32b   : > { %v3423_v46 = vpop.f32.mrf.mxu1  ;;  %v3470_v34 = vadd.f32 %v3469_v4, %v14068_v54 }
 0x32c   : > { %v3424_v41 = vadd.f32 %v3423_v46, %v3375_v24  ;;  %v10225_v24 = vor.u32 %v11595_v6, %v10224_v42  ;;  %v11505_v46 = vld [vmem:[%s13375_s20 + $0x2e8] sm:$0xf0] }
 0x32d   : > { %v9865_v63 = vor.u32 %v11505_v46, %v9864_v39 }
 0x32e   : > { %3618 = vmatmul.bf16.gmra.mxu1 %v13761_v30  ;;  %3892 = vmatpush.bf16.msra.mxu3 %v10225_v24  ;;  %v4458_v37 = vmax.f32 %v3424_v41, 0.0  ;;  %v10024_v24 = vld [vmem:[%s13375_s20 + $0x418] sm:$0xf]  ;;  %v11545_v41 = vld [vmem:[%s13375_s20 + $0x428] sm:$0xf0] }
 0x32f   : > { %3667 = vmatmul.bf16.gmra.mxu2 %v13943_v9  ;;  %v3379_v10 = vpop.f32.mrf.mxu0  ;;  %3796 = vmatpush.bf16.msra.mxu1 %v9865_v63  ;;  %v10025_v63 = vor.u32 %v11545_v41, %v10024_v24 }
 0x330   : > { %v3380_v56 = vadd.f32 %v3379_v10, %v13985_v1 }
 0x331   : > { %v3518_v52 = vpop.f32.mrf.mxu3  ;;  %3845 = vmatpush.bf16.msra.mxu2 %v10025_v63 }
 0x332   : > { %v14133_v2 = vadd.f32 %v3518_v52, %v3470_v34  ;;  %v3472_v16 = vpop.f32.mrf.mxu2  ;;  %3574 = vmatmul.bf16.gmra.mxu0 %v13775_v0 }
 0x333   : > { %v3425_v4 = vpop.f32.mrf.mxu1  ;;  %v3473_v52 = vadd.f32 %v3472_v16, %v14068_v54  ;;  %v9684_v16 = vld [vmem:[%s13375_s20 + $0x170] sm:$0xf] }
 0x334   : > { %v3426_v38 = vadd.f32 %v3425_v4, %v3377_v27  ;;  %v11460_v4 = vld [vmem:[%s13375_s20 + $0x180] sm:$0xf0] }
 0x336   : > { %3716 = vmatmul.bf16.gmra.mxu3 %v13731_v35  ;;  %v4463_v1 = vmax.f32 %v3426_v38, 0.0 }
 0x337   : > { %v3381_v34 = vpop.f32.mrf.mxu0 }
 0x338   : > { %v14138_v10 = vpack.c.bf16 %v4463_v1, %v4458_v37  ;;  %v3382_v25 = vadd.f32 %v3381_v34, %v14000_v14  ;;  %v9685_v37 = vor.u32 %v11460_v4, %v9684_v16  ;;  %v10204_v1 = vld [vmem:[%s13375_s20 + $0x580] sm:$0xf]  ;;  %v9844_v34 = vld [vmem:[%s13375_s20 + $0x2b0] sm:$0xf] }
 0x339   : > { %v3521_v42 = vpop.f32.mrf.mxu3 }
 0x33a   : > { %16702 = vst [vmem:[#allocation79_spill] sm:$0xff] %v14138_v10  ;;  %v14141_v6 = vadd.f32 %v3521_v42, %v3473_v52  ;;  %v3474_v39 = vpop.f32.mrf.mxu2  ;;  %v11590_v52 = vld [vmem:[%s13375_s20 + $0x590] sm:$0xf0]  ;;  %3748 = vmatpush.bf16.msra.mxu0 %v9685_v37 }
 0x33b   : > { %v3428_v27 = vpop.f32.mrf.mxu1  ;;  %v3475_v14 = vadd.f32 %v3474_v39, %v14068_v54 }
 0x33c   : > { %v3429_v46 = vadd.f32 %v3428_v27, %v3380_v56  ;;  %v10205_v56 = vor.u32 %v11590_v52, %v10204_v1  ;;  %v11500_v27 = vld [vmem:[%s13375_s20 + $0x2c0] sm:$0xf0] }
 0x33d   : > { %v9845_v41 = vor.u32 %v11500_v27, %v9844_v34  ;;  %v11540_v27 = vld [vmem:[%s13375_s20 + $0x400] sm:$0xf0] }
 0x33e   : > { %3623 = vmatmul.bf16.gmra.mxu1 %v13789_v28  ;;  %3893 = vmatpush.bf16.msra.mxu3 %v10205_v56  ;;  %v10004_v56 = vld [vmem:[%s13375_s20 + $0x3f0] sm:$0xf] }
 0x33f   : > { %3672 = vmatmul.bf16.gmra.mxu2 %v13965_v59  ;;  %v3384_v38 = vpop.f32.mrf.mxu0  ;;  %3797 = vmatpush.bf16.msra.mxu1 %v9845_v41  ;;  %v10005_v41 = vor.u32 %v11540_v27, %v10004_v56 }
 0x340   : > { %v3385_v42 = vadd.f32 %v3384_v38, %v14007_v31  ;;  %v4468_v31 = vmax.f32 %v3429_v46, 0.0 }
 0x341   : > { %v3523_v10 = vpop.f32.mrf.mxu3  ;;  %3846 = vmatpush.bf16.msra.mxu2 %v10005_v41 }
 0x342   : > { %v14155_v24 = vadd.f32 %v3523_v10, %v3475_v14  ;;  %v3477_v63 = vpop.f32.mrf.mxu2  ;;  %3579 = vmatmul.bf16.gmra.mxu0 %v13803_v48 }
 0x343   : > { %v3430_v39 = vpop.f32.mrf.mxu1  ;;  %v3478_v10 = vadd.f32 %v3477_v63, %v14068_v54  ;;  %v11455_v63 = vld [vmem:[%s13375_s20 + $0x158] sm:$0xf0] }
 0x344   : > { %v3431_v16 = vadd.f32 %v3430_v39, %v3382_v25  ;;  %v9664_v39 = vld [vmem:[%s13375_s20 + $0x148] sm:$0xf] }
 0x346   : > { %3721 = vmatmul.bf16.gmra.mxu3 %v13759_v29  ;;  %v4473_v4 = vmax.f32 %v3431_v16, 0.0  ;;  %v9665_v16 = vor.u32 %v11455_v63, %v9664_v39 }
 0x347   : > { %v3386_v14 = vpop.f32.mrf.mxu0 }
 0x348   : > { %v14160_v38 = vpack.c.bf16 %v4473_v4, %v4468_v31  ;;  %v3387_v37 = vadd.f32 %v3386_v14, %v14024_v57  ;;  %v10184_v31 = vld [vmem:[%s13375_s20 + $0x558] sm:$0xf]  ;;  %v11585_v4 = vld [vmem:[%s13375_s20 + $0x568] sm:$0xf0]  ;;  %3749 = vmatpush.bf16.msra.mxu0 %v9665_v16 }
 0x349   : > { %v3526_v1 = vpop.f32.mrf.mxu3  ;;  %v10185_v14 = vor.u32 %v11585_v4, %v10184_v31 }
 0x34a   : > { %16703 = vst [vmem:[#allocation80_spill] sm:$0xff] %v14160_v38  ;;  %v14163_v52 = vadd.f32 %v3526_v1, %v3478_v10  ;;  %v3479_v34 = vpop.f32.mrf.mxu2  ;;  %v9824_v1 = vld [vmem:[%s13375_s20 + $0x288] sm:$0xf]  ;;  %v11495_v38 = vld [vmem:[%s13375_s20 + $0x298] sm:$0xf0] }
 0x34b   : > { %v3433_v25 = vpop.f32.mrf.mxu1  ;;  %v3480_v57 = vadd.f32 %v3479_v34, %v14068_v54  ;;  %3894 = vmatpush.bf16.msra.mxu3 %v10185_v14  ;;  %v11535_v14 = vld [vmem:[%s13375_s20 + $0x3d8] sm:$0xf0] }
 0x34c   : > { %v3434_v46 = vadd.f32 %v3433_v25, %v3385_v42  ;;  %v9825_v25 = vor.u32 %v11495_v38, %v9824_v1 }
 0x34e   : > { %3628 = vmatmul.bf16.gmra.mxu1 %v13821_v49  ;;  %v4478_v39 = vmax.f32 %v3434_v46, 0.0  ;;  %v10164_v46 = vld [vmem:[%s13375_s20 + $0x530] sm:$0xf] }
 0x34f   : > { %3677 = vmatmul.bf16.gmra.mxu2 %v13987_v22  ;;  %v3389_v10 = vpop.f32.mrf.mxu0  ;;  %3798 = vmatpush.bf16.msra.mxu1 %v9825_v25  ;;  %v11580_v25 = vld [vmem:[%s13375_s20 + $0x540] sm:$0xf0] }
 0x350   : > { %v3390_v62 = vadd.f32 %v3389_v10, %v14031_v21  ;;  %v9984_v10 = vld [vmem:[%s13375_s20 + $0x3c8] sm:$0xf] }
 0x351   : > { %v3528_v42 = vpop.f32.mrf.mxu3  ;;  %v9985_v1 = vor.u32 %v11535_v14, %v9984_v10  ;;  %v10144_v10 = vld [vmem:[%s13375_s20 + $0x508] sm:$0xf] }
 0x352   : > { %v14177_v56 = vadd.f32 %v3528_v42, %v3480_v57  ;;  %v3482_v27 = vpop.f32.mrf.mxu2  ;;  %3584 = vmatmul.bf16.gmra.mxu0 %v13835_v58 }
 0x353   : > { %v3435_v34 = vpop.f32.mrf.mxu1  ;;  %v3483_v63 = vadd.f32 %v3482_v27, %v14068_v54  ;;  %3847 = vmatpush.bf16.msra.mxu2 %v9985_v1 }
 0x354   : > { %v3436_v41 = vadd.f32 %v3435_v34, %v3387_v37  ;;  %v10165_v34 = vor.u32 %v11580_v25, %v10164_v46 }
 0x356   : > { %3726 = vmatmul.bf16.gmra.mxu3 %v13787_v26  ;;  %v4483_v21 = vmax.f32 %v3436_v41, 0.0  ;;  %v11448_v41 = vld [vmem:[%s13375_s20 + $0x124] sm:$0xf] }
 0x357   : > { %v3391_v38 = vpop.f32.mrf.mxu0  ;;  %3895 = vmatpush.bf16.msra.mxu3 %v10165_v34 }
 0x358   : > { %v14182_v16 = vpack.c.bf16 %v4483_v21, %v4478_v39  ;;  %v3392_v31 = vadd.f32 %v3391_v38, %v14045_v13  ;;  %v9646_v39 = vld [vmem:[%s13375_s20 + $0x134] sm:$0xf0]  ;;  %v11488_v38 = vld [vmem:[%s13375_s20 + $0x264] sm:$0xf] }
 0x359   : > { %v3531_v4 = vpop.f32.mrf.mxu3  ;;  %v9649_v13 = vor.u32 %v11448_v41, %v9646_v39  ;;  %v16705_v39 = vld [vmem:[#allocation68_spill] sm:$0xff] }
 0x35a   : > { %16704 = vst [vmem:[#allocation81_spill] sm:$0xff] %v14182_v16  ;;  %v14185_v57 = vadd.f32 %v3531_v4, %v3483_v63  ;;  %v3484_v37 = vpop.f32.mrf.mxu2  ;;  %v9806_v4 = vld [vmem:[%s13375_s20 + $0x274] sm:$0xf0] }
 0x35b   : > { %v3438_v42 = vpop.f32.mrf.mxu1  ;;  %v3485_v21 = vadd.f32 %v3484_v37, %v14068_v54  ;;  %3938 = vmatpush.bf16.msrb.mxu0 %v9649_v13  ;;  %v9809_v1 = vor.u32 %v11488_v38, %v9806_v4 }
 0x35c   : > { %v3439_v27 = vadd.f32 %v3438_v42, %v3390_v62  ;;  %v11575_v42 = vld [vmem:[%s13375_s20 + $0x518] sm:$0xf0] }
 0x35d   : > { %v10145_v25 = vor.u32 %v11575_v42, %v10144_v10  ;;  %3987 = vmatpush.bf16.msrb.mxu1 %v9809_v1 }
 0x35e   : > { %3633 = vmatmul.bf16.gmra.mxu1 %v13847_v55  ;;  %v4488_v13 = vmax.f32 %v3439_v27, 0.0 }
 0x35f   : > { %3682 = vmatmul.bf16.gmra.mxu2 %v14013_v32  ;;  %v3394_v63 = vpop.f32.mrf.mxu0  ;;  %3896 = vmatpush.bf16.msra.mxu3 %v10145_v25  ;;  %v9966_v25 = vld [vmem:[%s13375_s20 + $0x3b4] sm:$0xf0] }
 0x360   : > { %v3395_v62 = vadd.f32 %v3394_v63, %v14051_v8 }
 0x361   : > { %v3533_v14 = vpop.f32.mrf.mxu3 }
 0x362   : > { %v14201_v46 = vadd.f32 %v3533_v14, %v3485_v21  ;;  %v3487_v41 = vpop.f32.mrf.mxu2  ;;  %3589 = vmatmul.bf16.gmra.mxu0 %v16705_v39 }
 0x363   : > { %v3440_v37 = vpop.f32.mrf.mxu1  ;;  %v3488_v8 = vadd.f32 %v3487_v41, %v14068_v54  ;;  %v11443_v41 = vld [vmem:[%s13375_s20 + $0xfc] sm:$0xf] }
 0x364   : > { %v3441_v34 = vadd.f32 %v3440_v37, %v3392_v31 }
 0x366   : > { %3731 = vmatmul.bf16.gmra.mxu3 %v13819_v47  ;;  %v4493_v16 = vmax.f32 %v3441_v34, 0.0 }
 0x367   : > { %v3396_v63 = vpop.f32.mrf.mxu0 }
 0x368   : > { %v14206_v21 = vpack.c.bf16 %v4493_v16, %v4488_v13  ;;  %v3397_v38 = vadd.f32 %v3396_v63, %v14064_v33  ;;  %v11528_v16 = vld [vmem:[%s13375_s20 + $0x3a4] sm:$0xf]  ;;  %v9626_v13 = vld [vmem:[%s13375_s20 + $0x10c] sm:$0xf0] }
 0x369   : > { %v3536_v4 = vpop.f32.mrf.mxu3  ;;  %v9969_v34 = vor.u32 %v11528_v16, %v9966_v25  ;;  %v9786_v63 = vld [vmem:[%s13375_s20 + $0x24c] sm:$0xf0] }
 0x36a   : > { %16706 = vst [vmem:[#allocation68_spill] sm:$0xff] %v14206_v21  ;;  %v14209_v10 = vadd.f32 %v3536_v4, %v3488_v8  ;;  %v3489_v31 = vpop.f32.mrf.mxu2  ;;  %v11483_v8 = vld [vmem:[%s13375_s20 + $0x23c] sm:$0xf] }
 0x36b   : > { %v3443_v14 = vpop.f32.mrf.mxu1  ;;  %v3490_v27 = vadd.f32 %v3489_v31, %v14068_v54  ;;  %4036 = vmatpush.bf16.msrb.mxu2 %v9969_v34 }
 0x36c   : > { %v3444_v1 = vadd.f32 %v3443_v14, %v3395_v62  ;;  %v9629_v62 = vor.u32 %v11443_v41, %v9626_v13  ;;  %v9789_v14 = vor.u32 %v11483_v8, %v9786_v63  ;;  %v11523_v63 = vld [vmem:[%s13375_s20 + $0x37c] sm:$0xf] }
 0x36e   : > { %3638 = vmatmul.bf16.gmra.mxu1 %v13879_v50  ;;  %3939 = vmatpush.bf16.msrb.mxu0 %v9629_v62  ;;  %v9946_v62 = vld [vmem:[%s13375_s20 + $0x38c] sm:$0xf0] }
 0x36f   : > { %3687 = vmatmul.bf16.gmra.mxu2 %v14035_v43  ;;  %v3555_v42 = vpop.f32.mrf.mxu0  ;;  %3988 = vmatpush.bf16.msrb.mxu1 %v9789_v14  ;;  %v11438_v14 = vld [vmem:[%s13375_s20 + $0xd4] sm:$0xf] }
 0x370   : > { %v3556_v37 = vadd.f32 %v3555_v42, %v14075_v23  ;;  %v4498_v23 = vmax.f32 %v3444_v1, 0.0  ;;  %v16709_v1 = vld [vmem:[#allocation55_spill] sm:$0xff] }
 0x371   : > { %v3538_v33 = vpop.f32.mrf.mxu3 }
 0x372   : > { %v14221_v4 = vadd.f32 %v3538_v33, %v3490_v27  ;;  %v3492_v21 = vpop.f32.mrf.mxu2  ;;  %3750 = vmatmul.bf16.vlgmr.msra.gmra.mxu0 %v16707_v17 }
 0x373   : > { %v3445_v31 = vpop.f32.mrf.mxu1  ;;  %v3493_v27 = vadd.f32 %v3492_v21, %v14068_v54 }
 0x374   : > { %v3446_v47 = vadd.f32 %v3445_v31, %v3397_v38 }
 0x376   : > { %3736 = vmatmul.bf16.gmra.mxu3 %v13845_v53  ;;  %v4503_v42 = vmax.f32 %v3446_v47, 0.0  ;;  %v16710_v53 = vld [vmem:[#allocation56_spill] sm:$0xff] }
 0x377   : > { %v3557_v16 = vpop.f32.mrf.mxu0 }
 0x378   : > { %v14226_v25 = vpack.c.bf16 %v4503_v42, %v4498_v23  ;;  %v3558_v33 = vadd.f32 %v3557_v16, %v14089_v18  ;;  %v9949_v23 = vor.u32 %v11523_v63, %v9946_v62  ;;  %v9606_v42 = vld [vmem:[%s13375_s20 + $0xe4] sm:$0xf0]  ;;  %v10126_v16 = vld [vmem:[%s13375_s20 + $0x4f4] sm:$0xf0] }
 0x379   : > { %v3541_v41 = vpop.f32.mrf.mxu3 }
 0x37a   : > { %16708 = vst [vmem:[#allocation54_spill] sm:$0xff] %v14226_v25  ;;  %v14229_v34 = vadd.f32 %v3541_v41, %v3493_v27  ;;  %v3494_v38 = vpop.f32.mrf.mxu2  ;;  %v11568_v27 = vld [vmem:[%s13375_s20 + $0x4e4] sm:$0xf]  ;;  %v9609_v41 = vor.u32 %v11438_v14, %v9606_v42  ;;  %v11478_v25 = vld [vmem:[%s13375_s20 + $0x214] sm:$0xf]  ;;  %4037 = vmatpush.bf16.msrb.mxu2 %v9949_v23 }
 0x37b   : > { %v3604_v13 = vpop.f32.mrf.mxu1  ;;  %v3495_v47 = vadd.f32 %v3494_v38, %v14068_v54  ;;  %v9766_v54 = vld [vmem:[%s13375_s20 + $0x224] sm:$0xf0]  ;;  %v11433_v42 = vld [vmem:[%s13375_s20 + $0xac] sm:$0xf] }
 0x37c   : > { %v3605_v8 = vadd.f32 %v3604_v13, %v3556_v37  ;;  %v10129_v13 = vor.u32 %v11568_v27, %v10126_v16  ;;  %v9769_v26 = vor.u32 %v11478_v25, %v9766_v54  ;;  %3940 = vmatpush.bf16.msrb.mxu0 %v9609_v41  ;;  %v9926_v23 = vld [vmem:[%s13375_s20 + $0x364] sm:$0xf0] }
 0x37e   : > { %3799 = vmatmul.bf16.vlgmr.msra.gmra.mxu1 %v16709_v1  ;;  %4085 = vmatpush.bf16.msrb.mxu3 %v10129_v13  ;;  %v10106_v13 = vld [vmem:[%s13375_s20 + $0x4cc] sm:$0xf0] }
 0x37f   : > { %3848 = vmatmul.bf16.vlgmr.msra.gmra.mxu2 %v13677_v61  ;;  %v3560_v21 = vpop.f32.mrf.mxu0  ;;  %3989 = vmatpush.bf16.msrb.mxu1 %v9769_v26 }
 0x380   : > { %v3561_v31 = vadd.f32 %v3560_v21, %v14097_v40 }
 0x381   : > { %v3543_v18 = vpop.f32.mrf.mxu3 }
 0x382   : > { %v14241_v37 = vadd.f32 %v3543_v18, %v3495_v47  ;;  %v3653_v38 = vpop.f32.mrf.mxu2  ;;  %3755 = vmatmul.bf16.gmra.mxu0 %v16710_v53 }
 0x383   : > { %v3654_v29 = vadd.f32 %v3653_v38, %v3605_v8  ;;  %v3606_v35 = vpop.f32.mrf.mxu1 }
 0x384   : > { %v3607_v40 = vadd.f32 %v3606_v35, %v3558_v33  ;;  %v11518_v33 = vld [vmem:[%s13375_s20 + $0x354] sm:$0xf] }
 0x385   : > { %v4429_v18 = vmax.f32 %v3654_v29, 0.0  ;;  %v9929_v41 = vor.u32 %v11518_v33, %v9926_v23  ;;  %v11563_v29 = vld [vmem:[%s13375_s20 + $0x4bc] sm:$0xf] }
 0x386   : > { %3897 = vmatmul.bf16.vlgmr.msra.gmra.mxu3 %v13877_v44  ;;  %v10109_v38 = vor.u32 %v11563_v29, %v10106_v13 }
 0x387   : > { %v3562_v47 = vpop.f32.mrf.mxu0  ;;  %4038 = vmatpush.bf16.msrb.mxu2 %v9929_v41 }
 0x388   : > { %v3563_v21 = vadd.f32 %v3562_v47, %v14111_v15  ;;  %v9746_v47 = vld [vmem:[%s13375_s20 + $0x1fc] sm:$0xf0]  ;;  %4086 = vmatpush.bf16.msrb.mxu3 %v10109_v38 }
 0x389   : > { %v14248_v63 = vpop.f32.mrf.mxu3  ;;  %v9906_v38 = vld [vmem:[%s13375_s20 + $0x33c] sm:$0xf0] }
 0x38a   : > { %v3655_v62 = vpop.f32.mrf.mxu2 }
 0x38b   : > { %v3656_v14 = vadd.f32 %v3655_v62, %v3607_v40  ;;  %v3609_v25 = vpop.f32.mrf.mxu1  ;;  %v11473_v40 = vld [vmem:[%s13375_s20 + $0x1ec] sm:$0xf] }
 0x38c   : > { %v3610_v8 = vadd.f32 %v3609_v25, %v3561_v31  ;;  %v9586_v31 = vld [vmem:[%s13375_s20 + $0xbc] sm:$0xf0]  ;;  %v9749_v25 = vor.u32 %v11473_v40, %v9746_v47  ;;  %v11428_v40 = vld [vmem:[%s13375_s20 + $0x84] sm:$0xf] }
 0x38d   : > { %v4434_v35 = vmax.f32 %v3656_v14, 0.0  ;;  %v9589_v54 = vor.u32 %v11433_v42, %v9586_v31  ;;  %v16712_v14 = vld [vmem:[#allocation57_spill] sm:$0xff] }
 0x38e   : > { %3804 = vmatmul.bf16.gmra.mxu1 %v13691_v19 }
 0x38f   : > { %v14251_v26 = vpack.c.bf16 %v4434_v35, %v4429_v18  ;;  %3853 = vmatmul.bf16.gmra.mxu2 %v13705_v45  ;;  %v3565_v15 = vpop.f32.mrf.mxu0  ;;  %3941 = vmatpush.bf16.msrb.mxu0 %v9589_v54  ;;  %v11513_v54 = vld [vmem:[%s13375_s20 + $0x32c] sm:$0xf] }
 0x390   : > { %v3566_v27 = vadd.f32 %v3565_v15, %v14119_v20  ;;  %3990 = vmatpush.bf16.msrb.mxu1 %v9749_v25  ;;  %v9909_v25 = vor.u32 %v11513_v54, %v9906_v38 }
 0x391   : > { %16711 = vst [vmem:[#allocation55_spill] sm:$0xff] %v14251_v26  ;;  %v14258_v16 = vpop.f32.mrf.mxu3 }
 0x392   : > { %v3658_v62 = vpop.f32.mrf.mxu2  ;;  %3760 = vmatmul.bf16.gmra.mxu0 %v16712_v14  ;;  %4039 = vmatpush.bf16.msrb.mxu2 %v9909_v25 }
 0x393   : > { %v3659_v18 = vadd.f32 %v3658_v62, %v3610_v8  ;;  %v3611_v35 = vpop.f32.mrf.mxu1 }
 0x394   : > { %v3612_v20 = vadd.f32 %v3611_v35, %v3563_v21  ;;  %v10086_v35 = vld [vmem:[%s13375_s20 + $0x4a4] sm:$0xf0] }
 0x395   : > { %v4439_v29 = vmax.f32 %v3659_v18, 0.0  ;;  %v11558_v18 = vld [vmem:[%s13375_s20 + $0x494] sm:$0xf] }
 0x396   : > { %3902 = vmatmul.bf16.gmra.mxu3 %v13899_v51 }
 0x397   : > { %v3567_v15 = vpop.f32.mrf.mxu0 }
 0x398   : > { %v3568_v33 = vadd.f32 %v3567_v15, %v14133_v2  ;;  %v10089_v15 = vor.u32 %v11558_v18, %v10086_v35  ;;  %v11508_v35 = vld [vmem:[%s13375_s20 + $0x304] sm:$0xf] }
 0x399   : > { %v14268_v23 = vpop.f32.mrf.mxu3 }
 0x39a   : > { %v3660_v42 = vpop.f32.mrf.mxu2  ;;  %4087 = vmatpush.bf16.msrb.mxu3 %v10089_v15  ;;  %v11423_v15 = vld [vmem:[%s13375_s20 + $0x5c] sm:$0xf] }
 0x39b   : > { %v3661_v41 = vadd.f32 %v3660_v42, %v3612_v20  ;;  %v3614_v8 = vpop.f32.mrf.mxu1  ;;  %v11468_v42 = vld [vmem:[%s13375_s20 + $0x1c4] sm:$0xf] }
 0x39c   : > { %v3615_v31 = vadd.f32 %v3614_v8, %v3566_v27  ;;  %v9566_v27 = vld [vmem:[%s13375_s20 + $0x94] sm:$0xf0] }
 0x39d   : > { %v4444_v21 = vmax.f32 %v3661_v41, 0.0  ;;  %v9569_v20 = vor.u32 %v11428_v40, %v9566_v27  ;;  %v9726_v41 = vld [vmem:[%s13375_s20 + $0x1d4] sm:$0xf0] }
 0x39e   : > { %3809 = vmatmul.bf16.gmra.mxu1 %v13719_v7 }
 0x39f   : > { %v14271_v13 = vpack.c.bf16 %v4444_v21, %v4439_v29  ;;  %3858 = vmatmul.bf16.gmra.mxu2 %v13733_v36  ;;  %v3570_v2 = vpop.f32.mrf.mxu0  ;;  %v16714_v29 = vld [vmem:[#allocation59_spill] sm:$0xff]  ;;  %v9729_v21 = vor.u32 %v11468_v42, %v9726_v41  ;;  %3942 = vmatpush.bf16.msrb.mxu0 %v9569_v20 }
 0x3a0   : > { %v3571_v47 = vadd.f32 %v3570_v2, %v14141_v6  ;;  %v9886_v20 = vld [vmem:[%s13375_s20 + $0x314] sm:$0xf0] }
 0x3a1   : > { %16713 = vst [vmem:[#allocation56_spill] sm:$0xff] %v14271_v13  ;;  %v14278_v62 = vpop.f32.mrf.mxu3  ;;  %3991 = vmatpush.bf16.msrb.mxu1 %v9729_v21  ;;  %v10066_v21 = vld [vmem:[%s13375_s20 + $0x47c] sm:$0xf0] }
 0x3a2   : > { %v3663_v8 = vpop.f32.mrf.mxu2  ;;  %3765 = vmatmul.bf16.gmra.mxu0 %v16714_v29 }
 0x3a3   : > { %v3664_v13 = vadd.f32 %v3663_v8, %v3615_v31  ;;  %v3616_v26 = vpop.f32.mrf.mxu1  ;;  %v9889_v8 = vor.u32 %v11508_v35, %v9886_v20 }
 0x3a4   : > { %v3617_v6 = vadd.f32 %v3616_v26, %v3568_v33 }
 0x3a5   : > { %v4449_v18 = vmax.f32 %v3664_v13, 0.0  ;;  %v11553_v13 = vld [vmem:[%s13375_s20 + $0x46c] sm:$0xf]  ;;  %4040 = vmatpush.bf16.msrb.mxu2 %v9889_v8 }
 0x3a6   : > { %3907 = vmatmul.bf16.gmra.mxu3 %v13921_v5 }
 0x3a7   : > { %v3572_v2 = vpop.f32.mrf.mxu0 }
 0x3a8   : > { %v3573_v54 = vadd.f32 %v3572_v2, %v14155_v24  ;;  %v10069_v2 = vor.u32 %v11553_v13, %v10066_v21  ;;  %v11503_v21 = vld [vmem:[%s13375_s20 + $0x2dc] sm:$0xf] }
 0x3a9   : > { %v14288_v38 = vpop.f32.mrf.mxu3 }
 0x3aa   : > { %v3665_v40 = vpop.f32.mrf.mxu2  ;;  %4088 = vmatpush.bf16.msrb.mxu3 %v10069_v2  ;;  %v11418_v2 = vld [vmem:[%s13375_s20 + $0x34] sm:$0xf] }
 0x3ab   : > { %v3666_v25 = vadd.f32 %v3665_v40, %v3617_v6  ;;  %v3619_v31 = vpop.f32.mrf.mxu1  ;;  %v11463_v40 = vld [vmem:[%s13375_s20 + $0x19c] sm:$0xf] }
 0x3ac   : > { %v3620_v27 = vadd.f32 %v3619_v31, %v3571_v47  ;;  %v9546_v47 = vld [vmem:[%s13375_s20 + $0x6c] sm:$0xf0] }
 0x3ad   : > { %v4454_v26 = vmax.f32 %v3666_v25, 0.0  ;;  %v9549_v6 = vor.u32 %v11423_v15, %v9546_v47  ;;  %v9706_v25 = vld [vmem:[%s13375_s20 + $0x1ac] sm:$0xf0] }
 0x3ae   : > { %3814 = vmatmul.bf16.gmra.mxu1 %v13747_v3 }
 0x3af   : > { %v14291_v33 = vpack.c.bf16 %v4454_v26, %v4449_v18  ;;  %3863 = vmatmul.bf16.gmra.mxu2 %v13761_v30  ;;  %v3575_v24 = vpop.f32.mrf.mxu0  ;;  %v16716_v18 = vld [vmem:[#allocation61_spill] sm:$0xff]  ;;  %v9709_v26 = vor.u32 %v11463_v40, %v9706_v25  ;;  %3943 = vmatpush.bf16.msrb.mxu0 %v9549_v6  ;;  %v9866_v6 = vld [vmem:[%s13375_s20 + $0x2ec] sm:$0xf0] }
 0x3b0   : > { %v3576_v42 = vadd.f32 %v3575_v24, %v14163_v52 }
 0x3b1   : > { %16715 = vst [vmem:[#allocation57_spill] sm:$0xff] %v14291_v33  ;;  %v14298_v41 = vpop.f32.mrf.mxu3  ;;  %3992 = vmatpush.bf16.msrb.mxu1 %v9709_v26  ;;  %v10046_v26 = vld [vmem:[%s13375_s20 + $0x454] sm:$0xf0] }
 0x3b2   : > { %v3668_v31 = vpop.f32.mrf.mxu2  ;;  %3770 = vmatmul.bf16.gmra.mxu0 %v16716_v18 }
 0x3b3   : > { %v3669_v33 = vadd.f32 %v3668_v31, %v3620_v27  ;;  %v3621_v5 = vpop.f32.mrf.mxu1  ;;  %v9869_v31 = vor.u32 %v11503_v21, %v9866_v6 }
 0x3b4   : > { %v3622_v52 = vadd.f32 %v3621_v5, %v3573_v54 }
 0x3b5   : > { %v4459_v13 = vmax.f32 %v3669_v33, 0.0  ;;  %v11548_v33 = vld [vmem:[%s13375_s20 + $0x444] sm:$0xf]  ;;  %4041 = vmatpush.bf16.msrb.mxu2 %v9869_v31 }
 0x3b6   : > { %3912 = vmatmul.bf16.gmra.mxu3 %v13943_v9 }
 0x3b7   : > { %v3577_v24 = vpop.f32.mrf.mxu0 }
 0x3b8   : > { %v3578_v35 = vadd.f32 %v3577_v24, %v14177_v56  ;;  %v10049_v24 = vor.u32 %v11548_v33, %v10046_v26 }
 0x3b9   : > { %v14308_v20 = vpop.f32.mrf.mxu3 }
 0x3ba   : > { %v3670_v15 = vpop.f32.mrf.mxu2  ;;  %4089 = vmatpush.bf16.msrb.mxu3 %v10049_v24 }
 0x3bb   : > { %v3671_v8 = vadd.f32 %v3670_v15, %v3622_v52  ;;  %v3624_v27 = vpop.f32.mrf.mxu1  ;;  %v11458_v15 = vld [vmem:[%s13375_s20 + $0x174] sm:$0xf] }
 0x3bc   : > { %v3625_v47 = vadd.f32 %v3624_v27, %v3576_v42  ;;  %v9526_v42 = vld [vmem:[%s13375_s20 + $0x44] sm:$0xf0] }
 0x3bd   : > { %v4464_v5 = vmax.f32 %v3671_v8, 0.0  ;;  %v9529_v52 = vor.u32 %v11418_v2, %v9526_v42  ;;  %v9686_v8 = vld [vmem:[%s13375_s20 + $0x184] sm:$0xf0] }
 0x3be   : > { %3819 = vmatmul.bf16.gmra.mxu1 %v13775_v0 }
 0x3bf   : > { %v14311_v54 = vpack.c.bf16 %v4464_v5, %v4459_v13  ;;  %3868 = vmatmul.bf16.gmra.mxu2 %v13789_v28  ;;  %v3580_v56 = vpop.f32.mrf.mxu0  ;;  %v16718_v13 = vld [vmem:[#allocation63_spill] sm:$0xff]  ;;  %v9689_v5 = vor.u32 %v11458_v15, %v9686_v8  ;;  %3944 = vmatpush.bf16.msrb.mxu0 %v9529_v52  ;;  %v9846_v8 = vld [vmem:[%s13375_s20 + $0x2c4] sm:$0xf0] }
 0x3c0   : > { %v3581_v40 = vadd.f32 %v3580_v56, %v14185_v57  ;;  %v11498_v15 = vld [vmem:[%s13375_s20 + $0x2b4] sm:$0xf] }
 0x3c1   : > { %16717 = vst [vmem:[#allocation59_spill] sm:$0xff] %v14311_v54  ;;  %v14318_v25 = vpop.f32.mrf.mxu3  ;;  %3993 = vmatpush.bf16.msrb.mxu1 %v9689_v5  ;;  %v9849_v5 = vor.u32 %v11498_v15, %v9846_v8  ;;  %v11493_v8 = vld [vmem:[%s13375_s20 + $0x28c] sm:$0xf] }
 0x3c2   : > { %v3673_v27 = vpop.f32.mrf.mxu2  ;;  %3775 = vmatmul.bf16.gmra.mxu0 %v16718_v13 }
 0x3c3   : > { %v3674_v54 = vadd.f32 %v3673_v27, %v3625_v47  ;;  %v3626_v9 = vpop.f32.mrf.mxu1  ;;  %v11543_v27 = vld [vmem:[%s13375_s20 + $0x41c] sm:$0xf]  ;;  %4042 = vmatpush.bf16.msrb.mxu2 %v9849_v5 }
 0x3c4   : > { %v3627_v57 = vadd.f32 %v3626_v9, %v3578_v35  ;;  %v11413_v9 = vld [vmem:[%s13375_s20 + $0xc] sm:$0xf]  ;;  %v9506_v35 = vld [vmem:[%s13375_s20 + $0x1c] sm:$0xf0] }
 0x3c5   : > { %v4469_v33 = vmax.f32 %v3674_v54, 0.0  ;;  %v9509_v52 = vor.u32 %v11413_v9, %v9506_v35 }
 0x3c6   : > { %3917 = vmatmul.bf16.gmra.mxu3 %v13965_v59  ;;  %v11531_v59 = vld [vmem:[%s13375_s20 + $0x3b8] sm:$0xf0] }
 0x3c7   : > { %v3582_v56 = vpop.f32.mrf.mxu0  ;;  %3945 = vmatpush.bf16.msrb.mxu0 %v9509_v52 }
 0x3c8   : > { %v3583_v21 = vadd.f32 %v3582_v56, %v14201_v46  ;;  %v11453_v56 = vld [vmem:[%s13375_s20 + $0x14c] sm:$0xf] }
 0x3c9   : > { %v14328_v6 = vpop.f32.mrf.mxu3 }
 0x3ca   : > { %v3675_v2 = vpop.f32.mrf.mxu2 }
 0x3cb   : > { %v3676_v31 = vadd.f32 %v3675_v2, %v3627_v57  ;;  %v3629_v47 = vpop.f32.mrf.mxu1  ;;  %v10026_v57 = vld [vmem:[%s13375_s20 + $0x42c] sm:$0xf0]  ;;  %v9666_v2 = vld [vmem:[%s13375_s20 + $0x15c] sm:$0xf0] }
 0x3cc   : > { %v3630_v42 = vadd.f32 %v3629_v47, %v3581_v40  ;;  %v9669_v47 = vor.u32 %v11453_v56, %v9666_v2  ;;  %v11538_v2 = vld [vmem:[%s13375_s20 + $0x3f4] sm:$0xf] }
 0x3cd   : > { %v4474_v26 = vmax.f32 %v3676_v31, 0.0  ;;  %v10029_v31 = vor.u32 %v11543_v27, %v10026_v57  ;;  %v9826_v27 = vld [vmem:[%s13375_s20 + $0x29c] sm:$0xf0] }
 0x3ce   : > { %3824 = vmatmul.bf16.gmra.mxu1 %v13803_v48  ;;  %v9829_v56 = vor.u32 %v11493_v8, %v9826_v27  ;;  %v10286_v8 = vld [vmem:[%s13375_s20 + $0x634] sm:$0xf0]  ;;  %v9652_v27 = vld [vmem:[%s13375_s20 + $0x128] sm:$0xf] }
 0x3cf   : > { %v14333_v24 = vpack.c.bf16 %v4474_v26, %v4469_v33  ;;  %3873 = vmatmul.bf16.gmra.mxu2 %v13821_v49  ;;  %v3585_v46 = vpop.f32.mrf.mxu0  ;;  %v16720_v26 = vld [vmem:[#allocation65_spill] sm:$0xff]  ;;  %4090 = vmatpush.bf16.msrb.mxu3 %v10029_v31 }
 0x3d0   : > { %v3586_v40 = vadd.f32 %v3585_v46, %v14209_v10  ;;  %3994 = vmatpush.bf16.msrb.mxu1 %v9669_v47  ;;  %v10006_v31 = vld [vmem:[%s13375_s20 + $0x404] sm:$0xf0]  ;;  %4043 = vmatpush.bf16.msrb.mxu2 %v9829_v56 }
 0x3d1   : > { %16719 = vst [vmem:[#allocation61_spill] sm:$0xff] %v14333_v24  ;;  %v14340_v54 = vpop.f32.mrf.mxu3 }
 0x3d2   : > { %v3678_v33 = vpop.f32.mrf.mxu2  ;;  %3780 = vmatmul.bf16.gmra.mxu0 %v16720_v26 }
 0x3d3   : > { %v3679_v9 = vadd.f32 %v3678_v33, %v3630_v42  ;;  %v3631_v35 = vpop.f32.mrf.mxu1 }
 0x3d4   : > { %v3632_v10 = vadd.f32 %v3631_v35, %v3583_v21  ;;  %v10009_v21 = vor.u32 %v11538_v2, %v10006_v31  ;;  %v11533_v2 = vld [vmem:[%s13375_s20 + $0x3cc] sm:$0xf] }
 0x3d6   : > { %3922 = vmatmul.bf16.gmra.mxu3 %v13987_v22 }
 0x3d7   : > { %v3587_v52 = vpop.f32.mrf.mxu0  ;;  %4091 = vmatpush.bf16.msrb.mxu3 %v10009_v21 }
 0x3d8   : > { %v3588_v46 = vadd.f32 %v3587_v52, %v14221_v4  ;;  %v4479_v4 = vmax.f32 %v3679_v9, 0.0  ;;  %v11608_v52 = vld [vmem:[%s13375_s20 + $0x624] sm:$0xf]  ;;  %v9986_v9 = vld [vmem:[%s13375_s20 + $0x3dc] sm:$0xf0] }
 0x3d9   : > { %v14348_v15 = vpop.f32.mrf.mxu3  ;;  %v10289_v56 = vor.u32 %v11608_v52, %v10286_v8  ;;  %v9989_v31 = vor.u32 %v11533_v2, %v9986_v9  ;;  %v9812_v9 = vld [vmem:[%s13375_s20 + $0x268] sm:$0xf] }
 0x3da   : > { %v3680_v57 = vpop.f32.mrf.mxu2 }
 0x3db   : > { %v3681_v5 = vadd.f32 %v3680_v57, %v3632_v10  ;;  %v3634_v42 = vpop.f32.mrf.mxu1  ;;  %4134 = vmatpush.bf16.msra.mxu0 %v10289_v56  ;;  %4092 = vmatpush.bf16.msrb.mxu3 %v9989_v31  ;;  %v11603_v31 = vld [vmem:[%s13375_s20 + $0x5fc] sm:$0xf] }
 0x3dc   : > { %v3635_v47 = vadd.f32 %v3634_v42, %v3586_v40  ;;  %v11451_v42 = vld [vmem:[%s13375_s20 + $0x138] sm:$0xf0] }
 0x3dd   : > { %v4484_v33 = vmax.f32 %v3681_v5, 0.0  ;;  %v9653_v5 = vor.u32 %v11451_v42, %v9652_v27  ;;  %v14373_v27 = vld [vmem:[%s13378_s27] sm:$0x1f] }
 0x3de   : > { %3829 = vmatmul.bf16.gmra.mxu1 %v13835_v58  ;;  %v14376_v42 = vperm.slane %v14373_v27, 2 }
 0x3df   : > { %v14355_v35 = vpack.c.bf16 %v4484_v33, %v4479_v4  ;;  %3878 = vmatmul.bf16.gmra.mxu2 %v13847_v55  ;;  %v3590_v10 = vpop.f32.mrf.mxu0  ;;  %v16722_v4 = vld [vmem:[#allocation67_spill] sm:$0xff]  ;;  %4183 = vmatpush.bf16.msra.mxu1 %v9653_v5 }
 0x3e0   : > { %v3591_v40 = vadd.f32 %v3590_v10, %v14229_v34  ;;  %v3708_v51 = vadd.f32 %v14268_v23, %v14376_v42  ;;  %v3710_v23 = vadd.f32 %v14278_v62, %v14376_v42  ;;  %v3713_v62 = vadd.f32 %v14288_v38, %v14376_v42 }
 0x3e1   : > { %16721 = vst [vmem:[#allocation63_spill] sm:$0xff] %v14355_v35  ;;  %v14362_v57 = vpop.f32.mrf.mxu3 }
 0x3e2   : > { %v3683_v21 = vpop.f32.mrf.mxu2  ;;  %3785 = vmatmul.bf16.gmra.mxu0 %v16722_v4 }
 0x3e3   : > { %v3684_v33 = vadd.f32 %v3683_v21, %v3635_v47  ;;  %v3636_v35 = vpop.f32.mrf.mxu1  ;;  %v10266_v21 = vld [vmem:[%s13375_s20 + $0x60c] sm:$0xf0] }
 0x3e4   : > { %v3637_v34 = vadd.f32 %v3636_v35, %v3588_v46  ;;  %v11491_v46 = vld [vmem:[%s13375_s20 + $0x278] sm:$0xf0] }
 0x3e5   : > { %v9813_v5 = vor.u32 %v11491_v46, %v9812_v9  ;;  %v4489_v24 = vmax.f32 %v3684_v33, 0.0 }
 0x3e6   : > { %3927 = vmatmul.bf16.gmra.mxu3 %v14013_v32  ;;  %v3703_v32 = vadd.f32 %v14248_v63, %v14376_v42 }
 0x3e7   : > { %v3592_v10 = vpop.f32.mrf.mxu0  ;;  %4232 = vmatpush.bf16.msra.mxu2 %v9813_v5  ;;  %v3705_v5 = vadd.f32 %v14258_v16, %v14376_v42 }
 0x3e8   : > { %v3593_v52 = vadd.f32 %v3592_v10, %v14241_v37  ;;  %v10269_v10 = vor.u32 %v11603_v31, %v10266_v21 }
 0x3e9   : > { %v14370_v8 = vpop.f32.mrf.mxu3 }
 0x3ea   : > { %v3685_v47 = vpop.f32.mrf.mxu2  ;;  %4135 = vmatpush.bf16.msra.mxu0 %v10269_v10 }
 0x3eb   : > { %v3686_v2 = vadd.f32 %v3685_v47, %v3637_v34  ;;  %v3639_v56 = vpop.f32.mrf.mxu1  ;;  %v9632_v47 = vld [vmem:[%s13375_s20 + $0x100] sm:$0xf] }
 0x3ec   : > { %v3640_v35 = vadd.f32 %v3639_v56, %v3591_v40  ;;  %v11446_v40 = vld [vmem:[%s13375_s20 + $0x110] sm:$0xf0] }
 0x3ed   : > { %v4494_v37 = vmax.f32 %v3686_v2, 0.0  ;;  %v9633_v33 = vor.u32 %v11446_v40, %v9632_v47  ;;  %v9792_v47 = vld [vmem:[%s13375_s20 + $0x240] sm:$0xf]  ;;  %v11486_v40 = vld [vmem:[%s13375_s20 + $0x250] sm:$0xf0] }
 0x3ee   : > { %3834 = vmatmul.bf16.gmra.mxu1 %v16705_v39 }
 0x3ef   : > { %v14385_v22 = vpack.c.bf16 %v4494_v37, %v4489_v24  ;;  %3883 = vmatmul.bf16.gmra.mxu2 %v13879_v50  ;;  %v3751_v34 = vpop.f32.mrf.mxu0  ;;  %4184 = vmatpush.bf16.msra.mxu1 %v9633_v33  ;;  %v9793_v33 = vor.u32 %v11486_v40, %v9792_v47 }
 0x3f0   : > { %v3752_v9 = vadd.f32 %v3751_v34, %v3703_v32 }
 0x3f1   : > { %16723 = vst [vmem:[#allocation65_spill] sm:$0xff] %v14385_v22  ;;  %v14390_v56 = vpop.f32.mrf.mxu3  ;;  %4233 = vmatpush.bf16.msra.mxu2 %v9793_v33 }
 0x3f2   : > { %v3688_v2 = vpop.f32.mrf.mxu2  ;;  %3946 = vmatmul.bf16.vlgmr.msrb.gmra.mxu0 %v13646_v11 }
 0x3f3   : > { %v3689_v63 = vadd.f32 %v3688_v2, %v3640_v35  ;;  %v3641_v24 = vpop.f32.mrf.mxu1  ;;  %v11598_v2 = vld [vmem:[%s13375_s20 + $0x5d4] sm:$0xf] }
 0x3f4   : > { %v3642_v46 = vadd.f32 %v3641_v24, %v3593_v52  ;;  %v10246_v52 = vld [vmem:[%s13375_s20 + $0x5e4] sm:$0xf0] }
 0x3f5   : > { %v9972_v24 = vld [vmem:[%s13375_s20 + $0x3a8] sm:$0xf]  ;;  %v4499_v22 = vmax.f32 %v3689_v63, 0.0  ;;  %v10249_v16 = vor.u32 %v11598_v2, %v10246_v52 }
 0x3f6   : > { %3932 = vmatmul.bf16.gmra.mxu3 %v14035_v43 }
 0x3f7   : > { %v3753_v31 = vpop.f32.mrf.mxu0  ;;  %4136 = vmatpush.bf16.msra.mxu0 %v10249_v16 }
 0x3f8   : > { %v3754_v21 = vadd.f32 %v3753_v31, %v3705_v5  ;;  %v9612_v31 = vld [vmem:[%s13375_s20 + $0xd8] sm:$0xf] }
 0x3f9   : > { %v14396_v32 = vpop.f32.mrf.mxu3 }
 0x3fa   : > { %v3690_v37 = vpop.f32.mrf.mxu2 }
 0x3fb   : > { %v3691_v10 = vadd.f32 %v3690_v37, %v3642_v46  ;;  %v3800_v34 = vpop.f32.mrf.mxu1  ;;  %v9973_v46 = vor.u32 %v11531_v59, %v9972_v24  ;;  %v11441_v37 = vld [vmem:[%s13375_s20 + $0xe8] sm:$0xf0] }
 0x3fc   : > { %v3801_v35 = vadd.f32 %v3800_v34, %v3752_v9 }
 0x3fd   : > { %v4504_v43 = vmax.f32 %v3691_v10, 0.0  ;;  %4281 = vmatpush.bf16.msra.mxu3 %v9973_v46  ;;  %v9613_v10 = vor.u32 %v11441_v37, %v9612_v31  ;;  %v9772_v46 = vld [vmem:[%s13375_s20 + $0x218] sm:$0xf]  ;;  %v11593_v31 = vld [vmem:[%s13375_s20 + $0x5ac] sm:$0xf] }
 0x3fe   : > { %3995 = vmatmul.bf16.vlgmr.msrb.gmra.mxu1 %v16707_v17  ;;  %v10226_v37 = vld [vmem:[%s13375_s20 + $0x5bc] sm:$0xf0] }
 0x3ff   : > { %v14407_v5 = vpack.c.bf16 %v4504_v43, %v4499_v22  ;;  %4044 = vmatmul.bf16.vlgmr.msrb.gmra.mxu2 %v16709_v1  ;;  %v3756_v9 = vpop.f32.mrf.mxu0  ;;  %4185 = vmatpush.bf16.msra.mxu1 %v9613_v10  ;;  %v9952_v10 = vld [vmem:[%s13375_s20 + $0x380] sm:$0xf] }
 0x400   : > { %v3757_v63 = vadd.f32 %v3756_v9, %v3708_v51 }
 0x401   : > { %16724 = vst [vmem:[#allocation67_spill] sm:$0xff] %v14407_v5  ;;  %v14412_v34 = vpop.f32.mrf.mxu3 }
 0x402   : > { %v3849_v47 = vpop.f32.mrf.mxu2  ;;  %3951 = vmatmul.bf16.gmra.mxu0 %v13675_v60 }
 0x403   : > { %v3850_v59 = vadd.f32 %v3849_v47, %v3801_v35  ;;  %v3802_v22 = vpop.f32.mrf.mxu1  ;;  %v11481_v35 = vld [vmem:[%s13375_s20 + $0x228] sm:$0xf0]  ;;  %v10229_v47 = vor.u32 %v11593_v31, %v10226_v37 }
 0x404   : > { %v3803_v43 = vadd.f32 %v3802_v22, %v3754_v21  ;;  %v9773_v21 = vor.u32 %v11481_v35, %v9772_v46  ;;  %v11526_v22 = vld [vmem:[%s13375_s20 + $0x390] sm:$0xf0] }
 0x405   : > { %4137 = vmatpush.bf16.msra.mxu0 %v10229_v47 }
 0x406   : > { %4093 = vmatmul.bf16.vlgmr.msrb.gmra.mxu3 %v13677_v61  ;;  %4234 = vmatpush.bf16.msra.mxu2 %v9773_v21 }
 0x407   : > { %v3758_v51 = vpop.f32.mrf.mxu0 }
 0x408   : > { %v3759_v40 = vadd.f32 %v3758_v51, %v3710_v23  ;;  %v9592_v23 = vld [vmem:[%s13375_s20 + $0xb0] sm:$0xf]  ;;  %v11436_v51 = vld [vmem:[%s13375_s20 + $0xc0] sm:$0xf0] }
 0x409   : > { %v3898_v33 = vpop.f32.mrf.mxu3 }
 0x40a   : > { %v3899_v2 = vadd.f32 %v3898_v33, %v3850_v59  ;;  %v3851_v52 = vpop.f32.mrf.mxu2  ;;  %v9953_v59 = vor.u32 %v11526_v22, %v9952_v10 }
 0x40b   : > { %v3852_v24 = vadd.f32 %v3851_v52, %v3803_v43  ;;  %v3805_v16 = vpop.f32.mrf.mxu1  ;;  %v9593_v52 = vor.u32 %v11436_v51, %v9592_v23  ;;  %v9752_v23 = vld [vmem:[%s13375_s20 + $0x1f0] sm:$0xf] }
 0x40c   : > { %v3806_v9 = vadd.f32 %v3805_v16, %v3757_v63  ;;  %4282 = vmatpush.bf16.msra.mxu3 %v9953_v59  ;;  %v4430_v38 = vmax.f32 %v3899_v2, 0.0 }
 0x40d   : > { %4186 = vmatpush.bf16.msra.mxu1 %v9593_v52  ;;  %v11588_v52 = vld [vmem:[%s13375_s20 + $0x584] sm:$0xf] }
 0x40e   : > { %4000 = vmatmul.bf16.gmra.mxu1 %v16710_v53 }
 0x40f   : > { %4049 = vmatmul.bf16.gmra.mxu2 %v13691_v19  ;;  %v3761_v43 = vpop.f32.mrf.mxu0 }
 0x410   : > { %v3762_v63 = vadd.f32 %v3761_v43, %v3713_v62 }
 0x411   : > { %v3900_v33 = vpop.f32.mrf.mxu3 }
 0x412   : > { %v3901_v16 = vadd.f32 %v3900_v33, %v3852_v24  ;;  %v3854_v46 = vpop.f32.mrf.mxu2  ;;  %3956 = vmatmul.bf16.gmra.mxu0 %v13703_v12  ;;  %v3715_v24 = vadd.f32 %v14298_v41, %v14376_v42  ;;  %v3718_v41 = vadd.f32 %v14308_v20, %v14376_v42 }
 0x413   : > { %v3855_v21 = vadd.f32 %v3854_v46, %v3806_v9  ;;  %v3807_v31 = vpop.f32.mrf.mxu1  ;;  %v9932_v46 = vld [vmem:[%s13375_s20 + $0x358] sm:$0xf] }
 0x414   : > { %v4435_v35 = vmax.f32 %v3901_v16, 0.0  ;;  %v3808_v37 = vadd.f32 %v3807_v31, %v3759_v40  ;;  %v11476_v40 = vld [vmem:[%s13375_s20 + $0x200] sm:$0xf0]  ;;  %v10206_v16 = vld [vmem:[%s13375_s20 + $0x594] sm:$0xf0] }
 0x415   : > { %v9753_v33 = vor.u32 %v11476_v40, %v9752_v23  ;;  %v16726_v23 = vld [vmem:[#allocation58_spill] sm:$0xff] }
 0x416   : > { %v14431_v10 = vpack.c.bf16 %v4435_v35, %v4430_v38  ;;  %4098 = vmatmul.bf16.gmra.mxu3 %v13705_v45  ;;  %v10209_v38 = vor.u32 %v11588_v52, %v10206_v16  ;;  %v11521_v35 = vld [vmem:[%s13375_s20 + $0x368] sm:$0xf0] }
 0x417   : > { %v3763_v47 = vpop.f32.mrf.mxu0  ;;  %4235 = vmatpush.bf16.msra.mxu2 %v9753_v33 }
 0x418   : > { %16725 = vst [vmem:[#allocation82_spill] sm:$0xff] %v14431_v10  ;;  %v3764_v22 = vadd.f32 %v3763_v47, %v3715_v24  ;;  %4138 = vmatpush.bf16.msra.mxu0 %v10209_v38  ;;  %v11431_v24 = vld [vmem:[%s13375_s20 + $0x98] sm:$0xf0] }
 0x419   : > { %v3903_v62 = vpop.f32.mrf.mxu3 }
 0x41a   : > { %v3904_v2 = vadd.f32 %v3903_v62, %v3855_v21  ;;  %v3856_v59 = vpop.f32.mrf.mxu2  ;;  %v9933_v21 = vor.u32 %v11521_v35, %v9932_v46 }
 0x41b   : > { %v3857_v43 = vadd.f32 %v3856_v59, %v3808_v37  ;;  %v3810_v9 = vpop.f32.mrf.mxu1  ;;  %v9572_v37 = vld [vmem:[%s13375_s20 + $0x88] sm:$0xf] }
 0x41c   : > { %v3811_v51 = vadd.f32 %v3810_v9, %v3762_v63  ;;  %4283 = vmatpush.bf16.msra.mxu3 %v9933_v21  ;;  %v9573_v62 = vor.u32 %v11431_v24, %v9572_v37  ;;  %v4440_v20 = vmax.f32 %v3904_v2, 0.0  ;;  %v9732_v37 = vld [vmem:[%s13375_s20 + $0x1c8] sm:$0xf] }
 0x41e   : > { %4005 = vmatmul.bf16.gmra.mxu1 %v16712_v14 }
 0x41f   : > { %4054 = vmatmul.bf16.gmra.mxu2 %v13719_v7  ;;  %v3766_v31 = vpop.f32.mrf.mxu0  ;;  %4187 = vmatpush.bf16.msra.mxu1 %v9573_v62  ;;  %v11583_v62 = vld [vmem:[%s13375_s20 + $0x55c] sm:$0xf] }
 0x420   : > { %v3767_v63 = vadd.f32 %v3766_v31, %v3718_v41 }
 0x421   : > { %v3905_v47 = vpop.f32.mrf.mxu3 }
 0x422   : > { %v3906_v59 = vadd.f32 %v3905_v47, %v3857_v43  ;;  %v3859_v9 = vpop.f32.mrf.mxu2  ;;  %3961 = vmatmul.bf16.gmra.mxu0 %v16726_v23  ;;  %v3720_v43 = vadd.f32 %v14318_v25, %v14376_v42  ;;  %v3723_v25 = vadd.f32 %v14328_v6, %v14376_v42 }
 0x423   : > { %v3860_v33 = vadd.f32 %v3859_v9, %v3811_v51  ;;  %v3812_v52 = vpop.f32.mrf.mxu1  ;;  %v9912_v9 = vld [vmem:[%s13375_s20 + $0x330] sm:$0xf] }
 0x424   : > { %v4445_v40 = vmax.f32 %v3906_v59, 0.0  ;;  %v3813_v16 = vadd.f32 %v3812_v52, %v3764_v22  ;;  %v11471_v22 = vld [vmem:[%s13375_s20 + $0x1d8] sm:$0xf0]  ;;  %v10186_v59 = vld [vmem:[%s13375_s20 + $0x56c] sm:$0xf0] }
 0x425   : > { %v9733_v47 = vor.u32 %v11471_v22, %v9732_v37  ;;  %v16728_v37 = vld [vmem:[#allocation60_spill] sm:$0xff] }
 0x426   : > { %v14449_v46 = vpack.c.bf16 %v4445_v40, %v4440_v20  ;;  %4103 = vmatmul.bf16.gmra.mxu3 %v13733_v36  ;;  %v10189_v20 = vor.u32 %v11583_v62, %v10186_v59  ;;  %v11516_v40 = vld [vmem:[%s13375_s20 + $0x340] sm:$0xf0] }
 0x427   : > { %v3768_v38 = vpop.f32.mrf.mxu0  ;;  %4236 = vmatpush.bf16.msra.mxu2 %v9733_v47 }
 0x428   : > { %16727 = vst [vmem:[#allocation58_spill] sm:$0xff] %v14449_v46  ;;  %v3769_v35 = vadd.f32 %v3768_v38, %v3720_v43  ;;  %4139 = vmatpush.bf16.msra.mxu0 %v10189_v20  ;;  %v11426_v43 = vld [vmem:[%s13375_s20 + $0x70] sm:$0xf0] }
 0x429   : > { %v3908_v41 = vpop.f32.mrf.mxu3 }
 0x42a   : > { %v3909_v2 = vadd.f32 %v3908_v41, %v3860_v33  ;;  %v3861_v21 = vpop.f32.mrf.mxu2  ;;  %v9913_v33 = vor.u32 %v11516_v40, %v9912_v9 }
 0x42b   : > { %v3862_v31 = vadd.f32 %v3861_v21, %v3813_v16  ;;  %v3815_v51 = vpop.f32.mrf.mxu1  ;;  %v9552_v16 = vld [vmem:[%s13375_s20 + $0x60] sm:$0xf] }
 0x42c   : > { %v3816_v24 = vadd.f32 %v3815_v51, %v3767_v63  ;;  %4284 = vmatpush.bf16.msra.mxu3 %v9913_v33  ;;  %v9553_v41 = vor.u32 %v11426_v43, %v9552_v16  ;;  %v4450_v6 = vmax.f32 %v3909_v2, 0.0  ;;  %v9712_v16 = vld [vmem:[%s13375_s20 + $0x1a0] sm:$0xf] }
 0x42e   : > { %4010 = vmatmul.bf16.gmra.mxu1 %v16714_v29 }
 0x42f   : > { %4059 = vmatmul.bf16.gmra.mxu2 %v13747_v3  ;;  %v3771_v52 = vpop.f32.mrf.mxu0  ;;  %4188 = vmatpush.bf16.msra.mxu1 %v9553_v41  ;;  %v11578_v41 = vld [vmem:[%s13375_s20 + $0x534] sm:$0xf] }
 0x430   : > { %v3772_v63 = vadd.f32 %v3771_v52, %v3723_v25 }
 0x431   : > { %v3910_v38 = vpop.f32.mrf.mxu3 }
 0x432   : > { %v3911_v21 = vadd.f32 %v3910_v38, %v3862_v31  ;;  %v3864_v51 = vpop.f32.mrf.mxu2  ;;  %3966 = vmatmul.bf16.gmra.mxu0 %v16728_v37  ;;  %v3725_v31 = vadd.f32 %v14340_v54, %v14376_v42  ;;  %v3728_v54 = vadd.f32 %v14348_v15, %v14376_v42 }
 0x433   : > { %v3865_v47 = vadd.f32 %v3864_v51, %v3816_v24  ;;  %v3817_v62 = vpop.f32.mrf.mxu1  ;;  %v9892_v51 = vld [vmem:[%s13375_s20 + $0x308] sm:$0xf] }
 0x434   : > { %v4455_v22 = vmax.f32 %v3911_v21, 0.0  ;;  %v3818_v59 = vadd.f32 %v3817_v62, %v3769_v35  ;;  %v11466_v35 = vld [vmem:[%s13375_s20 + $0x1b0] sm:$0xf0]  ;;  %v10166_v21 = vld [vmem:[%s13375_s20 + $0x544] sm:$0xf0] }
 0x435   : > { %v9713_v38 = vor.u32 %v11466_v35, %v9712_v16  ;;  %v16730_v16 = vld [vmem:[#allocation62_spill] sm:$0xff] }
 0x436   : > { %v14467_v9 = vpack.c.bf16 %v4455_v22, %v4450_v6  ;;  %4108 = vmatmul.bf16.gmra.mxu3 %v13761_v30  ;;  %v10169_v6 = vor.u32 %v11578_v41, %v10166_v21  ;;  %v11511_v22 = vld [vmem:[%s13375_s20 + $0x318] sm:$0xf0] }
 0x437   : > { %v3773_v20 = vpop.f32.mrf.mxu0  ;;  %4237 = vmatpush.bf16.msra.mxu2 %v9713_v38 }
 0x438   : > { %16729 = vst [vmem:[#allocation60_spill] sm:$0xff] %v14467_v9  ;;  %v3774_v40 = vadd.f32 %v3773_v20, %v3725_v31  ;;  %4140 = vmatpush.bf16.msra.mxu0 %v10169_v6  ;;  %v11421_v31 = vld [vmem:[%s13375_s20 + $0x48] sm:$0xf0] }
 0x439   : > { %v3913_v25 = vpop.f32.mrf.mxu3 }
 0x43a   : > { %v3914_v2 = vadd.f32 %v3913_v25, %v3865_v47  ;;  %v3866_v33 = vpop.f32.mrf.mxu2  ;;  %v9893_v47 = vor.u32 %v11511_v22, %v9892_v51 }
 0x43b   : > { %v3867_v52 = vadd.f32 %v3866_v33, %v3818_v59  ;;  %v3820_v24 = vpop.f32.mrf.mxu1  ;;  %v9532_v59 = vld [vmem:[%s13375_s20 + $0x38] sm:$0xf] }
 0x43c   : > { %v3821_v43 = vadd.f32 %v3820_v24, %v3772_v63  ;;  %4285 = vmatpush.bf16.msra.mxu3 %v9893_v47  ;;  %v9533_v25 = vor.u32 %v11421_v31, %v9532_v59  ;;  %v4460_v15 = vmax.f32 %v3914_v2, 0.0  ;;  %v9692_v59 = vld [vmem:[%s13375_s20 + $0x178] sm:$0xf] }
 0x43e   : > { %4015 = vmatmul.bf16.gmra.mxu1 %v16716_v18 }
 0x43f   : > { %4064 = vmatmul.bf16.gmra.mxu2 %v13775_v0  ;;  %v3776_v62 = vpop.f32.mrf.mxu0  ;;  %4189 = vmatpush.bf16.msra.mxu1 %v9533_v25  ;;  %v11573_v25 = vld [vmem:[%s13375_s20 + $0x50c] sm:$0xf] }
 0x440   : > { %v3777_v63 = vadd.f32 %v3776_v62, %v3728_v54 }
 0x441   : > { %v3915_v20 = vpop.f32.mrf.mxu3 }
 0x442   : > { %v3916_v33 = vadd.f32 %v3915_v20, %v3867_v52  ;;  %v3869_v24 = vpop.f32.mrf.mxu2  ;;  %3971 = vmatmul.bf16.gmra.mxu0 %v16730_v16  ;;  %v3730_v52 = vadd.f32 %v14362_v57, %v14376_v42  ;;  %v3733_v57 = vadd.f32 %v14370_v8, %v14376_v42 }
 0x443   : > { %v3870_v38 = vadd.f32 %v3869_v24, %v3821_v43  ;;  %v3822_v41 = vpop.f32.mrf.mxu1  ;;  %v9872_v24 = vld [vmem:[%s13375_s20 + $0x2e0] sm:$0xf] }
 0x444   : > { %v4465_v35 = vmax.f32 %v3916_v33, 0.0  ;;  %v3823_v21 = vadd.f32 %v3822_v41, %v3774_v40  ;;  %v11461_v40 = vld [vmem:[%s13375_s20 + $0x188] sm:$0xf0]  ;;  %v10146_v33 = vld [vmem:[%s13375_s20 + $0x51c] sm:$0xf0] }
 0x445   : > { %v9693_v20 = vor.u32 %v11461_v40, %v9692_v59  ;;  %v16732_v59 = vld [vmem:[#allocation64_spill] sm:$0xff] }
 0x446   : > { %v14485_v51 = vpack.c.bf16 %v4465_v35, %v4460_v15  ;;  %4113 = vmatmul.bf16.gmra.mxu3 %v13789_v28  ;;  %v10149_v15 = vor.u32 %v11573_v25, %v10146_v33  ;;  %v11506_v35 = vld [vmem:[%s13375_s20 + $0x2f0] sm:$0xf0] }
 0x447   : > { %v3778_v6 = vpop.f32.mrf.mxu0  ;;  %4238 = vmatpush.bf16.msra.mxu2 %v9693_v20 }
 0x448   : > { %16731 = vst [vmem:[#allocation62_spill] sm:$0xff] %v14485_v51  ;;  %v3779_v22 = vadd.f32 %v3778_v6, %v3730_v52  ;;  %4141 = vmatpush.bf16.msra.mxu0 %v10149_v15  ;;  %v11416_v52 = vld [vmem:[%s13375_s20 + $0x20] sm:$0xf0] }
 0x449   : > { %v3918_v54 = vpop.f32.mrf.mxu3 }
 0x44a   : > { %v3919_v2 = vadd.f32 %v3918_v54, %v3870_v38  ;;  %v3871_v47 = vpop.f32.mrf.mxu2  ;;  %v9873_v38 = vor.u32 %v11506_v35, %v9872_v24 }
 0x44b   : > { %v3872_v62 = vadd.f32 %v3871_v47, %v3823_v21  ;;  %v3825_v43 = vpop.f32.mrf.mxu1  ;;  %v9512_v21 = vld [vmem:[%s13375_s20 + $0x10] sm:$0xf] }
 0x44c   : > { %v3826_v31 = vadd.f32 %v3825_v43, %v3777_v63  ;;  %4286 = vmatpush.bf16.msra.mxu3 %v9873_v38  ;;  %v9513_v54 = vor.u32 %v11416_v52, %v9512_v21  ;;  %v4470_v8 = vmax.f32 %v3919_v2, 0.0  ;;  %v9672_v2 = vld [vmem:[%s13375_s20 + $0x150] sm:$0xf] }
 0x44e   : > { %4020 = vmatmul.bf16.gmra.mxu1 %v16718_v13 }
 0x44f   : > { %4069 = vmatmul.bf16.gmra.mxu2 %v13803_v48  ;;  %v3781_v41 = vpop.f32.mrf.mxu0  ;;  %4190 = vmatpush.bf16.msra.mxu1 %v9513_v54  ;;  %v11501_v54 = vld [vmem:[%s13375_s20 + $0x2c8] sm:$0xf0] }
 0x450   : > { %v3782_v63 = vadd.f32 %v3781_v41, %v3733_v57  ;;  %v11456_v41 = vld [vmem:[%s13375_s20 + $0x160] sm:$0xf0] }
 0x451   : > { %v3920_v6 = vpop.f32.mrf.mxu3  ;;  %v9673_v21 = vor.u32 %v11456_v41, %v9672_v2  ;;  %v11496_v41 = vld [vmem:[%s13375_s20 + $0x2a0] sm:$0xf0] }
 0x452   : > { %v3921_v47 = vadd.f32 %v3920_v6, %v3872_v62  ;;  %v3874_v43 = vpop.f32.mrf.mxu2  ;;  %3976 = vmatmul.bf16.gmra.mxu0 %v16732_v59  ;;  %v3735_v62 = vadd.f32 %v14390_v56, %v14376_v42  ;;  %v9852_v6 = vld [vmem:[%s13375_s20 + $0x2b8] sm:$0xf] }
 0x453   : > { %v3875_v20 = vadd.f32 %v3874_v43, %v3826_v31  ;;  %v3827_v25 = vpop.f32.mrf.mxu1  ;;  %4239 = vmatpush.bf16.msra.mxu2 %v9673_v21  ;;  %v9853_v56 = vor.u32 %v11501_v54, %v9852_v6  ;;  %v10132_v43 = vld [vmem:[%s13375_s20 + $0x4e8] sm:$0xf] }
 0x454   : > { %v4475_v40 = vmax.f32 %v3921_v47, 0.0  ;;  %v3828_v33 = vadd.f32 %v3827_v25, %v3779_v22  ;;  %v16734_v6 = vld [vmem:[#allocation66_spill] sm:$0xff] }
 0x455   : > { %4287 = vmatpush.bf16.msra.mxu3 %v9853_v56 }
 0x456   : > { %v14503_v24 = vpack.c.bf16 %v4475_v40, %v4470_v8  ;;  %4118 = vmatmul.bf16.gmra.mxu3 %v13821_v49  ;;  %v11571_v8 = vld [vmem:[%s13375_s20 + $0x4f8] sm:$0xf0] }
 0x457   : > { %v3783_v15 = vpop.f32.mrf.mxu0  ;;  %v10133_v40 = vor.u32 %v11571_v8, %v10132_v43 }
 0x458   : > { %16733 = vst [vmem:[#allocation64_spill] sm:$0xff] %v14503_v24  ;;  %v3784_v35 = vadd.f32 %v3783_v15, %v3735_v62  ;;  %v11611_v62 = vld [vmem:[%s13375_s20 + $0x638] sm:$0xf0]  ;;  %v9832_v15 = vld [vmem:[%s13375_s20 + $0x290] sm:$0xf] }
 0x459   : > { %v3923_v57 = vpop.f32.mrf.mxu3  ;;  %4330 = vmatpush.bf16.msrb.mxu0 %v10133_v40  ;;  %v9833_v21 = vor.u32 %v11496_v41, %v9832_v15 }
 0x45a   : > { %v3924_v38 = vadd.f32 %v3923_v57, %v3875_v20  ;;  %v3876_v31 = vpop.f32.mrf.mxu2  ;;  %v3738_v20 = vadd.f32 %v14396_v32, %v14376_v42 }
 0x45b   : > { %v3877_v52 = vadd.f32 %v3876_v31, %v3828_v33  ;;  %v3830_v22 = vpop.f32.mrf.mxu1  ;;  %v10292_v33 = vld [vmem:[%s13375_s20 + $0x628] sm:$0xf]  ;;  %4288 = vmatpush.bf16.msra.mxu3 %v9833_v21  ;;  %v11566_v21 = vld [vmem:[%s13375_s20 + $0x4d0] sm:$0xf0] }
 0x45c   : > { %v3831_v47 = vadd.f32 %v3830_v22, %v3782_v63  ;;  %v10293_v2 = vor.u32 %v11611_v62, %v10292_v33  ;;  %v4480_v32 = vmax.f32 %v3924_v38, 0.0 }
 0x45e   : > { %4025 = vmatmul.bf16.gmra.mxu1 %v16720_v26 }
 0x45f   : > { %4074 = vmatmul.bf16.gmra.mxu2 %v13835_v58  ;;  %v3786_v25 = vpop.f32.mrf.mxu0  ;;  %4379 = vmatpush.bf16.msrb.mxu1 %v10293_v2  ;;  %v11649_v2 = vld [vmem:[%s13380_s5 + $0x128] sm:$0xf0] }
 0x460   : > { %v3787_v63 = vadd.f32 %v3786_v25, %v3738_v20 }
 0x461   : > { %v3925_v57 = vpop.f32.mrf.mxu3 }
 0x462   : > { %v3926_v31 = vadd.f32 %v3925_v57, %v3877_v52  ;;  %v3879_v22 = vpop.f32.mrf.mxu2  ;;  %3981 = vmatmul.bf16.gmra.mxu0 %v16734_v6  ;;  %v3740_v52 = vadd.f32 %v14412_v34, %v14376_v42  ;;  %v10436_v57 = vld [vmem:[%s13380_s5 + $0x118] sm:$0xf] }
 0x463   : > { %v3880_v56 = vadd.f32 %v3879_v22, %v3831_v47  ;;  %v3832_v43 = vpop.f32.mrf.mxu1  ;;  %v10437_v41 = vor.u32 %v11649_v2, %v10436_v57  ;;  %v10272_v34 = vld [vmem:[%s13375_s20 + $0x600] sm:$0xf] }
 0x464   : > { %v4485_v54 = vmax.f32 %v3926_v31, 0.0  ;;  %v3833_v8 = vadd.f32 %v3832_v43, %v3784_v35  ;;  %v10112_v31 = vld [vmem:[%s13375_s20 + $0x4c0] sm:$0xf] }
 0x465   : > { %v10113_v22 = vor.u32 %v11566_v21, %v10112_v31  ;;  %5840 = vmatpush.bf16.msrb.mxu2 %v10437_v41 }
 0x466   : > { %v14523_v40 = vpack.c.bf16 %v4485_v54, %v4480_v32  ;;  %4123 = vmatmul.bf16.gmra.mxu3 %v13847_v55  ;;  %v11606_v32 = vld [vmem:[%s13375_s20 + $0x610] sm:$0xf0] }
 0x467   : > { %v3788_v20 = vpop.f32.mrf.mxu0  ;;  %4331 = vmatpush.bf16.msrb.mxu0 %v10113_v22  ;;  %v11644_v22 = vld [vmem:[%s13380_s5 + $0x100] sm:$0xf0] }
 0x468   : > { %16735 = vst [vmem:[#allocation66_spill] sm:$0xff] %v14523_v40  ;;  %v3789_v25 = vadd.f32 %v3788_v20, %v3740_v52 }
 0x469   : > { %v3928_v33 = vpop.f32.mrf.mxu3 }
 0x46a   : > { %v3929_v38 = vadd.f32 %v3928_v33, %v3880_v56  ;;  %v3881_v62 = vpop.f32.mrf.mxu2  ;;  %v10273_v56 = vor.u32 %v11606_v32, %v10272_v34 }
 0x46b   : > { %v3882_v47 = vadd.f32 %v3881_v62, %v3833_v8  ;;  %v3835_v15 = vpop.f32.mrf.mxu1 }
 0x46c   : > { %v3836_v35 = vadd.f32 %v3835_v15, %v3787_v63  ;;  %4380 = vmatpush.bf16.msrb.mxu1 %v10273_v56  ;;  %v4490_v63 = vmax.f32 %v3929_v38, 0.0  ;;  %v11561_v56 = vld [vmem:[%s13375_s20 + $0x4a8] sm:$0xf0] }
 0x46e   : > { %4030 = vmatmul.bf16.gmra.mxu1 %v16722_v4 }
 0x46f   : > { %4079 = vmatmul.bf16.gmra.mxu2 %v16705_v39  ;;  %v3947_v42 = vpop.f32.mrf.mxu0 }
 0x471   : > { %v3930_v54 = vpop.f32.mrf.mxu3 }
 0x472   : > { %v3931_v43 = vadd.f32 %v3930_v54, %v3882_v47  ;;  %v3884_v8 = vpop.f32.mrf.mxu2  ;;  %4142 = vmatmul.bf16.vlgmr.msra.gmra.mxu0 %v13877_v44  ;;  %v14541_v47 = vperm.slane %v14373_v27, 3  ;;  %v10092_v54 = vld [vmem:[%s13375_s20 + $0x498] sm:$0xf] }
 0x473   : > { %v3885_v20 = vadd.f32 %v3884_v8, %v3836_v35  ;;  %v3837_v33 = vpop.f32.mrf.mxu1  ;;  %v10093_v27 = vor.u32 %v11561_v56, %v10092_v54  ;;  %v11689_v8 = vld [vmem:[%s13380_s5 + $0x268] sm:$0xf0] }
 0x474   : > { %v4495_v52 = vmax.f32 %v3931_v43, 0.0  ;;  %v3838_v62 = vadd.f32 %v3837_v33, %v3789_v25  ;;  %v3948_v38 = vadd.f32 %v3947_v42, %v14541_v47  ;;  %v10416_v25 = vld [vmem:[%s13380_s5 + $0xf0] sm:$0xf]  ;;  %v10596_v43 = vld [vmem:[%s13380_s5 + $0x258] sm:$0xf] }
 0x475   : > { %v10417_v32 = vor.u32 %v11644_v22, %v10416_v25  ;;  %4332 = vmatpush.bf16.msrb.mxu0 %v10093_v27 }
 0x476   : > { %v14537_v15 = vpack.c.bf16 %v4495_v52, %v4490_v63  ;;  %4128 = vmatmul.bf16.gmra.mxu3 %v13879_v50  ;;  %v10597_v63 = vor.u32 %v11689_v8, %v10596_v43  ;;  %v10252_v52 = vld [vmem:[%s13375_s20 + $0x5d8] sm:$0xf] }
 0x477   : > { %v3949_v57 = vpop.f32.mrf.mxu0  ;;  %5841 = vmatpush.bf16.msrb.mxu2 %v10417_v32 }
 0x478   : > { %16736 = vst [vmem:[#allocation83_spill] sm:$0xff] %v14537_v15  ;;  %5889 = vmatpush.bf16.msrb.mxu3 %v10597_v63  ;;  %v11639_v63 = vld [vmem:[%s13380_s5 + $0xd8] sm:$0xf0] }
 0x479   : > { %v3933_v2 = vpop.f32.mrf.mxu3 }
 0x47a   : > { %v3934_v41 = vadd.f32 %v3933_v2, %v3885_v20  ;;  %v3886_v31 = vpop.f32.mrf.mxu2  ;;  %v11601_v20 = vld [vmem:[%s13375_s20 + $0x5e8] sm:$0xf0] }
 0x47b   : > { %v3887_v35 = vadd.f32 %v3886_v31, %v3838_v62  ;;  %v3996_v21 = vpop.f32.mrf.mxu1  ;;  %v10253_v62 = vor.u32 %v11601_v20, %v10252_v52 }
 0x47c   : > { %v3997_v34 = vadd.f32 %v3996_v21, %v3948_v38  ;;  %v3950_v38 = vadd.f32 %v3949_v57, %v14541_v47  ;;  %v16737_v21 = vld [vmem:[#allocation69_spill] sm:$0xff] }
 0x47d   : > { %4381 = vmatpush.bf16.msrb.mxu1 %v10253_v62  ;;  %v11556_v62 = vld [vmem:[%s13375_s20 + $0x480] sm:$0xf0] }
 0x47e   : > { %4191 = vmatmul.bf16.vlgmr.msra.gmra.mxu1 %v13646_v11  ;;  %v4500_v11 = vmax.f32 %v3934_v41, 0.0 }
 0x47f   : > { %4240 = vmatmul.bf16.vlgmr.msra.gmra.mxu2 %v16707_v17  ;;  %v3952_v42 = vpop.f32.mrf.mxu0 }
 0x480   : > { %v3953_v43 = vadd.f32 %v3952_v42, %v14541_v47 }
 0x481   : > { %v3935_v33 = vpop.f32.mrf.mxu3 }
 0x482   : > { %v3936_v2 = vadd.f32 %v3935_v33, %v3887_v35  ;;  %v4045_v31 = vpop.f32.mrf.mxu2  ;;  %4147 = vmatmul.bf16.gmra.mxu0 %v16737_v21  ;;  %v10072_v33 = vld [vmem:[%s13375_s20 + $0x470] sm:$0xf] }
 0x483   : > { %v4046_v22 = vadd.f32 %v4045_v31, %v3997_v34  ;;  %v3998_v17 = vpop.f32.mrf.mxu1  ;;  %v10396_v34 = vld [vmem:[%s13380_s5 + $0xc8] sm:$0xf] }
 0x484   : > { %v4505_v25 = vmax.f32 %v3936_v2, 0.0  ;;  %v3999_v32 = vadd.f32 %v3998_v17, %v3950_v38  ;;  %v10397_v20 = vor.u32 %v11639_v63, %v10396_v34  ;;  %v10576_v2 = vld [vmem:[%s13380_s5 + $0x230] sm:$0xf]  ;;  %v11684_v38 = vld [vmem:[%s13380_s5 + $0x240] sm:$0xf0] }
 0x485   : > { %v10577_v31 = vor.u32 %v11684_v38, %v10576_v2  ;;  %v10376_v2 = vld [vmem:[%s13380_s5 + $0xa0] sm:$0xf] }
 0x486   : > { %v14556_v54 = vpack.c.bf16 %v4505_v25, %v4500_v11  ;;  %4289 = vmatmul.bf16.vlgmr.msra.gmra.mxu3 %v16709_v1  ;;  %v10073_v1 = vor.u32 %v11556_v62, %v10072_v33  ;;  %5842 = vmatpush.bf16.msrb.mxu2 %v10397_v20  ;;  %v10232_v11 = vld [vmem:[%s13375_s20 + $0x5b0] sm:$0xf]  ;;  %v11596_v25 = vld [vmem:[%s13375_s20 + $0x5c0] sm:$0xf0] }
 0x487   : > { %v3954_v57 = vpop.f32.mrf.mxu0  ;;  %5890 = vmatpush.bf16.msrb.mxu3 %v10577_v31  ;;  %v10233_v17 = vor.u32 %v11596_v25, %v10232_v11  ;;  %v10052_v31 = vld [vmem:[%s13375_s20 + $0x448] sm:$0xf]  ;;  %v11551_v11 = vld [vmem:[%s13375_s20 + $0x458] sm:$0xf0]  ;;  %v10556_v25 = vld [vmem:[%s13380_s5 + $0x208] sm:$0xf] }
 0x488   : > { %4333 = vmatpush.bf16.msrb.mxu0 %v10073_v1 }
 0x489   : > { %v4094_v35 = vpop.f32.mrf.mxu3  ;;  %4382 = vmatpush.bf16.msrb.mxu1 %v10233_v17 }
 0x48a   : > { %v14559_v56 = vadd.f32 %v4094_v35, %v4046_v22  ;;  %v4047_v27 = vpop.f32.mrf.mxu2  ;;  %v3955_v35 = vadd.f32 %v3954_v57, %v14541_v47 }
 0x48b   : > { %v4048_v41 = vadd.f32 %v4047_v27, %v3999_v32  ;;  %v4001_v8 = vpop.f32.mrf.mxu1  ;;  %v16738_v27 = vld [vmem:[#allocation70_spill] sm:$0xff] }
 0x48c   : > { %v4002_v52 = vadd.f32 %v4001_v8, %v3953_v43 }
 0x48e   : > { %4196 = vmatmul.bf16.gmra.mxu1 %v13675_v60 }
 0x48f   : > { %4245 = vmatmul.bf16.gmra.mxu2 %v16710_v53  ;;  %v3957_v42 = vpop.f32.mrf.mxu0 }
 0x490   : > { %v3958_v57 = vadd.f32 %v3957_v42, %v14541_v47 }
 0x491   : > { %v4096_v22 = vpop.f32.mrf.mxu3 }
 0x492   : > { %v14572_v32 = vadd.f32 %v4096_v22, %v4048_v41  ;;  %v4050_v43 = vpop.f32.mrf.mxu2  ;;  %4152 = vmatmul.bf16.gmra.mxu0 %v16738_v27  ;;  %v11679_v22 = vld [vmem:[%s13380_s5 + $0x218] sm:$0xf0] }
 0x493   : > { %v4051_v60 = vadd.f32 %v4050_v43, %v4002_v52  ;;  %v4003_v53 = vpop.f32.mrf.mxu1  ;;  %v11634_v52 = vld [vmem:[%s13380_s5 + $0xb0] sm:$0xf0]  ;;  %v10557_v17 = vor.u32 %v11679_v22, %v10556_v25  ;;  %v10356_v25 = vld [vmem:[%s13380_s5 + $0x78] sm:$0xf] }
 0x494   : > { %v4004_v8 = vadd.f32 %v4003_v53, %v3955_v35  ;;  %v10377_v38 = vor.u32 %v11634_v52, %v10376_v2  ;;  %v10212_v35 = vld [vmem:[%s13375_s20 + $0x588] sm:$0xf]  ;;  %v11591_v43 = vld [vmem:[%s13375_s20 + $0x598] sm:$0xf0] }
 0x495   : > { %5891 = vmatpush.bf16.msrb.mxu3 %v10557_v17  ;;  %v10213_v53 = vor.u32 %v11591_v43, %v10212_v35  ;;  %v10032_v17 = vld [vmem:[%s13375_s20 + $0x420] sm:$0xf]  ;;  %v11546_v35 = vld [vmem:[%s13375_s20 + $0x430] sm:$0xf0]  ;;  %v10536_v43 = vld [vmem:[%s13380_s5 + $0x1e0] sm:$0xf] }
 0x496   : > { %4294 = vmatmul.bf16.gmra.mxu3 %v13691_v19  ;;  %v10053_v19 = vor.u32 %v11551_v11, %v10052_v31  ;;  %5843 = vmatpush.bf16.msrb.mxu2 %v10377_v38 }
 0x497   : > { %v3959_v34 = vpop.f32.mrf.mxu0  ;;  %4383 = vmatpush.bf16.msrb.mxu1 %v10213_v53 }
 0x498   : > { %4334 = vmatpush.bf16.msrb.mxu0 %v10053_v19 }
 0x499   : > { %v4099_v41 = vpop.f32.mrf.mxu3 }
 0x49a   : > { %v14577_v63 = vadd.f32 %v4099_v41, %v4051_v60  ;;  %v4052_v20 = vpop.f32.mrf.mxu2  ;;  %v3960_v41 = vadd.f32 %v3959_v34, %v14541_v47 }
 0x49b   : > { %v4053_v33 = vadd.f32 %v4052_v20, %v4004_v8  ;;  %v4006_v62 = vpop.f32.mrf.mxu1  ;;  %v16739_v20 = vld [vmem:[#allocation71_spill] sm:$0xff] }
 0x49c   : > { %v4007_v1 = vadd.f32 %v4006_v62, %v3958_v57 }
 0x49e   : > { %4201 = vmatmul.bf16.gmra.mxu1 %v13703_v12 }
 0x49f   : > { %4250 = vmatmul.bf16.gmra.mxu2 %v16712_v14  ;;  %v3962_v42 = vpop.f32.mrf.mxu0 }
 0x4a0   : > { %v3963_v34 = vadd.f32 %v3962_v42, %v14541_v47 }
 0x4a1   : > { %v4101_v60 = vpop.f32.mrf.mxu3 }
 0x4a2   : > { %v14590_v8 = vadd.f32 %v4101_v60, %v4053_v33  ;;  %v4055_v57 = vpop.f32.mrf.mxu2  ;;  %4157 = vmatmul.bf16.gmra.mxu0 %v16739_v20  ;;  %v11674_v60 = vld [vmem:[%s13380_s5 + $0x1f0] sm:$0xf0] }
 0x4a3   : > { %v4056_v12 = vadd.f32 %v4055_v57, %v4007_v1  ;;  %v4008_v14 = vpop.f32.mrf.mxu1  ;;  %v11629_v1 = vld [vmem:[%s13380_s5 + $0x88] sm:$0xf0]  ;;  %v10537_v53 = vor.u32 %v11674_v60, %v10536_v43  ;;  %v10336_v43 = vld [vmem:[%s13380_s5 + $0x50] sm:$0xf] }
 0x4a4   : > { %v4009_v62 = vadd.f32 %v4008_v14, %v3960_v41  ;;  %v10357_v22 = vor.u32 %v11629_v1, %v10356_v25  ;;  %v10192_v41 = vld [vmem:[%s13375_s20 + $0x560] sm:$0xf]  ;;  %v11586_v57 = vld [vmem:[%s13375_s20 + $0x570] sm:$0xf0] }
 0x4a5   : > { %5892 = vmatpush.bf16.msrb.mxu3 %v10537_v53  ;;  %v10193_v14 = vor.u32 %v11586_v57, %v10192_v41  ;;  %v10012_v53 = vld [vmem:[%s13375_s20 + $0x3f8] sm:$0xf]  ;;  %v11541_v41 = vld [vmem:[%s13375_s20 + $0x408] sm:$0xf0]  ;;  %v10516_v57 = vld [vmem:[%s13380_s5 + $0x1b8] sm:$0xf] }
 0x4a6   : > { %4299 = vmatmul.bf16.gmra.mxu3 %v13719_v7  ;;  %v10033_v7 = vor.u32 %v11546_v35, %v10032_v17  ;;  %5844 = vmatpush.bf16.msrb.mxu2 %v10357_v22 }
 0x4a7   : > { %v3964_v2 = vpop.f32.mrf.mxu0  ;;  %4384 = vmatpush.bf16.msrb.mxu1 %v10193_v14 }
 0x4a8   : > { %4335 = vmatpush.bf16.msrb.mxu0 %v10033_v7 }
 0x4a9   : > { %v4104_v33 = vpop.f32.mrf.mxu3 }
 0x4aa   : > { %v14595_v52 = vadd.f32 %v4104_v33, %v4056_v12  ;;  %v4057_v38 = vpop.f32.mrf.mxu2  ;;  %v3965_v33 = vadd.f32 %v3964_v2, %v14541_v47 }
 0x4ab   : > { %v4058_v31 = vadd.f32 %v4057_v38, %v4009_v62  ;;  %v4011_v11 = vpop.f32.mrf.mxu1  ;;  %v16740_v38 = vld [vmem:[#allocation72_spill] sm:$0xff] }
 0x4ac   : > { %v4012_v19 = vadd.f32 %v4011_v11, %v3963_v34 }
 0x4ae   : > { %4206 = vmatmul.bf16.gmra.mxu1 %v16726_v23 }
 0x4af   : > { %4255 = vmatmul.bf16.gmra.mxu2 %v16714_v29  ;;  %v3967_v42 = vpop.f32.mrf.mxu0 }
 0x4b0   : > { %v3968_v2 = vadd.f32 %v3967_v42, %v14541_v47 }
 0x4b1   : > { %v4106_v12 = vpop.f32.mrf.mxu3 }
 0x4b2   : > { %v14608_v62 = vadd.f32 %v4106_v12, %v4058_v31  ;;  %v4060_v34 = vpop.f32.mrf.mxu2  ;;  %4162 = vmatmul.bf16.gmra.mxu0 %v16740_v38  ;;  %v11669_v12 = vld [vmem:[%s13380_s5 + $0x1c8] sm:$0xf0] }
 0x4b3   : > { %v4061_v23 = vadd.f32 %v4060_v34, %v4012_v19  ;;  %v4013_v29 = vpop.f32.mrf.mxu1  ;;  %v11624_v19 = vld [vmem:[%s13380_s5 + $0x60] sm:$0xf0]  ;;  %v10517_v14 = vor.u32 %v11669_v12, %v10516_v57  ;;  %v10316_v57 = vld [vmem:[%s13380_s5 + $0x28] sm:$0xf] }
 0x4b4   : > { %v4014_v11 = vadd.f32 %v4013_v29, %v3965_v33  ;;  %v10337_v60 = vor.u32 %v11624_v19, %v10336_v43  ;;  %v10172_v33 = vld [vmem:[%s13375_s20 + $0x538] sm:$0xf]  ;;  %v11581_v34 = vld [vmem:[%s13375_s20 + $0x548] sm:$0xf0] }
 0x4b5   : > { %5893 = vmatpush.bf16.msrb.mxu3 %v10517_v14  ;;  %v10173_v29 = vor.u32 %v11581_v34, %v10172_v33  ;;  %v9992_v14 = vld [vmem:[%s13375_s20 + $0x3d0] sm:$0xf]  ;;  %v11536_v33 = vld [vmem:[%s13375_s20 + $0x3e0] sm:$0xf0]  ;;  %v10496_v34 = vld [vmem:[%s13380_s5 + $0x190] sm:$0xf] }
 0x4b6   : > { %4304 = vmatmul.bf16.gmra.mxu3 %v13747_v3  ;;  %v10013_v3 = vor.u32 %v11541_v41, %v10012_v53  ;;  %5845 = vmatpush.bf16.msrb.mxu2 %v10337_v60 }
 0x4b7   : > { %v3969_v25 = vpop.f32.mrf.mxu0  ;;  %4385 = vmatpush.bf16.msrb.mxu1 %v10173_v29 }
 0x4b8   : > { %4336 = vmatpush.bf16.msrb.mxu0 %v10013_v3 }
 0x4b9   : > { %v4109_v31 = vpop.f32.mrf.mxu3 }
 0x4ba   : > { %v14613_v1 = vadd.f32 %v4109_v31, %v4061_v23  ;;  %v4062_v22 = vpop.f32.mrf.mxu2  ;;  %v3970_v31 = vadd.f32 %v3969_v25, %v14541_v47 }
 0x4bb   : > { %v4063_v17 = vadd.f32 %v4062_v22, %v4014_v11  ;;  %v4016_v35 = vpop.f32.mrf.mxu1  ;;  %v16741_v22 = vld [vmem:[#allocation73_spill] sm:$0xff] }
 0x4bc   : > { %v4017_v7 = vadd.f32 %v4016_v35, %v3968_v2 }
 0x4be   : > { %4211 = vmatmul.bf16.gmra.mxu1 %v16728_v37 }
 0x4bf   : > { %4260 = vmatmul.bf16.gmra.mxu2 %v16716_v18  ;;  %v3972_v42 = vpop.f32.mrf.mxu0 }
 0x4c0   : > { %v3973_v25 = vadd.f32 %v3972_v42, %v14541_v47 }
 0x4c1   : > { %v4111_v23 = vpop.f32.mrf.mxu3 }
 0x4c2   : > { %v14626_v11 = vadd.f32 %v4111_v23, %v4063_v17  ;;  %v4065_v2 = vpop.f32.mrf.mxu2  ;;  %4167 = vmatmul.bf16.gmra.mxu0 %v16741_v22  ;;  %v11664_v23 = vld [vmem:[%s13380_s5 + $0x1a0] sm:$0xf0] }
 0x4c3   : > { %v4066_v37 = vadd.f32 %v4065_v2, %v4017_v7  ;;  %v4018_v18 = vpop.f32.mrf.mxu1  ;;  %v11619_v7 = vld [vmem:[%s13380_s5 + $0x38] sm:$0xf0]  ;;  %v10497_v29 = vor.u32 %v11664_v23, %v10496_v34 }
 0x4c4   : > { %v4019_v35 = vadd.f32 %v4018_v18, %v3970_v31  ;;  %v10317_v12 = vor.u32 %v11619_v7, %v10316_v57  ;;  %v10152_v31 = vld [vmem:[%s13375_s20 + $0x510] sm:$0xf]  ;;  %v11576_v2 = vld [vmem:[%s13375_s20 + $0x520] sm:$0xf0] }
 0x4c5   : > { %5894 = vmatpush.bf16.msrb.mxu3 %v10497_v29  ;;  %v10153_v18 = vor.u32 %v11576_v2, %v10152_v31  ;;  %v10476_v29 = vld [vmem:[%s13380_s5 + $0x168] sm:$0xf] }
 0x4c6   : > { %4309 = vmatmul.bf16.gmra.mxu3 %v13775_v0  ;;  %v9993_v0 = vor.u32 %v11536_v33, %v9992_v14  ;;  %5846 = vmatpush.bf16.msrb.mxu2 %v10317_v12  ;;  %v10296_v14 = vld [vmem:[%s13380_s5] sm:$0xf] }
 0x4c7   : > { %v3974_v43 = vpop.f32.mrf.mxu0  ;;  %4386 = vmatpush.bf16.msrb.mxu1 %v10153_v18  ;;  %v11654_v18 = vld [vmem:[%s13380_s5 + $0x150] sm:$0xf0] }
 0x4c8   : > { %4337 = vmatpush.bf16.msrb.mxu0 %v9993_v0 }
 0x4c9   : > { %v4114_v17 = vpop.f32.mrf.mxu3 }
 0x4ca   : > { %v14631_v19 = vadd.f32 %v4114_v17, %v4066_v37  ;;  %v4067_v60 = vpop.f32.mrf.mxu2  ;;  %v3975_v17 = vadd.f32 %v3974_v43, %v14541_v47 }
 0x4cb   : > { %v4068_v53 = vadd.f32 %v4067_v60, %v4019_v35  ;;  %v4021_v41 = vpop.f32.mrf.mxu1  ;;  %v16742_v60 = vld [vmem:[#allocation74_spill] sm:$0xff] }
 0x4cc   : > { %v4022_v3 = vadd.f32 %v4021_v41, %v3973_v25 }
 0x4ce   : > { %4216 = vmatmul.bf16.gmra.mxu1 %v16730_v16 }
 0x4cf   : > { %4265 = vmatmul.bf16.gmra.mxu2 %v16718_v13  ;;  %v3977_v42 = vpop.f32.mrf.mxu0 }
 0x4d0   : > { %v3978_v43 = vadd.f32 %v3977_v42, %v14541_v47 }
 0x4d1   : > { %v4116_v37 = vpop.f32.mrf.mxu3 }
 0x4d2   : > { %v14644_v35 = vadd.f32 %v4116_v37, %v4068_v53  ;;  %v4070_v25 = vpop.f32.mrf.mxu2  ;;  %4172 = vmatmul.bf16.gmra.mxu0 %v16742_v60  ;;  %v11614_v53 = vld [vmem:[%s13380_s5 + $0x10] sm:$0xf0]  ;;  %v10456_v37 = vld [vmem:[%s13380_s5 + $0x140] sm:$0xf] }
 0x4d3   : > { %v4071_v13 = vadd.f32 %v4070_v25, %v4022_v3  ;;  %v4023_v16 = vpop.f32.mrf.mxu1  ;;  %v10297_v34 = vor.u32 %v11614_v53, %v10296_v14  ;;  %v11659_v3 = vld [vmem:[%s13380_s5 + $0x178] sm:$0xf0]  ;;  %v10457_v25 = vor.u32 %v11654_v18, %v10456_v37  ;;  %v11729_v37 = vld [vmem:[%s13380_s5 + $0x3a8] sm:$0xf0] }
 0x4d4   : > { %v4024_v41 = vadd.f32 %v4023_v16, %v3975_v17  ;;  %v10477_v2 = vor.u32 %v11659_v3, %v10476_v29  ;;  %v11076_v29 = vld [vmem:[%s13380_s5 + $0x618] sm:$0xf]  ;;  %v11809_v3 = vld [vmem:[%s13380_s5 + $0x628] sm:$0xf0] }
 0x4d5   : > { %5847 = vmatpush.bf16.msrb.mxu2 %v10297_v34 }
 0x4d6   : > { %4314 = vmatmul.bf16.gmra.mxu3 %v13803_v48 }
 0x4d7   : > { %v3979_v57 = vpop.f32.mrf.mxu0  ;;  %5895 = vmatpush.bf16.msrb.mxu3 %v10477_v2  ;;  %v11077_v2 = vor.u32 %v11809_v3, %v11076_v29 }
 0x4d9   : > { %v4119_v7 = vpop.f32.mrf.mxu3  ;;  %6036 = vmatpush.bf16.msra.mxu2 %v11077_v2  ;;  %v11804_v2 = vld [vmem:[%s13380_s5 + $0x600] sm:$0xf0] }
 0x4da   : > { %v14649_v12 = vadd.f32 %v4119_v7, %v4071_v13  ;;  %v4072_v33 = vpop.f32.mrf.mxu2  ;;  %v3980_v13 = vadd.f32 %v3979_v57, %v14541_v47 }
 0x4db   : > { %v4073_v0 = vadd.f32 %v4072_v33, %v4024_v41  ;;  %v4026_v23 = vpop.f32.mrf.mxu1  ;;  %v16743_v41 = vld [vmem:[#allocation75_spill] sm:$0xff]  ;;  %5896 = vmatpush.bf16.msrb.mxu3 %v10457_v25 }
 0x4dc   : > { %v4027_v31 = vadd.f32 %v4026_v23, %v3978_v43  ;;  %v11769_v25 = vld [vmem:[%s13380_s5 + $0x4e8] sm:$0xf0] }
 0x4de   : > { %4221 = vmatmul.bf16.gmra.mxu1 %v16732_v59 }
 0x4df   : > { %4270 = vmatmul.bf16.gmra.mxu2 %v16720_v26  ;;  %v3982_v48 = vpop.f32.mrf.mxu0 }
 0x4e0   : > { %v3983_v57 = vadd.f32 %v3982_v48, %v14541_v47 }
 0x4e1   : > { %v4121_v17 = vpop.f32.mrf.mxu3 }
 0x4e2   : > { %v14660_v42 = vadd.f32 %v4121_v17, %v4073_v0  ;;  %v4075_v16 = vpop.f32.mrf.mxu2  ;;  %4177 = vmatmul.bf16.gmra.mxu0 %v16743_v41  ;;  %v10916_v17 = vld [vmem:[%s13380_s5 + $0x4d8] sm:$0xf] }
 0x4e3   : > { %v4076_v59 = vadd.f32 %v4075_v16, %v4027_v31  ;;  %v4028_v7 = vpop.f32.mrf.mxu1  ;;  %v10756_v31 = vld [vmem:[%s13380_s5 + $0x398] sm:$0xf]  ;;  %v10917_v16 = vor.u32 %v11769_v25, %v10916_v17  ;;  %v10438_v17 = vld [vmem:[%s13380_s5 + $0x12c] sm:$0xf0] }
 0x4e4   : > { %v4029_v26 = vadd.f32 %v4028_v7, %v3980_v13 }
 0x4e5   : > { %5987 = vmatpush.bf16.msra.mxu1 %v10917_v16 }
 0x4e6   : > { %4319 = vmatmul.bf16.gmra.mxu3 %v13835_v58  ;;  %v10757_v58 = vor.u32 %v11729_v37, %v10756_v31  ;;  %v11056_v31 = vld [vmem:[%s13380_s5 + $0x5f0] sm:$0xf] }
 0x4e7   : > { %v3984_v14 = vpop.f32.mrf.mxu0  ;;  %v10736_v37 = vld [vmem:[%s13380_s5 + $0x370] sm:$0xf] }
 0x4e8   : > { %5938 = vmatpush.bf16.msra.mxu0 %v10757_v58  ;;  %v3985_v7 = vadd.f32 %v3984_v14, %v14541_v47  ;;  %v11057_v58 = vor.u32 %v11804_v2, %v11056_v31 }
 0x4e9   : > { %v4124_v53 = vpop.f32.mrf.mxu3 }
 0x4ea   : > { %v14665_v43 = vadd.f32 %v4124_v53, %v4076_v59  ;;  %v4077_v33 = vpop.f32.mrf.mxu2  ;;  %6037 = vmatpush.bf16.msra.mxu2 %v11057_v58 }
 0x4eb   : > { %v4078_v34 = vadd.f32 %v4077_v33, %v4029_v26  ;;  %v4031_v0 = vpop.f32.mrf.mxu1 }
 0x4ec   : > { %v4032_v23 = vadd.f32 %v4031_v0, %v3983_v57 }
 0x4ee   : > { %4226 = vmatmul.bf16.gmra.mxu1 %v16734_v6 }
 0x4ef   : > { %4275 = vmatmul.bf16.gmra.mxu2 %v16722_v4  ;;  %v4143_v18 = vpop.f32.mrf.mxu0 }
 0x4f0   : > { %v4144_v48 = vadd.f32 %v4143_v18, %v14559_v56  ;;  %v11647_v18 = vld [vmem:[%s13380_s5 + $0x11c] sm:$0xf] }
 0x4f1   : > { %v4126_v13 = vpop.f32.mrf.mxu3 }
 0x4f2   : > { %v14677_v59 = vadd.f32 %v4126_v13, %v4078_v34  ;;  %v4080_v26 = vpop.f32.mrf.mxu2  ;;  %4338 = vmatmul.bf16.vlgmr.msrb.gmra.mxu0 %v13677_v61  ;;  %v4431_v14 = vmax.f32 %v4144_v48, 0.0  ;;  %v10441_v13 = vor.u32 %v11647_v18, %v10438_v17  ;;  %v16745_v48 = vld [vmem:[#allocation76_spill] sm:$0xff]  ;;  %v11036_v18 = vld [vmem:[%s13380_s5 + $0x5c8] sm:$0xf]  ;;  %v11799_v17 = vld [vmem:[%s13380_s5 + $0x5d8] sm:$0xf0] }
 0x4f3   : > { %v4081_v6 = vadd.f32 %v4080_v26, %v4032_v23  ;;  %v4033_v4 = vpop.f32.mrf.mxu1  ;;  %v12144_v23 = vld [vmem:[%s13378_s27] sm:$0x1f]  ;;  %v11764_v26 = vld [vmem:[%s13380_s5 + $0x4c0] sm:$0xf0] }
 0x4f4   : > { %v4034_v53 = vadd.f32 %v4033_v4, %v3985_v7  ;;  %v14686_v29 = vperm.slane %v12144_v23, 4  ;;  %v10896_v7 = vld [vmem:[%s13380_s5 + $0x4b0] sm:$0xf]  ;;  %6085 = vmatpush.bf16.msra.mxu3 %v10441_v13  ;;  %v11037_v13 = vor.u32 %v11799_v17, %v11036_v18 }
 0x4f6   : > { %4324 = vmatmul.bf16.gmra.mxu3 %v16705_v39  ;;  %6038 = vmatpush.bf16.msra.mxu2 %v11037_v13 }
 0x4f7   : > { %v4145_v56 = vpop.f32.mrf.mxu0 }
 0x4f8   : > { %v4146_v33 = vadd.f32 %v4145_v56, %v14572_v32  ;;  %v11724_v32 = vld [vmem:[%s13380_s5 + $0x380] sm:$0xf0] }
 0x4f9   : > { %v4129_v57 = vpop.f32.mrf.mxu3  ;;  %v10737_v25 = vor.u32 %v11724_v32, %v10736_v37 }
 0x4fa   : > { %v14683_v47 = vadd.f32 %v4129_v57, %v4081_v6  ;;  %v4436_v61 = vmax.f32 %v4146_v33, 0.0  ;;  %v4082_v34 = vpop.f32.mrf.mxu2 }
 0x4fb   : > { %v4083_v0 = vadd.f32 %v4082_v34, %v4034_v53  ;;  %v4192_v3 = vpop.f32.mrf.mxu1  ;;  %5939 = vmatpush.bf16.msra.mxu0 %v10737_v25  ;;  %v10897_v53 = vor.u32 %v11764_v26, %v10896_v7  ;;  %v10716_v25 = vld [vmem:[%s13380_s5 + $0x348] sm:$0xf] }
 0x4fc   : > { %v14688_v39 = vpack.c.bf16 %v4436_v61, %v4431_v14  ;;  %v4193_v56 = vadd.f32 %v4192_v3, %v14686_v29  ;;  %v16746_v61 = vld [vmem:[#allocation55_spill] sm:$0xff] }
 0x4fd   : > { %5988 = vmatpush.bf16.msra.mxu1 %v10897_v53  ;;  %v10418_v7 = vld [vmem:[%s13380_s5 + $0x104] sm:$0xf0] }
 0x4fe   : > { %16744 = vst [vmem:[#allocation69_spill] sm:$0xff] %v14688_v39  ;;  %4387 = vmatmul.bf16.vlgmr.msrb.gmra.mxu1 %v13877_v44 }
 0x4ff   : > { %5848 = vmatmul.bf16.vlgmr.msrb.gmra.mxu2 %v16745_v48  ;;  %v4148_v16 = vpop.f32.mrf.mxu0 }
 0x500   : > { %v4149_v4 = vadd.f32 %v4148_v16, %v14577_v63  ;;  %v11642_v16 = vld [vmem:[%s13380_s5 + $0xf4] sm:$0xf] }
 0x501   : > { %v4131_v6 = vpop.f32.mrf.mxu3 }
 0x502   : > { %v14702_v57 = vadd.f32 %v4131_v6, %v4083_v0  ;;  %v4241_v33 = vpop.f32.mrf.mxu2  ;;  %4343 = vmatmul.bf16.gmra.mxu0 %v13705_v45  ;;  %v4441_v45 = vmax.f32 %v4149_v4, 0.0  ;;  %v10421_v6 = vor.u32 %v11642_v16, %v10418_v7  ;;  %v16747_v4 = vld [vmem:[#allocation77_spill] sm:$0xff]  ;;  %v11016_v7 = vld [vmem:[%s13380_s5 + $0x5a0] sm:$0xf] }
 0x503   : > { %v4242_v44 = vadd.f32 %v4241_v33, %v4193_v56  ;;  %v4194_v14 = vpop.f32.mrf.mxu1  ;;  %v10876_v56 = vld [vmem:[%s13380_s5 + $0x488] sm:$0xf]  ;;  %v11759_v33 = vld [vmem:[%s13380_s5 + $0x498] sm:$0xf0] }
 0x504   : > { %v4195_v23 = vadd.f32 %v4194_v14, %v14686_v29  ;;  %6086 = vmatpush.bf16.msra.mxu3 %v10421_v6  ;;  %v10696_v6 = vld [vmem:[%s13380_s5 + $0x320] sm:$0xf] }
 0x506   : > { %5897 = vmatmul.bf16.vlgmr.msrb.gmra.mxu3 %v16746_v61 }
 0x507   : > { %v4150_v63 = vpop.f32.mrf.mxu0 }
 0x508   : > { %v4151_v34 = vadd.f32 %v4150_v63, %v14590_v8  ;;  %v11719_v8 = vld [vmem:[%s13380_s5 + $0x358] sm:$0xf0]  ;;  %v10877_v63 = vor.u32 %v11759_v33, %v10876_v56  ;;  %v11637_v56 = vld [vmem:[%s13380_s5 + $0xcc] sm:$0xf]  ;;  %v10398_v33 = vld [vmem:[%s13380_s5 + $0xdc] sm:$0xf0] }
 0x509   : > { %v4290_v0 = vpop.f32.mrf.mxu3  ;;  %v10717_v26 = vor.u32 %v11719_v8, %v10716_v25 }
 0x50a   : > { %v14708_v3 = vadd.f32 %v4290_v0, %v4242_v44  ;;  %v4446_v31 = vmax.f32 %v4151_v34, 0.0  ;;  %v4243_v2 = vpop.f32.mrf.mxu2  ;;  %5989 = vmatpush.bf16.msra.mxu1 %v10877_v63  ;;  %v10401_v63 = vor.u32 %v11637_v56, %v10398_v33 }
 0x50b   : > { %v4244_v37 = vadd.f32 %v4243_v2, %v4195_v23  ;;  %v4197_v58 = vpop.f32.mrf.mxu1  ;;  %5940 = vmatpush.bf16.msra.mxu0 %v10717_v26  ;;  %v11794_v26 = vld [vmem:[%s13380_s5 + $0x5b0] sm:$0xf0] }
 0x50c   : > { %v14710_v32 = vpack.c.bf16 %v4446_v31, %v4441_v45  ;;  %v4198_v34 = vadd.f32 %v4197_v58, %v14686_v29  ;;  %v16748_v31 = vld [vmem:[#allocation56_spill] sm:$0xff]  ;;  %6087 = vmatpush.bf16.msra.mxu3 %v10401_v63  ;;  %v11789_v63 = vld [vmem:[%s13380_s5 + $0x588] sm:$0xf0] }
 0x50e   : > { %4392 = vmatmul.bf16.gmra.mxu1 %v16737_v21 }
 0x50f   : > { %5853 = vmatmul.bf16.gmra.mxu2 %v16747_v4  ;;  %v4153_v53 = vpop.f32.mrf.mxu0 }
 0x510   : > { %v4154_v44 = vadd.f32 %v4153_v53, %v14595_v52  ;;  %v11017_v53 = vor.u32 %v11794_v26, %v11016_v7 }
 0x511   : > { %v4292_v14 = vpop.f32.mrf.mxu3 }
 0x512   : > { %v14724_v0 = vadd.f32 %v4292_v14, %v4244_v37  ;;  %v4246_v23 = vpop.f32.mrf.mxu2  ;;  %4348 = vmatmul.bf16.gmra.mxu0 %v13733_v36  ;;  %v4451_v36 = vmax.f32 %v4154_v44, 0.0  ;;  %v16749_v44 = vld [vmem:[#allocation78_spill] sm:$0xff]  ;;  %6039 = vmatpush.bf16.msra.mxu2 %v11017_v53 }
 0x513   : > { %v4247_v21 = vadd.f32 %v4246_v23, %v4198_v34  ;;  %v4199_v45 = vpop.f32.mrf.mxu1  ;;  %v10856_v23 = vld [vmem:[%s13380_s5 + $0x460] sm:$0xf] }
 0x514   : > { %v4200_v58 = vadd.f32 %v4199_v45, %v14686_v29 }
 0x516   : > { %5902 = vmatmul.bf16.gmra.mxu3 %v16748_v31 }
 0x517   : > { %v4155_v52 = vpop.f32.mrf.mxu0 }
 0x518   : > { %v4156_v2 = vadd.f32 %v4155_v52, %v14608_v62  ;;  %v11714_v62 = vld [vmem:[%s13380_s5 + $0x330] sm:$0xf0] }
 0x519   : > { %v4295_v37 = vpop.f32.mrf.mxu3  ;;  %v10697_v14 = vor.u32 %v11714_v62, %v10696_v6 }
 0x51a   : > { %v14730_v18 = vadd.f32 %v4295_v37, %v4247_v21  ;;  %v4456_v17 = vmax.f32 %v4156_v2, 0.0  ;;  %v4248_v25 = vpop.f32.mrf.mxu2  ;;  %v11754_v21 = vld [vmem:[%s13380_s5 + $0x470] sm:$0xf0] }
 0x51b   : > { %v4249_v13 = vadd.f32 %v4248_v25, %v4200_v58  ;;  %v4202_v8 = vpop.f32.mrf.mxu1  ;;  %5941 = vmatpush.bf16.msra.mxu0 %v10697_v14  ;;  %v10857_v2 = vor.u32 %v11754_v21, %v10856_v23  ;;  %v16750_v25 = vld [vmem:[#allocation57_spill] sm:$0xff]  ;;  %v11632_v21 = vld [vmem:[%s13380_s5 + $0xa4] sm:$0xf] }
 0x51c   : > { %v14732_v16 = vpack.c.bf16 %v4456_v17, %v4451_v36  ;;  %v4203_v37 = vadd.f32 %v4202_v8, %v14686_v29  ;;  %v10996_v14 = vld [vmem:[%s13380_s5 + $0x578] sm:$0xf] }
 0x51d   : > { %5990 = vmatpush.bf16.msra.mxu1 %v10857_v2  ;;  %v10997_v23 = vor.u32 %v11789_v63, %v10996_v14  ;;  %v16752_v14 = vld [vmem:[#allocation59_spill] sm:$0xff] }
 0x51e   : > { %4397 = vmatmul.bf16.gmra.mxu1 %v16738_v27 }
 0x51f   : > { %5858 = vmatmul.bf16.gmra.mxu2 %v16749_v44  ;;  %v4158_v34 = vpop.f32.mrf.mxu0 }
 0x520   : > { %v4159_v45 = vadd.f32 %v4158_v34, %v14613_v1  ;;  %v10676_v34 = vld [vmem:[%s13380_s5 + $0x2f8] sm:$0xf]  ;;  %6040 = vmatpush.bf16.msra.mxu2 %v10997_v23 }
 0x521   : > { %v4297_v52 = vpop.f32.mrf.mxu3 }
 0x522   : > { %v14746_v58 = vadd.f32 %v4297_v52, %v4249_v13  ;;  %v4251_v36 = vpop.f32.mrf.mxu2  ;;  %4353 = vmatmul.bf16.gmra.mxu0 %v13761_v30  ;;  %v4461_v30 = vmax.f32 %v4159_v45, 0.0  ;;  %v10378_v52 = vld [vmem:[%s13380_s5 + $0xb4] sm:$0xf0]  ;;  %v16751_v45 = vld [vmem:[#allocation79_spill] sm:$0xff] }
 0x523   : > { %v4252_v27 = vadd.f32 %v4251_v36, %v4203_v37  ;;  %v4204_v17 = vpop.f32.mrf.mxu1  ;;  %v10381_v37 = vor.u32 %v11632_v21, %v10378_v52 }
 0x524   : > { %v4205_v8 = vadd.f32 %v4204_v17, %v14686_v29  ;;  %v11749_v17 = vld [vmem:[%s13380_s5 + $0x448] sm:$0xf0] }
 0x525   : > { %6088 = vmatpush.bf16.msra.mxu3 %v10381_v37  ;;  %v10976_v37 = vld [vmem:[%s13380_s5 + $0x550] sm:$0xf] }
 0x526   : > { %5907 = vmatmul.bf16.gmra.mxu3 %v16750_v25 }
 0x527   : > { %v4160_v1 = vpop.f32.mrf.mxu0 }
 0x528   : > { %v4161_v7 = vadd.f32 %v4160_v1, %v14626_v11  ;;  %v11709_v11 = vld [vmem:[%s13380_s5 + $0x308] sm:$0xf0] }
 0x529   : > { %v4300_v13 = vpop.f32.mrf.mxu3  ;;  %v10677_v2 = vor.u32 %v11709_v11, %v10676_v34 }
 0x52a   : > { %v14752_v26 = vadd.f32 %v4300_v13, %v4252_v27  ;;  %v4466_v6 = vmax.f32 %v4161_v7, 0.0  ;;  %v4253_v53 = vpop.f32.mrf.mxu2  ;;  %v10836_v27 = vld [vmem:[%s13380_s5 + $0x438] sm:$0xf] }
 0x52b   : > { %v4254_v62 = vadd.f32 %v4253_v53, %v4205_v8  ;;  %v4207_v56 = vpop.f32.mrf.mxu1  ;;  %5942 = vmatpush.bf16.msra.mxu0 %v10677_v2  ;;  %v10837_v13 = vor.u32 %v11749_v17, %v10836_v27  ;;  %v10656_v27 = vld [vmem:[%s13380_s5 + $0x2d0] sm:$0xf] }
 0x52c   : > { %v14754_v33 = vpack.c.bf16 %v4466_v6, %v4461_v30  ;;  %v4208_v8 = vadd.f32 %v4207_v56, %v14686_v29 }
 0x52d   : > { %5991 = vmatpush.bf16.msra.mxu1 %v10837_v13  ;;  %v10358_v13 = vld [vmem:[%s13380_s5 + $0x8c] sm:$0xf0] }
 0x52e   : > { %4402 = vmatmul.bf16.gmra.mxu1 %v16739_v20 }
 0x52f   : > { %5863 = vmatmul.bf16.gmra.mxu2 %v16751_v45  ;;  %v4163_v36 = vpop.f32.mrf.mxu0 }
 0x530   : > { %v4164_v1 = vadd.f32 %v4163_v36, %v14631_v19  ;;  %v11784_v36 = vld [vmem:[%s13380_s5 + $0x560] sm:$0xf0] }
 0x531   : > { %v4302_v7 = vpop.f32.mrf.mxu3  ;;  %v10977_v17 = vor.u32 %v11784_v36, %v10976_v37  ;;  %v16754_v36 = vld [vmem:[#allocation61_spill] sm:$0xff] }
 0x532   : > { %v14768_v30 = vadd.f32 %v4302_v7, %v4254_v62  ;;  %v4256_v6 = vpop.f32.mrf.mxu2  ;;  %4358 = vmatmul.bf16.gmra.mxu0 %v13789_v28  ;;  %v4471_v28 = vmax.f32 %v4164_v1, 0.0  ;;  %v11627_v7 = vld [vmem:[%s13380_s5 + $0x7c] sm:$0xf]  ;;  %v16753_v1 = vld [vmem:[#allocation80_spill] sm:$0xff] }
 0x533   : > { %v4257_v20 = vadd.f32 %v4256_v6, %v4208_v8  ;;  %v4209_v53 = vpop.f32.mrf.mxu1  ;;  %v10361_v6 = vor.u32 %v11627_v7, %v10358_v13  ;;  %6041 = vmatpush.bf16.msra.mxu2 %v10977_v17 }
 0x534   : > { %v4210_v56 = vadd.f32 %v4209_v53, %v14686_v29  ;;  %v10816_v53 = vld [vmem:[%s13380_s5 + $0x410] sm:$0xf] }
 0x535   : > { %6089 = vmatpush.bf16.msra.mxu3 %v10361_v6 }
 0x536   : > { %5912 = vmatmul.bf16.gmra.mxu3 %v16752_v14 }
 0x537   : > { %v4165_v19 = vpop.f32.mrf.mxu0 }
 0x538   : > { %v4166_v63 = vadd.f32 %v4165_v19, %v14644_v35  ;;  %v11704_v35 = vld [vmem:[%s13380_s5 + $0x2e0] sm:$0xf0] }
 0x539   : > { %v4305_v62 = vpop.f32.mrf.mxu3  ;;  %v10657_v8 = vor.u32 %v11704_v35, %v10656_v27  ;;  %v11744_v19 = vld [vmem:[%s13380_s5 + $0x420] sm:$0xf0]  ;;  %v10636_v35 = vld [vmem:[%s13380_s5 + $0x2a8] sm:$0xf] }
 0x53a   : > { %v14774_v34 = vadd.f32 %v4305_v62, %v4257_v20  ;;  %v4476_v23 = vmax.f32 %v4166_v63, 0.0  ;;  %v4258_v11 = vpop.f32.mrf.mxu2 }
 0x53b   : > { %v4259_v21 = vadd.f32 %v4258_v11, %v4210_v56  ;;  %v4212_v52 = vpop.f32.mrf.mxu1  ;;  %5943 = vmatpush.bf16.msra.mxu0 %v10657_v8  ;;  %v10817_v56 = vor.u32 %v11744_v19, %v10816_v53  ;;  %v10956_v19 = vld [vmem:[%s13380_s5 + $0x528] sm:$0xf] }
 0x53c   : > { %v14776_v2 = vpack.c.bf16 %v4476_v23, %v4471_v28  ;;  %v4213_v28 = vadd.f32 %v4212_v52, %v14686_v29 }
 0x53d   : > { %5992 = vmatpush.bf16.msra.mxu1 %v10817_v56  ;;  %v11622_v56 = vld [vmem:[%s13380_s5 + $0x54] sm:$0xf] }
 0x53e   : > { %4407 = vmatmul.bf16.gmra.mxu1 %v16740_v38 }
 0x53f   : > { %5868 = vmatmul.bf16.gmra.mxu2 %v16753_v1  ;;  %v4168_v20 = vpop.f32.mrf.mxu0 }
 0x540   : > { %v4169_v63 = vadd.f32 %v4168_v20, %v14649_v12 }
 0x541   : > { %v4307_v62 = vpop.f32.mrf.mxu3 }
 0x542   : > { %v14790_v23 = vadd.f32 %v4307_v62, %v4259_v21  ;;  %v4261_v38 = vpop.f32.mrf.mxu2  ;;  %4363 = vmatmul.bf16.gmra.mxu0 %v13821_v49  ;;  %v11699_v49 = vld [vmem:[%s13380_s5 + $0x2b8] sm:$0xf0]  ;;  %v4481_v7 = vmax.f32 %v4169_v63, 0.0 }
 0x543   : > { %v4262_v11 = vadd.f32 %v4261_v38, %v4213_v28  ;;  %v4214_v37 = vpop.f32.mrf.mxu1  ;;  %v10637_v6 = vor.u32 %v11699_v49, %v10636_v35  ;;  %v11779_v62 = vld [vmem:[%s13380_s5 + $0x538] sm:$0xf0]  ;;  %v10338_v38 = vld [vmem:[%s13380_s5 + $0x64] sm:$0xf0] }
 0x544   : > { %v4215_v52 = vadd.f32 %v4214_v37, %v14686_v29  ;;  %v10957_v28 = vor.u32 %v11779_v62, %v10956_v19  ;;  %v11694_v37 = vld [vmem:[%s13380_s5 + $0x290] sm:$0xf0]  ;;  %v10341_v63 = vor.u32 %v11622_v56, %v10338_v38  ;;  %v11739_v35 = vld [vmem:[%s13380_s5 + $0x3f8] sm:$0xf0]  ;;  %v16756_v56 = vld [vmem:[#allocation63_spill] sm:$0xff] }
 0x545   : > { %5944 = vmatpush.bf16.msra.mxu0 %v10637_v6 }
 0x546   : > { %5917 = vmatmul.bf16.gmra.mxu3 %v16754_v36  ;;  %6042 = vmatpush.bf16.msra.mxu2 %v10957_v28 }
 0x547   : > { %v4170_v12 = vpop.f32.mrf.mxu0  ;;  %6090 = vmatpush.bf16.msra.mxu3 %v10341_v63 }
 0x548   : > { %v4171_v27 = vadd.f32 %v4170_v12, %v14660_v42 }
 0x549   : > { %v4310_v17 = vpop.f32.mrf.mxu3 }
 0x54a   : > { %v14796_v21 = vadd.f32 %v4310_v17, %v4262_v11  ;;  %v4486_v13 = vmax.f32 %v4171_v27, 0.0  ;;  %v4263_v8 = vpop.f32.mrf.mxu2  ;;  %v10616_v11 = vld [vmem:[%s13380_s5 + $0x280] sm:$0xf]  ;;  %v16755_v27 = vld [vmem:[#allocation81_spill] sm:$0xff] }
 0x54b   : > { %v4264_v20 = vadd.f32 %v4263_v8, %v4215_v52  ;;  %v4217_v53 = vpop.f32.mrf.mxu1  ;;  %v10617_v12 = vor.u32 %v11694_v37, %v10616_v11  ;;  %v10796_v52 = vld [vmem:[%s13380_s5 + $0x3e8] sm:$0xf]  ;;  %v10776_v11 = vld [vmem:[%s13380_s5 + $0x3c0] sm:$0xf]  ;;  %v11734_v37 = vld [vmem:[%s13380_s5 + $0x3d0] sm:$0xf0] }
 0x54c   : > { %v14800_v42 = vpack.c.bf16 %v4486_v13, %v4481_v7  ;;  %v10797_v13 = vor.u32 %v11739_v35, %v10796_v52  ;;  %v4218_v8 = vadd.f32 %v4217_v53, %v14686_v29 }
 0x54d   : > { %5945 = vmatpush.bf16.msra.mxu0 %v10617_v12 }
 0x54e   : > { %4412 = vmatmul.bf16.gmra.mxu1 %v16741_v22 }
 0x54f   : > { %5873 = vmatmul.bf16.gmra.mxu2 %v16755_v27  ;;  %v4173_v17 = vpop.f32.mrf.mxu0  ;;  %5993 = vmatpush.bf16.msra.mxu1 %v10797_v13  ;;  %v11774_v13 = vld [vmem:[%s13380_s5 + $0x510] sm:$0xf0] }
 0x550   : > { %v4174_v49 = vadd.f32 %v4173_v17, %v14665_v43  ;;  %v10777_v17 = vor.u32 %v11734_v37, %v10776_v11 }
 0x551   : > { %v4312_v7 = vpop.f32.mrf.mxu3 }
 0x552   : > { %v14814_v6 = vadd.f32 %v4312_v7, %v4264_v20  ;;  %v4266_v22 = vpop.f32.mrf.mxu2  ;;  %4368 = vmatmul.bf16.gmra.mxu0 %v13847_v55  ;;  %v4491_v55 = vmax.f32 %v4174_v49, 0.0  ;;  %v10936_v7 = vld [vmem:[%s13380_s5 + $0x500] sm:$0xf]  ;;  %v16757_v49 = vld [vmem:[#allocation68_spill] sm:$0xff] }
 0x553   : > { %v4267_v19 = vadd.f32 %v4266_v22, %v4218_v8  ;;  %v4219_v62 = vpop.f32.mrf.mxu1  ;;  %v11617_v8 = vld [vmem:[%s13380_s5 + $0x2c] sm:$0xf]  ;;  %v10937_v22 = vor.u32 %v11774_v13, %v10936_v7  ;;  %5994 = vmatpush.bf16.msra.mxu1 %v10777_v17  ;;  %v16758_v7 = vld [vmem:[#allocation65_spill] sm:$0xff] }
 0x554   : > { %v4220_v53 = vadd.f32 %v4219_v62, %v14686_v29  ;;  %v10318_v62 = vld [vmem:[%s13380_s5 + $0x3c] sm:$0xf0] }
 0x555   : > { %6043 = vmatpush.bf16.msra.mxu2 %v10937_v22 }
 0x556   : > { %5922 = vmatmul.bf16.gmra.mxu3 %v16756_v56 }
 0x557   : > { %v4175_v43 = vpop.f32.mrf.mxu0 }
 0x558   : > { %v4176_v28 = vadd.f32 %v4175_v43, %v14677_v59 }
 0x559   : > { %v4315_v38 = vpop.f32.mrf.mxu3 }
 0x55a   : > { %v14820_v20 = vadd.f32 %v4315_v38, %v4267_v19  ;;  %v4496_v63 = vmax.f32 %v4176_v28, 0.0  ;;  %v4268_v12 = vpop.f32.mrf.mxu2  ;;  %v10321_v19 = vor.u32 %v11617_v8, %v10318_v62  ;;  %v11612_v28 = vld [vmem:[%s13380_s5 + $0x4] sm:$0xf]  ;;  %v10298_v38 = vld [vmem:[%s13380_s5 + $0x14] sm:$0xf0] }
 0x55b   : > { %v4269_v52 = vadd.f32 %v4268_v12, %v4220_v53  ;;  %v4222_v35 = vpop.f32.mrf.mxu1  ;;  %v10301_v37 = vor.u32 %v11612_v28, %v10298_v38  ;;  %v11767_v28 = vld [vmem:[%s13380_s5 + $0x4dc] sm:$0xf]  ;;  %v10918_v38 = vld [vmem:[%s13380_s5 + $0x4ec] sm:$0xf0] }
 0x55c   : > { %v14827_v59 = vpack.c.bf16 %v4496_v63, %v4491_v55  ;;  %6091 = vmatpush.bf16.msra.mxu3 %v10321_v19  ;;  %v4223_v55 = vadd.f32 %v4222_v35, %v14686_v29 }
 0x55e   : > { %4417 = vmatmul.bf16.gmra.mxu1 %v16742_v60 }
 0x55f   : > { %5878 = vmatmul.bf16.gmra.mxu2 %v16757_v49  ;;  %v4178_v43 = vpop.f32.mrf.mxu0 }
 0x560   : > { %v4179_v53 = vadd.f32 %v4178_v43, %v14683_v47  ;;  %6092 = vmatpush.bf16.msra.mxu3 %v10301_v37  ;;  %v10921_v37 = vor.u32 %v11767_v28, %v10918_v38 }
 0x561   : > { %v4317_v11 = vpop.f32.mrf.mxu3 }
 0x562   : > { %v14836_v63 = vadd.f32 %v4317_v11, %v4269_v52  ;;  %v4271_v12 = vpop.f32.mrf.mxu2  ;;  %4373 = vmatmul.bf16.gmra.mxu0 %v13879_v50  ;;  %v4501_v22 = vmax.f32 %v4179_v53, 0.0  ;;  %6232 = vmatpush.bf16.msrb.mxu2 %v10921_v37 }
 0x563   : > { %v4272_v60 = vadd.f32 %v4271_v12, %v4223_v55  ;;  %v4224_v17 = vpop.f32.mrf.mxu1  ;;  %v10598_v55 = vld [vmem:[%s13380_s5 + $0x26c] sm:$0xf0]  ;;  %v11727_v12 = vld [vmem:[%s13380_s5 + $0x39c] sm:$0xf] }
 0x564   : > { %v4225_v52 = vadd.f32 %v4224_v17, %v14686_v29  ;;  %v16760_v17 = vld [vmem:[#allocation54_spill] sm:$0xff] }
 0x566   : > { %5927 = vmatmul.bf16.gmra.mxu3 %v16758_v7  ;;  %v10738_v7 = vld [vmem:[%s13380_s5 + $0x384] sm:$0xf0] }
 0x567   : > { %v4180_v13 = vpop.f32.mrf.mxu0 }
 0x568   : > { %v4181_v47 = vadd.f32 %v4180_v13, %v14702_v57  ;;  %v11687_v57 = vld [vmem:[%s13380_s5 + $0x25c] sm:$0xf]  ;;  %v10758_v13 = vld [vmem:[%s13380_s5 + $0x3ac] sm:$0xf0] }
 0x569   : > { %v4320_v8 = vpop.f32.mrf.mxu3  ;;  %v10601_v53 = vor.u32 %v11687_v57, %v10598_v55 }
 0x56a   : > { %v14842_v35 = vadd.f32 %v4320_v8, %v4272_v60  ;;  %v4506_v62 = vmax.f32 %v4181_v47, 0.0  ;;  %v4273_v50 = vpop.f32.mrf.mxu2  ;;  %v10761_v8 = vor.u32 %v11727_v12, %v10758_v13  ;;  %v11762_v12 = vld [vmem:[%s13380_s5 + $0x4b4] sm:$0xf] }
 0x56b   : > { %v4274_v19 = vadd.f32 %v4273_v50, %v4225_v52  ;;  %v4227_v43 = vpop.f32.mrf.mxu1  ;;  %6134 = vmatpush.bf16.msrb.mxu0 %v10601_v53  ;;  %v10898_v53 = vld [vmem:[%s13380_s5 + $0x4c4] sm:$0xf0] }
 0x56c   : > { %v14846_v11 = vpack.c.bf16 %v4506_v62, %v4501_v22  ;;  %v4228_v52 = vadd.f32 %v4227_v43, %v14686_v29  ;;  %6183 = vmatpush.bf16.msrb.mxu1 %v10761_v8  ;;  %v10901_v13 = vor.u32 %v11762_v12, %v10898_v53  ;;  %v10578_v8 = vld [vmem:[%s13380_s5 + $0x244] sm:$0xf0] }
 0x56e   : > { %16759 = vst [vmem:[#allocation70_spill] sm:$0xff] %v14846_v11  ;;  %4422 = vmatmul.bf16.gmra.mxu1 %v16743_v41  ;;  %6233 = vmatpush.bf16.msrb.mxu2 %v10901_v13 }
 0x56f   : > { %5883 = vmatmul.bf16.gmra.mxu2 %v16760_v17  ;;  %v4339_v60 = vpop.f32.mrf.mxu0 }
 0x571   : > { %v4322_v47 = vpop.f32.mrf.mxu3 }
 0x572   : > { %v14855_v50 = vadd.f32 %v4322_v47, %v4274_v19  ;;  %v4276_v22 = vpop.f32.mrf.mxu2  ;;  %5946 = vmatmul.bf16.vlgmr.msra.gmra.mxu0 %v14431_v10  ;;  %v11682_v47 = vld [vmem:[%s13380_s5 + $0x234] sm:$0xf] }
 0x573   : > { %v4277_v41 = vadd.f32 %v4276_v22, %v4228_v52  ;;  %v4229_v62 = vpop.f32.mrf.mxu1  ;;  %v10581_v22 = vor.u32 %v11682_v47, %v10578_v8 }
 0x574   : > { %v4230_v43 = vadd.f32 %v4229_v62, %v14686_v29  ;;  %v11078_v29 = vld [vmem:[%s13380_s5 + $0x62c] sm:$0xf0]  ;;  %v11722_v62 = vld [vmem:[%s13380_s5 + $0x374] sm:$0xf] }
 0x575   : > { %6135 = vmatpush.bf16.msrb.mxu0 %v10581_v22  ;;  %v10741_v12 = vor.u32 %v11722_v62, %v10738_v7  ;;  %v11757_v62 = vld [vmem:[%s13380_s5 + $0x48c] sm:$0xf] }
 0x576   : > { %5932 = vmatmul.bf16.gmra.mxu3 %v14407_v5  ;;  %v11807_v5 = vld [vmem:[%s13380_s5 + $0x61c] sm:$0xf] }
 0x577   : > { %v4341_v28 = vpop.f32.mrf.mxu0  ;;  %6184 = vmatpush.bf16.msrb.mxu1 %v10741_v12 }
 0x578   : > { %v4342_v53 = vadd.f32 %v4341_v28, %v14724_v0 }
 0x579   : > { %v4325_v38 = vpop.f32.mrf.mxu3 }
 0x57a   : > { %v14860_v19 = vadd.f32 %v4325_v38, %v4277_v41  ;;  %v4278_v37 = vpop.f32.mrf.mxu2  ;;  %v4340_v41 = vadd.f32 %v4339_v60, %v14708_v3 }
 0x57b   : > { %v4279_v57 = vadd.f32 %v4278_v37, %v4230_v43  ;;  %v4388_v55 = vpop.f32.mrf.mxu1  ;;  %v4788_v43 = vld [vmem:[%s13383_s28] sm:$0x1f]  ;;  %v11081_v37 = vor.u32 %v11807_v5, %v11078_v29 }
 0x57c   : > { %v4389_v13 = vadd.f32 %v4388_v55, %v4340_v41  ;;  %v14877_v47 = vperm.slane %v4788_v43, 0  ;;  %v10878_v41 = vld [vmem:[%s13380_s5 + $0x49c] sm:$0xf0] }
 0x57d   : > { %6281 = vmatpush.bf16.msrb.mxu3 %v11081_v37  ;;  %v10558_v43 = vld [vmem:[%s13380_s5 + $0x21c] sm:$0xf0] }
 0x57e   : > { %5995 = vmatmul.bf16.vlgmr.msra.gmra.mxu1 %v14688_v39  ;;  %v4432_v5 = vmax.f32 %v4389_v13, 0.0  ;;  %v11802_v13 = vld [vmem:[%s13380_s5 + $0x5f4] sm:$0xf] }
 0x57f   : > { %v4344_v52 = vpop.f32.mrf.mxu0 }
 0x581   : > { %v4327_v38 = vpop.f32.mrf.mxu3 }
 0x582   : > { %v14873_v56 = vadd.f32 %v4327_v38, %v4279_v57  ;;  %v5849_v36 = vpop.f32.mrf.mxu2  ;;  %5951 = vmatmul.bf16.gmra.mxu0 %v14449_v46  ;;  %v10881_v38 = vor.u32 %v11757_v62, %v10878_v41 }
 0x583   : > { %v4390_v3 = vpop.f32.mrf.mxu1  ;;  %v5850_v0 = vadd.f32 %v5849_v36, %v14877_v47  ;;  %v11677_v36 = vld [vmem:[%s13380_s5 + $0x20c] sm:$0xf] }
 0x584   : > { %v4391_v60 = vadd.f32 %v4390_v3, %v4342_v53  ;;  %6234 = vmatpush.bf16.msrb.mxu2 %v10881_v38  ;;  %v10561_v53 = vor.u32 %v11677_v36, %v10558_v43  ;;  %v11058_v3 = vld [vmem:[%s13380_s5 + $0x604] sm:$0xf0] }
 0x586   : > { %6093 = vmatmul.bf16.vlgmr.msra.gmra.mxu3 %v16745_v48  ;;  %v4437_v7 = vmax.f32 %v4391_v60, 0.0  ;;  %v11717_v60 = vld [vmem:[%s13380_s5 + $0x34c] sm:$0xf]  ;;  %6136 = vmatpush.bf16.msrb.mxu0 %v10561_v53 }
 0x587   : > { %v4346_v28 = vpop.f32.mrf.mxu0 }
 0x588   : > { %v14881_v57 = vpack.c.bf16 %v4437_v7, %v4432_v5  ;;  %v4345_v5 = vadd.f32 %v4344_v52, %v14730_v18  ;;  %v4347_v41 = vadd.f32 %v4346_v28, %v14746_v58 }
 0x589   : > { %v5898_v55 = vpop.f32.mrf.mxu3 }
 0x58a   : > { %16761 = vst [vmem:[#allocation71_spill] sm:$0xff] %v14881_v57  ;;  %v14883_v8 = vadd.f32 %v5898_v55, %v5850_v0  ;;  %v5851_v22 = vpop.f32.mrf.mxu2  ;;  %6044 = vmatmul.bf16.vlgmr.msra.gmra.mxu2 %v14881_v57  ;;  %v11061_v0 = vor.u32 %v11802_v13, %v11058_v3  ;;  %v10718_v55 = vld [vmem:[%s13380_s5 + $0x35c] sm:$0xf0]  ;;  %v11752_v3 = vld [vmem:[%s13380_s5 + $0x464] sm:$0xf] }
 0x58b   : > { %v4393_v29 = vpop.f32.mrf.mxu1  ;;  %v5852_v37 = vadd.f32 %v5851_v22, %v14877_v47  ;;  %v10721_v62 = vor.u32 %v11717_v60, %v10718_v55  ;;  %v10858_v60 = vld [vmem:[%s13380_s5 + $0x474] sm:$0xf0] }
 0x58c   : > { %v4394_v38 = vadd.f32 %v4393_v29, %v4345_v5  ;;  %6282 = vmatpush.bf16.msrb.mxu3 %v11061_v0  ;;  %v10861_v5 = vor.u32 %v11752_v3, %v10858_v60 }
 0x58d   : > { %6185 = vmatpush.bf16.msrb.mxu1 %v10721_v62 }
 0x58e   : > { %6000 = vmatmul.bf16.gmra.mxu1 %v14710_v32  ;;  %v4442_v18 = vmax.f32 %v4394_v38, 0.0  ;;  %6235 = vmatpush.bf16.msrb.mxu2 %v10861_v5  ;;  %v11038_v38 = vld [vmem:[%s13380_s5 + $0x5dc] sm:$0xf0] }
 0x58f   : > { %v4349_v12 = vpop.f32.mrf.mxu0 }
 0x591   : > { %v5900_v7 = vpop.f32.mrf.mxu3 }
 0x592   : > { %v14897_v48 = vadd.f32 %v5900_v7, %v5852_v37  ;;  %v5854_v14 = vpop.f32.mrf.mxu2  ;;  %5956 = vmatmul.bf16.gmra.mxu0 %v14467_v9  ;;  %v10538_v7 = vld [vmem:[%s13380_s5 + $0x1f4] sm:$0xf0] }
 0x593   : > { %v4395_v22 = vpop.f32.mrf.mxu1  ;;  %v5855_v43 = vadd.f32 %v5854_v14, %v14877_v47  ;;  %v11672_v14 = vld [vmem:[%s13380_s5 + $0x1e4] sm:$0xf] }
 0x594   : > { %v4396_v36 = vadd.f32 %v4395_v22, %v4347_v41  ;;  %v10541_v62 = vor.u32 %v11672_v14, %v10538_v7  ;;  %v11797_v41 = vld [vmem:[%s13380_s5 + $0x5cc] sm:$0xf]  ;;  %v11712_v22 = vld [vmem:[%s13380_s5 + $0x324] sm:$0xf] }
 0x596   : > { %6098 = vmatmul.bf16.gmra.mxu3 %v16747_v4  ;;  %v4447_v52 = vmax.f32 %v4396_v36, 0.0  ;;  %v4350_v36 = vadd.f32 %v4349_v12, %v14752_v26  ;;  %6137 = vmatpush.bf16.msrb.mxu0 %v10541_v62 }
 0x597   : > { %v4351_v37 = vpop.f32.mrf.mxu0 }
 0x598   : > { %v14903_v58 = vpack.c.bf16 %v4447_v52, %v4442_v18  ;;  %v11041_v52 = vor.u32 %v11797_v41, %v11038_v38  ;;  %v4352_v60 = vadd.f32 %v4351_v37, %v14768_v30  ;;  %v11747_v38 = vld [vmem:[%s13380_s5 + $0x43c] sm:$0xf] }
 0x599   : > { %v5903_v28 = vpop.f32.mrf.mxu3 }
 0x59a   : > { %16762 = vst [vmem:[#allocation72_spill] sm:$0xff] %v14903_v58  ;;  %v14905_v29 = vadd.f32 %v5903_v28, %v5855_v43  ;;  %v5856_v53 = vpop.f32.mrf.mxu2  ;;  %6049 = vmatmul.bf16.gmra.mxu2 %v14903_v58  ;;  %v10698_v43 = vld [vmem:[%s13380_s5 + $0x334] sm:$0xf0]  ;;  %6283 = vmatpush.bf16.msrb.mxu3 %v11041_v52 }
 0x59b   : > { %v4398_v13 = vpop.f32.mrf.mxu1  ;;  %v5857_v0 = vadd.f32 %v5856_v53, %v14877_v47  ;;  %v10701_v3 = vor.u32 %v11712_v22, %v10698_v43  ;;  %v10838_v22 = vld [vmem:[%s13380_s5 + $0x44c] sm:$0xf0] }
 0x59c   : > { %v4399_v5 = vadd.f32 %v4398_v13, %v4350_v36  ;;  %v10841_v36 = vor.u32 %v11747_v38, %v10838_v22 }
 0x59d   : > { %6186 = vmatpush.bf16.msrb.mxu1 %v10701_v3 }
 0x59e   : > { %6005 = vmatmul.bf16.gmra.mxu1 %v14732_v16  ;;  %v4452_v26 = vmax.f32 %v4399_v5, 0.0  ;;  %6236 = vmatpush.bf16.msrb.mxu2 %v10841_v36  ;;  %v11018_v5 = vld [vmem:[%s13380_s5 + $0x5b4] sm:$0xf0] }
 0x59f   : > { %v4354_v55 = vpop.f32.mrf.mxu0 }
 0x5a1   : > { %v5905_v18 = vpop.f32.mrf.mxu3 }
 0x5a2   : > { %v14919_v28 = vadd.f32 %v5905_v18, %v5857_v0  ;;  %v5859_v4 = vpop.f32.mrf.mxu2  ;;  %5961 = vmatmul.bf16.gmra.mxu0 %v14485_v51  ;;  %v10518_v18 = vld [vmem:[%s13380_s5 + $0x1cc] sm:$0xf0] }
 0x5a3   : > { %v4400_v53 = vpop.f32.mrf.mxu1  ;;  %v5860_v7 = vadd.f32 %v5859_v4, %v14877_v47  ;;  %v11667_v4 = vld [vmem:[%s13380_s5 + $0x1bc] sm:$0xf] }
 0x5a4   : > { %v4401_v14 = vadd.f32 %v4400_v53, %v4352_v60  ;;  %v10521_v3 = vor.u32 %v11667_v4, %v10518_v18  ;;  %v11792_v60 = vld [vmem:[%s13380_s5 + $0x5a4] sm:$0xf]  ;;  %v11707_v53 = vld [vmem:[%s13380_s5 + $0x2fc] sm:$0xf] }
 0x5a6   : > { %6103 = vmatmul.bf16.gmra.mxu3 %v16749_v44  ;;  %v4457_v12 = vmax.f32 %v4401_v14, 0.0  ;;  %v4355_v14 = vadd.f32 %v4354_v55, %v14774_v34  ;;  %6138 = vmatpush.bf16.msrb.mxu0 %v10521_v3 }
 0x5a7   : > { %v4356_v0 = vpop.f32.mrf.mxu0 }
 0x5a8   : > { %v14925_v30 = vpack.c.bf16 %v4457_v12, %v4452_v26  ;;  %v11021_v12 = vor.u32 %v11792_v60, %v11018_v5  ;;  %v4357_v22 = vadd.f32 %v4356_v0, %v14790_v23  ;;  %v11742_v5 = vld [vmem:[%s13380_s5 + $0x414] sm:$0xf] }
 0x5a9   : > { %v5908_v37 = vpop.f32.mrf.mxu3 }
 0x5aa   : > { %16763 = vst [vmem:[#allocation73_spill] sm:$0xff] %v14925_v30  ;;  %v14927_v13 = vadd.f32 %v5908_v37, %v5860_v7  ;;  %v5861_v62 = vpop.f32.mrf.mxu2  ;;  %6054 = vmatmul.bf16.gmra.mxu2 %v14925_v30  ;;  %v10678_v7 = vld [vmem:[%s13380_s5 + $0x30c] sm:$0xf0]  ;;  %6284 = vmatpush.bf16.msrb.mxu3 %v11021_v12 }
 0x5ab   : > { %v4403_v41 = vpop.f32.mrf.mxu1  ;;  %v5862_v52 = vadd.f32 %v5861_v62, %v14877_v47  ;;  %v10681_v38 = vor.u32 %v11707_v53, %v10678_v7  ;;  %v10818_v53 = vld [vmem:[%s13380_s5 + $0x424] sm:$0xf0] }
 0x5ac   : > { %v4404_v36 = vadd.f32 %v4403_v41, %v4355_v14  ;;  %v10821_v14 = vor.u32 %v11742_v5, %v10818_v53 }
 0x5ad   : > { %6187 = vmatpush.bf16.msrb.mxu1 %v10681_v38 }
 0x5ae   : > { %6010 = vmatmul.bf16.gmra.mxu1 %v14754_v33  ;;  %v4462_v34 = vmax.f32 %v4404_v36, 0.0  ;;  %6237 = vmatpush.bf16.msrb.mxu2 %v10821_v14  ;;  %v10998_v36 = vld [vmem:[%s13380_s5 + $0x58c] sm:$0xf0] }
 0x5af   : > { %v4359_v43 = vpop.f32.mrf.mxu0 }
 0x5b1   : > { %v5910_v26 = vpop.f32.mrf.mxu3 }
 0x5b2   : > { %v14941_v37 = vadd.f32 %v5910_v26, %v5862_v52  ;;  %v5864_v44 = vpop.f32.mrf.mxu2  ;;  %5966 = vmatmul.bf16.gmra.mxu0 %v14503_v24  ;;  %v10498_v26 = vld [vmem:[%s13380_s5 + $0x1a4] sm:$0xf0] }
 0x5b3   : > { %v4405_v62 = vpop.f32.mrf.mxu1  ;;  %v5865_v18 = vadd.f32 %v5864_v44, %v14877_v47  ;;  %v11662_v44 = vld [vmem:[%s13380_s5 + $0x194] sm:$0xf] }
 0x5b4   : > { %v4406_v4 = vadd.f32 %v4405_v62, %v4357_v22  ;;  %v10501_v38 = vor.u32 %v11662_v44, %v10498_v26  ;;  %v11787_v22 = vld [vmem:[%s13380_s5 + $0x57c] sm:$0xf]  ;;  %v11702_v62 = vld [vmem:[%s13380_s5 + $0x2d4] sm:$0xf] }
 0x5b6   : > { %6108 = vmatmul.bf16.gmra.mxu3 %v16751_v45  ;;  %v4467_v55 = vmax.f32 %v4406_v4, 0.0  ;;  %v4360_v4 = vadd.f32 %v4359_v43, %v14796_v21  ;;  %6139 = vmatpush.bf16.msrb.mxu0 %v10501_v38 }
 0x5b7   : > { %v4361_v52 = vpop.f32.mrf.mxu0 }
 0x5b8   : > { %v14947_v23 = vpack.c.bf16 %v4467_v55, %v4462_v34  ;;  %v11001_v55 = vor.u32 %v11787_v22, %v10998_v36  ;;  %v4362_v53 = vadd.f32 %v4361_v52, %v14814_v6  ;;  %v11657_v22 = vld [vmem:[%s13380_s5 + $0x16c] sm:$0xf]  ;;  %v10478_v36 = vld [vmem:[%s13380_s5 + $0x17c] sm:$0xf0] }
 0x5b9   : > { %v5913_v0 = vpop.f32.mrf.mxu3 }
 0x5ba   : > { %16764 = vst [vmem:[#allocation74_spill] sm:$0xff] %v14947_v23  ;;  %v14949_v41 = vadd.f32 %v5913_v0, %v5865_v18  ;;  %v5866_v3 = vpop.f32.mrf.mxu2  ;;  %6059 = vmatmul.bf16.gmra.mxu2 %v14947_v23  ;;  %v10658_v18 = vld [vmem:[%s13380_s5 + $0x2e4] sm:$0xf0]  ;;  %6285 = vmatpush.bf16.msrb.mxu3 %v11001_v55  ;;  %v11737_v55 = vld [vmem:[%s13380_s5 + $0x3ec] sm:$0xf] }
 0x5bb   : > { %v4408_v60 = vpop.f32.mrf.mxu1  ;;  %v5867_v12 = vadd.f32 %v5866_v3, %v14877_v47  ;;  %v10661_v5 = vor.u32 %v11702_v62, %v10658_v18  ;;  %v10798_v18 = vld [vmem:[%s13380_s5 + $0x3fc] sm:$0xf0] }
 0x5bc   : > { %v4409_v14 = vadd.f32 %v4408_v60, %v4360_v4  ;;  %v10481_v4 = vor.u32 %v11657_v22, %v10478_v36  ;;  %v10638_v22 = vld [vmem:[%s13380_s5 + $0x2bc] sm:$0xf0] }
 0x5bd   : > { %6188 = vmatpush.bf16.msrb.mxu1 %v10661_v5  ;;  %v10801_v5 = vor.u32 %v11737_v55, %v10798_v18 }
 0x5be   : > { %6015 = vmatmul.bf16.gmra.mxu1 %v14776_v2  ;;  %v4472_v43 = vmax.f32 %v4409_v14, 0.0  ;;  %6140 = vmatpush.bf16.msrb.mxu0 %v10481_v4  ;;  %v10458_v14 = vld [vmem:[%s13380_s5 + $0x154] sm:$0xf0] }
 0x5bf   : > { %v4364_v7 = vpop.f32.mrf.mxu0  ;;  %6238 = vmatpush.bf16.msrb.mxu2 %v10801_v5 }
 0x5c0   : > { %v4365_v36 = vadd.f32 %v4364_v7, %v14820_v20 }
 0x5c1   : > { %v5915_v34 = vpop.f32.mrf.mxu3 }
 0x5c2   : > { %v14963_v0 = vadd.f32 %v5915_v34, %v5867_v12  ;;  %v5869_v3 = vpop.f32.mrf.mxu2  ;;  %5971 = vmatmul.bf16.gmra.mxu0 %v14523_v40 }
 0x5c3   : > { %v4410_v44 = vpop.f32.mrf.mxu1  ;;  %v5870_v12 = vadd.f32 %v5869_v3, %v14877_v47  ;;  %v11782_v3 = vld [vmem:[%s13380_s5 + $0x554] sm:$0xf] }
 0x5c4   : > { %v4411_v21 = vadd.f32 %v4410_v44, %v4362_v53  ;;  %v11652_v53 = vld [vmem:[%s13380_s5 + $0x144] sm:$0xf]  ;;  %v10978_v44 = vld [vmem:[%s13380_s5 + $0x564] sm:$0xf0] }
 0x5c6   : > { %6113 = vmatmul.bf16.gmra.mxu3 %v16753_v1  ;;  %v4477_v26 = vmax.f32 %v4411_v21, 0.0  ;;  %v10461_v21 = vor.u32 %v11652_v53, %v10458_v14 }
 0x5c7   : > { %v4366_v6 = vpop.f32.mrf.mxu0 }
 0x5c8   : > { %v14969_v52 = vpack.c.bf16 %v4477_v26, %v4472_v43  ;;  %6141 = vmatpush.bf16.msrb.mxu0 %v10461_v21  ;;  %v4367_v55 = vadd.f32 %v4366_v6, %v14836_v63 }
 0x5c9   : > { %v5918_v60 = vpop.f32.mrf.mxu3 }
 0x5ca   : > { %16765 = vst [vmem:[#allocation75_spill] sm:$0xff] %v14969_v52  ;;  %v14971_v38 = vadd.f32 %v5918_v60, %v5870_v12  ;;  %v5871_v62 = vpop.f32.mrf.mxu2  ;;  %6064 = vmatmul.bf16.gmra.mxu2 %v14969_v52  ;;  %v10981_v12 = vor.u32 %v11782_v3, %v10978_v44  ;;  %v11697_v60 = vld [vmem:[%s13380_s5 + $0x2ac] sm:$0xf]  ;;  %v11692_v3 = vld [vmem:[%s13380_s5 + $0x284] sm:$0xf] }
 0x5cb   : > { %v4413_v34 = vpop.f32.mrf.mxu1  ;;  %v5872_v43 = vadd.f32 %v5871_v62, %v14877_v47  ;;  %v10641_v45 = vor.u32 %v11697_v60, %v10638_v22  ;;  %v10778_v60 = vld [vmem:[%s13380_s5 + $0x3d4] sm:$0xf0]  ;;  %v11777_v22 = vld [vmem:[%s13380_s5 + $0x52c] sm:$0xf] }
 0x5cc   : > { %6286 = vmatpush.bf16.msrb.mxu3 %v10981_v12  ;;  %v4414_v18 = vadd.f32 %v4413_v34, %v4365_v36  ;;  %v11732_v12 = vld [vmem:[%s13380_s5 + $0x3c4] sm:$0xf] }
 0x5cd   : > { %6189 = vmatpush.bf16.msrb.mxu1 %v10641_v45  ;;  %v10618_v45 = vld [vmem:[%s13380_s5 + $0x294] sm:$0xf0]  ;;  %v10781_v36 = vor.u32 %v11732_v12, %v10778_v60 }
 0x5ce   : > { %6020 = vmatmul.bf16.gmra.mxu1 %v14800_v42  ;;  %v4482_v20 = vmax.f32 %v4414_v18, 0.0  ;;  %v10621_v21 = vor.u32 %v11692_v3, %v10618_v45 }
 0x5cf   : > { %v4369_v26 = vpop.f32.mrf.mxu0  ;;  %6239 = vmatpush.bf16.msrb.mxu2 %v10781_v36 }
 0x5d1   : > { %v5920_v1 = vpop.f32.mrf.mxu3  ;;  %6190 = vmatpush.bf16.msrb.mxu1 %v10621_v21 }
 0x5d2   : > { %v14987_v4 = vadd.f32 %v5920_v1, %v5872_v43  ;;  %v5874_v5 = vpop.f32.mrf.mxu2  ;;  %5976 = vmatmul.bf16.gmra.mxu0 %v14537_v15 }
 0x5d3   : > { %v4415_v62 = vpop.f32.mrf.mxu1  ;;  %v5875_v7 = vadd.f32 %v5874_v5, %v14877_v47 }
 0x5d4   : > { %v4416_v53 = vadd.f32 %v4415_v62, %v4367_v55  ;;  %v10958_v55 = vld [vmem:[%s13380_s5 + $0x53c] sm:$0xf0] }
 0x5d5   : > { %v10961_v18 = vor.u32 %v11777_v22, %v10958_v55 }
 0x5d6   : > { %6118 = vmatmul.bf16.gmra.mxu3 %v16755_v27  ;;  %v4487_v1 = vmax.f32 %v4416_v53, 0.0  ;;  %v11772_v53 = vld [vmem:[%s13380_s5 + $0x504] sm:$0xf] }
 0x5d7   : > { %v4371_v14 = vpop.f32.mrf.mxu0  ;;  %6287 = vmatpush.bf16.msrb.mxu3 %v10961_v18  ;;  %v10764_v18 = vld [vmem:[%s13380_s5 + $0x3a0] sm:$0xf] }
 0x5d8   : > { %v14993_v63 = vpack.c.bf16 %v4487_v1, %v4482_v20  ;;  %v10938_v20 = vld [vmem:[%s13380_s5 + $0x514] sm:$0xf0]  ;;  %v4370_v1 = vadd.f32 %v4369_v26, %v14842_v35  ;;  %v4372_v45 = vadd.f32 %v4371_v14, %v14855_v50 }
 0x5d9   : > { %v5923_v6 = vpop.f32.mrf.mxu3 }
 0x5da   : > { %16766 = vst [vmem:[#allocation55_spill] sm:$0xff] %v14993_v63  ;;  %v14995_v34 = vadd.f32 %v5923_v6, %v5875_v7  ;;  %v5876_v44 = vpop.f32.mrf.mxu2  ;;  %6069 = vmatmul.bf16.gmra.mxu2 %v14993_v63  ;;  %v10941_v6 = vor.u32 %v11772_v53, %v10938_v20 }
 0x5db   : > { %v4418_v43 = vpop.f32.mrf.mxu1  ;;  %v5877_v5 = vadd.f32 %v5876_v44, %v14877_v47 }
 0x5dc   : > { %v4419_v21 = vadd.f32 %v4418_v43, %v4370_v1  ;;  %6288 = vmatpush.bf16.msrb.mxu3 %v10941_v6  ;;  %v10444_v1 = vld [vmem:[%s13380_s5 + $0x120] sm:$0xf] }
 0x5de   : > { %6025 = vmatmul.bf16.gmra.mxu1 %v14827_v59  ;;  %v4492_v35 = vmax.f32 %v4419_v21, 0.0 }
 0x5df   : > { %v4374_v62 = vpop.f32.mrf.mxu0 }
 0x5e1   : > { %v5925_v7 = vpop.f32.mrf.mxu3 }
 0x5e2   : > { %v15009_v3 = vadd.f32 %v5925_v7, %v5877_v5  ;;  %v5879_v12 = vpop.f32.mrf.mxu2  ;;  %5981 = vmatmul.bf16.gmra.mxu0 %v14556_v54  ;;  %v11730_v5 = vld [vmem:[%s13380_s5 + $0x3b0] sm:$0xf0] }
 0x5e3   : > { %v4420_v60 = vpop.f32.mrf.mxu1  ;;  %v5880_v22 = vadd.f32 %v5879_v12, %v14877_v47  ;;  %v10765_v20 = vor.u32 %v11730_v5, %v10764_v18  ;;  %v11650_v7 = vld [vmem:[%s13380_s5 + $0x130] sm:$0xf0]  ;;  %v4375_v12 = vadd.f32 %v4374_v62, %v14860_v19 }
 0x5e4   : > { %v4421_v44 = vadd.f32 %v4420_v60, %v4372_v45  ;;  %v10445_v6 = vor.u32 %v11650_v7, %v10444_v1 }
 0x5e5   : > { %6428 = vmatpush.bf16.msra.mxu2 %v10765_v20 }
 0x5e6   : > { %6123 = vmatmul.bf16.gmra.mxu3 %v16757_v49  ;;  %v4497_v26 = vmax.f32 %v4421_v44, 0.0  ;;  %6330 = vmatpush.bf16.msra.mxu0 %v10445_v6 }
 0x5e7   : > { %v4376_v36 = vpop.f32.mrf.mxu0 }
 0x5e8   : > { %v15015_v55 = vpack.c.bf16 %v4497_v26, %v4492_v35  ;;  %v10604_v35 = vld [vmem:[%s13380_s5 + $0x260] sm:$0xf]  ;;  %v11690_v26 = vld [vmem:[%s13380_s5 + $0x270] sm:$0xf0]  ;;  %v4377_v18 = vadd.f32 %v4376_v36, %v14873_v56 }
 0x5e9   : > { %v5928_v50 = vpop.f32.mrf.mxu3 }
 0x5ea   : > { %16767 = vst [vmem:[#allocation56_spill] sm:$0xff] %v15015_v55  ;;  %v15017_v14 = vadd.f32 %v5928_v50, %v5880_v22  ;;  %v5881_v43 = vpop.f32.mrf.mxu2  ;;  %6074 = vmatmul.bf16.gmra.mxu2 %v15015_v55  ;;  %v10605_v50 = vor.u32 %v11690_v26, %v10604_v35 }
 0x5eb   : > { %v4423_v53 = vpop.f32.mrf.mxu1  ;;  %v5882_v45 = vadd.f32 %v5881_v43, %v14877_v47 }
 0x5ec   : > { %v4424_v5 = vadd.f32 %v4423_v53, %v4375_v12  ;;  %6379 = vmatpush.bf16.msra.mxu1 %v10605_v50  ;;  %v10424_v50 = vld [vmem:[%s13380_s5 + $0xf8] sm:$0xf] }
 0x5ee   : > { %6030 = vmatmul.bf16.gmra.mxu1 %v14846_v11  ;;  %v4502_v19 = vmax.f32 %v4424_v5, 0.0  ;;  %v10924_v5 = vld [vmem:[%s13380_s5 + $0x4e0] sm:$0xf] }
 0x5ef   : > { %v5947_v21 = vpop.f32.mrf.mxu0 }
 0x5f0   : > { %v5948_v44 = vadd.f32 %v5947_v21, %v14883_v8  ;;  %v11725_v21 = vld [vmem:[%s13380_s5 + $0x388] sm:$0xf0] }
 0x5f1   : > { %v5930_v60 = vpop.f32.mrf.mxu3 }
 0x5f2   : > { %v15030_v22 = vadd.f32 %v5930_v60, %v5882_v45  ;;  %v5884_v20 = vpop.f32.mrf.mxu2  ;;  %6142 = vmatmul.bf16.vlgmr.msrb.gmra.mxu0 %v16746_v61  ;;  %v10744_v45 = vld [vmem:[%s13380_s5 + $0x378] sm:$0xf] }
 0x5f3   : > { %v4425_v43 = vpop.f32.mrf.mxu1  ;;  %v5885_v62 = vadd.f32 %v5884_v20, %v14877_v47  ;;  %v10745_v60 = vor.u32 %v11725_v21, %v10744_v45 }
 0x5f4   : > { %v4426_v1 = vadd.f32 %v4425_v43, %v4377_v18  ;;  %v11645_v18 = vld [vmem:[%s13380_s5 + $0x108] sm:$0xf0]  ;;  %v11770_v43 = vld [vmem:[%s13380_s5 + $0x4f0] sm:$0xf0] }
 0x5f5   : > { %6429 = vmatpush.bf16.msra.mxu2 %v10745_v60  ;;  %v10425_v20 = vor.u32 %v11645_v18, %v10424_v50  ;;  %v11720_v50 = vld [vmem:[%s13380_s5 + $0x360] sm:$0xf0] }
 0x5f6   : > { %6128 = vmatmul.bf16.gmra.mxu3 %v16760_v17  ;;  %v4507_v8 = vmax.f32 %v4426_v1, 0.0 }
 0x5f7   : > { %v5949_v7 = vpop.f32.mrf.mxu0  ;;  %6331 = vmatpush.bf16.msra.mxu0 %v10425_v20 }
 0x5f8   : > { %v15036_v56 = vpack.c.bf16 %v4507_v8, %v4502_v19  ;;  %v5950_v53 = vadd.f32 %v5949_v7, %v14897_v48  ;;  %v10925_v48 = vor.u32 %v11770_v43, %v10924_v5  ;;  %v11685_v7 = vld [vmem:[%s13380_s5 + $0x248] sm:$0xf0]  ;;  %v10404_v43 = vld [vmem:[%s13380_s5 + $0xd0] sm:$0xf] }
 0x5f9   : > { %v5933_v36 = vpop.f32.mrf.mxu3 }
 0x5fa   : > { %16768 = vst [vmem:[#allocation57_spill] sm:$0xff] %v15036_v56  ;;  %v15039_v6 = vadd.f32 %v5933_v36, %v5885_v62  ;;  %6079 = vmatmul.bf16.gmra.mxu2 %v15036_v56  ;;  %v5886_v35 = vpop.f32.mrf.mxu2  ;;  %6477 = vmatpush.bf16.msra.mxu3 %v10925_v48  ;;  %v11640_v48 = vld [vmem:[%s13380_s5 + $0xe0] sm:$0xf0] }
 0x5fb   : > { %v5996_v12 = vpop.f32.mrf.mxu1  ;;  %v5887_v1 = vadd.f32 %v5886_v35, %v14877_v47  ;;  %v10724_v35 = vld [vmem:[%s13380_s5 + $0x350] sm:$0xf] }
 0x5fc   : > { %v5997_v26 = vadd.f32 %v5996_v12, %v5948_v44  ;;  %v10584_v44 = vld [vmem:[%s13380_s5 + $0x238] sm:$0xf]  ;;  %v10725_v5 = vor.u32 %v11720_v50, %v10724_v35 }
 0x5fd   : > { %v10585_v45 = vor.u32 %v11685_v7, %v10584_v44 }
 0x5fe   : > { %6191 = vmatmul.bf16.vlgmr.msrb.gmra.mxu1 %v14431_v10  ;;  %6430 = vmatpush.bf16.msra.mxu2 %v10725_v5 }
 0x5ff   : > { %v5952_v19 = vpop.f32.mrf.mxu0  ;;  %6380 = vmatpush.bf16.msra.mxu1 %v10585_v45 }
 0x600   : > { %v5953_v62 = vadd.f32 %v5952_v19, %v14905_v29  ;;  %v10405_v19 = vor.u32 %v11640_v48, %v10404_v43 }
 0x601   : > { %v5935_v8 = vpop.f32.mrf.mxu3 }
 0x602   : > { %v15053_v36 = vadd.f32 %v5935_v8, %v5887_v1  ;;  %6147 = vmatmul.bf16.gmra.mxu0 %v16748_v31  ;;  %v11765_v8 = vld [vmem:[%s13380_s5 + $0x4c8] sm:$0xf0] }
 0x603   : > { %v5998_v21 = vpop.f32.mrf.mxu1  ;;  %6332 = vmatpush.bf16.msra.mxu0 %v10405_v19 }
 0x604   : > { %v5999_v47 = vadd.f32 %v5998_v21, %v5950_v53  ;;  %v10904_v53 = vld [vmem:[%s13380_s5 + $0x4b8] sm:$0xf] }
 0x606   : > { %6289 = vmatmul.bf16.vlgmr.msrb.gmra.mxu3 %v14881_v57 }
 0x607   : > { %v5954_v12 = vpop.f32.mrf.mxu0 }
 0x608   : > { %v5955_v29 = vadd.f32 %v5954_v12, %v14919_v28  ;;  %v10905_v28 = vor.u32 %v11765_v8, %v10904_v53  ;;  %v11680_v12 = vld [vmem:[%s13380_s5 + $0x220] sm:$0xf0]  ;;  %v11715_v8 = vld [vmem:[%s13380_s5 + $0x338] sm:$0xf0] }
 0x609   : > { %v15058_v60 = vpop.f32.mrf.mxu3 }
 0x60a   : > { %6240 = vmatmul.bf16.vlgmr.msrb.gmra.mxu2 %v14688_v39  ;;  %6478 = vmatpush.bf16.msra.mxu3 %v10905_v28 }
 0x60b   : > { %v6001_v18 = vpop.f32.mrf.mxu1 }
 0x60c   : > { %v6002_v20 = vadd.f32 %v6001_v18, %v5953_v62  ;;  %v10564_v62 = vld [vmem:[%s13380_s5 + $0x210] sm:$0xf] }
 0x60d   : > { %v6045_v1 = vpop.f32.mrf.mxu2  ;;  %v10565_v35 = vor.u32 %v11680_v12, %v10564_v62  ;;  %v10384_v12 = vld [vmem:[%s13380_s5 + $0xa8] sm:$0xf] }
 0x60e   : > { %v6046_v44 = vadd.f32 %v6045_v1, %v5997_v26  ;;  %6196 = vmatmul.bf16.gmra.mxu1 %v14449_v46 }
 0x60f   : > { %v5957_v7 = vpop.f32.mrf.mxu0  ;;  %6381 = vmatpush.bf16.msra.mxu1 %v10565_v35 }
 0x610   : > { %v5958_v45 = vadd.f32 %v5957_v7, %v14927_v13  ;;  %v7065_v43 = vmax.f32 %v6046_v44, 0.0  ;;  %v10884_v44 = vld [vmem:[%s13380_s5 + $0x490] sm:$0xf] }
 0x611   : > { %v15069_v21 = vpop.f32.mrf.mxu3 }
 0x612   : > { %6152 = vmatmul.bf16.gmra.mxu0 %v16750_v25 }
 0x613   : > { %v6003_v50 = vpop.f32.mrf.mxu1 }
 0x614   : > { %v6004_v26 = vadd.f32 %v6003_v50, %v5955_v29  ;;  %v10704_v29 = vld [vmem:[%s13380_s5 + $0x328] sm:$0xf] }
 0x615   : > { %v6047_v18 = vpop.f32.mrf.mxu2  ;;  %v10705_v7 = vor.u32 %v11715_v8, %v10704_v29  ;;  %v11675_v29 = vld [vmem:[%s13380_s5 + $0x1f8] sm:$0xf0] }
 0x616   : > { %6294 = vmatmul.bf16.gmra.mxu3 %v14903_v58  ;;  %v6048_v13 = vadd.f32 %v6047_v18, %v5999_v47  ;;  %v11635_v47 = vld [vmem:[%s13380_s5 + $0xb8] sm:$0xf0] }
 0x617   : > { %v5959_v5 = vpop.f32.mrf.mxu0  ;;  %6431 = vmatpush.bf16.msra.mxu2 %v10705_v7  ;;  %v10385_v50 = vor.u32 %v11635_v47, %v10384_v12 }
 0x618   : > { %v7070_v48 = vmax.f32 %v6048_v13, 0.0  ;;  %v5960_v53 = vadd.f32 %v5959_v5, %v14941_v37  ;;  %v11760_v37 = vld [vmem:[%s13380_s5 + $0x4a0] sm:$0xf0] }
 0x619   : > { %v15076_v1 = vpop.f32.mrf.mxu3  ;;  %v10885_v13 = vor.u32 %v11760_v37, %v10884_v44  ;;  %6333 = vmatpush.bf16.msra.mxu0 %v10385_v50 }
 0x61a   : > { %v15078_v19 = vpack.c.bf16 %v7070_v48, %v7065_v43  ;;  %6245 = vmatmul.bf16.gmra.mxu2 %v14710_v32 }
 0x61b   : > { %v6006_v28 = vpop.f32.mrf.mxu1  ;;  %6479 = vmatpush.bf16.msra.mxu3 %v10885_v13  ;;  %v10684_v13 = vld [vmem:[%s13380_s5 + $0x300] sm:$0xf] }
 0x61c   : > { %16769 = vst [vmem:[#allocation81_spill] sm:$0xff] %v15078_v19  ;;  %v6007_v62 = vadd.f32 %v6006_v28, %v5958_v45  ;;  %v10544_v45 = vld [vmem:[%s13380_s5 + $0x1e8] sm:$0xf] }
 0x61d   : > { %v6050_v35 = vpop.f32.mrf.mxu2  ;;  %v10545_v8 = vor.u32 %v11675_v29, %v10544_v45  ;;  %v16770_v28 = vld [vmem:[#allocation59_spill] sm:$0xff] }
 0x61e   : > { %v6051_v18 = vadd.f32 %v6050_v35, %v6002_v20  ;;  %6201 = vmatmul.bf16.gmra.mxu1 %v14467_v9 }
 0x61f   : > { %v5962_v5 = vpop.f32.mrf.mxu0  ;;  %6382 = vmatpush.bf16.msra.mxu1 %v10545_v8 }
 0x620   : > { %v5963_v43 = vadd.f32 %v5962_v5, %v14949_v41  ;;  %v7075_v44 = vmax.f32 %v6051_v18, 0.0  ;;  %v11710_v5 = vld [vmem:[%s13380_s5 + $0x310] sm:$0xf0]  ;;  %v10864_v18 = vld [vmem:[%s13380_s5 + $0x468] sm:$0xf] }
 0x621   : > { %v15089_v48 = vpop.f32.mrf.mxu3  ;;  %v10685_v29 = vor.u32 %v11710_v5, %v10684_v13  ;;  %v11670_v13 = vld [vmem:[%s13380_s5 + $0x1d0] sm:$0xf0] }
 0x622   : > { %6157 = vmatmul.bf16.gmra.mxu0 %v16770_v28 }
 0x623   : > { %v6008_v7 = vpop.f32.mrf.mxu1  ;;  %6432 = vmatpush.bf16.msra.mxu2 %v10685_v29 }
 0x624   : > { %v6009_v20 = vadd.f32 %v6008_v7, %v5960_v53  ;;  %v10364_v7 = vld [vmem:[%s13380_s5 + $0x80] sm:$0xf] }
 0x625   : > { %v6052_v12 = vpop.f32.mrf.mxu2 }
 0x626   : > { %6299 = vmatmul.bf16.gmra.mxu3 %v14925_v30  ;;  %v6053_v41 = vadd.f32 %v6052_v12, %v6004_v26  ;;  %v11630_v26 = vld [vmem:[%s13380_s5 + $0x90] sm:$0xf0] }
 0x627   : > { %v5964_v47 = vpop.f32.mrf.mxu0 }
 0x628   : > { %v7080_v35 = vmax.f32 %v6053_v41, 0.0  ;;  %v5965_v50 = vadd.f32 %v5964_v47, %v14963_v0  ;;  %v10365_v41 = vor.u32 %v11630_v26, %v10364_v7  ;;  %v11755_v0 = vld [vmem:[%s13380_s5 + $0x478] sm:$0xf0] }
 0x629   : > { %v15096_v37 = vpop.f32.mrf.mxu3  ;;  %v10865_v19 = vor.u32 %v11755_v0, %v10864_v18  ;;  %v11705_v0 = vld [vmem:[%s13380_s5 + $0x2e8] sm:$0xf0] }
 0x62a   : > { %6250 = vmatmul.bf16.gmra.mxu2 %v14732_v16  ;;  %v15101_v53 = vpack.c.bf16 %v7080_v35, %v7075_v44  ;;  %6334 = vmatpush.bf16.msra.mxu0 %v10365_v41  ;;  %v10664_v41 = vld [vmem:[%s13380_s5 + $0x2d8] sm:$0xf] }
 0x62b   : > { %v6011_v45 = vpop.f32.mrf.mxu1  ;;  %6480 = vmatpush.bf16.msra.mxu3 %v10865_v19 }
 0x62c   : > { %16771 = vst [vmem:[#allocation54_spill] sm:$0xff] %v15101_v53  ;;  %v6012_v8 = vadd.f32 %v6011_v45, %v5963_v43  ;;  %v10524_v43 = vld [vmem:[%s13380_s5 + $0x1c0] sm:$0xf]  ;;  %v16772_v45 = vld [vmem:[#allocation61_spill] sm:$0xff] }
 0x62d   : > { %v6055_v12 = vpop.f32.mrf.mxu2  ;;  %v10525_v5 = vor.u32 %v11670_v13, %v10524_v43  ;;  %v10665_v13 = vor.u32 %v11705_v0, %v10664_v41  ;;  %v11665_v41 = vld [vmem:[%s13380_s5 + $0x1a8] sm:$0xf0] }
 0x62e   : > { %v6056_v47 = vadd.f32 %v6055_v12, %v6007_v62  ;;  %6206 = vmatmul.bf16.gmra.mxu1 %v14485_v51 }
 0x62f   : > { %v5967_v30 = vpop.f32.mrf.mxu0  ;;  %6383 = vmatpush.bf16.msra.mxu1 %v10525_v5  ;;  %6433 = vmatpush.bf16.msra.mxu2 %v10665_v13 }
 0x630   : > { %v5968_v44 = vadd.f32 %v5967_v30, %v14971_v38  ;;  %v7085_v26 = vmax.f32 %v6056_v47, 0.0  ;;  %v10844_v47 = vld [vmem:[%s13380_s5 + $0x440] sm:$0xf] }
 0x631   : > { %v15109_v35 = vpop.f32.mrf.mxu3 }
 0x632   : > { %6162 = vmatmul.bf16.gmra.mxu0 %v16772_v45 }
 0x633   : > { %v6013_v29 = vpop.f32.mrf.mxu1 }
 0x634   : > { %v6014_v62 = vadd.f32 %v6013_v29, %v5965_v50  ;;  %v10344_v29 = vld [vmem:[%s13380_s5 + $0x58] sm:$0xf] }
 0x635   : > { %v6057_v7 = vpop.f32.mrf.mxu2 }
 0x636   : > { %6304 = vmatmul.bf16.gmra.mxu3 %v14947_v23  ;;  %v6058_v30 = vadd.f32 %v6057_v7, %v6009_v20  ;;  %v11625_v20 = vld [vmem:[%s13380_s5 + $0x68] sm:$0xf0] }
 0x637   : > { %v5969_v38 = vpop.f32.mrf.mxu0 }
 0x638   : > { %v7090_v19 = vmax.f32 %v6058_v30, 0.0  ;;  %v5970_v18 = vadd.f32 %v5969_v38, %v14987_v4  ;;  %v10345_v30 = vor.u32 %v11625_v20, %v10344_v29  ;;  %v11750_v4 = vld [vmem:[%s13380_s5 + $0x450] sm:$0xf0] }
 0x639   : > { %v15116_v12 = vpop.f32.mrf.mxu3  ;;  %v10845_v53 = vor.u32 %v11750_v4, %v10844_v47  ;;  %v11620_v4 = vld [vmem:[%s13380_s5 + $0x40] sm:$0xf0] }
 0x63a   : > { %6255 = vmatmul.bf16.gmra.mxu2 %v14754_v33  ;;  %v15121_v50 = vpack.c.bf16 %v7090_v19, %v7085_v26  ;;  %6335 = vmatpush.bf16.msra.mxu0 %v10345_v30  ;;  %v10324_v30 = vld [vmem:[%s13380_s5 + $0x30] sm:$0xf] }
 0x63b   : > { %v6016_v43 = vpop.f32.mrf.mxu1  ;;  %6481 = vmatpush.bf16.msra.mxu3 %v10845_v53 }
 0x63c   : > { %16773 = vst [vmem:[#allocation59_spill] sm:$0xff] %v15121_v50  ;;  %v6017_v5 = vadd.f32 %v6016_v43, %v5968_v44  ;;  %v10504_v44 = vld [vmem:[%s13380_s5 + $0x198] sm:$0xf]  ;;  %v16774_v43 = vld [vmem:[#allocation63_spill] sm:$0xff] }
 0x63d   : > { %v6060_v7 = vpop.f32.mrf.mxu2  ;;  %v10505_v0 = vor.u32 %v11665_v41, %v10504_v44  ;;  %v11700_v44 = vld [vmem:[%s13380_s5 + $0x2c0] sm:$0xf0]  ;;  %v10325_v41 = vor.u32 %v11620_v4, %v10324_v30  ;;  %v10304_v50 = vld [vmem:[%s13380_s5 + $0x8] sm:$0xf] }
 0x63e   : > { %v6061_v38 = vadd.f32 %v6060_v7, %v6012_v8  ;;  %6211 = vmatmul.bf16.gmra.mxu1 %v14503_v24  ;;  %v11660_v4 = vld [vmem:[%s13380_s5 + $0x180] sm:$0xf0] }
 0x63f   : > { %v5972_v23 = vpop.f32.mrf.mxu0  ;;  %6384 = vmatpush.bf16.msra.mxu1 %v10505_v0  ;;  %6336 = vmatpush.bf16.msra.mxu0 %v10325_v41 }
 0x640   : > { %v5973_v26 = vadd.f32 %v5972_v23, %v14995_v34  ;;  %v7095_v34 = vmax.f32 %v6061_v38, 0.0 }
 0x641   : > { %v15129_v19 = vpop.f32.mrf.mxu3 }
 0x642   : > { %6167 = vmatmul.bf16.gmra.mxu0 %v16774_v43 }
 0x643   : > { %v6018_v8 = vpop.f32.mrf.mxu1 }
 0x644   : > { %v6019_v13 = vadd.f32 %v6018_v8, %v5970_v18  ;;  %v10644_v18 = vld [vmem:[%s13380_s5 + $0x2b0] sm:$0xf] }
 0x645   : > { %v6062_v29 = vpop.f32.mrf.mxu2  ;;  %v10645_v8 = vor.u32 %v11700_v44, %v10644_v18  ;;  %v16776_v44 = vld [vmem:[#allocation65_spill] sm:$0xff] }
 0x646   : > { %6309 = vmatmul.bf16.gmra.mxu3 %v14969_v52  ;;  %v6063_v20 = vadd.f32 %v6062_v29, %v6014_v62  ;;  %v11745_v29 = vld [vmem:[%s13380_s5 + $0x428] sm:$0xf0]  ;;  %v11615_v52 = vld [vmem:[%s13380_s5 + $0x18] sm:$0xf0] }
 0x647   : > { %v5974_v23 = vpop.f32.mrf.mxu0  ;;  %6434 = vmatpush.bf16.msra.mxu2 %v10645_v8  ;;  %v10305_v57 = vor.u32 %v11615_v52, %v10304_v50 }
 0x648   : > { %v7100_v53 = vmax.f32 %v6063_v20, 0.0  ;;  %v5975_v47 = vadd.f32 %v5974_v23, %v15009_v3  ;;  %v10824_v3 = vld [vmem:[%s13380_s5 + $0x418] sm:$0xf] }
 0x649   : > { %v15136_v7 = vpop.f32.mrf.mxu3  ;;  %v10825_v23 = vor.u32 %v11745_v29, %v10824_v3  ;;  %6337 = vmatpush.bf16.msra.mxu0 %v10305_v57  ;;  %v10464_v29 = vld [vmem:[%s13380_s5 + $0x148] sm:$0xf] }
 0x64a   : > { %6260 = vmatmul.bf16.gmra.mxu2 %v14776_v2  ;;  %v15143_v0 = vpack.c.bf16 %v7100_v53, %v7095_v34 }
 0x64b   : > { %v6021_v62 = vpop.f32.mrf.mxu1  ;;  %6482 = vmatpush.bf16.msra.mxu3 %v10825_v23  ;;  %v10624_v23 = vld [vmem:[%s13380_s5 + $0x288] sm:$0xf] }
 0x64c   : > { %16775 = vst [vmem:[#allocation61_spill] sm:$0xff] %v15143_v0  ;;  %v6022_v38 = vadd.f32 %v6021_v62, %v5973_v26  ;;  %v10484_v26 = vld [vmem:[%s13380_s5 + $0x170] sm:$0xf]  ;;  %v10784_v0 = vld [vmem:[%s13380_s5 + $0x3c8] sm:$0xf] }
 0x64d   : > { %v6065_v20 = vpop.f32.mrf.mxu2  ;;  %v10485_v18 = vor.u32 %v11660_v4, %v10484_v26 }
 0x64e   : > { %v6066_v58 = vadd.f32 %v6065_v20, %v6017_v5  ;;  %6216 = vmatmul.bf16.gmra.mxu1 %v14523_v40  ;;  %v11655_v20 = vld [vmem:[%s13380_s5 + $0x158] sm:$0xf0] }
 0x64f   : > { %v5977_v30 = vpop.f32.mrf.mxu0  ;;  %6385 = vmatpush.bf16.msra.mxu1 %v10485_v18  ;;  %v10804_v18 = vld [vmem:[%s13380_s5 + $0x3f0] sm:$0xf] }
 0x650   : > { %v5978_v34 = vadd.f32 %v5977_v30, %v15017_v14  ;;  %v7105_v62 = vmax.f32 %v6066_v58, 0.0  ;;  %v11695_v30 = vld [vmem:[%s13380_s5 + $0x298] sm:$0xf0]  ;;  %v11740_v58 = vld [vmem:[%s13380_s5 + $0x400] sm:$0xf0] }
 0x651   : > { %v15151_v53 = vpop.f32.mrf.mxu3  ;;  %v10625_v4 = vor.u32 %v11695_v30, %v10624_v23 }
 0x652   : > { %6172 = vmatmul.bf16.gmra.mxu0 %v16776_v44 }
 0x653   : > { %v6023_v5 = vpop.f32.mrf.mxu1  ;;  %6435 = vmatpush.bf16.msra.mxu2 %v10625_v4 }
 0x654   : > { %v6024_v41 = vadd.f32 %v6023_v5, %v5975_v47  ;;  %v10465_v47 = vor.u32 %v11655_v20, %v10464_v29  ;;  %v16778_v20 = vld [vmem:[#allocation67_spill] sm:$0xff] }
 0x655   : > { %v6067_v52 = vpop.f32.mrf.mxu2 }
 0x656   : > { %6314 = vmatmul.bf16.gmra.mxu3 %v14993_v63  ;;  %v6068_v14 = vadd.f32 %v6067_v52, %v6019_v13  ;;  %6386 = vmatpush.bf16.msra.mxu1 %v10465_v47  ;;  %v11735_v63 = vld [vmem:[%s13380_s5 + $0x3d8] sm:$0xf0] }
 0x657   : > { %v5979_v50 = vpop.f32.mrf.mxu0  ;;  %v10785_v29 = vor.u32 %v11735_v63, %v10784_v0  ;;  %v15181_v63 = vld [vmem:[%s13383_s28] sm:$0x1f] }
 0x658   : > { %v7110_v8 = vmax.f32 %v6068_v14, 0.0  ;;  %v5980_v3 = vadd.f32 %v5979_v50, %v15030_v22  ;;  %v10805_v22 = vor.u32 %v11740_v58, %v10804_v18  ;;  %v15184_v0 = vperm.slane %v15181_v63, 1  ;;  %v10606_v58 = vld [vmem:[%s13380_s5 + $0x274] sm:$0xf0] }
 0x659   : > { %v15158_v57 = vpop.f32.mrf.mxu3 }
 0x65a   : > { %6265 = vmatmul.bf16.gmra.mxu2 %v14800_v42  ;;  %v15165_v26 = vpack.c.bf16 %v7110_v8, %v7105_v62  ;;  %6483 = vmatpush.bf16.msra.mxu3 %v10805_v22 }
 0x65b   : > { %v6026_v13 = vpop.f32.mrf.mxu1 }
 0x65c   : > { %16777 = vst [vmem:[#allocation63_spill] sm:$0xff] %v15165_v26  ;;  %v6027_v5 = vadd.f32 %v6026_v13, %v5978_v34  ;;  %v11064_v26 = vld [vmem:[%s13380_s5 + $0x5f8] sm:$0xf] }
 0x65d   : > { %v6070_v52 = vpop.f32.mrf.mxu2 }
 0x65e   : > { %v6071_v14 = vadd.f32 %v6070_v52, %v6022_v38  ;;  %6221 = vmatmul.bf16.gmra.mxu1 %v14537_v15  ;;  %6484 = vmatpush.bf16.msra.mxu3 %v10785_v29 }
 0x65f   : > { %v5982_v50 = vpop.f32.mrf.mxu0 }
 0x660   : > { %v5983_v62 = vadd.f32 %v5982_v50, %v15039_v6  ;;  %v7115_v13 = vmax.f32 %v6071_v14, 0.0  ;;  %v11084_v50 = vld [vmem:[%s13380_s5 + $0x620] sm:$0xf] }
 0x661   : > { %v15173_v8 = vpop.f32.mrf.mxu3 }
 0x662   : > { %6177 = vmatmul.bf16.gmra.mxu0 %v16778_v20 }
 0x663   : > { %v6028_v34 = vpop.f32.mrf.mxu1 }
 0x664   : > { %v6029_v23 = vadd.f32 %v6028_v34, %v5980_v3  ;;  %v11688_v3 = vld [vmem:[%s13380_s5 + $0x264] sm:$0xf] }
 0x665   : > { %v6072_v38 = vpop.f32.mrf.mxu2  ;;  %v10609_v52 = vor.u32 %v11688_v3, %v10606_v58  ;;  %v11648_v3 = vld [vmem:[%s13380_s5 + $0x124] sm:$0xf] }
 0x666   : > { %6319 = vmatmul.bf16.gmra.mxu3 %v15015_v55  ;;  %v6073_v30 = vadd.f32 %v6072_v38, %v6024_v41  ;;  %v6095_v38 = vadd.f32 %v15058_v60, %v15184_v0 }
 0x667   : > { %v5984_v47 = vpop.f32.mrf.mxu0  ;;  %6624 = vmatpush.bf16.msrb.mxu2 %v10609_v52 }
 0x668   : > { %v7120_v4 = vmax.f32 %v6073_v30, 0.0  ;;  %v5985_v6 = vadd.f32 %v5984_v47, %v15053_v36  ;;  %v11810_v36 = vld [vmem:[%s13380_s5 + $0x630] sm:$0xf0] }
 0x669   : > { %v15178_v18 = vpop.f32.mrf.mxu3  ;;  %v11085_v34 = vor.u32 %v11810_v36, %v11084_v50 }
 0x66a   : > { %6270 = vmatmul.bf16.gmra.mxu2 %v14827_v59  ;;  %v15189_v22 = vpack.c.bf16 %v7120_v4, %v7115_v13 }
 0x66b   : > { %v6031_v41 = vpop.f32.mrf.mxu1  ;;  %6526 = vmatpush.bf16.msrb.mxu0 %v11085_v34 }
 0x66c   : > { %16779 = vst [vmem:[#allocation65_spill] sm:$0xff] %v15189_v22  ;;  %v6032_v14 = vadd.f32 %v6031_v41, %v5983_v62  ;;  %v16780_v22 = vld [vmem:[#allocation76_spill] sm:$0xff]  ;;  %v10446_v62 = vld [vmem:[%s13380_s5 + $0x134] sm:$0xf0] }
 0x66d   : > { %v6075_v29 = vpop.f32.mrf.mxu2  ;;  %v10449_v41 = vor.u32 %v11648_v3, %v10446_v62 }
 0x66e   : > { %v6076_v30 = vadd.f32 %v6075_v29, %v6027_v5  ;;  %6226 = vmatmul.bf16.gmra.mxu1 %v14556_v54  ;;  %v6097_v5 = vadd.f32 %v15069_v21, %v15184_v0 }
 0x66f   : > { %v6143_v47 = vpop.f32.mrf.mxu0  ;;  %6575 = vmatpush.bf16.msrb.mxu1 %v10449_v41  ;;  %v10586_v41 = vld [vmem:[%s13380_s5 + $0x24c] sm:$0xf0] }
 0x670   : > { %v6144_v4 = vadd.f32 %v6143_v47, %v6095_v38  ;;  %v7125_v29 = vmax.f32 %v6076_v30, 0.0  ;;  %v10766_v30 = vld [vmem:[%s13380_s5 + $0x3b4] sm:$0xf0] }
 0x671   : > { %v15196_v13 = vpop.f32.mrf.mxu3 }
 0x672   : > { %6338 = vmatmul.bf16.vlgmr.msra.gmra.mxu0 %v16780_v22 }
 0x673   : > { %v6033_v58 = vpop.f32.mrf.mxu1 }
 0x674   : > { %v6034_v52 = vadd.f32 %v6033_v58, %v5985_v6  ;;  %v11683_v58 = vld [vmem:[%s13380_s5 + $0x23c] sm:$0xf] }
 0x675   : > { %v6077_v60 = vpop.f32.mrf.mxu2 }
 0x676   : > { %6324 = vmatmul.bf16.gmra.mxu3 %v15036_v56  ;;  %v6078_v50 = vadd.f32 %v6077_v60, %v6029_v23  ;;  %v10589_v56 = vor.u32 %v11683_v58, %v10586_v41  ;;  %v11805_v23 = vld [vmem:[%s13380_s5 + $0x608] sm:$0xf0]  ;;  %v11728_v60 = vld [vmem:[%s13380_s5 + $0x3a4] sm:$0xf]  ;;  %v16782_v58 = vld [vmem:[#allocation77_spill] sm:$0xff] }
 0x677   : > { %v6145_v36 = vpop.f32.mrf.mxu0  ;;  %v11643_v41 = vld [vmem:[%s13380_s5 + $0xfc] sm:$0xf] }
 0x678   : > { %v7130_v34 = vmax.f32 %v6078_v50, 0.0  ;;  %v6146_v47 = vadd.f32 %v6145_v36, %v6097_v5  ;;  %v6100_v50 = vadd.f32 %v15076_v1, %v15184_v0  ;;  %v11065_v36 = vor.u32 %v11805_v23, %v11064_v26  ;;  %6625 = vmatpush.bf16.msrb.mxu2 %v10589_v56 }
 0x679   : > { %v15204_v38 = vpop.f32.mrf.mxu3  ;;  %v6102_v56 = vadd.f32 %v15089_v48, %v15184_v0  ;;  %v11723_v48 = vld [vmem:[%s13380_s5 + $0x37c] sm:$0xf] }
 0x67a   : > { %6275 = vmatmul.bf16.gmra.mxu2 %v14846_v11  ;;  %v15207_v6 = vpack.c.bf16 %v7130_v34, %v7125_v29  ;;  %v10769_v29 = vor.u32 %v11728_v60, %v10766_v30  ;;  %6527 = vmatpush.bf16.msrb.mxu0 %v11065_v36 }
 0x67b   : > { %v6192_v3 = vpop.f32.mrf.mxu1 }
 0x67c   : > { %16781 = vst [vmem:[#allocation67_spill] sm:$0xff] %v15207_v6  ;;  %v6193_v62 = vadd.f32 %v6192_v3, %v6144_v4  ;;  %6673 = vmatpush.bf16.msrb.mxu3 %v10769_v29  ;;  %v10426_v6 = vld [vmem:[%s13380_s5 + $0x10c] sm:$0xf0] }
 0x67d   : > { %v6080_v21 = vpop.f32.mrf.mxu2  ;;  %v10429_v1 = vor.u32 %v11643_v41, %v10426_v6 }
 0x67e   : > { %v6081_v5 = vadd.f32 %v6080_v21, %v6032_v14  ;;  %6387 = vmatmul.bf16.vlgmr.msra.gmra.mxu1 %v16746_v61 }
 0x67f   : > { %v6148_v34 = vpop.f32.mrf.mxu0  ;;  %6576 = vmatpush.bf16.msrb.mxu1 %v10429_v1  ;;  %v11044_v1 = vld [vmem:[%s13380_s5 + $0x5d0] sm:$0xf] }
 0x680   : > { %v6149_v3 = vadd.f32 %v6148_v34, %v6100_v50  ;;  %v7135_v60 = vmax.f32 %v6081_v5, 0.0 }
 0x681   : > { %v15218_v4 = vpop.f32.mrf.mxu3 }
 0x682   : > { %6343 = vmatmul.bf16.gmra.mxu0 %v16782_v58 }
 0x683   : > { %v6194_v55 = vpop.f32.mrf.mxu1 }
 0x684   : > { %v6195_v14 = vadd.f32 %v6194_v55, %v6146_v47  ;;  %v11678_v55 = vld [vmem:[%s13380_s5 + $0x214] sm:$0xf]  ;;  %v10566_v47 = vld [vmem:[%s13380_s5 + $0x224] sm:$0xf0] }
 0x685   : > { %v6082_v26 = vpop.f32.mrf.mxu2  ;;  %v10569_v34 = vor.u32 %v11678_v55, %v10566_v47  ;;  %v16784_v47 = vld [vmem:[#allocation78_spill] sm:$0xff] }
 0x686   : > { %6485 = vmatmul.bf16.vlgmr.msra.gmra.mxu3 %v14688_v39  ;;  %v6083_v21 = vadd.f32 %v6082_v26, %v6034_v52  ;;  %v11800_v39 = vld [vmem:[%s13380_s5 + $0x5e0] sm:$0xf0]  ;;  %v10746_v26 = vld [vmem:[%s13380_s5 + $0x38c] sm:$0xf0] }
 0x687   : > { %v6150_v23 = vpop.f32.mrf.mxu0  ;;  %6626 = vmatpush.bf16.msrb.mxu2 %v10569_v34  ;;  %v11045_v5 = vor.u32 %v11800_v39, %v11044_v1 }
 0x688   : > { %v7140_v30 = vmax.f32 %v6083_v21, 0.0  ;;  %v6151_v50 = vadd.f32 %v6150_v23, %v6102_v56  ;;  %v6105_v56 = vadd.f32 %v15096_v37, %v15184_v0  ;;  %v10749_v23 = vor.u32 %v11723_v48, %v10746_v26 }
 0x689   : > { %v6290_v36 = vpop.f32.mrf.mxu3  ;;  %6528 = vmatpush.bf16.msrb.mxu0 %v11045_v5 }
 0x68a   : > { %6436 = vmatmul.bf16.vlgmr.msra.gmra.mxu2 %v14431_v10  ;;  %v15229_v6 = vpack.c.bf16 %v7140_v30, %v7135_v60  ;;  %6674 = vmatpush.bf16.msrb.mxu3 %v10749_v23 }
 0x68b   : > { %v6197_v29 = vpop.f32.mrf.mxu1 }
 0x68c   : > { %16783 = vst [vmem:[#allocation76_spill] sm:$0xff] %v15229_v6  ;;  %v6198_v41 = vadd.f32 %v6197_v29, %v6149_v3  ;;  %v11638_v29 = vld [vmem:[%s13380_s5 + $0xd4] sm:$0xf]  ;;  %v10406_v6 = vld [vmem:[%s13380_s5 + $0xe4] sm:$0xf0] }
 0x68d   : > { %v6241_v52 = vpop.f32.mrf.mxu2  ;;  %v10409_v34 = vor.u32 %v11638_v29, %v10406_v6  ;;  %v10546_v6 = vld [vmem:[%s13380_s5 + $0x1fc] sm:$0xf0] }
 0x68e   : > { %v6242_v21 = vadd.f32 %v6241_v52, %v6193_v62  ;;  %6392 = vmatmul.bf16.gmra.mxu1 %v16748_v31  ;;  %v6107_v62 = vadd.f32 %v15109_v35, %v15184_v0  ;;  %v11024_v35 = vld [vmem:[%s13380_s5 + $0x5a8] sm:$0xf] }
 0x68f   : > { %v6153_v60 = vpop.f32.mrf.mxu0  ;;  %6577 = vmatpush.bf16.msrb.mxu1 %v10409_v34  ;;  %v11795_v34 = vld [vmem:[%s13380_s5 + $0x5b8] sm:$0xf0] }
 0x690   : > { %v6291_v30 = vadd.f32 %v6290_v36, %v6242_v21  ;;  %v6154_v3 = vadd.f32 %v6153_v60, %v6105_v56 }
 0x691   : > { %v6292_v55 = vpop.f32.mrf.mxu3 }
 0x692   : > { %6348 = vmatmul.bf16.gmra.mxu0 %v16784_v47  ;;  %v7066_v56 = vmax.f32 %v6291_v30, 0.0  ;;  %v6110_v30 = vadd.f32 %v15116_v12, %v15184_v0 }
 0x693   : > { %v6199_v39 = vpop.f32.mrf.mxu1 }
 0x694   : > { %v6200_v1 = vadd.f32 %v6199_v39, %v6151_v50  ;;  %v11673_v50 = vld [vmem:[%s13380_s5 + $0x1ec] sm:$0xf] }
 0x695   : > { %v6243_v37 = vpop.f32.mrf.mxu2  ;;  %v10549_v60 = vor.u32 %v11673_v50, %v10546_v6  ;;  %v16786_v50 = vld [vmem:[#allocation79_spill] sm:$0xff] }
 0x696   : > { %6490 = vmatmul.bf16.gmra.mxu3 %v14710_v32  ;;  %v6244_v36 = vadd.f32 %v6243_v37, %v6195_v14  ;;  %v11718_v14 = vld [vmem:[%s13380_s5 + $0x354] sm:$0xf]  ;;  %v11633_v6 = vld [vmem:[%s13380_s5 + $0xac] sm:$0xf] }
 0x697   : > { %v6155_v48 = vpop.f32.mrf.mxu0  ;;  %6627 = vmatpush.bf16.msrb.mxu2 %v10549_v60 }
 0x698   : > { %v6293_v52 = vadd.f32 %v6292_v55, %v6244_v36  ;;  %v6156_v5 = vadd.f32 %v6155_v48, %v6107_v62  ;;  %v11025_v55 = vor.u32 %v11795_v34, %v11024_v35  ;;  %v10726_v62 = vld [vmem:[%s13380_s5 + $0x364] sm:$0xf0] }
 0x699   : > { %v6295_v26 = vpop.f32.mrf.mxu3  ;;  %v10729_v48 = vor.u32 %v11718_v14, %v10726_v62 }
 0x69a   : > { %v7071_v21 = vmax.f32 %v6293_v52, 0.0  ;;  %6441 = vmatmul.bf16.gmra.mxu2 %v14449_v46  ;;  %6529 = vmatpush.bf16.msrb.mxu0 %v11025_v55 }
 0x69b   : > { %v6202_v23 = vpop.f32.mrf.mxu1  ;;  %6675 = vmatpush.bf16.msrb.mxu3 %v10729_v48  ;;  %v10526_v48 = vld [vmem:[%s13380_s5 + $0x1d4] sm:$0xf0] }
 0x69c   : > { %v15247_v29 = vpack.c.bf16 %v7071_v21, %v7066_v56  ;;  %v6203_v39 = vadd.f32 %v6202_v23, %v6154_v3  ;;  %v10386_v23 = vld [vmem:[%s13380_s5 + $0xbc] sm:$0xf0] }
 0x69d   : > { %v6246_v37 = vpop.f32.mrf.mxu2  ;;  %v10389_v35 = vor.u32 %v11633_v6, %v10386_v23 }
 0x69e   : > { %16785 = vst [vmem:[#allocation77_spill] sm:$0xff] %v15247_v29  ;;  %v6247_v36 = vadd.f32 %v6246_v37, %v6198_v41  ;;  %6397 = vmatmul.bf16.gmra.mxu1 %v16750_v25  ;;  %v6112_v41 = vadd.f32 %v15129_v19, %v15184_v0  ;;  %v11713_v29 = vld [vmem:[%s13380_s5 + $0x32c] sm:$0xf] }
 0x69f   : > { %v6158_v52 = vpop.f32.mrf.mxu0  ;;  %6578 = vmatpush.bf16.msrb.mxu1 %v10389_v35  ;;  %v11790_v35 = vld [vmem:[%s13380_s5 + $0x590] sm:$0xf0] }
 0x6a0   : > { %v6296_v56 = vadd.f32 %v6295_v26, %v6247_v36  ;;  %v6159_v3 = vadd.f32 %v6158_v52, %v6110_v30 }
 0x6a1   : > { %v6297_v21 = vpop.f32.mrf.mxu3 }
 0x6a2   : > { %6353 = vmatmul.bf16.gmra.mxu0 %v16786_v50  ;;  %v7076_v30 = vmax.f32 %v6296_v56, 0.0  ;;  %v6115_v56 = vadd.f32 %v15136_v7, %v15184_v0 }
 0x6a3   : > { %v6204_v60 = vpop.f32.mrf.mxu1 }
 0x6a4   : > { %v6205_v34 = vadd.f32 %v6204_v60, %v6156_v5  ;;  %v11668_v5 = vld [vmem:[%s13380_s5 + $0x1c4] sm:$0xf]  ;;  %v11004_v60 = vld [vmem:[%s13380_s5 + $0x580] sm:$0xf] }
 0x6a5   : > { %v6248_v12 = vpop.f32.mrf.mxu2  ;;  %v10529_v6 = vor.u32 %v11668_v5, %v10526_v48  ;;  %v10366_v48 = vld [vmem:[%s13380_s5 + $0x94] sm:$0xf0] }
 0x6a6   : > { %6495 = vmatmul.bf16.gmra.mxu3 %v14732_v16  ;;  %v6249_v26 = vadd.f32 %v6248_v12, %v6200_v1  ;;  %v10706_v12 = vld [vmem:[%s13380_s5 + $0x33c] sm:$0xf0] }
 0x6a7   : > { %v6160_v14 = vpop.f32.mrf.mxu0  ;;  %6628 = vmatpush.bf16.msrb.mxu2 %v10529_v6 }
 0x6a8   : > { %v6298_v37 = vadd.f32 %v6297_v21, %v6249_v26  ;;  %v6161_v55 = vadd.f32 %v6160_v14, %v6112_v41  ;;  %v11005_v21 = vor.u32 %v11790_v35, %v11004_v60  ;;  %v10709_v26 = vor.u32 %v11713_v29, %v10706_v12 }
 0x6a9   : > { %v6300_v62 = vpop.f32.mrf.mxu3  ;;  %v6117_v29 = vadd.f32 %v15151_v53, %v15184_v0 }
 0x6aa   : > { %v7081_v36 = vmax.f32 %v6298_v37, 0.0  ;;  %6446 = vmatmul.bf16.gmra.mxu2 %v14467_v9  ;;  %6530 = vmatpush.bf16.msrb.mxu0 %v11005_v21 }
 0x6ab   : > { %v6207_v52 = vpop.f32.mrf.mxu1  ;;  %6676 = vmatpush.bf16.msrb.mxu3 %v10709_v26 }
 0x6ac   : > { %v6208_v23 = vadd.f32 %v6207_v52, %v6159_v3  ;;  %v15268_v19 = vpack.c.bf16 %v7081_v36, %v7076_v30  ;;  %v16788_v30 = vld [vmem:[#allocation80_spill] sm:$0xff]  ;;  %v11628_v36 = vld [vmem:[%s13380_s5 + $0x84] sm:$0xf] }
 0x6ad   : > { %v6251_v1 = vpop.f32.mrf.mxu2  ;;  %v10369_v6 = vor.u32 %v11628_v36, %v10366_v48  ;;  %v10984_v48 = vld [vmem:[%s13380_s5 + $0x558] sm:$0xf] }
 0x6ae   : > { %16787 = vst [vmem:[#allocation78_spill] sm:$0xff] %v15268_v19  ;;  %v6252_v41 = vadd.f32 %v6251_v1, %v6203_v39  ;;  %6402 = vmatmul.bf16.gmra.mxu1 %v16770_v28 }
 0x6af   : > { %v6163_v14 = vpop.f32.mrf.mxu0  ;;  %6579 = vmatpush.bf16.msrb.mxu1 %v10369_v6  ;;  %v11708_v6 = vld [vmem:[%s13380_s5 + $0x304] sm:$0xf] }
 0x6b0   : > { %v6301_v3 = vadd.f32 %v6300_v62, %v6252_v41  ;;  %v6164_v37 = vadd.f32 %v6163_v14, %v6115_v56  ;;  %v10506_v41 = vld [vmem:[%s13380_s5 + $0x1ac] sm:$0xf0] }
 0x6b1   : > { %v6302_v5 = vpop.f32.mrf.mxu3 }
 0x6b2   : > { %6358 = vmatmul.bf16.gmra.mxu0 %v16788_v30  ;;  %v7086_v12 = vmax.f32 %v6301_v3, 0.0  ;;  %v6120_v3 = vadd.f32 %v15158_v57, %v15184_v0 }
 0x6b3   : > { %v6209_v52 = vpop.f32.mrf.mxu1 }
 0x6b4   : > { %v6210_v60 = vadd.f32 %v6209_v52, %v6161_v55  ;;  %v11663_v55 = vld [vmem:[%s13380_s5 + $0x19c] sm:$0xf]  ;;  %v11785_v52 = vld [vmem:[%s13380_s5 + $0x568] sm:$0xf0] }
 0x6b5   : > { %v6253_v7 = vpop.f32.mrf.mxu2  ;;  %v10509_v14 = vor.u32 %v11663_v55, %v10506_v41 }
 0x6b6   : > { %6500 = vmatmul.bf16.gmra.mxu3 %v14754_v33  ;;  %v6254_v39 = vadd.f32 %v6253_v7, %v6205_v34  ;;  %v10686_v7 = vld [vmem:[%s13380_s5 + $0x314] sm:$0xf0] }
 0x6b7   : > { %v6165_v62 = vpop.f32.mrf.mxu0  ;;  %6629 = vmatpush.bf16.msrb.mxu2 %v10509_v14 }
 0x6b8   : > { %v6303_v35 = vadd.f32 %v6302_v5, %v6254_v39  ;;  %v6166_v1 = vadd.f32 %v6165_v62, %v6117_v29  ;;  %v10985_v5 = vor.u32 %v11785_v52, %v10984_v48  ;;  %v10689_v39 = vor.u32 %v11708_v6, %v10686_v7  ;;  %v11780_v7 = vld [vmem:[%s13380_s5 + $0x540] sm:$0xf0] }
 0x6b9   : > { %v6305_v21 = vpop.f32.mrf.mxu3 }
 0x6ba   : > { %v7091_v56 = vmax.f32 %v6303_v35, 0.0  ;;  %6451 = vmatmul.bf16.gmra.mxu2 %v14485_v51  ;;  %6531 = vmatpush.bf16.msrb.mxu0 %v10985_v5  ;;  %v10964_v5 = vld [vmem:[%s13380_s5 + $0x530] sm:$0xf] }
 0x6bb   : > { %v6212_v26 = vpop.f32.mrf.mxu1  ;;  %6677 = vmatpush.bf16.msrb.mxu3 %v10689_v39  ;;  %v10486_v39 = vld [vmem:[%s13380_s5 + $0x184] sm:$0xf0] }
 0x6bc   : > { %v6213_v36 = vadd.f32 %v6212_v26, %v6164_v37  ;;  %v15286_v53 = vpack.c.bf16 %v7091_v56, %v7086_v12  ;;  %v11623_v12 = vld [vmem:[%s13380_s5 + $0x5c] sm:$0xf]  ;;  %v10346_v56 = vld [vmem:[%s13380_s5 + $0x6c] sm:$0xf0] }
 0x6bd   : > { %v6256_v34 = vpop.f32.mrf.mxu2  ;;  %v10349_v26 = vor.u32 %v11623_v12, %v10346_v56  ;;  %v11703_v56 = vld [vmem:[%s13380_s5 + $0x2dc] sm:$0xf] }
 0x6be   : > { %16789 = vst [vmem:[#allocation79_spill] sm:$0xff] %v15286_v53  ;;  %v6257_v29 = vadd.f32 %v6256_v34, %v6208_v23  ;;  %6407 = vmatmul.bf16.gmra.mxu1 %v16772_v45 }
 0x6bf   : > { %v6168_v62 = vpop.f32.mrf.mxu0  ;;  %6580 = vmatpush.bf16.msrb.mxu1 %v10349_v26 }
 0x6c0   : > { %v6306_v37 = vadd.f32 %v6305_v21, %v6257_v29  ;;  %v6169_v35 = vadd.f32 %v6168_v62, %v6120_v3  ;;  %v6122_v21 = vadd.f32 %v15173_v8, %v15184_v0  ;;  %v11658_v29 = vld [vmem:[%s13380_s5 + $0x174] sm:$0xf]  ;;  %v10965_v62 = vor.u32 %v11780_v7, %v10964_v5 }
 0x6c1   : > { %v6307_v55 = vpop.f32.mrf.mxu3  ;;  %v10489_v8 = vor.u32 %v11658_v29, %v10486_v39  ;;  %v10326_v29 = vld [vmem:[%s13380_s5 + $0x44] sm:$0xf0] }
 0x6c2   : > { %6363 = vmatmul.bf16.gmra.mxu0 %v16755_v27  ;;  %v7096_v3 = vmax.f32 %v6306_v37, 0.0 }
 0x6c3   : > { %v6214_v41 = vpop.f32.mrf.mxu1  ;;  %6532 = vmatpush.bf16.msrb.mxu0 %v10965_v62  ;;  %6630 = vmatpush.bf16.msrb.mxu2 %v10489_v8 }
 0x6c4   : > { %v6215_v57 = vadd.f32 %v6214_v41, %v6166_v1 }
 0x6c5   : > { %v6258_v23 = vpop.f32.mrf.mxu2 }
 0x6c6   : > { %6505 = vmatmul.bf16.gmra.mxu3 %v14776_v2  ;;  %v6259_v14 = vadd.f32 %v6258_v23, %v6210_v60  ;;  %v10944_v23 = vld [vmem:[%s13380_s5 + $0x508] sm:$0xf] }
 0x6c7   : > { %v6170_v48 = vpop.f32.mrf.mxu0 }
 0x6c8   : > { %v6308_v52 = vadd.f32 %v6307_v55, %v6259_v14  ;;  %v6171_v6 = vadd.f32 %v6170_v48, %v6122_v21  ;;  %v10666_v55 = vld [vmem:[%s13380_s5 + $0x2ec] sm:$0xf0]  ;;  %v11775_v21 = vld [vmem:[%s13380_s5 + $0x518] sm:$0xf0]  ;;  %v6125_v14 = vadd.f32 %v15178_v18, %v15184_v0 }
 0x6c9   : > { %v6310_v34 = vpop.f32.mrf.mxu3  ;;  %v10669_v37 = vor.u32 %v11703_v56, %v10666_v55 }
 0x6ca   : > { %v7101_v1 = vmax.f32 %v6308_v52, 0.0  ;;  %6456 = vmatmul.bf16.gmra.mxu2 %v14503_v24  ;;  %v10945_v52 = vor.u32 %v11775_v21, %v10944_v23  ;;  %v10306_v23 = vld [vmem:[%s13380_s5 + $0x1c] sm:$0xf0] }
 0x6cb   : > { %v6217_v12 = vpop.f32.mrf.mxu1  ;;  %6678 = vmatpush.bf16.msrb.mxu3 %v10669_v37  ;;  %v11613_v37 = vld [vmem:[%s13380_s5 + $0xc] sm:$0xf] }
 0x6cc   : > { %v6218_v60 = vadd.f32 %v6217_v12, %v6169_v35  ;;  %v15305_v41 = vpack.c.bf16 %v7101_v1, %v7096_v3  ;;  %6533 = vmatpush.bf16.msrb.mxu0 %v10945_v52  ;;  %v11618_v1 = vld [vmem:[%s13380_s5 + $0x34] sm:$0xf]  ;;  %v10309_v52 = vor.u32 %v11613_v37, %v10306_v23 }
 0x6cd   : > { %v6261_v26 = vpop.f32.mrf.mxu2  ;;  %v10329_v62 = vor.u32 %v11618_v1, %v10326_v29  ;;  %v11698_v1 = vld [vmem:[%s13380_s5 + $0x2b4] sm:$0xf] }
 0x6ce   : > { %16790 = vst [vmem:[#allocation80_spill] sm:$0xff] %v15305_v41  ;;  %v6262_v48 = vadd.f32 %v6261_v26, %v6213_v36  ;;  %6412 = vmatmul.bf16.gmra.mxu1 %v16774_v43 }
 0x6cf   : > { %v6173_v35 = vpop.f32.mrf.mxu0  ;;  %6581 = vmatpush.bf16.msrb.mxu1 %v10329_v62 }
 0x6d0   : > { %v6311_v5 = vadd.f32 %v6310_v34, %v6262_v48  ;;  %v6174_v7 = vadd.f32 %v6173_v35, %v6125_v14  ;;  %v6127_v34 = vadd.f32 %v15196_v13, %v15184_v0  ;;  %v10466_v48 = vld [vmem:[%s13380_s5 + $0x15c] sm:$0xf0] }
 0x6d1   : > { %v6312_v3 = vpop.f32.mrf.mxu3 }
 0x6d2   : > { %6368 = vmatmul.bf16.gmra.mxu0 %v16757_v49  ;;  %v7106_v21 = vmax.f32 %v6311_v5, 0.0  ;;  %v6130_v5 = vadd.f32 %v15204_v38, %v15184_v0 }
 0x6d3   : > { %v6219_v39 = vpop.f32.mrf.mxu1  ;;  %6582 = vmatpush.bf16.msrb.mxu1 %v10309_v52 }
 0x6d4   : > { %v6220_v18 = vadd.f32 %v6219_v39, %v6171_v6  ;;  %v11653_v6 = vld [vmem:[%s13380_s5 + $0x14c] sm:$0xf] }
 0x6d5   : > { %v6263_v36 = vpop.f32.mrf.mxu2  ;;  %v10469_v13 = vor.u32 %v11653_v6, %v10466_v48 }
 0x6d6   : > { %6510 = vmatmul.bf16.gmra.mxu3 %v14800_v42  ;;  %v6264_v12 = vadd.f32 %v6263_v36, %v6215_v57  ;;  %v10646_v57 = vld [vmem:[%s13380_s5 + $0x2c4] sm:$0xf0] }
 0x6d7   : > { %v6175_v8 = vpop.f32.mrf.mxu0  ;;  %6631 = vmatpush.bf16.msrb.mxu2 %v10469_v13 }
 0x6d8   : > { %v6313_v56 = vadd.f32 %v6312_v3, %v6264_v12  ;;  %v6176_v55 = vadd.f32 %v6175_v8, %v6127_v34  ;;  %v10649_v3 = vor.u32 %v11698_v1, %v10646_v57  ;;  %v11693_v12 = vld [vmem:[%s13380_s5 + $0x28c] sm:$0xf]  ;;  %v10626_v8 = vld [vmem:[%s13380_s5 + $0x29c] sm:$0xf0]  ;;  %v11651_v57 = vld [vmem:[%s13380_s5 + $0x138] sm:$0xf0] }
 0x6d9   : > { %v6315_v26 = vpop.f32.mrf.mxu3 }
 0x6da   : > { %v7111_v14 = vmax.f32 %v6313_v56, 0.0  ;;  %6461 = vmatmul.bf16.gmra.mxu2 %v14523_v40  ;;  %6679 = vmatpush.bf16.msrb.mxu3 %v10649_v3 }
 0x6db   : > { %v6222_v35 = vpop.f32.mrf.mxu1 }
 0x6dc   : > { %v6223_v29 = vadd.f32 %v6222_v35, %v6174_v7  ;;  %v15325_v39 = vpack.c.bf16 %v7111_v14, %v7106_v21  ;;  %v10629_v7 = vor.u32 %v11693_v12, %v10626_v8  ;;  %v11808_v8 = vld [vmem:[%s13380_s5 + $0x624] sm:$0xf] }
 0x6dd   : > { %v6266_v62 = vpop.f32.mrf.mxu2 }
 0x6de   : > { %16791 = vst [vmem:[#allocation84_spill] sm:$0xff] %v15325_v39  ;;  %v6267_v36 = vadd.f32 %v6266_v62, %v6218_v60  ;;  %6417 = vmatmul.bf16.gmra.mxu1 %v16776_v44  ;;  %6680 = vmatpush.bf16.msrb.mxu3 %v10629_v7  ;;  %v6132_v60 = vadd.f32 %v15218_v4, %v15184_v0 }
 0x6df   : > { %v6178_v34 = vpop.f32.mrf.mxu0 }
 0x6e0   : > { %v6316_v56 = vadd.f32 %v6315_v26, %v6267_v36  ;;  %v6179_v37 = vadd.f32 %v6178_v34, %v6130_v5  ;;  %v11768_v36 = vld [vmem:[%s13380_s5 + $0x4e4] sm:$0xf]  ;;  %v10926_v34 = vld [vmem:[%s13380_s5 + $0x4f4] sm:$0xf0] }
 0x6e1   : > { %v6317_v23 = vpop.f32.mrf.mxu3  ;;  %v10929_v4 = vor.u32 %v11768_v36, %v10926_v34 }
 0x6e2   : > { %6373 = vmatmul.bf16.gmra.mxu0 %v16760_v17  ;;  %v7116_v13 = vmax.f32 %v6316_v56, 0.0  ;;  %v11086_v56 = vld [vmem:[%s13380_s5 + $0x634] sm:$0xf0] }
 0x6e3   : > { %v6224_v21 = vpop.f32.mrf.mxu1  ;;  %6722 = vmatpush.bf16.msra.mxu0 %v10929_v4  ;;  %v11089_v7 = vor.u32 %v11808_v8, %v11086_v56  ;;  %v10906_v4 = vld [vmem:[%s13380_s5 + $0x4cc] sm:$0xf0] }
 0x6e4   : > { %v6225_v14 = vadd.f32 %v6224_v21, %v6176_v55  ;;  %v10452_v55 = vld [vmem:[%s13380_s5 + $0x128] sm:$0xf] }
 0x6e5   : > { %v6268_v38 = vpop.f32.mrf.mxu2  ;;  %v10453_v62 = vor.u32 %v11651_v57, %v10452_v55  ;;  %6771 = vmatpush.bf16.msra.mxu1 %v11089_v7  ;;  %v11691_v7 = vld [vmem:[%s13380_s5 + $0x278] sm:$0xf0] }
 0x6e6   : > { %6515 = vmatmul.bf16.gmra.mxu3 %v14827_v59  ;;  %v6269_v6 = vadd.f32 %v6268_v38, %v6220_v18 }
 0x6e7   : > { %v6180_v26 = vpop.f32.mrf.mxu0  ;;  %6820 = vmatpush.bf16.msra.mxu2 %v10453_v62  ;;  %v11646_v62 = vld [vmem:[%s13380_s5 + $0x110] sm:$0xf0] }
 0x6e8   : > { %v6318_v48 = vadd.f32 %v6317_v23, %v6269_v6  ;;  %v6181_v52 = vadd.f32 %v6180_v26, %v6132_v60  ;;  %v15349_v26 = vperm.slane %v15181_v63, 2 }
 0x6e9   : > { %v6320_v35 = vpop.f32.mrf.mxu3 }
 0x6ea   : > { %v7121_v1 = vmax.f32 %v6318_v48, 0.0  ;;  %6466 = vmatmul.bf16.gmra.mxu2 %v14537_v15 }
 0x6eb   : > { %v6227_v3 = vpop.f32.mrf.mxu1 }
 0x6ec   : > { %v6228_v5 = vadd.f32 %v6227_v3, %v6179_v37  ;;  %v15341_v12 = vpack.c.bf16 %v7121_v1, %v7116_v13  ;;  %v16793_v37 = vld [vmem:[#allocation71_spill] sm:$0xff] }
 0x6ed   : > { %v6271_v0 = vpop.f32.mrf.mxu2 }
 0x6ee   : > { %16792 = vst [vmem:[#allocation85_spill] sm:$0xff] %v15341_v12  ;;  %v6272_v18 = vadd.f32 %v6271_v0, %v6223_v29  ;;  %6422 = vmatmul.bf16.gmra.mxu1 %v16778_v20  ;;  %v11763_v0 = vld [vmem:[%s13380_s5 + $0x4bc] sm:$0xf] }
 0x6ef   : > { %v6339_v23 = vpop.f32.mrf.mxu0  ;;  %v10909_v56 = vor.u32 %v11763_v0, %v10906_v4 }
 0x6f0   : > { %v6321_v21 = vadd.f32 %v6320_v35, %v6272_v18  ;;  %v6340_v57 = vadd.f32 %v6339_v23, %v15349_v26 }
 0x6f1   : > { %v6322_v38 = vpop.f32.mrf.mxu3  ;;  %6723 = vmatpush.bf16.msra.mxu0 %v10909_v56  ;;  %v11641_v56 = vld [vmem:[%s13380_s5 + $0xe8] sm:$0xf0] }
 0x6f2   : > { %6534 = vmatmul.bf16.vlgmr.msrb.gmra.mxu0 %v16793_v37  ;;  %v7126_v55 = vmax.f32 %v6321_v21, 0.0 }
 0x6f3   : > { %v6229_v60 = vpop.f32.mrf.mxu1 }
 0x6f4   : > { %v6230_v6 = vadd.f32 %v6229_v60, %v6181_v52  ;;  %v10432_v52 = vld [vmem:[%s13380_s5 + $0x100] sm:$0xf]  ;;  %v11066_v60 = vld [vmem:[%s13380_s5 + $0x60c] sm:$0xf0] }
 0x6f5   : > { %v6273_v29 = vpop.f32.mrf.mxu2  ;;  %v10433_v34 = vor.u32 %v11646_v62, %v10432_v52 }
 0x6f6   : > { %6520 = vmatmul.bf16.gmra.mxu3 %v14846_v11  ;;  %v6274_v48 = vadd.f32 %v6273_v29, %v6225_v14  ;;  %v10612_v14 = vld [vmem:[%s13380_s5 + $0x268] sm:$0xf] }
 0x6f7   : > { %v6341_v13 = vpop.f32.mrf.mxu0  ;;  %6821 = vmatpush.bf16.msra.mxu2 %v10433_v34  ;;  %v10613_v21 = vor.u32 %v11691_v7, %v10612_v14 }
 0x6f8   : > { %v6323_v35 = vadd.f32 %v6322_v38, %v6274_v48  ;;  %v11803_v38 = vld [vmem:[%s13380_s5 + $0x5fc] sm:$0xf] }
 0x6f9   : > { %v6325_v1 = vpop.f32.mrf.mxu3  ;;  %v11069_v48 = vor.u32 %v11803_v38, %v11066_v60  ;;  %6869 = vmatpush.bf16.msra.mxu3 %v10613_v21  ;;  %v11758_v38 = vld [vmem:[%s13380_s5 + $0x494] sm:$0xf]  ;;  %v10886_v60 = vld [vmem:[%s13380_s5 + $0x4a4] sm:$0xf0] }
 0x6fa   : > { %v7131_v3 = vmax.f32 %v6323_v35, 0.0  ;;  %6471 = vmatmul.bf16.gmra.mxu2 %v14556_v54 }
 0x6fb   : > { %v6388_v36 = vpop.f32.mrf.mxu1  ;;  %6772 = vmatpush.bf16.msra.mxu1 %v11069_v48 }
 0x6fc   : > { %v6389_v63 = vadd.f32 %v6388_v36, %v6340_v57  ;;  %v15358_v18 = vpack.c.bf16 %v7131_v3, %v7126_v55  ;;  %v6342_v55 = vadd.f32 %v6341_v13, %v15349_v26  ;;  %v16795_v3 = vld [vmem:[#allocation72_spill] sm:$0xff]  ;;  %v10412_v13 = vld [vmem:[%s13380_s5 + $0xd8] sm:$0xf] }
 0x6fd   : > { %v6276_v8 = vpop.f32.mrf.mxu2 }
 0x6fe   : > { %16794 = vst [vmem:[#allocation71_spill] sm:$0xff] %v15358_v18  ;;  %v6277_v23 = vadd.f32 %v6276_v8, %v6228_v5  ;;  %6583 = vmatmul.bf16.vlgmr.msrb.gmra.mxu1 %v16780_v22 }
 0x6ff   : > { %v6344_v29 = vpop.f32.mrf.mxu0 }
 0x700   : > { %v6326_v35 = vadd.f32 %v6325_v1, %v6277_v23  ;;  %v6345_v14 = vadd.f32 %v6344_v29, %v15349_v26  ;;  %v10413_v23 = vor.u32 %v11641_v56, %v10412_v13 }
 0x701   : > { %v6327_v57 = vpop.f32.mrf.mxu3 }
 0x702   : > { %6539 = vmatmul.bf16.gmra.mxu0 %v16795_v3  ;;  %v7136_v4 = vmax.f32 %v6326_v35, 0.0  ;;  %6822 = vmatpush.bf16.msra.mxu2 %v10413_v23  ;;  %v10889_v35 = vor.u32 %v11758_v38, %v10886_v60 }
 0x703   : > { %v6390_v52 = vpop.f32.mrf.mxu1 }
 0x704   : > { %v6391_v5 = vadd.f32 %v6390_v52, %v6342_v55  ;;  %v11686_v55 = vld [vmem:[%s13380_s5 + $0x250] sm:$0xf0]  ;;  %6724 = vmatpush.bf16.msra.mxu0 %v10889_v35 }
 0x705   : > { %v6278_v62 = vpop.f32.mrf.mxu2 }
 0x706   : > { %6681 = vmatmul.bf16.vlgmr.msrb.gmra.mxu3 %v14431_v10  ;;  %v6279_v36 = vadd.f32 %v6278_v62, %v6230_v6  ;;  %v10592_v6 = vld [vmem:[%s13380_s5 + $0x240] sm:$0xf]  ;;  %v11798_v62 = vld [vmem:[%s13380_s5 + $0x5d4] sm:$0xf] }
 0x707   : > { %v6346_v34 = vpop.f32.mrf.mxu0  ;;  %v10593_v52 = vor.u32 %v11686_v55, %v10592_v6 }
 0x708   : > { %v6328_v1 = vadd.f32 %v6327_v57, %v6279_v36  ;;  %v11046_v36 = vld [vmem:[%s13380_s5 + $0x5e4] sm:$0xf0] }
 0x709   : > { %v6486_v0 = vpop.f32.mrf.mxu3  ;;  %v11049_v18 = vor.u32 %v11798_v62, %v11046_v36  ;;  %6870 = vmatpush.bf16.msra.mxu3 %v10593_v52  ;;  %v10866_v52 = vld [vmem:[%s13380_s5 + $0x47c] sm:$0xf0]  ;;  %v10572_v62 = vld [vmem:[%s13380_s5 + $0x218] sm:$0xf] }
 0x70a   : > { %v7141_v8 = vmax.f32 %v6328_v1, 0.0  ;;  %6632 = vmatmul.bf16.vlgmr.msrb.gmra.mxu2 %v16746_v61 }
 0x70b   : > { %v6393_v7 = vpop.f32.mrf.mxu1  ;;  %6773 = vmatpush.bf16.msra.mxu1 %v11049_v18 }
 0x70c   : > { %v6394_v21 = vadd.f32 %v6393_v7, %v6345_v14  ;;  %v15374_v48 = vpack.c.bf16 %v7141_v8, %v7136_v4  ;;  %v6347_v4 = vadd.f32 %v6346_v34, %v15349_v26  ;;  %v16797_v8 = vld [vmem:[#allocation73_spill] sm:$0xff]  ;;  %v10392_v34 = vld [vmem:[%s13380_s5 + $0xb0] sm:$0xf] }
 0x70d   : > { %v6437_v57 = vpop.f32.mrf.mxu2 }
 0x70e   : > { %16796 = vst [vmem:[#allocation72_spill] sm:$0xff] %v15374_v48  ;;  %v6438_v29 = vadd.f32 %v6437_v57, %v6389_v63  ;;  %6588 = vmatmul.bf16.gmra.mxu1 %v16782_v58 }
 0x70f   : > { %v6349_v1 = vpop.f32.mrf.mxu0 }
 0x710   : > { %v15380_v14 = vadd.f32 %v6486_v0, %v6438_v29  ;;  %v6350_v18 = vadd.f32 %v6349_v1, %v15349_v26  ;;  %v11636_v0 = vld [vmem:[%s13380_s5 + $0xc0] sm:$0xf0]  ;;  %v11753_v29 = vld [vmem:[%s13380_s5 + $0x46c] sm:$0xf] }
 0x711   : > { %v6488_v13 = vpop.f32.mrf.mxu3  ;;  %v10393_v35 = vor.u32 %v11636_v0, %v10392_v34  ;;  %v10869_v36 = vor.u32 %v11753_v29, %v10866_v52  ;;  %v16798_v0 = vld [vmem:[#allocation74_spill] sm:$0xff] }
 0x712   : > { %6544 = vmatmul.bf16.gmra.mxu0 %v16797_v8 }
 0x713   : > { %v6395_v63 = vpop.f32.mrf.mxu1  ;;  %6823 = vmatpush.bf16.msra.mxu2 %v10393_v35  ;;  %6725 = vmatpush.bf16.msra.mxu0 %v10869_v36 }
 0x714   : > { %v6396_v56 = vadd.f32 %v6395_v63, %v6347_v4  ;;  %v11681_v4 = vld [vmem:[%s13380_s5 + $0x228] sm:$0xf0] }
 0x715   : > { %v6439_v7 = vpop.f32.mrf.mxu2  ;;  %v10573_v1 = vor.u32 %v11681_v4, %v10572_v62  ;;  %v11793_v63 = vld [vmem:[%s13380_s5 + $0x5ac] sm:$0xf] }
 0x716   : > { %6686 = vmatmul.bf16.gmra.mxu3 %v14449_v46  ;;  %v6440_v23 = vadd.f32 %v6439_v7, %v6391_v5  ;;  %v11026_v7 = vld [vmem:[%s13380_s5 + $0x5bc] sm:$0xf0]  ;;  %v10966_v46 = vld [vmem:[%s13380_s5 + $0x544] sm:$0xf0] }
 0x717   : > { %v6351_v38 = vpop.f32.mrf.mxu0  ;;  %v11029_v48 = vor.u32 %v11793_v63, %v11026_v7  ;;  %6871 = vmatpush.bf16.msra.mxu3 %v10573_v1  ;;  %v11748_v1 = vld [vmem:[%s13380_s5 + $0x444] sm:$0xf]  ;;  %v10846_v63 = vld [vmem:[%s13380_s5 + $0x454] sm:$0xf0]  ;;  %v10552_v7 = vld [vmem:[%s13380_s5 + $0x1f0] sm:$0xf] }
 0x718   : > { %v15385_v6 = vadd.f32 %v6488_v13, %v6440_v23  ;;  %v6352_v34 = vadd.f32 %v6351_v38, %v15349_v26  ;;  %v10372_v38 = vld [vmem:[%s13380_s5 + $0x88] sm:$0xf] }
 0x719   : > { %v6491_v60 = vpop.f32.mrf.mxu3  ;;  %6774 = vmatpush.bf16.msra.mxu1 %v11029_v48 }
 0x71a   : > { %6637 = vmatmul.bf16.gmra.mxu2 %v16748_v31 }
 0x71b   : > { %v6398_v57 = vpop.f32.mrf.mxu1 }
 0x71c   : > { %v6399_v55 = vadd.f32 %v6398_v57, %v6350_v18 }
 0x71d   : > { %v6442_v5 = vpop.f32.mrf.mxu2 }
 0x71e   : > { %v6443_v13 = vadd.f32 %v6442_v5, %v6394_v21  ;;  %6593 = vmatmul.bf16.gmra.mxu1 %v16784_v47 }
 0x71f   : > { %v6354_v23 = vpop.f32.mrf.mxu0 }
 0x720   : > { %v15398_v18 = vadd.f32 %v6491_v60, %v6443_v13  ;;  %v6355_v48 = vadd.f32 %v6354_v23, %v15349_v26  ;;  %v11631_v60 = vld [vmem:[%s13380_s5 + $0x98] sm:$0xf0] }
 0x721   : > { %v6493_v12 = vpop.f32.mrf.mxu3  ;;  %v10373_v4 = vor.u32 %v11631_v60, %v10372_v38  ;;  %v16799_v60 = vld [vmem:[#allocation75_spill] sm:$0xff] }
 0x722   : > { %6549 = vmatmul.bf16.gmra.mxu0 %v16798_v0 }
 0x723   : > { %v6400_v21 = vpop.f32.mrf.mxu1  ;;  %6824 = vmatpush.bf16.msra.mxu2 %v10373_v4 }
 0x724   : > { %v6401_v57 = vadd.f32 %v6400_v21, %v6352_v34  ;;  %v10849_v34 = vor.u32 %v11748_v1, %v10846_v63  ;;  %v11676_v21 = vld [vmem:[%s13380_s5 + $0x200] sm:$0xf0] }
 0x725   : > { %v6444_v35 = vpop.f32.mrf.mxu2  ;;  %v10553_v23 = vor.u32 %v11676_v21, %v10552_v7 }
 0x726   : > { %6691 = vmatmul.bf16.gmra.mxu3 %v14467_v9  ;;  %v6445_v29 = vadd.f32 %v6444_v35, %v6396_v56  ;;  %v11788_v35 = vld [vmem:[%s13380_s5 + $0x584] sm:$0xf]  ;;  %6726 = vmatpush.bf16.msra.mxu0 %v10849_v34 }
 0x727   : > { %v6356_v52 = vpop.f32.mrf.mxu0  ;;  %6872 = vmatpush.bf16.msra.mxu3 %v10553_v23  ;;  %v11743_v23 = vld [vmem:[%s13380_s5 + $0x41c] sm:$0xf] }
 0x728   : > { %v15403_v5 = vadd.f32 %v6493_v12, %v6445_v29  ;;  %v11006_v29 = vld [vmem:[%s13380_s5 + $0x594] sm:$0xf0]  ;;  %v6357_v38 = vadd.f32 %v6356_v52, %v15349_v26  ;;  %v10352_v52 = vld [vmem:[%s13380_s5 + $0x60] sm:$0xf] }
 0x729   : > { %v6496_v62 = vpop.f32.mrf.mxu3  ;;  %v11009_v41 = vor.u32 %v11788_v35, %v11006_v29  ;;  %v10826_v35 = vld [vmem:[%s13380_s5 + $0x42c] sm:$0xf0]  ;;  %v10532_v29 = vld [vmem:[%s13380_s5 + $0x1c8] sm:$0xf] }
 0x72a   : > { %6642 = vmatmul.bf16.gmra.mxu2 %v16750_v25 }
 0x72b   : > { %v6403_v36 = vpop.f32.mrf.mxu1  ;;  %6775 = vmatpush.bf16.msra.mxu1 %v11009_v41 }
 0x72c   : > { %v6404_v13 = vadd.f32 %v6403_v36, %v6355_v48 }
 0x72d   : > { %v6447_v56 = vpop.f32.mrf.mxu2 }
 0x72e   : > { %v6448_v12 = vadd.f32 %v6447_v56, %v6399_v55  ;;  %6598 = vmatmul.bf16.gmra.mxu1 %v16786_v50 }
 0x72f   : > { %v6359_v39 = vpop.f32.mrf.mxu0 }
 0x730   : > { %v15416_v48 = vadd.f32 %v6496_v62, %v6448_v12  ;;  %v6360_v41 = vadd.f32 %v6359_v39, %v15349_v26  ;;  %v11626_v62 = vld [vmem:[%s13380_s5 + $0x70] sm:$0xf0] }
 0x731   : > { %v6498_v53 = vpop.f32.mrf.mxu3  ;;  %v10353_v21 = vor.u32 %v11626_v62, %v10352_v52 }
 0x732   : > { %6554 = vmatmul.bf16.gmra.mxu0 %v16799_v60 }
 0x733   : > { %v6405_v55 = vpop.f32.mrf.mxu1  ;;  %6825 = vmatpush.bf16.msra.mxu2 %v10353_v21 }
 0x734   : > { %v6406_v36 = vadd.f32 %v6405_v55, %v6357_v38  ;;  %v10829_v38 = vor.u32 %v11743_v23, %v10826_v35  ;;  %v11671_v55 = vld [vmem:[%s13380_s5 + $0x1d8] sm:$0xf0] }
 0x735   : > { %v6449_v4 = vpop.f32.mrf.mxu2  ;;  %v10533_v39 = vor.u32 %v11671_v55, %v10532_v29  ;;  %v10332_v55 = vld [vmem:[%s13380_s5 + $0x38] sm:$0xf] }
 0x736   : > { %6696 = vmatmul.bf16.gmra.mxu3 %v14485_v51  ;;  %v6450_v1 = vadd.f32 %v6449_v4, %v6401_v57  ;;  %v11783_v4 = vld [vmem:[%s13380_s5 + $0x55c] sm:$0xf]  ;;  %6727 = vmatpush.bf16.msra.mxu0 %v10829_v38 }
 0x737   : > { %v6361_v63 = vpop.f32.mrf.mxu0  ;;  %6873 = vmatpush.bf16.msra.mxu3 %v10533_v39 }
 0x738   : > { %v15421_v56 = vadd.f32 %v6498_v53, %v6450_v1  ;;  %v10986_v1 = vld [vmem:[%s13380_s5 + $0x56c] sm:$0xf0]  ;;  %v6362_v62 = vadd.f32 %v6361_v63, %v15349_v26 }
 0x739   : > { %v6501_v7 = vpop.f32.mrf.mxu3  ;;  %v10989_v51 = vor.u32 %v11783_v4, %v10986_v1 }
 0x73a   : > { %6647 = vmatmul.bf16.gmra.mxu2 %v16770_v28 }
 0x73b   : > { %v6408_v34 = vpop.f32.mrf.mxu1  ;;  %6776 = vmatpush.bf16.msra.mxu1 %v10989_v51  ;;  %v10806_v51 = vld [vmem:[%s13380_s5 + $0x404] sm:$0xf0] }
 0x73c   : > { %v6409_v12 = vadd.f32 %v6408_v34, %v6360_v41 }
 0x73d   : > { %v6452_v57 = vpop.f32.mrf.mxu2 }
 0x73e   : > { %v6453_v53 = vadd.f32 %v6452_v57, %v6404_v13  ;;  %6603 = vmatmul.bf16.gmra.mxu1 %v16788_v30  ;;  %v16800_v13 = vld [vmem:[#allocation55_spill] sm:$0xff] }
 0x73f   : > { %v6364_v19 = vpop.f32.mrf.mxu0 }
 0x740   : > { %v15434_v41 = vadd.f32 %v6501_v7, %v6453_v53  ;;  %v11738_v7 = vld [vmem:[%s13380_s5 + $0x3f4] sm:$0xf]  ;;  %v6365_v63 = vadd.f32 %v6364_v19, %v15349_v26  ;;  %v11621_v53 = vld [vmem:[%s13380_s5 + $0x48] sm:$0xf0] }
 0x741   : > { %v6503_v52 = vpop.f32.mrf.mxu3  ;;  %v10809_v39 = vor.u32 %v11738_v7, %v10806_v51  ;;  %v11778_v19 = vld [vmem:[%s13380_s5 + $0x534] sm:$0xf] }
 0x742   : > { %6559 = vmatmul.bf16.gmra.mxu0 %v16800_v13  ;;  %v10969_v7 = vor.u32 %v11778_v19, %v10966_v46  ;;  %v10312_v19 = vld [vmem:[%s13380_s5 + $0x10] sm:$0xf] }
 0x743   : > { %v6410_v34 = vpop.f32.mrf.mxu1  ;;  %6728 = vmatpush.bf16.msra.mxu0 %v10809_v39 }
 0x744   : > { %v6411_v21 = vadd.f32 %v6410_v34, %v6362_v62  ;;  %v10512_v62 = vld [vmem:[%s13380_s5 + $0x1a0] sm:$0xf]  ;;  %6777 = vmatpush.bf16.msra.mxu1 %v10969_v7  ;;  %v11616_v7 = vld [vmem:[%s13380_s5 + $0x20] sm:$0xf0] }
 0x745   : > { %v6454_v23 = vpop.f32.mrf.mxu2 }
 0x746   : > { %6701 = vmatmul.bf16.gmra.mxu3 %v14503_v24  ;;  %v6455_v35 = vadd.f32 %v6454_v23, %v6406_v36  ;;  %v10333_v36 = vor.u32 %v11621_v53, %v10332_v55  ;;  %v10786_v24 = vld [vmem:[%s13380_s5 + $0x3dc] sm:$0xf0]  ;;  %v16801_v53 = vld [vmem:[#allocation56_spill] sm:$0xff] }
 0x747   : > { %v6366_v29 = vpop.f32.mrf.mxu0 }
 0x748   : > { %v15439_v38 = vadd.f32 %v6503_v52, %v6455_v35  ;;  %v11666_v52 = vld [vmem:[%s13380_s5 + $0x1b0] sm:$0xf0]  ;;  %6826 = vmatpush.bf16.msra.mxu2 %v10333_v36  ;;  %v11733_v35 = vld [vmem:[%s13380_s5 + $0x3cc] sm:$0xf]  ;;  %v6367_v55 = vadd.f32 %v6366_v29, %v15349_v26 }
 0x749   : > { %v6506_v57 = vpop.f32.mrf.mxu3  ;;  %v10513_v23 = vor.u32 %v11666_v52, %v10512_v62  ;;  %v10789_v10 = vor.u32 %v11733_v35, %v10786_v24 }
 0x74a   : > { %6652 = vmatmul.bf16.gmra.mxu2 %v16772_v45 }
 0x74b   : > { %v6413_v4 = vpop.f32.mrf.mxu1  ;;  %6874 = vmatpush.bf16.msra.mxu3 %v10513_v23  ;;  %6729 = vmatpush.bf16.msra.mxu0 %v10789_v10  ;;  %v11661_v23 = vld [vmem:[%s13380_s5 + $0x188] sm:$0xf0] }
 0x74c   : > { %v6414_v1 = vadd.f32 %v6413_v4, %v6365_v63 }
 0x74d   : > { %v6457_v34 = vpop.f32.mrf.mxu2 }
 0x74e   : > { %v6458_v9 = vadd.f32 %v6457_v34, %v6409_v12  ;;  %6608 = vmatmul.bf16.gmra.mxu1 %v16755_v27  ;;  %v10492_v34 = vld [vmem:[%s13380_s5 + $0x178] sm:$0xf] }
 0x74f   : > { %v6369_v11 = vpop.f32.mrf.mxu0 }
 0x750   : > { %v15454_v63 = vadd.f32 %v6506_v57, %v6458_v9  ;;  %v11773_v9 = vld [vmem:[%s13380_s5 + $0x50c] sm:$0xf]  ;;  %v10946_v57 = vld [vmem:[%s13380_s5 + $0x51c] sm:$0xf0]  ;;  %v6370_v29 = vadd.f32 %v6369_v11, %v15349_v26 }
 0x751   : > { %v6508_v51 = vpop.f32.mrf.mxu3  ;;  %v10949_v62 = vor.u32 %v11773_v9, %v10946_v57 }
 0x752   : > { %6564 = vmatmul.bf16.gmra.mxu0 %v16801_v53 }
 0x753   : > { %v6415_v12 = vpop.f32.mrf.mxu1  ;;  %6778 = vmatpush.bf16.msra.mxu1 %v10949_v62  ;;  %v16802_v62 = vld [vmem:[#allocation57_spill] sm:$0xff] }
 0x754   : > { %v6416_v39 = vadd.f32 %v6415_v12, %v6367_v55 }
 0x755   : > { %v6459_v24 = vpop.f32.mrf.mxu2 }
 0x756   : > { %6706 = vmatmul.bf16.gmra.mxu3 %v14523_v40  ;;  %v6460_v46 = vadd.f32 %v6459_v24, %v6411_v21  ;;  %v10493_v21 = vor.u32 %v11661_v23, %v10492_v34  ;;  %v10472_v24 = vld [vmem:[%s13380_s5 + $0x150] sm:$0xf] }
 0x757   : > { %v6371_v4 = vpop.f32.mrf.mxu0 }
 0x758   : > { %v15459_v10 = vadd.f32 %v6508_v51, %v6460_v46  ;;  %v10313_v51 = vor.u32 %v11616_v7, %v10312_v19  ;;  %6875 = vmatpush.bf16.msra.mxu3 %v10493_v21  ;;  %v11656_v46 = vld [vmem:[%s13380_s5 + $0x160] sm:$0xf0] }
 0x759   : > { %v6511_v36 = vpop.f32.mrf.mxu3  ;;  %v10473_v57 = vor.u32 %v11656_v46, %v10472_v24  ;;  %v10772_v46 = vld [vmem:[%s13380_s5 + $0x3a8] sm:$0xf] }
 0x75a   : > { %6657 = vmatmul.bf16.gmra.mxu2 %v16774_v43 }
 0x75b   : > { %v6418_v52 = vpop.f32.mrf.mxu1  ;;  %6827 = vmatpush.bf16.msra.mxu2 %v10313_v51 }
 0x75c   : > { %v6419_v35 = vadd.f32 %v6418_v52, %v6370_v29  ;;  %v6372_v29 = vadd.f32 %v6371_v4, %v15349_v26  ;;  %6876 = vmatpush.bf16.msra.mxu3 %v10473_v57  ;;  %v11092_v4 = vld [vmem:[%s13380_s5 + $0x628] sm:$0xf]  ;;  %v11731_v57 = vld [vmem:[%s13380_s5 + $0x3b8] sm:$0xf0] }
 0x75d   : > { %v6462_v55 = vpop.f32.mrf.mxu2 }
 0x75e   : > { %v6463_v12 = vadd.f32 %v6462_v55, %v6414_v1  ;;  %6613 = vmatmul.bf16.gmra.mxu1 %v16757_v49  ;;  %v11811_v55 = vld [vmem:[%s13380_s5 + $0x638] sm:$0xf0] }
 0x75f   : > { %v6374_v11 = vpop.f32.mrf.mxu0 }
 0x760   : > { %v15472_v40 = vadd.f32 %v6511_v36, %v6463_v12  ;;  %v6375_v36 = vadd.f32 %v6374_v11, %v15349_v26  ;;  %v11093_v12 = vor.u32 %v11811_v55, %v11092_v4  ;;  %v16803_v4 = vld [vmem:[#allocation69_spill] sm:$0xff] }
 0x761   : > { %v6513_v9 = vpop.f32.mrf.mxu3 }
 0x762   : > { %6569 = vmatmul.bf16.gmra.mxu0 %v16802_v62  ;;  %7016 = vmatpush.bf16.msrb.mxu2 %v11093_v12 }
 0x763   : > { %v6420_v1 = vpop.f32.mrf.mxu1 }
 0x764   : > { %v6421_v52 = vadd.f32 %v6420_v1, %v6372_v29 }
 0x765   : > { %v6464_v34 = vpop.f32.mrf.mxu2 }
 0x766   : > { %6711 = vmatmul.bf16.gmra.mxu3 %v14537_v15  ;;  %v6465_v23 = vadd.f32 %v6464_v34, %v6416_v39  ;;  %v10773_v39 = vor.u32 %v11731_v57, %v10772_v46  ;;  %v11771_v34 = vld [vmem:[%s13380_s5 + $0x4f8] sm:$0xf0] }
 0x767   : > { %v6376_v19 = vpop.f32.mrf.mxu0 }
 0x768   : > { %v15477_v21 = vadd.f32 %v6513_v9, %v6465_v23  ;;  %v10932_v9 = vld [vmem:[%s13380_s5 + $0x4e8] sm:$0xf]  ;;  %6918 = vmatpush.bf16.msrb.mxu0 %v10773_v39 }
 0x769   : > { %v6516_v7 = vpop.f32.mrf.mxu3  ;;  %v10933_v11 = vor.u32 %v11771_v34, %v10932_v9 }
 0x76a   : > { %6662 = vmatmul.bf16.gmra.mxu2 %v16776_v44 }
 0x76b   : > { %v6423_v51 = vpop.f32.mrf.mxu1  ;;  %6967 = vmatpush.bf16.msrb.mxu1 %v10933_v11  ;;  %v11819_v11 = vld [vmem:[%s13385_s14 + $0x38] sm:$0xff] }
 0x76c   : > { %v6424_v24 = vadd.f32 %v6423_v51, %v6375_v36  ;;  %v6377_v36 = vadd.f32 %v6376_v19, %v15349_v26  ;;  %v11072_v26 = vld [vmem:[%s13380_s5 + $0x600] sm:$0xf]  ;;  %v11806_v19 = vld [vmem:[%s13380_s5 + $0x610] sm:$0xf0]  ;;  %7509 = vmatpush.bf16.msrb.mxu3 %v11819_v11 }
 0x76d   : > { %v6467_v29 = vpop.f32.mrf.mxu2  ;;  %v11073_v9 = vor.u32 %v11806_v19, %v11072_v26 }
 0x76e   : > { %v6468_v1 = vadd.f32 %v6467_v29, %v6419_v35  ;;  %6618 = vmatmul.bf16.gmra.mxu1 %v16760_v17 }
 0x76f   : > { %v6535_v23 = vpop.f32.mrf.mxu0  ;;  %7017 = vmatpush.bf16.msrb.mxu2 %v11073_v9  ;;  %v15514_v9 = vld [vmem:[%s13383_s28] sm:$0x1f] }
 0x770   : > { %v6536_v62 = vadd.f32 %v6535_v23, %v15380_v14  ;;  %v15489_v49 = vadd.f32 %v6516_v7, %v6468_v1  ;;  %v10752_v23 = vld [vmem:[%s13380_s5 + $0x380] sm:$0xf] }
 0x771   : > { %v6518_v15 = vpop.f32.mrf.mxu3 }
 0x772   : > { %6730 = vmatmul.bf16.vlgmr.msra.gmra.mxu0 %v16803_v4  ;;  %v7067_v29 = vmax.f32 %v6536_v62, 0.0  ;;  %v10912_v62 = vld [vmem:[%s13380_s5 + $0x4c0] sm:$0xf] }
 0x773   : > { %v6425_v35 = vpop.f32.mrf.mxu1 }
 0x774   : > { %v6426_v55 = vadd.f32 %v6425_v35, %v6377_v36  ;;  %v11766_v35 = vld [vmem:[%s13380_s5 + $0x4d0] sm:$0xf0] }
 0x775   : > { %v6469_v51 = vpop.f32.mrf.mxu2 }
 0x776   : > { %6716 = vmatmul.bf16.gmra.mxu3 %v14556_v54  ;;  %v6470_v12 = vadd.f32 %v6469_v51, %v6421_v52  ;;  %v11726_v52 = vld [vmem:[%s13380_s5 + $0x390] sm:$0xf0] }
 0x777   : > { %v6537_v46 = vpop.f32.mrf.mxu0 }
 0x778   : > { %v6538_v7 = vadd.f32 %v6537_v46, %v15385_v6  ;;  %v15495_v57 = vadd.f32 %v6518_v15, %v6470_v12  ;;  %v10753_v6 = vor.u32 %v11726_v52, %v10752_v23  ;;  %v10913_v12 = vor.u32 %v11766_v35, %v10912_v62  ;;  %v10732_v35 = vld [vmem:[%s13380_s5 + $0x358] sm:$0xf] }
 0x779   : > { %v6521_v14 = vpop.f32.mrf.mxu3 }
 0x77a   : > { %v7072_v39 = vmax.f32 %v6538_v7, 0.0  ;;  %6667 = vmatmul.bf16.gmra.mxu2 %v16778_v20  ;;  %6919 = vmatpush.bf16.msrb.mxu0 %v10753_v6 }
 0x77b   : > { %v6584_v1 = vpop.f32.mrf.mxu1  ;;  %6968 = vmatpush.bf16.msrb.mxu1 %v10913_v12  ;;  %v11818_v12 = vld [vmem:[%s13385_s14 + $0x30] sm:$0xff] }
 0x77c   : > { %v15500_v34 = vpack.c.bf16 %v7072_v39, %v7067_v29  ;;  %7510 = vmatpush.bf16.msrb.mxu3 %v11818_v12 }
 0x77d   : > { %v6472_v36 = vpop.f32.mrf.mxu2 }
 0x77e   : > { %v6473_v15 = vadd.f32 %v6472_v36, %v6424_v24  ;;  %6779 = vmatmul.bf16.vlgmr.msra.gmra.mxu1 %v16793_v37 }
 0x77f   : > { %v6540_v51 = vpop.f32.mrf.mxu0 }
 0x780   : > { %v6541_v7 = vadd.f32 %v6540_v51, %v15398_v18  ;;  %v15509_v29 = vadd.f32 %v6521_v14, %v6473_v15  ;;  %v15517_v18 = vperm.slane %v15514_v9, 3  ;;  %v11721_v51 = vld [vmem:[%s13380_s5 + $0x368] sm:$0xf0] }
 0x781   : > { %v6523_v46 = vpop.f32.mrf.mxu3 }
 0x782   : > { %6735 = vmatmul.bf16.gmra.mxu0 %v14710_v32  ;;  %v7077_v11 = vmax.f32 %v6541_v7, 0.0  ;;  %v6585_v62 = vadd.f32 %v6584_v1, %v15517_v18 }
 0x783   : > { %v6586_v24 = vpop.f32.mrf.mxu1 }
 0x785   : > { %v6474_v39 = vpop.f32.mrf.mxu2 }
 0x786   : > { %6877 = vmatmul.bf16.vlgmr.msra.gmra.mxu3 %v16746_v61  ;;  %v6475_v26 = vadd.f32 %v6474_v39, %v6426_v55  ;;  %v11052_v61 = vld [vmem:[%s13380_s5 + $0x5d8] sm:$0xf]  ;;  %v11801_v55 = vld [vmem:[%s13380_s5 + $0x5e8] sm:$0xf0] }
 0x787   : > { %v6542_v19 = vpop.f32.mrf.mxu0  ;;  %v11053_v15 = vor.u32 %v11801_v55, %v11052_v61 }
 0x788   : > { %v6543_v14 = vadd.f32 %v6542_v19, %v15403_v5  ;;  %v15520_v52 = vadd.f32 %v6523_v46, %v6475_v26  ;;  %v10733_v46 = vor.u32 %v11721_v51, %v10732_v35  ;;  %v11761_v26 = vld [vmem:[%s13380_s5 + $0x4a8] sm:$0xf0] }
 0x789   : > { %v6682_v23 = vpop.f32.mrf.mxu3  ;;  %7018 = vmatpush.bf16.msrb.mxu2 %v11053_v15 }
 0x78a   : > { %v7082_v36 = vmax.f32 %v6543_v14, 0.0  ;;  %6828 = vmatmul.bf16.vlgmr.msra.gmra.mxu2 %v16780_v22  ;;  %v10892_v22 = vld [vmem:[%s13380_s5 + $0x498] sm:$0xf]  ;;  %6920 = vmatpush.bf16.msrb.mxu0 %v10733_v46  ;;  %v11032_v46 = vld [vmem:[%s13380_s5 + $0x5b0] sm:$0xf] }
 0x78b   : > { %v6589_v6 = vpop.f32.mrf.mxu1  ;;  %v10893_v14 = vor.u32 %v11761_v26, %v10892_v22  ;;  %v10712_v26 = vld [vmem:[%s13380_s5 + $0x330] sm:$0xf] }
 0x78c   : > { %v15529_v39 = vpack.c.bf16 %v7082_v36, %v7077_v11  ;;  %v6587_v36 = vadd.f32 %v6586_v24, %v15517_v18  ;;  %v11796_v24 = vld [vmem:[%s13380_s5 + $0x5c0] sm:$0xf0]  ;;  %v6590_v22 = vadd.f32 %v6589_v6, %v15517_v18 }
 0x78d   : > { %v6633_v5 = vpop.f32.mrf.mxu2  ;;  %6969 = vmatpush.bf16.msrb.mxu1 %v10893_v14  ;;  %v11817_v14 = vld [vmem:[%s13385_s14 + $0x28] sm:$0xff] }
 0x78e   : > { %v6634_v7 = vadd.f32 %v6633_v5, %v6585_v62  ;;  %6784 = vmatmul.bf16.gmra.mxu1 %v16795_v3  ;;  %7511 = vmatpush.bf16.msrb.mxu3 %v11817_v14 }
 0x78f   : > { %v6545_v19 = vpop.f32.mrf.mxu0 }
 0x790   : > { %v6546_v61 = vadd.f32 %v6545_v19, %v15416_v48  ;;  %v15535_v55 = vadd.f32 %v6682_v23, %v6634_v7  ;;  %v11716_v19 = vld [vmem:[%s13380_s5 + $0x340] sm:$0xf0] }
 0x791   : > { %v6684_v1 = vpop.f32.mrf.mxu3 }
 0x792   : > { %6740 = vmatmul.bf16.gmra.mxu0 %v14732_v16  ;;  %v7087_v12 = vmax.f32 %v6546_v61, 0.0 }
 0x793   : > { %v6591_v11 = vpop.f32.mrf.mxu1 }
 0x795   : > { %v6635_v15 = vpop.f32.mrf.mxu2 }
 0x796   : > { %6882 = vmatmul.bf16.gmra.mxu3 %v16748_v31  ;;  %v6636_v62 = vadd.f32 %v6635_v15, %v6587_v36  ;;  %v11033_v31 = vor.u32 %v11796_v24, %v11032_v46  ;;  %v11756_v15 = vld [vmem:[%s13380_s5 + $0x480] sm:$0xf0] }
 0x797   : > { %v6547_v35 = vpop.f32.mrf.mxu0 }
 0x798   : > { %v6548_v48 = vadd.f32 %v6547_v35, %v15421_v56  ;;  %v15541_v23 = vadd.f32 %v6684_v1, %v6636_v62  ;;  %7019 = vmatpush.bf16.msrb.mxu2 %v11033_v31  ;;  %v10713_v1 = vor.u32 %v11716_v19, %v10712_v26 }
 0x799   : > { %v6687_v51 = vpop.f32.mrf.mxu3 }
 0x79a   : > { %v7092_v5 = vmax.f32 %v6548_v48, 0.0  ;;  %6833 = vmatmul.bf16.gmra.mxu2 %v16782_v58  ;;  %v10872_v58 = vld [vmem:[%s13380_s5 + $0x470] sm:$0xf]  ;;  %6921 = vmatpush.bf16.msrb.mxu0 %v10713_v1 }
 0x79b   : > { %v6594_v7 = vpop.f32.mrf.mxu1  ;;  %v10873_v35 = vor.u32 %v11756_v15, %v10872_v58  ;;  %v10692_v58 = vld [vmem:[%s13380_s5 + $0x308] sm:$0xf]  ;;  %v11711_v15 = vld [vmem:[%s13380_s5 + $0x318] sm:$0xf0] }
 0x79c   : > { %v15550_v36 = vpack.c.bf16 %v7092_v5, %v7087_v12  ;;  %v6592_v5 = vadd.f32 %v6591_v11, %v15517_v18  ;;  %v11791_v11 = vld [vmem:[%s13380_s5 + $0x598] sm:$0xf0] }
 0x79d   : > { %v6638_v56 = vpop.f32.mrf.mxu2  ;;  %6970 = vmatpush.bf16.msrb.mxu1 %v10873_v35 }
 0x79e   : > { %v6639_v61 = vadd.f32 %v6638_v56, %v6590_v22  ;;  %6789 = vmatmul.bf16.gmra.mxu1 %v16797_v8  ;;  %v11012_v56 = vld [vmem:[%s13380_s5 + $0x588] sm:$0xf] }
 0x79f   : > { %v6550_v62 = vpop.f32.mrf.mxu0 }
 0x7a0   : > { %v6551_v48 = vadd.f32 %v6550_v62, %v15434_v41  ;;  %v15556_v46 = vadd.f32 %v6687_v51, %v6639_v61  ;;  %v6595_v61 = vadd.f32 %v6594_v7, %v15517_v18  ;;  %v11816_v62 = vld [vmem:[%s13385_s14 + $0x20] sm:$0xff] }
 0x7a1   : > { %v6689_v6 = vpop.f32.mrf.mxu3  ;;  %7512 = vmatpush.bf16.msrb.mxu3 %v11816_v62  ;;  %v10992_v62 = vld [vmem:[%s13380_s5 + $0x560] sm:$0xf] }
 0x7a2   : > { %6745 = vmatmul.bf16.gmra.mxu0 %v14754_v33  ;;  %v7097_v19 = vmax.f32 %v6551_v48, 0.0 }
 0x7a3   : > { %v6596_v12 = vpop.f32.mrf.mxu1 }
 0x7a5   : > { %v6640_v24 = vpop.f32.mrf.mxu2 }
 0x7a6   : > { %6887 = vmatmul.bf16.gmra.mxu3 %v16750_v25  ;;  %v6641_v31 = vadd.f32 %v6640_v24, %v6592_v5  ;;  %v11013_v25 = vor.u32 %v11791_v11, %v11012_v56  ;;  %v11751_v5 = vld [vmem:[%s13380_s5 + $0x458] sm:$0xf0] }
 0x7a7   : > { %v6552_v22 = vpop.f32.mrf.mxu0 }
 0x7a8   : > { %v6553_v41 = vadd.f32 %v6552_v22, %v15439_v38  ;;  %v15562_v51 = vadd.f32 %v6689_v6, %v6641_v31  ;;  %7020 = vmatpush.bf16.msrb.mxu2 %v11013_v25  ;;  %v10693_v6 = vor.u32 %v11711_v15, %v10692_v58 }
 0x7a9   : > { %v6692_v26 = vpop.f32.mrf.mxu3 }
 0x7aa   : > { %v7102_v14 = vmax.f32 %v6553_v41, 0.0  ;;  %6838 = vmatmul.bf16.gmra.mxu2 %v16784_v47  ;;  %v10852_v47 = vld [vmem:[%s13380_s5 + $0x448] sm:$0xf]  ;;  %6922 = vmatpush.bf16.msrb.mxu0 %v10693_v6 }
 0x7ab   : > { %v6599_v1 = vpop.f32.mrf.mxu1  ;;  %v10853_v31 = vor.u32 %v11751_v5, %v10852_v47  ;;  %v11706_v47 = vld [vmem:[%s13380_s5 + $0x2f0] sm:$0xf0]  ;;  %v11815_v5 = vld [vmem:[%s13385_s14 + $0x18] sm:$0xff] }
 0x7ac   : > { %v15571_v35 = vpack.c.bf16 %v7102_v14, %v7097_v19  ;;  %v6597_v14 = vadd.f32 %v6596_v12, %v15517_v18  ;;  %v11786_v12 = vld [vmem:[%s13380_s5 + $0x570] sm:$0xf0]  ;;  %v6600_v6 = vadd.f32 %v6599_v1, %v15517_v18  ;;  %7513 = vmatpush.bf16.msrb.mxu3 %v11815_v5 }
 0x7ad   : > { %v6643_v38 = vpop.f32.mrf.mxu2  ;;  %6971 = vmatpush.bf16.msrb.mxu1 %v10853_v31 }
 0x7ae   : > { %v6644_v48 = vadd.f32 %v6643_v38, %v6595_v61  ;;  %6794 = vmatmul.bf16.gmra.mxu1 %v16798_v0 }
 0x7af   : > { %v6555_v24 = vpop.f32.mrf.mxu0 }
 0x7b0   : > { %v6556_v22 = vadd.f32 %v6555_v24, %v15454_v63  ;;  %v15577_v41 = vadd.f32 %v6692_v26, %v6644_v48  ;;  %v10672_v48 = vld [vmem:[%s13380_s5 + $0x2e0] sm:$0xf] }
 0x7b1   : > { %v6694_v7 = vpop.f32.mrf.mxu3  ;;  %v10673_v31 = vor.u32 %v11706_v47, %v10672_v48  ;;  %v11701_v48 = vld [vmem:[%s13380_s5 + $0x2c8] sm:$0xf0] }
 0x7b2   : > { %6750 = vmatmul.bf16.gmra.mxu0 %v14776_v2  ;;  %v7107_v58 = vmax.f32 %v6556_v22, 0.0 }
 0x7b3   : > { %v6601_v19 = vpop.f32.mrf.mxu1  ;;  %6923 = vmatpush.bf16.msrb.mxu0 %v10673_v31 }
 0x7b5   : > { %v6645_v56 = vpop.f32.mrf.mxu2 }
 0x7b6   : > { %6892 = vmatmul.bf16.gmra.mxu3 %v16770_v28  ;;  %v6646_v11 = vadd.f32 %v6645_v56, %v6597_v14  ;;  %v10993_v28 = vor.u32 %v11786_v12, %v10992_v62 }
 0x7b7   : > { %v6557_v25 = vpop.f32.mrf.mxu0 }
 0x7b8   : > { %v6558_v63 = vadd.f32 %v6557_v25, %v15459_v10  ;;  %v15583_v26 = vadd.f32 %v6694_v7, %v6646_v11  ;;  %7021 = vmatpush.bf16.msrb.mxu2 %v10993_v28  ;;  %v11746_v7 = vld [vmem:[%s13380_s5 + $0x430] sm:$0xf0] }
 0x7b9   : > { %v6697_v61 = vpop.f32.mrf.mxu3 }
 0x7ba   : > { %v7112_v15 = vmax.f32 %v6558_v63, 0.0  ;;  %6843 = vmatmul.bf16.gmra.mxu2 %v16786_v50  ;;  %v10832_v50 = vld [vmem:[%s13380_s5 + $0x420] sm:$0xf] }
 0x7bb   : > { %v6604_v38 = vpop.f32.mrf.mxu1  ;;  %v10833_v56 = vor.u32 %v11746_v7, %v10832_v50  ;;  %v11814_v50 = vld [vmem:[%s13385_s14 + $0x10] sm:$0xff] }
 0x7bc   : > { %v15592_v24 = vpack.c.bf16 %v7112_v15, %v7107_v58  ;;  %v6602_v58 = vadd.f32 %v6601_v19, %v15517_v18  ;;  %v10972_v19 = vld [vmem:[%s13380_s5 + $0x538] sm:$0xf]  ;;  %7514 = vmatpush.bf16.msrb.mxu3 %v11814_v50 }
 0x7bd   : > { %v6648_v10 = vpop.f32.mrf.mxu2  ;;  %6972 = vmatpush.bf16.msrb.mxu1 %v10833_v56  ;;  %v10632_v56 = vld [vmem:[%s13380_s5 + $0x290] sm:$0xf] }
 0x7be   : > { %v6649_v22 = vadd.f32 %v6648_v10, %v6600_v6  ;;  %6799 = vmatmul.bf16.gmra.mxu1 %v16799_v60 }
 0x7bf   : > { %v6560_v14 = vpop.f32.mrf.mxu0 }
 0x7c0   : > { %v6561_v1 = vadd.f32 %v6560_v14, %v15472_v40  ;;  %v15598_v25 = vadd.f32 %v6697_v61, %v6649_v22  ;;  %v10652_v61 = vld [vmem:[%s13380_s5 + $0x2b8] sm:$0xf] }
 0x7c1   : > { %v6699_v11 = vpop.f32.mrf.mxu3  ;;  %v10653_v10 = vor.u32 %v11701_v48, %v10652_v61 }
 0x7c2   : > { %6755 = vmatmul.bf16.gmra.mxu0 %v14800_v42  ;;  %v7117_v47 = vmax.f32 %v6561_v1, 0.0  ;;  %v11696_v1 = vld [vmem:[%s13380_s5 + $0x2a0] sm:$0xf0] }
 0x7c3   : > { %v6606_v63 = vpop.f32.mrf.mxu1  ;;  %6924 = vmatpush.bf16.msrb.mxu0 %v10653_v10 }
 0x7c5   : > { %v6650_v15 = vpop.f32.mrf.mxu2 }
 0x7c6   : > { %6897 = vmatmul.bf16.gmra.mxu3 %v16772_v45  ;;  %v6651_v62 = vadd.f32 %v6650_v15, %v6602_v58  ;;  %v11781_v45 = vld [vmem:[%s13380_s5 + $0x548] sm:$0xf0]  ;;  %v10633_v15 = vor.u32 %v11696_v1, %v10632_v56  ;;  %v10952_v56 = vld [vmem:[%s13380_s5 + $0x510] sm:$0xf]  ;;  %v11776_v1 = vld [vmem:[%s13380_s5 + $0x520] sm:$0xf0] }
 0x7c7   : > { %v6562_v12 = vpop.f32.mrf.mxu0  ;;  %v10973_v22 = vor.u32 %v11781_v45, %v10972_v19  ;;  %v11741_v58 = vld [vmem:[%s13380_s5 + $0x408] sm:$0xf0] }
 0x7c8   : > { %v6563_v28 = vadd.f32 %v6562_v12, %v15477_v21  ;;  %v15604_v6 = vadd.f32 %v6699_v11, %v6651_v62  ;;  %v6605_v21 = vadd.f32 %v6604_v38, %v15517_v18  ;;  %6925 = vmatpush.bf16.msrb.mxu0 %v10633_v15 }
 0x7c9   : > { %v6702_v40 = vpop.f32.mrf.mxu3  ;;  %7022 = vmatpush.bf16.msrb.mxu2 %v10973_v22 }
 0x7ca   : > { %v7122_v5 = vmax.f32 %v6563_v28, 0.0  ;;  %6848 = vmatmul.bf16.gmra.mxu2 %v16788_v30  ;;  %v10812_v30 = vld [vmem:[%s13380_s5 + $0x3f8] sm:$0xf] }
 0x7cb   : > { %v6609_v31 = vpop.f32.mrf.mxu1  ;;  %v10813_v12 = vor.u32 %v11741_v58, %v10812_v30  ;;  %v11813_v58 = vld [vmem:[%s13385_s14 + $0x8] sm:$0xff] }
 0x7cc   : > { %v15613_v7 = vpack.c.bf16 %v7122_v5, %v7117_v47  ;;  %v6607_v47 = vadd.f32 %v6606_v63, %v15517_v18  ;;  %v6610_v30 = vadd.f32 %v6609_v31, %v15517_v18  ;;  %7515 = vmatpush.bf16.msrb.mxu3 %v11813_v58 }
 0x7cd   : > { %v6653_v14 = vpop.f32.mrf.mxu2  ;;  %6973 = vmatpush.bf16.msrb.mxu1 %v10813_v12 }
 0x7ce   : > { %v6654_v11 = vadd.f32 %v6653_v14, %v6605_v21  ;;  %6804 = vmatmul.bf16.gmra.mxu1 %v16800_v13  ;;  %v11736_v21 = vld [vmem:[%s13380_s5 + $0x3e0] sm:$0xf0] }
 0x7cf   : > { %v6565_v62 = vpop.f32.mrf.mxu0 }
 0x7d0   : > { %v6566_v38 = vadd.f32 %v6565_v62, %v15489_v49  ;;  %v15621_v61 = vadd.f32 %v6702_v40, %v6654_v11  ;;  %v10792_v40 = vld [vmem:[%s13380_s5 + $0x3d0] sm:$0xf]  ;;  %v10953_v11 = vor.u32 %v11776_v1, %v10952_v56 }
 0x7d1   : > { %v6704_v28 = vpop.f32.mrf.mxu3  ;;  %v10793_v63 = vor.u32 %v11736_v21, %v10792_v40 }
 0x7d2   : > { %6760 = vmatmul.bf16.gmra.mxu0 %v14827_v59  ;;  %v7127_v50 = vmax.f32 %v6566_v38, 0.0  ;;  %7023 = vmatpush.bf16.msrb.mxu2 %v10953_v11 }
 0x7d3   : > { %v6611_v48 = vpop.f32.mrf.mxu1  ;;  %6974 = vmatpush.bf16.msrb.mxu1 %v10793_v63 }
 0x7d5   : > { %v6655_v5 = vpop.f32.mrf.mxu2 }
 0x7d6   : > { %6902 = vmatmul.bf16.gmra.mxu3 %v16774_v43  ;;  %v6656_v19 = vadd.f32 %v6655_v5, %v6607_v47  ;;  %v16804_v5 = vld [vmem:[#allocation70_spill] sm:$0xff] }
 0x7d7   : > { %v6567_v45 = vpop.f32.mrf.mxu0 }
 0x7d8   : > { %v6568_v49 = vadd.f32 %v6567_v45, %v15495_v57  ;;  %v15627_v22 = vadd.f32 %v6704_v28, %v6656_v19  ;;  %v11812_v28 = vld [vmem:[%s13385_s14] sm:$0xff]  ;;  %v6612_v19 = vadd.f32 %v6611_v48, %v15517_v18 }
 0x7d9   : > { %v6707_v10 = vpop.f32.mrf.mxu3  ;;  %7516 = vmatpush.bf16.msrb.mxu3 %v11812_v28 }
 0x7da   : > { %v7132_v14 = vmax.f32 %v6568_v49, 0.0  ;;  %6853 = vmatmul.bf16.gmra.mxu2 %v16755_v27 }
 0x7db   : > { %v6614_v43 = vpop.f32.mrf.mxu1 }
 0x7dc   : > { %v15636_v57 = vpack.c.bf16 %v7132_v14, %v7127_v50  ;;  %v6615_v63 = vadd.f32 %v6614_v43, %v15517_v18 }
 0x7dd   : > { %v6658_v15 = vpop.f32.mrf.mxu2 }
 0x7de   : > { %v6659_v62 = vadd.f32 %v6658_v15, %v6610_v30  ;;  %6809 = vmatmul.bf16.gmra.mxu1 %v16801_v53 }
 0x7df   : > { %v6570_v12 = vpop.f32.mrf.mxu0 }
 0x7e0   : > { %v6571_v27 = vadd.f32 %v6570_v12, %v15509_v29  ;;  %v15641_v47 = vadd.f32 %v6707_v10, %v6659_v62  ;;  %v16805_v10 = vld [vmem:[#allocation68_spill] sm:$0xff]  ;;  %v16807_v12 = vld [vmem:[#allocation82_spill] sm:$0xff] }
 0x7e1   : > { %v6709_v38 = vpop.f32.mrf.mxu3 }
 0x7e2   : > { %6765 = vmatmul.bf16.gmra.mxu0 %v16804_v5  ;;  %v7137_v29 = vmax.f32 %v6571_v27, 0.0 }
 0x7e3   : > { %v6616_v31 = vpop.f32.mrf.mxu1 }
 0x7e5   : > { %v6660_v45 = vpop.f32.mrf.mxu2 }
 0x7e6   : > { %6907 = vmatmul.bf16.gmra.mxu3 %v16776_v44  ;;  %v6661_v49 = vadd.f32 %v6660_v45, %v6612_v19  ;;  %v16806_v44 = vld [vmem:[#allocation57_spill] sm:$0xff] }
 0x7e7   : > { %v6572_v40 = vpop.f32.mrf.mxu0 }
 0x7e8   : > { %v6573_v21 = vadd.f32 %v6572_v40, %v15520_v52  ;;  %v15647_v14 = vadd.f32 %v6709_v38, %v6661_v49  ;;  %v6617_v38 = vadd.f32 %v6616_v31, %v15517_v18 }
 0x7e9   : > { %v6712_v50 = vpop.f32.mrf.mxu3 }
 0x7ea   : > { %v7142_v56 = vmax.f32 %v6573_v21, 0.0  ;;  %6858 = vmatmul.bf16.gmra.mxu2 %v16805_v10  ;;  %v11851_v10 = vld [vmem:[%s13385_s14 + $0x138] sm:$0xff] }
 0x7eb   : > { %v6619_v1 = vpop.f32.mrf.mxu1  ;;  %7705 = vmatpush.bf16.msra.mxu3 %v11851_v10 }
 0x7ec   : > { %v15651_v11 = vpack.c.bf16 %v7142_v56, %v7137_v29  ;;  %v11827_v56 = vld [vmem:[%s13385_s14 + $0x78] sm:$0xff] }
 0x7ed   : > { %v6663_v48 = vpop.f32.mrf.mxu2  ;;  %7558 = vmatpush.bf16.msra.mxu0 %v11827_v56  ;;  %v11850_v56 = vld [vmem:[%s13385_s14 + $0x130] sm:$0xff] }
 0x7ee   : > { %v6664_v30 = vadd.f32 %v6663_v48, %v6615_v63  ;;  %6814 = vmatmul.bf16.gmra.mxu1 %v16806_v44  ;;  %v11835_v63 = vld [vmem:[%s13385_s14 + $0xb8] sm:$0xff] }
 0x7ef   : > { %v6731_v58 = vpop.f32.mrf.mxu0  ;;  %7607 = vmatpush.bf16.msra.mxu1 %v11835_v63  ;;  %7706 = vmatpush.bf16.msra.mxu3 %v11850_v56 }
 0x7f0   : > { %v6732_v52 = vadd.f32 %v6731_v58, %v15535_v55  ;;  %v15655_v62 = vadd.f32 %v6712_v50, %v6664_v30  ;;  %v11843_v55 = vld [vmem:[%s13385_s14 + $0xf8] sm:$0xff]  ;;  %v6620_v50 = vadd.f32 %v6619_v1, %v15517_v18 }
 0x7f1   : > { %v6714_v15 = vpop.f32.mrf.mxu3  ;;  %7656 = vmatpush.bf16.msra.mxu2 %v11843_v55  ;;  %v16808_v58 = vld [vmem:[#allocation58_spill] sm:$0xff] }
 0x7f2   : > { %6926 = vmatmul.bf16.vlgmr.msrb.gmra.mxu0 %v16807_v12 }
 0x7f3   : > { %v6621_v27 = vpop.f32.mrf.mxu1 }
 0x7f5   : > { %v6665_v43 = vpop.f32.mrf.mxu2 }
 0x7f6   : > { %6912 = vmatmul.bf16.gmra.mxu3 %v16778_v20  ;;  %v6666_v28 = vadd.f32 %v6665_v43, %v6617_v38 }
 0x7f7   : > { %v6733_v19 = vpop.f32.mrf.mxu0 }
 0x7f8   : > { %v6734_v49 = vadd.f32 %v6733_v19, %v15541_v23  ;;  %v15661_v40 = vadd.f32 %v6714_v15, %v6666_v28  ;;  %v6622_v15 = vadd.f32 %v6621_v27, %v15517_v18  ;;  %v15683_v18 = vperm.slane %v15514_v9, 4  ;;  %v11842_v27 = vld [vmem:[%s13385_s14 + $0xf0] sm:$0xff]  ;;  %v16810_v9 = vld [vmem:[#allocation60_spill] sm:$0xff] }
 0x7f9   : > { %v6717_v45 = vpop.f32.mrf.mxu3  ;;  %7657 = vmatpush.bf16.msra.mxu2 %v11842_v27 }
 0x7fa   : > { %6863 = vmatmul.bf16.gmra.mxu2 %v16760_v17 }
 0x7fb   : > { %v6780_v21 = vpop.f32.mrf.mxu1 }
 0x7fc   : > { %v6781_v31 = vadd.f32 %v6780_v21, %v6732_v52 }
 0x7fd   : > { %v6668_v20 = vpop.f32.mrf.mxu2 }
 0x7fe   : > { %v6669_v29 = vadd.f32 %v6668_v20, %v6620_v50  ;;  %6975 = vmatmul.bf16.vlgmr.msrb.gmra.mxu1 %v16803_v4  ;;  %v16809_v4 = vld [vmem:[#allocation81_spill] sm:$0xff]  ;;  %v7068_v38 = vmax.f32 %v6781_v31, 0.0 }
 0x7ff   : > { %v6736_v48 = vpop.f32.mrf.mxu0 }
 0x800   : > { %v6737_v23 = vadd.f32 %v6736_v48, %v15556_v46  ;;  %v15671_v17 = vadd.f32 %v6717_v45, %v6669_v29  ;;  %v11826_v29 = vld [vmem:[%s13385_s14 + $0x70] sm:$0xff] }
 0x801   : > { %v6719_v30 = vpop.f32.mrf.mxu3  ;;  %7559 = vmatpush.bf16.msra.mxu0 %v11826_v29 }
 0x802   : > { %6931 = vmatmul.bf16.gmra.mxu0 %v16808_v58  ;;  %v16811_v58 = vld [vmem:[#allocation54_spill] sm:$0xff] }
 0x803   : > { %v6782_v1 = vpop.f32.mrf.mxu1 }
 0x804   : > { %v6783_v52 = vadd.f32 %v6782_v1, %v6734_v49 }
 0x805   : > { %v6670_v12 = vpop.f32.mrf.mxu2 }
 0x806   : > { %7517 = vmatmul.bf16.vlgmr.msrb.gmra.mxu3 %v16809_v4  ;;  %v7073_v43 = vmax.f32 %v6783_v52, 0.0  ;;  %v6671_v28 = vadd.f32 %v6670_v12, %v6622_v15 }
 0x807   : > { %v6738_v46 = vpop.f32.mrf.mxu0 }
 0x808   : > { %v15676_v19 = vpack.c.bf16 %v7073_v43, %v7068_v38  ;;  %v6739_v45 = vadd.f32 %v6738_v46, %v15562_v51  ;;  %v15679_v21 = vadd.f32 %v6719_v30, %v6671_v28  ;;  %v11834_v51 = vld [vmem:[%s13385_s14 + $0xb0] sm:$0xff]  ;;  %v11841_v28 = vld [vmem:[%s13385_s14 + $0xe8] sm:$0xff] }
 0x809   : > { %v6878_v55 = vpop.f32.mrf.mxu3  ;;  %7608 = vmatpush.bf16.msra.mxu1 %v11834_v51  ;;  %7658 = vmatpush.bf16.msra.mxu2 %v11841_v28  ;;  %v11824_v28 = vld [vmem:[%s13385_s14 + $0x60] sm:$0xff] }
 0x80a   : > { %7024 = vmatmul.bf16.vlgmr.msrb.gmra.mxu2 %v16793_v37 }
 0x80b   : > { %v6785_v49 = vpop.f32.mrf.mxu1 }
 0x80c   : > { %v6786_v50 = vadd.f32 %v6785_v49, %v6737_v23  ;;  %v11825_v49 = vld [vmem:[%s13385_s14 + $0x68] sm:$0xff] }
 0x80d   : > { %v6829_v31 = vpop.f32.mrf.mxu2  ;;  %7560 = vmatpush.bf16.msra.mxu0 %v11825_v49 }
 0x80e   : > { %v6830_v20 = vadd.f32 %v6829_v31, %v15683_v18  ;;  %6980 = vmatmul.bf16.gmra.mxu1 %v14710_v32  ;;  %v7078_v1 = vmax.f32 %v6786_v50, 0.0  ;;  %v11849_v50 = vld [vmem:[%s13385_s14 + $0x128] sm:$0xff] }
 0x80f   : > { %v6741_v10 = vpop.f32.mrf.mxu0  ;;  %v11833_v31 = vld [vmem:[%s13385_s14 + $0xa8] sm:$0xff]  ;;  %7707 = vmatpush.bf16.msra.mxu3 %v11849_v50 }
 0x810   : > { %v6742_v63 = vadd.f32 %v6741_v10, %v15577_v41  ;;  %v15692_v37 = vadd.f32 %v6878_v55, %v6830_v20  ;;  %7609 = vmatpush.bf16.msra.mxu1 %v11833_v31 }
 0x811   : > { %v6880_v48 = vpop.f32.mrf.mxu3  ;;  %7561 = vmatpush.bf16.msra.mxu0 %v11824_v28 }
 0x812   : > { %6936 = vmatmul.bf16.gmra.mxu0 %v16810_v9 }
 0x813   : > { %v6787_v30 = vpop.f32.mrf.mxu1 }
 0x814   : > { %v6788_v23 = vadd.f32 %v6787_v30, %v6739_v45 }
 0x815   : > { %v6831_v32 = vpop.f32.mrf.mxu2 }
 0x816   : > { %7522 = vmatmul.bf16.gmra.mxu3 %v16811_v58  ;;  %v7083_v15 = vmax.f32 %v6788_v23, 0.0  ;;  %v6832_v41 = vadd.f32 %v6831_v32, %v15683_v18 }
 0x817   : > { %v6743_v52 = vpop.f32.mrf.mxu0 }
 0x818   : > { %v6744_v4 = vadd.f32 %v6743_v52, %v15583_v26  ;;  %v15698_v38 = vadd.f32 %v6880_v48, %v6832_v41  ;;  %v15700_v43 = vpack.c.bf16 %v7083_v15, %v7078_v1  ;;  %v11840_v15 = vld [vmem:[%s13385_s14 + $0xe0] sm:$0xff] }
 0x819   : > { %v6883_v12 = vpop.f32.mrf.mxu3  ;;  %7659 = vmatpush.bf16.msra.mxu2 %v11840_v15  ;;  %v11847_v15 = vld [vmem:[%s13385_s14 + $0x118] sm:$0xff] }
 0x81a   : > { %7029 = vmatmul.bf16.gmra.mxu2 %v16795_v3  ;;  %v16812_v3 = vld [vmem:[#allocation62_spill] sm:$0xff] }
 0x81b   : > { %v6790_v46 = vpop.f32.mrf.mxu1 }
 0x81c   : > { %v6791_v45 = vadd.f32 %v6790_v46, %v6742_v63  ;;  %v16813_v63 = vld [vmem:[#allocation59_spill] sm:$0xff] }
 0x81d   : > { %v6834_v55 = vpop.f32.mrf.mxu2  ;;  %v11848_v46 = vld [vmem:[%s13385_s14 + $0x120] sm:$0xff] }
 0x81e   : > { %v6835_v27 = vadd.f32 %v6834_v55, %v15683_v18  ;;  %6985 = vmatmul.bf16.gmra.mxu1 %v14732_v16  ;;  %v7088_v48 = vmax.f32 %v6791_v45, 0.0  ;;  %v11832_v45 = vld [vmem:[%s13385_s14 + $0xa0] sm:$0xff]  ;;  %7708 = vmatpush.bf16.msra.mxu3 %v11848_v46 }
 0x81f   : > { %v6746_v26 = vpop.f32.mrf.mxu0  ;;  %7610 = vmatpush.bf16.msra.mxu1 %v11832_v45 }
 0x820   : > { %v6747_v20 = vadd.f32 %v6746_v26, %v15598_v25  ;;  %v15710_v56 = vadd.f32 %v6883_v12, %v6835_v27  ;;  %v16815_v26 = vld [vmem:[#allocation61_spill] sm:$0xff] }
 0x821   : > { %v6885_v29 = vpop.f32.mrf.mxu3 }
 0x822   : > { %6941 = vmatmul.bf16.gmra.mxu0 %v16812_v3  ;;  %7709 = vmatpush.bf16.msra.mxu3 %v11847_v15 }
 0x823   : > { %v6792_v51 = vpop.f32.mrf.mxu1 }
 0x824   : > { %v6793_v10 = vadd.f32 %v6792_v51, %v6744_v4 }
 0x825   : > { %v6836_v16 = vpop.f32.mrf.mxu2 }
 0x826   : > { %7527 = vmatmul.bf16.gmra.mxu3 %v16813_v63  ;;  %v7093_v9 = vmax.f32 %v6793_v10, 0.0  ;;  %v6837_v25 = vadd.f32 %v6836_v16, %v15683_v18 }
 0x827   : > { %v6748_v30 = vpop.f32.mrf.mxu0 }
 0x828   : > { %v6749_v23 = vadd.f32 %v6748_v30, %v15604_v6  ;;  %v15716_v32 = vadd.f32 %v6885_v29, %v6837_v25  ;;  %v15718_v1 = vpack.c.bf16 %v7093_v9, %v7088_v48  ;;  %v11839_v48 = vld [vmem:[%s13385_s14 + $0xd8] sm:$0xff] }
 0x829   : > { %v6888_v58 = vpop.f32.mrf.mxu3  ;;  %7660 = vmatpush.bf16.msra.mxu2 %v11839_v48  ;;  %v11830_v48 = vld [vmem:[%s13385_s14 + $0x90] sm:$0xff] }
 0x82a   : > { %7034 = vmatmul.bf16.gmra.mxu2 %v16797_v8  ;;  %v16814_v8 = vld [vmem:[#allocation64_spill] sm:$0xff] }
 0x82b   : > { %v6795_v41 = vpop.f32.mrf.mxu1 }
 0x82c   : > { %v6796_v52 = vadd.f32 %v6795_v41, %v6747_v20  ;;  %v11831_v41 = vld [vmem:[%s13385_s14 + $0x98] sm:$0xff] }
 0x82d   : > { %v6839_v4 = vpop.f32.mrf.mxu2  ;;  %7611 = vmatpush.bf16.msra.mxu1 %v11831_v41  ;;  %v16819_v41 = vld [vmem:[#allocation65_spill] sm:$0xff] }
 0x82e   : > { %v6840_v12 = vadd.f32 %v6839_v4, %v15683_v18  ;;  %6990 = vmatmul.bf16.gmra.mxu1 %v14754_v33  ;;  %v7098_v20 = vmax.f32 %v6796_v52, 0.0 }
 0x82f   : > { %v6751_v6 = vpop.f32.mrf.mxu0 }
 0x830   : > { %v6752_v55 = vadd.f32 %v6751_v6, %v15621_v61  ;;  %v15728_v49 = vadd.f32 %v6888_v58, %v6840_v12  ;;  %v11823_v58 = vld [vmem:[%s13385_s14 + $0x58] sm:$0xff] }
 0x831   : > { %v6890_v27 = vpop.f32.mrf.mxu3  ;;  %7562 = vmatpush.bf16.msra.mxu0 %v11823_v58  ;;  %v16816_v12 = vld [vmem:[#allocation66_spill] sm:$0xff]  ;;  %7612 = vmatpush.bf16.msra.mxu1 %v11830_v48  ;;  %v16818_v58 = vld [vmem:[#allocation83_spill] sm:$0xff] }
 0x832   : > { %6946 = vmatmul.bf16.gmra.mxu0 %v16814_v8 }
 0x833   : > { %v6797_v50 = vpop.f32.mrf.mxu1 }
 0x834   : > { %v6798_v31 = vadd.f32 %v6797_v50, %v6749_v23 }
 0x835   : > { %v6841_v33 = vpop.f32.mrf.mxu2 }
 0x836   : > { %7532 = vmatmul.bf16.gmra.mxu3 %v16815_v26  ;;  %v7103_v29 = vmax.f32 %v6798_v31, 0.0  ;;  %v6842_v61 = vadd.f32 %v6841_v33, %v15683_v18 }
 0x837   : > { %v6753_v3 = vpop.f32.mrf.mxu0 }
 0x838   : > { %v6754_v51 = vadd.f32 %v6753_v3, %v15627_v22  ;;  %v15734_v63 = vadd.f32 %v6890_v27, %v6842_v61  ;;  %v15736_v16 = vpack.c.bf16 %v7103_v29, %v7098_v20  ;;  %v11838_v20 = vld [vmem:[%s13385_s14 + $0xd0] sm:$0xff]  ;;  %v11821_v29 = vld [vmem:[%s13385_s14 + $0x48] sm:$0xff] }
 0x839   : > { %v6893_v10 = vpop.f32.mrf.mxu3  ;;  %7661 = vmatpush.bf16.msra.mxu2 %v11838_v20 }
 0x83a   : > { %7039 = vmatmul.bf16.gmra.mxu2 %v16798_v0 }
 0x83b   : > { %v6800_v9 = vpop.f32.mrf.mxu1 }
 0x83c   : > { %v6801_v25 = vadd.f32 %v6800_v9, %v6752_v55  ;;  %v11820_v9 = vld [vmem:[%s13385_s14 + $0x40] sm:$0xff] }
 0x83d   : > { %v6844_v30 = vpop.f32.mrf.mxu2 }
 0x83e   : > { %v6845_v23 = vadd.f32 %v6844_v30, %v15683_v18  ;;  %6995 = vmatmul.bf16.gmra.mxu1 %v14776_v2  ;;  %v16817_v2 = vld [vmem:[#allocation63_spill] sm:$0xff]  ;;  %v7108_v6 = vmax.f32 %v6801_v25, 0.0 }
 0x83f   : > { %v6756_v22 = vpop.f32.mrf.mxu0 }
 0x840   : > { %v6757_v52 = vadd.f32 %v6756_v22, %v15641_v47  ;;  %v15746_v0 = vadd.f32 %v6893_v10, %v6845_v23  ;;  %v11822_v47 = vld [vmem:[%s13385_s14 + $0x50] sm:$0xff] }
 0x841   : > { %v6895_v4 = vpop.f32.mrf.mxu3  ;;  %7563 = vmatpush.bf16.msra.mxu0 %v11822_v47  ;;  %v11845_v47 = vld [vmem:[%s13385_s14 + $0x108] sm:$0xff] }
 0x842   : > { %6951 = vmatmul.bf16.gmra.mxu0 %v16816_v12 }
 0x843   : > { %v6802_v28 = vpop.f32.mrf.mxu1 }
 0x844   : > { %v6803_v46 = vadd.f32 %v6802_v28, %v6754_v51 }
 0x845   : > { %v6846_v45 = vpop.f32.mrf.mxu2  ;;  %7564 = vmatpush.bf16.msra.mxu0 %v11821_v29 }
 0x846   : > { %7537 = vmatmul.bf16.gmra.mxu3 %v16817_v2  ;;  %v7113_v55 = vmax.f32 %v6803_v46, 0.0  ;;  %v6847_v27 = vadd.f32 %v6846_v45, %v15683_v18  ;;  %v11837_v45 = vld [vmem:[%s13385_s14 + $0xc8] sm:$0xff] }
 0x847   : > { %v6758_v8 = vpop.f32.mrf.mxu0  ;;  %7662 = vmatpush.bf16.msra.mxu2 %v11837_v45 }
 0x848   : > { %v6759_v50 = vadd.f32 %v6758_v8, %v15647_v14  ;;  %v15753_v26 = vadd.f32 %v6895_v4, %v6847_v27  ;;  %v15755_v33 = vpack.c.bf16 %v7113_v55, %v7108_v6  ;;  %v11846_v14 = vld [vmem:[%s13385_s14 + $0x110] sm:$0xff]  ;;  %v11829_v4 = vld [vmem:[%s13385_s14 + $0x88] sm:$0xff]  ;;  %v11828_v6 = vld [vmem:[%s13385_s14 + $0x80] sm:$0xff] }
 0x849   : > { %v6898_v31 = vpop.f32.mrf.mxu3  ;;  %7710 = vmatpush.bf16.msra.mxu3 %v11846_v14  ;;  %7565 = vmatpush.bf16.msra.mxu0 %v11820_v9 }
 0x84a   : > { %7044 = vmatmul.bf16.gmra.mxu2 %v16799_v60  ;;  %7613 = vmatpush.bf16.msra.mxu1 %v11829_v4 }
 0x84b   : > { %v6805_v61 = vpop.f32.mrf.mxu1 }
 0x84c   : > { %v6806_v3 = vadd.f32 %v6805_v61, %v6757_v52 }
 0x84d   : > { %v6849_v51 = vpop.f32.mrf.mxu2  ;;  %7711 = vmatpush.bf16.msra.mxu3 %v11845_v47 }
 0x84e   : > { %v6850_v10 = vadd.f32 %v6849_v51, %v15683_v18  ;;  %7000 = vmatmul.bf16.gmra.mxu1 %v14800_v42  ;;  %v7118_v52 = vmax.f32 %v6806_v3, 0.0  ;;  %v16820_v3 = vld [vmem:[#allocation67_spill] sm:$0xff] }
 0x84f   : > { %v6761_v25 = vpop.f32.mrf.mxu0  ;;  %7614 = vmatpush.bf16.msra.mxu1 %v11828_v6 }
 0x850   : > { %v6762_v30 = vadd.f32 %v6761_v25, %v15655_v62  ;;  %v15768_v60 = vadd.f32 %v6898_v31, %v6850_v10 }
 0x851   : > { %v15766_v23 = vpop.f32.mrf.mxu3 }
 0x852   : > { %6956 = vmatmul.bf16.gmra.mxu0 %v16818_v58  ;;  %v11844_v58 = vld [vmem:[%s13385_s14 + $0x100] sm:$0xff] }
 0x853   : > { %v6807_v15 = vpop.f32.mrf.mxu1  ;;  %7712 = vmatpush.bf16.msra.mxu3 %v11844_v58 }
 0x854   : > { %v6808_v42 = vadd.f32 %v6807_v15, %v6759_v50 }
 0x855   : > { %v15772_v22 = vpop.f32.mrf.mxu2 }
 0x856   : > { %7542 = vmatmul.bf16.gmra.mxu3 %v16819_v41  ;;  %v7123_v62 = vmax.f32 %v6808_v42, 0.0 }
 0x857   : > { %v6763_v12 = vpop.f32.mrf.mxu0 }
 0x858   : > { %v6764_v28 = vadd.f32 %v6763_v12, %v15661_v40  ;;  %v15776_v2 = vpack.c.bf16 %v7123_v62, %v7118_v52 }
 0x859   : > { %v6903_v46 = vpop.f32.mrf.mxu3 }
 0x85a   : > { %7049 = vmatmul.bf16.gmra.mxu2 %v16800_v13 }
 0x85b   : > { %v6810_v55 = vpop.f32.mrf.mxu1 }
 0x85c   : > { %v6811_v27 = vadd.f32 %v6810_v55, %v6762_v30 }
 0x85d   : > { %v6854_v8 = vpop.f32.mrf.mxu2 }
 0x85e   : > { %v6855_v50 = vadd.f32 %v6854_v8, %v15683_v18  ;;  %7005 = vmatmul.bf16.gmra.mxu1 %v14827_v59  ;;  %v7128_v10 = vmax.f32 %v6811_v27, 0.0  ;;  %v11836_v59 = vld [vmem:[%s13385_s14 + $0xc0] sm:$0xff] }
 0x85f   : > { %v6766_v40 = vpop.f32.mrf.mxu0  ;;  %7663 = vmatpush.bf16.msra.mxu2 %v11836_v59 }
 0x860   : > { %v6767_v31 = vadd.f32 %v6766_v40, %v15671_v17  ;;  %v15787_v13 = vadd.f32 %v6903_v46, %v6855_v50 }
 0x861   : > { %v15785_v20 = vpop.f32.mrf.mxu3 }
 0x862   : > { %6961 = vmatmul.bf16.gmra.mxu0 %v14556_v54 }
 0x863   : > { %v6812_v29 = vpop.f32.mrf.mxu1 }
 0x864   : > { %v6813_v61 = vadd.f32 %v6812_v29, %v6764_v28  ;;  %v16822_v28 = vld [vmem:[#allocation76_spill] sm:$0xff]  ;;  %v16823_v29 = vld [vmem:[#allocation78_spill] sm:$0xff] }
 0x865   : > { %v15791_v51 = vpop.f32.mrf.mxu2 }
 0x866   : > { %7547 = vmatmul.bf16.gmra.mxu3 %v16820_v3  ;;  %v7133_v14 = vmax.f32 %v6813_v61, 0.0 }
 0x867   : > { %v6768_v48 = vpop.f32.mrf.mxu0 }
 0x868   : > { %v6769_v9 = vadd.f32 %v6768_v48, %v15679_v21  ;;  %v15795_v25 = vpack.c.bf16 %v7133_v14, %v7128_v10  ;;  %v16821_v21 = vld [vmem:[#allocation77_spill] sm:$0xff] }
 0x869   : > { %v6908_v17 = vpop.f32.mrf.mxu3 }
 0x86a   : > { %7054 = vmatmul.bf16.gmra.mxu2 %v16801_v53 }
 0x86b   : > { %v6815_v54 = vpop.f32.mrf.mxu1 }
 0x86c   : > { %v6816_v30 = vadd.f32 %v6815_v54, %v6767_v31 }
 0x86d   : > { %v6859_v15 = vpop.f32.mrf.mxu2 }
 0x86e   : > { %v6860_v42 = vadd.f32 %v6859_v15, %v15683_v18  ;;  %7010 = vmatmul.bf16.gmra.mxu1 %v16804_v5  ;;  %v7138_v46 = vmax.f32 %v6816_v30, 0.0  ;;  %v16824_v30 = vld [vmem:[#allocation79_spill] sm:$0xff] }
 0x86f   : > { %v6927_v41 = vpop.f32.mrf.mxu0 }
 0x870   : > { %v15803_v62 = vadd.f32 %v6908_v17, %v6860_v42  ;;  %v6928_v48 = vadd.f32 %v6927_v41, %v15692_v37 }
 0x871   : > { %v15801_v52 = vpop.f32.mrf.mxu3 }
 0x872   : > { %7566 = vmatmul.bf16.vlgmr.msra.gmra.mxu0 %v16821_v21 }
 0x873   : > { %v6817_v4 = vpop.f32.mrf.mxu1 }
 0x874   : > { %v6818_v12 = vadd.f32 %v6817_v4, %v6769_v9 }
 0x875   : > { %v15807_v53 = vpop.f32.mrf.mxu2 }
 0x876   : > { %7552 = vmatmul.bf16.gmra.mxu3 %v16822_v28  ;;  %v7143_v45 = vmax.f32 %v6818_v12, 0.0 }
 0x877   : > { %v6929_v6 = vpop.f32.mrf.mxu0 }
 0x878   : > { %v15809_v27 = vpack.c.bf16 %v7143_v45, %v7138_v46  ;;  %v6930_v17 = vadd.f32 %v6929_v6, %v15698_v38 }
 0x879   : > { %v6913_v55 = vpop.f32.mrf.mxu3 }
 0x87a   : > { %7059 = vmatmul.bf16.gmra.mxu2 %v16806_v44 }
 0x87b   : > { %v6976_v5 = vpop.f32.mrf.mxu1 }
 0x87c   : > { %v6977_v54 = vadd.f32 %v6976_v5, %v6928_v48 }
 0x87d   : > { %v6864_v47 = vpop.f32.mrf.mxu2 }
 0x87e   : > { %v6865_v8 = vadd.f32 %v6864_v47, %v15683_v18  ;;  %7615 = vmatmul.bf16.vlgmr.msra.gmra.mxu1 %v15500_v34  ;;  %v16825_v47 = vld [vmem:[#allocation80_spill] sm:$0xff] }
 0x87f   : > { %v6932_v50 = vpop.f32.mrf.mxu0 }
 0x880   : > { %v15816_v31 = vadd.f32 %v6913_v55, %v6865_v8  ;;  %v6933_v45 = vadd.f32 %v6932_v50, %v15710_v56 }
 0x881   : > { %v15814_v40 = vpop.f32.mrf.mxu3 }
 0x882   : > { %7571 = vmatmul.bf16.gmra.mxu0 %v16823_v29 }
 0x883   : > { %v6978_v61 = vpop.f32.mrf.mxu1 }
 0x884   : > { %v6979_v15 = vadd.f32 %v6978_v61, %v6930_v17 }
 0x885   : > { %v15819_v3 = vpop.f32.mrf.mxu2 }
 0x887   : > { %v6934_v10 = vpop.f32.mrf.mxu0 }
 0x888   : > { %v6935_v55 = vadd.f32 %v6934_v10, %v15716_v32 }
 0x889   : > { %v15821_v14 = vpop.f32.mrf.mxu3 }
 0x88a   : > { %7664 = vmatmul.bf16.vlgmr.msra.gmra.mxu2 %v15676_v19 }
 0x88b   : > { %v6981_v44 = vpop.f32.mrf.mxu1 }
 0x88c   : > { %v6982_v5 = vadd.f32 %v6981_v44, %v6933_v45 }
 0x88d   : > { %v7025_v59 = vpop.f32.mrf.mxu2 }
 0x88e   : > { %7620 = vmatmul.bf16.gmra.mxu1 %v15529_v39  ;;  %v7026_v42 = vadd.f32 %v7025_v59, %v6977_v54 }
 0x88f   : > { %v6937_v34 = vpop.f32.mrf.mxu0 }
 0x890   : > { %v7069_v12 = vmax.f32 %v7026_v42, 0.0  ;;  %v6938_v10 = vadd.f32 %v6937_v34, %v15728_v49 }
 0x891   : > { %v15826_v9 = vpop.f32.mrf.mxu3 }
 0x892   : > { %7576 = vmatmul.bf16.gmra.mxu0 %v16824_v30 }
 0x893   : > { %v6983_v58 = vpop.f32.mrf.mxu1 }
 0x894   : > { %v6984_v29 = vadd.f32 %v6983_v58, %v6935_v55 }
 0x895   : > { %v7027_v21 = vpop.f32.mrf.mxu2 }
 0x896   : > { %v7028_v4 = vadd.f32 %v7027_v21, %v6979_v15  ;;  %v16826_v15 = vld [vmem:[#allocation84_spill] sm:$0xff] }
 0x897   : > { %v6939_v19 = vpop.f32.mrf.mxu0 }
 0x898   : > { %v7074_v28 = vmax.f32 %v7028_v4, 0.0  ;;  %v6940_v44 = vadd.f32 %v6939_v19, %v15734_v63 }
 0x899   : > { %v15830_v46 = vpop.f32.mrf.mxu3 }
 0x89a   : > { %v7229_v39 = vpack.c.bf16 %v7074_v28, %v7069_v12  ;;  %7669 = vmatmul.bf16.gmra.mxu2 %v15700_v43 }
 0x89b   : > { %v6986_v37 = vpop.f32.mrf.mxu1 }
 0x89c   : > { %7713 = vmatmul.bf16.vlgmr.msra.gmra.mxu3 %v7229_v39  ;;  %v6987_v58 = vadd.f32 %v6986_v37, %v6938_v10 }
 0x89d   : > { %v7030_v41 = vpop.f32.mrf.mxu2 }
 0x89e   : > { %7625 = vmatmul.bf16.gmra.mxu1 %v15550_v36  ;;  %v7031_v61 = vadd.f32 %v7030_v41, %v6982_v5 }
 0x89f   : > { %v6942_v38 = vpop.f32.mrf.mxu0 }
 0x8a0   : > { %v7079_v17 = vmax.f32 %v7031_v61, 0.0  ;;  %v6943_v19 = vadd.f32 %v6942_v38, %v15746_v0  ;;  %v6852_v0 = vadd.f32 %v15772_v22, %v15683_v18 }
 0x8a1   : > { %v15835_v6 = vpop.f32.mrf.mxu3 }
 0x8a2   : > { %7581 = vmatmul.bf16.gmra.mxu0 %v16825_v47  ;;  %v16827_v47 = vld [vmem:[#allocation85_spill] sm:$0xff] }
 0x8a3   : > { %v6988_v8 = vpop.f32.mrf.mxu1 }
 0x8a4   : > { %v6989_v4 = vadd.f32 %v6988_v8, %v6940_v44 }
 0x8a5   : > { %v7032_v59 = vpop.f32.mrf.mxu2 }
 0x8a6   : > { %v7033_v43 = vadd.f32 %v7032_v59, %v6984_v29 }
 0x8a7   : > { %v6944_v48 = vpop.f32.mrf.mxu0 }
 0x8a8   : > { %v7084_v54 = vmax.f32 %v7033_v43, 0.0  ;;  %v6945_v37 = vadd.f32 %v6944_v48, %v15753_v26 }
 0x8a9   : > { %v15839_v30 = vpop.f32.mrf.mxu3 }
 0x8aa   : > { %7674 = vmatmul.bf16.gmra.mxu2 %v15718_v1  ;;  %v7234_v36 = vpack.c.bf16 %v7084_v54, %v7079_v17 }
 0x8ab   : > { %v6991_v56 = vpop.f32.mrf.mxu1 }
 0x8ac   : > { %7718 = vmatmul.bf16.gmra.mxu3 %v7234_v36  ;;  %v6992_v5 = vadd.f32 %v6991_v56, %v6943_v19  ;;  %v6901_v56 = vadd.f32 %v15766_v23, %v6852_v0 }
 0x8ad   : > { %v7035_v50 = vpop.f32.mrf.mxu2 }
 0x8ae   : > { %7630 = vmatmul.bf16.gmra.mxu1 %v15571_v35  ;;  %v7036_v12 = vadd.f32 %v7035_v50, %v6987_v58 }
 0x8af   : > { %v6947_v32 = vpop.f32.mrf.mxu0 }
 0x8b0   : > { %v7089_v41 = vmax.f32 %v7036_v12, 0.0  ;;  %v6948_v48 = vadd.f32 %v6947_v32, %v15768_v60  ;;  %v6857_v32 = vadd.f32 %v15791_v51, %v15683_v18 }
 0x8b1   : > { %v15846_v42 = vpop.f32.mrf.mxu3 }
 0x8b2   : > { %7586 = vmatmul.bf16.gmra.mxu0 %v16826_v15  ;;  %v16828_v15 = vld [vmem:[#allocation71_spill] sm:$0xff] }
 0x8b3   : > { %v6993_v21 = vpop.f32.mrf.mxu1 }
 0x8b4   : > { %v6994_v29 = vadd.f32 %v6993_v21, %v6945_v37  ;;  %v16829_v37 = vld [vmem:[#allocation72_spill] sm:$0xff] }
 0x8b5   : > { %v7037_v1 = vpop.f32.mrf.mxu2 }
 0x8b6   : > { %v7038_v28 = vadd.f32 %v7037_v1, %v6989_v4 }
 0x8b7   : > { %v6949_v39 = vpop.f32.mrf.mxu0 }
 0x8b8   : > { %v7094_v45 = vmax.f32 %v7038_v28, 0.0  ;;  %v6950_v44 = vadd.f32 %v6949_v39, %v6901_v56 }
 0x8b9   : > { %v15849_v49 = vpop.f32.mrf.mxu3 }
 0x8ba   : > { %7679 = vmatmul.bf16.gmra.mxu2 %v15736_v16  ;;  %v7239_v35 = vpack.c.bf16 %v7094_v45, %v7089_v41 }
 0x8bb   : > { %v6996_v55 = vpop.f32.mrf.mxu1 }
 0x8bc   : > { %7723 = vmatmul.bf16.gmra.mxu3 %v7239_v35  ;;  %v6997_v58 = vadd.f32 %v6996_v55, %v6948_v48  ;;  %v6906_v55 = vadd.f32 %v15785_v20, %v6857_v32 }
 0x8bd   : > { %v7040_v63 = vpop.f32.mrf.mxu2 }
 0x8be   : > { %7635 = vmatmul.bf16.gmra.mxu1 %v15592_v24  ;;  %v7041_v61 = vadd.f32 %v7040_v63, %v6992_v5 }
 0x8bf   : > { %v6952_v34 = vpop.f32.mrf.mxu0 }
 0x8c0   : > { %v7099_v54 = vmax.f32 %v7041_v61, 0.0  ;;  %v6953_v35 = vadd.f32 %v6952_v34, %v15787_v13  ;;  %v6862_v34 = vadd.f32 %v15807_v53, %v15683_v18 }
 0x8c1   : > { %v15855_v43 = vpop.f32.mrf.mxu3 }
 0x8c2   : > { %7591 = vmatmul.bf16.gmra.mxu0 %v16827_v47  ;;  %v6911_v0 = vadd.f32 %v15801_v52, %v6862_v34  ;;  %v6867_v52 = vadd.f32 %v15819_v3, %v15683_v18 }
 0x8c3   : > { %v6998_v8 = vpop.f32.mrf.mxu1 }
 0x8c4   : > { %v6999_v21 = vadd.f32 %v6998_v8, %v6950_v44 }
 0x8c5   : > { %v7042_v16 = vpop.f32.mrf.mxu2 }
 0x8c6   : > { %v7043_v59 = vadd.f32 %v7042_v16, %v6994_v29 }
 0x8c7   : > { %v6954_v17 = vpop.f32.mrf.mxu0 }
 0x8c8   : > { %v7104_v36 = vmax.f32 %v7043_v59, 0.0  ;;  %v6955_v63 = vadd.f32 %v6954_v17, %v6906_v55  ;;  %v15879_v59 = vld [vmem:[%s960_s26] ss:$0 sm:$0xff] }
 0x8c9   : > { %v15863_v10 = vpop.f32.mrf.mxu3 }
 0x8ca   : > { %7684 = vmatmul.bf16.gmra.mxu2 %v15755_v33  ;;  %v7244_v24 = vpack.c.bf16 %v7104_v36, %v7099_v54  ;;  %v7519_v54 = vadd.f32 %v15879_v59, %v15821_v14 }
 0x8cb   : > { %v7001_v50 = vpop.f32.mrf.mxu1 }
 0x8cc   : > { %7728 = vmatmul.bf16.gmra.mxu3 %v7244_v24  ;;  %v7002_v19 = vadd.f32 %v7001_v50, %v6953_v35 }
 0x8cd   : > { %v7045_v26 = vpop.f32.mrf.mxu2 }
 0x8ce   : > { %7640 = vmatmul.bf16.gmra.mxu1 %v15613_v7  ;;  %v7046_v4 = vadd.f32 %v7045_v26, %v6997_v58 }
 0x8cf   : > { %v6957_v38 = vpop.f32.mrf.mxu0 }
 0x8d0   : > { %v7109_v28 = vmax.f32 %v7046_v4, 0.0  ;;  %v6958_v50 = vadd.f32 %v6957_v38, %v15803_v62 }
 0x8d1   : > { %v15867_v60 = vpop.f32.mrf.mxu3 }
 0x8d2   : > { %7596 = vmatmul.bf16.gmra.mxu0 %v16828_v15 }
 0x8d3   : > { %v7003_v33 = vpop.f32.mrf.mxu1 }
 0x8d4   : > { %v7004_v5 = vadd.f32 %v7003_v33, %v6955_v63 }
 0x8d5   : > { %v7047_v12 = vpop.f32.mrf.mxu2 }
 0x8d6   : > { %v7048_v22 = vadd.f32 %v7047_v12, %v6999_v21 }
 0x8d7   : > { %v6959_v1 = vpop.f32.mrf.mxu0 }
 0x8d8   : > { %v7114_v41 = vmax.f32 %v7048_v22, 0.0  ;;  %v7524_v22 = vadd.f32 %v15879_v59, %v15830_v46 }
 0x8d9   : > { %v15875_v8 = vpop.f32.mrf.mxu3 }
 0x8da   : > { %v7249_v7 = vpack.c.bf16 %v7114_v41, %v7109_v28  ;;  %7689 = vmatmul.bf16.gmra.mxu2 %v15776_v2  ;;  %v7521_v28 = vadd.f32 %v15879_v59, %v15826_v9 }
 0x8db   : > { %v7006_v23 = vpop.f32.mrf.mxu1 }
 0x8dc   : > { %7733 = vmatmul.bf16.gmra.mxu3 %v7249_v7  ;;  %v7007_v48 = vadd.f32 %v7006_v23, %v6958_v50  ;;  %v6916_v7 = vadd.f32 %v15814_v40, %v6867_v52 }
 0x8dd   : > { %v7050_v39 = vpop.f32.mrf.mxu2 }
 0x8de   : > { %7645 = vmatmul.bf16.gmra.mxu1 %v15636_v57  ;;  %v7051_v47 = vadd.f32 %v7050_v39, %v7002_v19 }
 0x8df   : > { %v6962_v45 = vpop.f32.mrf.mxu0 }
 0x8e0   : > { %v7119_v16 = vmax.f32 %v7051_v47, 0.0  ;;  %v6963_v41 = vadd.f32 %v6962_v45, %v15816_v31 }
 0x8e1   : > { %v15887_v36 = vpop.f32.mrf.mxu3 }
 0x8e2   : > { %7601 = vmatmul.bf16.gmra.mxu0 %v16829_v37 }
 0x8e3   : > { %v7008_v2 = vpop.f32.mrf.mxu1 }
 0x8e5   : > { %v7052_v51 = vpop.f32.mrf.mxu2 }
 0x8e6   : > { %v7053_v29 = vadd.f32 %v7052_v51, %v7004_v5  ;;  %v7529_v51 = vadd.f32 %v15879_v59, %v15839_v30 }
 0x8e7   : > { %v6964_v61 = vpop.f32.mrf.mxu0 }
 0x8e8   : > { %v7124_v57 = vmax.f32 %v7053_v29, 0.0 }
 0x8e9   : > { %v15891_v4 = vpop.f32.mrf.mxu3 }
 0x8ea   : > { %v7254_v13 = vpack.c.bf16 %v7124_v57, %v7119_v16  ;;  %7694 = vmatmul.bf16.gmra.mxu2 %v15795_v25  ;;  %v6960_v25 = vadd.f32 %v6959_v1, %v6911_v0  ;;  %v7526_v16 = vadd.f32 %v15879_v59, %v15835_v6  ;;  %v7534_v6 = vadd.f32 %v15879_v59, %v15849_v49  ;;  %v12148_v49 = vld [vmem:[#allocation2] sm:$0xff] }
 0x8eb   : > { %v7011_v20 = vpop.f32.mrf.mxu1 }
 0x8ec   : > { %7738 = vmatmul.bf16.gmra.mxu3 %v7254_v13  ;;  %v7009_v44 = vadd.f32 %v7008_v2, %v6960_v25  ;;  %v7012_v32 = vadd.f32 %v7011_v20, %v6963_v41 }
 0x8ed   : > { %v7055_v17 = vpop.f32.mrf.mxu2 }
 0x8ee   : > { %7650 = vmatmul.bf16.gmra.mxu1 %v15651_v11  ;;  %v7056_v53 = vadd.f32 %v7055_v17, %v7007_v48 }
 0x8ef   : > { %v7567_v24 = vpop.f32.mrf.mxu0 }
 0x8f0   : > { %v7568_v26 = vadd.f32 %v7567_v24, %v7519_v54  ;;  %v7129_v21 = vmax.f32 %v7056_v53, 0.0 }
 0x8f1   : > { %v15902_v35 = vpop.f32.mrf.mxu3 }
 0x8f3   : > { %v7013_v56 = vpop.f32.mrf.mxu1 }
 0x8f5   : > { %v7057_v58 = vpop.f32.mrf.mxu2 }
 0x8f6   : > { %v7058_v15 = vadd.f32 %v7057_v58, %v7009_v44  ;;  %v7531_v44 = vadd.f32 %v15879_v59, %v15846_v42 }
 0x8f7   : > { %v7569_v33 = vpop.f32.mrf.mxu0 }
 0x8f8   : > { %v7134_v14 = vmax.f32 %v7058_v15, 0.0  ;;  %v7570_v39 = vadd.f32 %v7569_v33, %v7521_v28  ;;  %v12147_v33 = vld [vmem:[#allocation2 + $0x30] sm:$0xff] }
 0x8f9   : > { %v15904_v40 = vpop.f32.mrf.mxu3 }
 0x8fa   : > { %v7259_v11 = vpack.c.bf16 %v7134_v14, %v7129_v21  ;;  %7699 = vmatmul.bf16.gmra.mxu2 %v15809_v27  ;;  %v6965_v27 = vadd.f32 %v6964_v61, %v6916_v7 }
 0x8fb   : > { %v7616_v12 = vpop.f32.mrf.mxu1 }
 0x8fc   : > { %v7617_v62 = vadd.f32 %v7616_v12, %v7568_v26  ;;  %7743 = vmatmul.bf16.gmra.mxu3 %v7259_v11  ;;  %v7014_v3 = vadd.f32 %v7013_v56, %v6965_v27 }
 0x8fd   : > { %v7060_v38 = vpop.f32.mrf.mxu2 }
 0x8fe   : > { %v7061_v55 = vadd.f32 %v7060_v38, %v7012_v32 }
 0x8ff   : > { %v7572_v1 = vpop.f32.mrf.mxu0 }
 0x900   : > { %v7573_v23 = vadd.f32 %v7572_v1, %v7524_v22  ;;  %v7139_v2 = vmax.f32 %v7061_v55, 0.0  ;;  %v12149_v55 = vld [vmem:[#allocation2 + $0x58] sm:$0xff] }
 0x901   : > { %v15910_v24 = vpop.f32.mrf.mxu3 }
 0x903   : > { %v7618_v18 = vpop.f32.mrf.mxu1 }
 0x904   : > { %v7619_v63 = vadd.f32 %v7618_v18, %v7570_v39  ;;  %v7536_v39 = vadd.f32 %v15879_v59, %v15855_v43 }
 0x905   : > { %v7062_v19 = vpop.f32.mrf.mxu2 }
 0x906   : > { %v7063_v46 = vadd.f32 %v7062_v19, %v7014_v3 }
 0x907   : > { %v7574_v37 = vpop.f32.mrf.mxu0 }
 0x908   : > { %v7144_v5 = vmax.f32 %v7063_v46, 0.0  ;;  %v7575_v13 = vadd.f32 %v7574_v37, %v7526_v16 }
 0x90a   : > { %v7264_v9 = vpack.c.bf16 %v7144_v5, %v7139_v2 }
 0x90b   : > { %v7621_v47 = vpop.f32.mrf.mxu1 }
 0x90c   : > { %v7622_v31 = vadd.f32 %v7621_v47, %v7573_v23  ;;  %7748 = vmatmul.bf16.gmra.mxu3 %v7264_v9 }
 0x90d   : > { %v7665_v45 = vpop.f32.mrf.mxu2 }
 0x90e   : > { %v7666_v29 = vadd.f32 %v7665_v45, %v7617_v62 }
 0x90f   : > { %v7577_v61 = vpop.f32.mrf.mxu0 }
 0x910   : > { %v7578_v57 = vadd.f32 %v7577_v61, %v7529_v51 }
 0x913   : > { %v7623_v20 = vpop.f32.mrf.mxu1 }
 0x914   : > { %v7624_v34 = vadd.f32 %v7623_v20, %v7575_v13 }
 0x915   : > { %v7667_v17 = vpop.f32.mrf.mxu2 }
 0x916   : > { %v7668_v54 = vadd.f32 %v7667_v17, %v7619_v63 }
 0x917   : > { %v7579_v50 = vpop.f32.mrf.mxu0 }
 0x918   : > { %v7580_v15 = vadd.f32 %v7579_v50, %v7531_v44 }
 0x91b   : > { %v7626_v0 = vpop.f32.mrf.mxu1 }
 0x91c   : > { %v7627_v26 = vadd.f32 %v7626_v0, %v7578_v57  ;;  %v12151_v57 = vld [vmem:[#allocation2 + $0x50] sm:$0xff] }
 0x91d   : > { %v7670_v25 = vpop.f32.mrf.mxu2 }
 0x91e   : > { %v7671_v30 = vadd.f32 %v7670_v25, %v7622_v31  ;;  %v12150_v31 = vld [vmem:[#allocation2 + $0x18] sm:$0xff] }
 0x91f   : > { %v7582_v48 = vpop.f32.mrf.mxu0  ;;  %v7714_v56 = vpop.f32.mrf.mxu3 }
 0x920   : > { %v7583_v53 = vadd.f32 %v7582_v48, %v7534_v6  ;;  %v7715_v58 = vadd.f32 %v7714_v56, %v7666_v29 }
 0x922   : > { %v7754_v21 = vadd.f32 %v12147_v33, %v7715_v58 }
 0x923   : > { %v7628_v14 = vpop.f32.mrf.mxu1 }
 0x924   : > { %v15923_v11 = vmax.f32 %v7754_v21, 0.0  ;;  %v7629_v12 = vadd.f32 %v7628_v14, %v7580_v15 }
 0x925   : > { %v7672_v52 = vpop.f32.mrf.mxu2 }
 0x926   : > { %v7673_v62 = vadd.f32 %v7672_v52, %v7624_v34  ;;  %v7539_v52 = vadd.f32 %v15879_v59, %v15863_v10  ;;  %7791 = vst [vmem:[#allocation2 + $0x30] sm:$0xff] (%p15915_p13), %v15923_v11 }
 0x927   : > { %v7716_v38 = vpop.f32.mrf.mxu3  ;;  %v7584_v27 = vpop.f32.mrf.mxu0 }
 0x928   : > { %v7717_v22 = vadd.f32 %v7716_v38, %v7668_v54  ;;  %v7585_v3 = vadd.f32 %v7584_v27, %v7536_v39 }
 0x92a   : > { %v7755_v1 = vadd.f32 %v12148_v49, %v7717_v22  ;;  %v12154_v22 = vld [vmem:[#allocation2 + $0x48] sm:$0xff] }
 0x92b   : > { %v7631_v28 = vpop.f32.mrf.mxu1 }
 0x92c   : > { %v15925_v41 = vmax.f32 %v7755_v1, 0.0  ;;  %v7632_v7 = vadd.f32 %v7631_v28, %v7583_v53  ;;  %v12153_v53 = vld [vmem:[#allocation2 + $0x8] sm:$0xff] }
 0x92d   : > { %v7675_v42 = vpop.f32.mrf.mxu2 }
 0x92e   : > { %v7676_v23 = vadd.f32 %v7675_v42, %v7627_v26  ;;  %v12152_v26 = vld [vmem:[#allocation2 + $0x68] sm:$0xff]  ;;  %7792 = vst [vmem:[#allocation2] sm:$0xff] (%p15915_p13), %v15925_v41 }
 0x92f   : > { %v7719_v32 = vpop.f32.mrf.mxu3  ;;  %v7587_v0 = vpop.f32.mrf.mxu0 }
 0x930   : > { %v7720_v18 = vadd.f32 %v7719_v32, %v7671_v30  ;;  %v7588_v38 = vadd.f32 %v7587_v0, %v7539_v52  ;;  %v7541_v32 = vadd.f32 %v15879_v59, %v15867_v60  ;;  %v12157_v0 = vld [vmem:[#allocation2 + $0x10] sm:$0xff] }
 0x932   : > { %v7756_v63 = vadd.f32 %v12149_v55, %v7720_v18  ;;  %v12155_v55 = vld [vmem:[#allocation2 + $0x40] sm:$0xff] }
 0x933   : > { %v7633_v19 = vpop.f32.mrf.mxu1 }
 0x934   : > { %v15929_v46 = vmax.f32 %v7756_v63, 0.0  ;;  %v7634_v37 = vadd.f32 %v7633_v19, %v7585_v3 }
 0x935   : > { %v7677_v2 = vpop.f32.mrf.mxu2 }
 0x936   : > { %v7678_v5 = vadd.f32 %v7677_v2, %v7629_v12  ;;  %7793 = vst [vmem:[#allocation2 + $0x58] sm:$0xff] (%p15915_p13), %v15929_v46 }
 0x937   : > { %v7721_v9 = vpop.f32.mrf.mxu3  ;;  %v7589_v15 = vpop.f32.mrf.mxu0 }
 0x938   : > { %v7722_v47 = vadd.f32 %v7721_v9, %v7673_v62  ;;  %v7590_v3 = vadd.f32 %v7589_v15, %v7541_v32  ;;  %v7544_v9 = vadd.f32 %v15879_v59, %v15875_v8 }
 0x93a   : > { %v7757_v45 = vadd.f32 %v12150_v31, %v7722_v47 }
 0x93b   : > { %v7636_v6 = vpop.f32.mrf.mxu1 }
 0x93c   : > { %v15931_v51 = vmax.f32 %v7757_v45, 0.0  ;;  %v7637_v1 = vadd.f32 %v7636_v6, %v7588_v38 }
 0x93d   : > { %v7680_v29 = vpop.f32.mrf.mxu2 }
 0x93e   : > { %v7681_v61 = vadd.f32 %v7680_v29, %v7632_v7  ;;  %v12156_v29 = vld [vmem:[#allocation2 + $0x20] sm:$0xff]  ;;  %7794 = vst [vmem:[#allocation2 + $0x18] sm:$0xff] (%p15915_p13), %v15931_v51 }
 0x93f   : > { %v7724_v16 = vpop.f32.mrf.mxu3  ;;  %v7592_v7 = vpop.f32.mrf.mxu0 }
 0x940   : > { %v7725_v43 = vadd.f32 %v7724_v16, %v7676_v23  ;;  %v7593_v45 = vadd.f32 %v7592_v7, %v7544_v9 }
 0x942   : > { %v7758_v13 = vadd.f32 %v12151_v57, %v7725_v43 }
 0x943   : > { %v7638_v21 = vpop.f32.mrf.mxu1 }
 0x944   : > { %v15933_v20 = vmax.f32 %v7758_v13, 0.0  ;;  %v7639_v10 = vadd.f32 %v7638_v21, %v7590_v3  ;;  %v12158_v21 = vld [vmem:[#allocation2 + $0x38] sm:$0xff] }
 0x945   : > { %v7682_v34 = vpop.f32.mrf.mxu2 }
 0x946   : > { %v7683_v17 = vadd.f32 %v7682_v34, %v7634_v37  ;;  %v7546_v34 = vadd.f32 %v15879_v59, %v15887_v36  ;;  %7795 = vst [vmem:[#allocation2 + $0x50] sm:$0xff] (%p15915_p13), %v15933_v20 }
 0x947   : > { %v7726_v54 = vpop.f32.mrf.mxu3  ;;  %v7594_v2 = vpop.f32.mrf.mxu0 }
 0x948   : > { %v7727_v50 = vadd.f32 %v7726_v54, %v7678_v5 }
 0x94a   : > { %v7759_v25 = vadd.f32 %v12152_v26, %v7727_v50  ;;  %v7595_v50 = vadd.f32 %v7594_v2, %v7546_v34 }
 0x94b   : > { %v7641_v23 = vpop.f32.mrf.mxu1 }
 0x94c   : > { %v15935_v30 = vmax.f32 %v7759_v25, 0.0  ;;  %v7642_v16 = vadd.f32 %v7641_v23, %v7593_v45  ;;  %v12159_v23 = vld [vmem:[#allocation2 + $0x60] sm:$0xff] }
 0x94d   : > { %v7685_v48 = vpop.f32.mrf.mxu2 }
 0x94e   : > { %v7686_v42 = vadd.f32 %v7685_v48, %v7637_v1  ;;  %v7551_v1 = vadd.f32 %v15879_v59, %v15902_v35  ;;  %7796 = vst [vmem:[#allocation2 + $0x68] sm:$0xff] (%p15915_p13), %v15935_v30 }
 0x94f   : > { %v7729_v56 = vpop.f32.mrf.mxu3  ;;  %v7597_v54 = vpop.f32.mrf.mxu0 }
 0x950   : > { %v7730_v44 = vadd.f32 %v7729_v56, %v7681_v61 }
 0x952   : > { %v7760_v58 = vadd.f32 %v12153_v53, %v7730_v44  ;;  %v7549_v53 = vadd.f32 %v15879_v59, %v15891_v4 }
 0x953   : > { %v7643_v31 = vpop.f32.mrf.mxu1 }
 0x954   : > { %v15937_v33 = vmax.f32 %v7760_v58, 0.0  ;;  %v7644_v25 = vadd.f32 %v7643_v31, %v7595_v50  ;;  %v7598_v15 = vadd.f32 %v7597_v54, %v7549_v53 }
 0x955   : > { %v7687_v14 = vpop.f32.mrf.mxu2 }
 0x956   : > { %v7688_v37 = vadd.f32 %v7687_v14, %v7639_v10  ;;  %7797 = vst [vmem:[#allocation2 + $0x8] sm:$0xff] (%p15915_p13), %v15937_v33 }
 0x957   : > { %v7731_v12 = vpop.f32.mrf.mxu3  ;;  %v7599_v36 = vpop.f32.mrf.mxu0 }
 0x958   : > { %v7732_v62 = vadd.f32 %v7731_v12, %v7683_v17 }
 0x95a   : > { %v7761_v49 = vadd.f32 %v12154_v22, %v7732_v62 }
 0x95b   : > { %v7646_v8 = vpop.f32.mrf.mxu1 }
 0x95c   : > { %v15941_v28 = vmax.f32 %v7761_v49, 0.0  ;;  %v7647_v12 = vadd.f32 %v7646_v8, %v7598_v15  ;;  %v12162_v8 = vld [vmem:[#allocation2 + $0x28] sm:$0xff] }
 0x95d   : > { %v7690_v18 = vpop.f32.mrf.mxu2 }
 0x95e   : > { %v7691_v57 = vadd.f32 %v7690_v18, %v7642_v16  ;;  %7798 = vst [vmem:[#allocation2 + $0x48] sm:$0xff] (%p15915_p13), %v15941_v28 }
 0x95f   : > { %v7734_v27 = vpop.f32.mrf.mxu3 }
 0x960   : > { %v7735_v39 = vadd.f32 %v7734_v27, %v7686_v42  ;;  %v7600_v42 = vadd.f32 %v7599_v36, %v7551_v1 }
 0x962   : > { %v7762_v63 = vadd.f32 %v12155_v55, %v7735_v39  ;;  %v7602_v39 = vpop.f32.mrf.mxu0 }
 0x963   : > { %v7648_v62 = vpop.f32.mrf.mxu1 }
 0x964   : > { %v15945_v19 = vmax.f32 %v7762_v63, 0.0  ;;  %v7649_v4 = vadd.f32 %v7648_v62, %v7600_v42  ;;  %v7554_v63 = vadd.f32 %v15879_v59, %v15904_v40 }
 0x965   : > { %v7692_v60 = vpop.f32.mrf.mxu2 }
 0x966   : > { %v7693_v56 = vadd.f32 %v7692_v60, %v7644_v25  ;;  %v7603_v2 = vadd.f32 %v7602_v39, %v7554_v63  ;;  %7799 = vst [vmem:[#allocation2 + $0x40] sm:$0xff] (%p15915_p13), %v15945_v19 }
 0x967   : > { %v7736_v5 = vpop.f32.mrf.mxu3 }
 0x968   : > { %v7737_v47 = vadd.f32 %v7736_v5, %v7688_v37  ;;  %v12160_v5 = vld [vmem:[#allocation2 + $0x70] sm:$0xff] }
 0x96a   : > { %v7763_v61 = vadd.f32 %v12156_v29, %v7737_v47  ;;  %v7604_v45 = vpop.f32.mrf.mxu0 }
 0x96b   : > { %v7651_v3 = vpop.f32.mrf.mxu1 }
 0x96c   : > { %v15949_v43 = vmax.f32 %v7763_v61, 0.0  ;;  %v7652_v35 = vadd.f32 %v7651_v3, %v7603_v2  ;;  %v7556_v61 = vadd.f32 %v15879_v59, %v15910_v24 }
 0x96d   : > { %v7695_v48 = vpop.f32.mrf.mxu2 }
 0x96e   : > { %v7696_v38 = vadd.f32 %v7695_v48, %v7647_v12  ;;  %7800 = vst [vmem:[#allocation2 + $0x20] sm:$0xff] (%p15915_p13), %v15949_v43 }
 0x96f   : > { %v7739_v13 = vpop.f32.mrf.mxu3 }
 0x970   : > { %v7740_v17 = vadd.f32 %v7739_v13, %v7691_v57  ;;  %v7605_v57 = vadd.f32 %v7604_v45, %v7556_v61  ;;  %v12161_v13 = vld [vmem:[#allocation2 + $0x78] sm:$0xff] }
 0x972   : > { %v7764_v26 = vadd.f32 %v12157_v0, %v7740_v17 }
 0x973   : > { %v7653_v16 = vpop.f32.mrf.mxu1 }
 0x974   : > { %v15953_v6 = vmax.f32 %v7764_v26, 0.0  ;;  %v7654_v17 = vadd.f32 %v7653_v16, %v7605_v57 }
 0x975   : > { %v7697_v22 = vpop.f32.mrf.mxu2 }
 0x976   : > { %v7698_v18 = vadd.f32 %v7697_v22, %v7649_v4  ;;  %7801 = vst [vmem:[#allocation2 + $0x10] sm:$0xff] (%p15915_p13), %v15953_v6 }
 0x977   : > { %v7741_v44 = vpop.f32.mrf.mxu3 }
 0x978   : > { %v7742_v58 = vadd.f32 %v7741_v44, %v7693_v56 }
 0x97a   : > { %v7765_v14 = vadd.f32 %v12158_v21, %v7742_v58 }
 0x97c   : > { %v15957_v52 = vmax.f32 %v7765_v14, 0.0 }
 0x97d   : > { %v7700_v37 = vpop.f32.mrf.mxu2 }
 0x97e   : > { %v7701_v31 = vadd.f32 %v7700_v37, %v7652_v35  ;;  %7802 = vst [vmem:[#allocation2 + $0x38] sm:$0xff] (%p15915_p13), %v15957_v52 }
 0x97f   : > { %v7744_v49 = vpop.f32.mrf.mxu3 }
 0x980   : > { %v7745_v7 = vadd.f32 %v7744_v49, %v7696_v38 }
 0x982   : > { %v7766_v27 = vadd.f32 %v12159_v23, %v7745_v7 }
 0x984   : > { %v15961_v32 = vmax.f32 %v7766_v27, 0.0 }
 0x985   : > { %v7702_v40 = vpop.f32.mrf.mxu2 }
 0x986   : > { %v7703_v50 = vadd.f32 %v7702_v40, %v7654_v17  ;;  %7803 = vst [vmem:[#allocation2 + $0x60] sm:$0xff] (%p15915_p13), %v15961_v32 }
 0x987   : > { %v7746_v55 = vpop.f32.mrf.mxu3 }
 0x988   : > { %v7747_v10 = vadd.f32 %v7746_v55, %v7698_v18 }
 0x98a   : > { %v7767_v9 = vadd.f32 %v12160_v5, %v7747_v10 }
 0x98c   : > { %v15965_v47 = vmax.f32 %v7767_v9, 0.0 }
 0x98e   : > { %7804 = vst [vmem:[#allocation2 + $0x70] sm:$0xff] (%p15915_p13), %v15965_v47 }
 0x98f   : > { %v7749_v29 = vpop.f32.mrf.mxu3 }
 0x990   : > { %v7750_v60 = vadd.f32 %v7749_v29, %v7701_v31 }
 0x992   : > { %v7768_v34 = vadd.f32 %v12161_v13, %v7750_v60 }
 0x994   : > { %v15969_v54 = vmax.f32 %v7768_v34, 0.0 }
 0x996   : > { %7805 = vst [vmem:[#allocation2 + $0x78] sm:$0xff] (%p15915_p13), %v15969_v54 }
 0x997   : > { %v7751_v0 = vpop.f32.mrf.mxu3 }
 0x998   : > { %v7752_v26 = vadd.f32 %v7751_v0, %v7703_v50  ;;  %7790 = sbr.rel (!%p15915_p13) target bundleno = 2463 (0x99f), region = 180 }
 0x99a   : > { %v7769_v25 = vadd.f32 %v12162_v8, %v7752_v26 }
 0x99c   : > { %v15971_v48 = vmax.f32 %v7769_v25, 0.0 }
 0x99e   : > { %7806 = vst [vmem:[#allocation2 + $0x28] sm:$0xff] %v15971_v48 }
 0x99f PF: > { %s16832_s21 = sld [smem:[#allocation41_spill]] }
 0x9a5   : > { %p11254_p0 = scmp.ne.s32.totalorder %s16832_s21, 1 }
 0x9a6   : > { %s16833_s20 = sld [smem:[#allocation93_spill]] (!%p11254_p0) }
 0x9a7   : > { %7810 = sbr.rel (%p11254_p0) target bundleno = 2879 (0xb3f), region = 184 }
 0x9ac   : > { %s16834_s14 = smov %s16833_s20  ;;  %v11859_v59 = vld [vmem:[%s16833_s20 + $0x38] sm:$0xff]  ;;  %v7827_v14 = vpack.c.bf16 %v15925_v41, %v15923_v11  ;;  %v7831_v36 = vpack.c.bf16 %v15949_v43, %v15945_v19  ;;  %v7828_v12 = vpack.c.bf16 %v15931_v51, %v15929_v46  ;;  %v7832_v62 = vpack.c.bf16 %v15957_v52, %v15953_v6  ;;  %v12163_v27 = vld [vmem:[#allocation17] ss:$0 sm:$0xff] }
 0x9ad   : > { %7887 = vmatpush.bf16.msra.mxu0 %v11859_v59  ;;  %11874 = vmatpush.bf16.msra.mxu2 %v11859_v59  ;;  %v11858_v24 = vld [vmem:[%s16834_s14 + $0x30] sm:$0xff]  ;;  %v11857_v56 = vld [vmem:[%s16834_s14 + $0x28] sm:$0xff]  ;;  %v11856_v44 = vld [vmem:[%s16834_s14 + $0x20] sm:$0xff]  ;;  %v7829_v38 = vpack.c.bf16 %v15935_v30, %v15933_v20  ;;  %v7833_v22 = vpack.c.bf16 %v15965_v47, %v15961_v32  ;;  %v7830_v49 = vpack.c.bf16 %v15941_v28, %v15937_v33  ;;  %vm7990_vm1 = vcmask 1043456  }
 0x9ae   : > { %v11855_v53 = vld [vmem:[%s16834_s14 + $0x18] sm:$0xff]  ;;  %v11854_v58 = vld [vmem:[%s16834_s14 + $0x10] sm:$0xff]  ;;  %v11853_v15 = vld [vmem:[%s16834_s14 + $0x8] sm:$0xff]  ;;  %v7834_v1 = vpack.c.bf16 %v15971_v48, %v15969_v54  ;;  %vm7965_vm2 = vcmask 64512  }
 0x9af   : > { %v11852_v21 = vld [vmem:[%s16834_s14] sm:$0xff]  ;;  %v7952_v7 = vld [vmem:[#allocation18] sm:$0xf] }
 0x9b0   : > { %v7992_v42 = vsel %vm7990_vm1, %v7952_v7, 0 }
 0x9b1   : > { %7888 = vmatpush.bf16.msra.mxu0 %v11858_v24  ;;  %11875 = vmatpush.bf16.msra.mxu2 %v11858_v24 }
 0x9b2   : > { %8001 = vmatpush.bf16.msra.mxu1 %v7992_v42  ;;  %11882 = vmatpush.bf16.msra.mxu3 %v7992_v42 }
 0x9b5   : > { %7889 = vmatpush.bf16.msra.mxu0 %v11857_v56  ;;  %11876 = vmatpush.bf16.msra.mxu2 %v11857_v56 }
 0x9b9   : > { %7890 = vmatpush.bf16.msra.mxu0 %v11856_v44  ;;  %11877 = vmatpush.bf16.msra.mxu2 %v11856_v44 }
 0x9bd   : > { %7891 = vmatpush.bf16.msra.mxu0 %v11855_v53  ;;  %11878 = vmatpush.bf16.msra.mxu2 %v11855_v53 }
 0x9c1   : > { %7892 = vmatpush.bf16.msra.mxu0 %v11854_v58  ;;  %11879 = vmatpush.bf16.msra.mxu2 %v11854_v58 }
 0x9c5   : > { %7893 = vmatpush.bf16.msra.mxu0 %v11853_v15  ;;  %11880 = vmatpush.bf16.msra.mxu2 %v11853_v15 }
 0x9c9   : > { %7894 = vmatpush.bf16.msra.mxu0 %v11852_v21  ;;  %11881 = vmatpush.bf16.msra.mxu2 %v11852_v21 }
 0x9cc   : > { %7895 = vmatmul.bf16.vlgmr.msra.gmra.mxu0 %v7827_v14  ;;  %7915 = vmatmul.bf16.vlgmr.msra.gmra.mxu2 %v7831_v36 }
 0x9dc   : > { %7900 = vmatmul.bf16.gmra.mxu0 %v7828_v12  ;;  %7920 = vmatmul.bf16.gmra.mxu2 %v7832_v62 }
 0x9ec   : > { %7905 = vmatmul.bf16.gmra.mxu0 %v7829_v38  ;;  %7925 = vmatmul.bf16.gmra.mxu2 %v7833_v22 }
 0x9fc   : > { %7910 = vmatmul.bf16.gmra.mxu0 %v7830_v49  ;;  %7930 = vmatmul.bf16.gmra.mxu2 %v7834_v1 }
 0xa49   : > { %v7896_v23 = vpop.f32.mrf.mxu0 }
 0xa4a   : > { %v7897_v39 = vadd.f32 %v12163_v27, %v7896_v23 }
 0xa4c   : > { %v7936_v63 = vmax.f32 %v7897_v39, 0.0 }
 0xa4f   : > { %v7916_v4 = vpop.f32.mrf.mxu2 }
 0xa50   : > { %v7917_v18 = vadd.f32 %v12163_v27, %v7916_v4 }
 0xa51   : > { %v7898_v3 = vpop.f32.mrf.mxu0 }
 0xa52   : > { %v7899_v55 = vadd.f32 %v12163_v27, %v7898_v3  ;;  %v7944_v35 = vmax.f32 %v7917_v18, 0.0 }
 0xa54   : > { %v7937_v10 = vmax.f32 %v7899_v55, 0.0 }
 0xa56   : > { %v7953_v37 = vpack.c.bf16 %v7937_v10, %v7936_v63 }
 0xa57   : > { %v7918_v2 = vpop.f32.mrf.mxu2 }
 0xa58   : > { %v7919_v5 = vadd.f32 %v12163_v27, %v7918_v2  ;;  %11287 = vmatmul.msk.bf16.vlgmr.msra.gmra.mxu1 %vm7965_vm2, %v7953_v37  ;;  %v16040_v2 = vld [vmem:[#allocation20] ss:$0 sm:$0xff] }
 0xa59   : > { %v7901_v9 = vpop.f32.mrf.mxu0 }
 0xa5a   : > { %v7945_v31 = vmax.f32 %v7919_v5, 0.0  ;;  %v7902_v61 = vadd.f32 %v12163_v27, %v7901_v9 }
 0xa5c   : > { %v7957_v45 = vpack.c.bf16 %v7945_v31, %v7944_v35  ;;  %v7938_v57 = vmax.f32 %v7902_v61, 0.0 }
 0xa5f   : > { %v7921_v29 = vpop.f32.mrf.mxu2 }
 0xa60   : > { %v7922_v34 = vadd.f32 %v12163_v27, %v7921_v29 }
 0xa61   : > { %v7903_v60 = vpop.f32.mrf.mxu0 }
 0xa62   : > { %v7904_v16 = vadd.f32 %v12163_v27, %v7903_v60  ;;  %v7946_v26 = vmax.f32 %v7922_v34, 0.0 }
 0xa64   : > { %v7939_v13 = vmax.f32 %v7904_v16, 0.0 }
 0xa66   : > { %v7954_v40 = vpack.c.bf16 %v7939_v13, %v7938_v57 }
 0xa67   : > { %v7923_v17 = vpop.f32.mrf.mxu2 }
 0xa68   : > { %v7924_v50 = vadd.f32 %v12163_v27, %v7923_v17  ;;  %11288 = vmatmul.msk.bf16.gmra.mxu1 %vm7965_vm2, %v7954_v40 }
 0xa69   : > { %v7906_v0 = vpop.f32.mrf.mxu0 }
 0xa6a   : > { %v7947_v8 = vmax.f32 %v7924_v50, 0.0  ;;  %v7907_v24 = vadd.f32 %v12163_v27, %v7906_v0 }
 0xa6c   : > { %v7958_v25 = vpack.c.bf16 %v7947_v8, %v7946_v26  ;;  %v7940_v53 = vmax.f32 %v7907_v24, 0.0 }
 0xa6e   : > { %11292 = vmatmul.msk.bf16.vlgmr.msra.gmra.mxu3 %vm7965_vm2, %v7958_v25 }
 0xa6f   : > { %v7926_v59 = vpop.f32.mrf.mxu2 }
 0xa70   : > { %v7927_v15 = vadd.f32 %v12163_v27, %v7926_v59 }
 0xa71   : > { %v7908_v56 = vpop.f32.mrf.mxu0 }
 0xa72   : > { %v7909_v44 = vadd.f32 %v12163_v27, %v7908_v56  ;;  %v7948_v62 = vmax.f32 %v7927_v15, 0.0 }
 0xa74   : > { %v7941_v58 = vmax.f32 %v7909_v44, 0.0 }
 0xa76   : > { %v7955_v21 = vpack.c.bf16 %v7941_v58, %v7940_v53 }
 0xa77   : > { %v7928_v14 = vpop.f32.mrf.mxu2 }
 0xa78   : > { %v7929_v36 = vadd.f32 %v12163_v27, %v7928_v14  ;;  %11289 = vmatmul.msk.bf16.gmra.mxu1 %vm7965_vm2, %v7955_v21 }
 0xa79   : > { %v7911_v12 = vpop.f32.mrf.mxu0 }
 0xa7a   : > { %v7949_v38 = vmax.f32 %v7929_v36, 0.0  ;;  %v7912_v1 = vadd.f32 %v12163_v27, %v7911_v12 }
 0xa7c   : > { %v7959_v22 = vpack.c.bf16 %v7949_v38, %v7948_v62  ;;  %v7942_v23 = vmax.f32 %v7912_v1, 0.0 }
 0xa7e   : > { %11293 = vmatmul.msk.bf16.gmra.mxu3 %vm7965_vm2, %v7959_v22 }
 0xa7f   : > { %v7931_v49 = vpop.f32.mrf.mxu2 }
 0xa80   : > { %v7932_v39 = vadd.f32 %v12163_v27, %v7931_v49 }
 0xa81   : > { %v7913_v7 = vpop.f32.mrf.mxu0 }
 0xa82   : > { %v7914_v42 = vadd.f32 %v12163_v27, %v7913_v7  ;;  %v7950_v63 = vmax.f32 %v7932_v39, 0.0 }
 0xa84   : > { %v7943_v4 = vmax.f32 %v7914_v42, 0.0 }
 0xa86   : > { %v7956_v18 = vpack.c.bf16 %v7943_v4, %v7942_v23 }
 0xa87   : > { %v7933_v3 = vpop.f32.mrf.mxu2 }
 0xa88   : > { %v7934_v55 = vadd.f32 %v12163_v27, %v7933_v3  ;;  %11290 = vmatmul.msk.bf16.gmra.mxu1 %vm7965_vm2, %v7956_v18 }
 0xa8a   : > { %v7951_v10 = vmax.f32 %v7934_v55, 0.0 }
 0xa8c   : > { %v7960_v37 = vpack.c.bf16 %v7951_v10, %v7950_v63 }
 0xa8e   : > { %11294 = vmatmul.msk.bf16.gmra.mxu3 %vm7965_vm2, %v7960_v37 }
 0xa98   : > { %11291 = vmatmul.msk.bf16.gmra.mxu1 %vm7965_vm2, %v7957_v45 }
 0xad5   : > { %v8003_v5 = vpop.f32.mrf.mxu1 }
 0xad6   : > { %v8004_v9 = vadd.f32 %v16040_v2, %v8003_v5 }
 0xad8   : > { %v11295_v35 = vmul.f32 -1.442695, %v8004_v9 }
 0xada   : > { %12165 = vpow2.f32 %v11295_v35 }
 0xadd   : > { %v8005_v31 = vpop.f32.mrf.mxu1 }
 0xade   : > { %v8006_v29 = vadd.f32 %v16040_v2, %v8005_v31 }
 0xae0   : > { %v12166_v27 = vpop.eup %12165  ;;  %v11296_v61 = vmul.f32 -1.442695, %v8006_v29 }
 0xae1   : > { %v8091_v60 = vadd.f32 1.0, %v12166_v27 }
 0xae2   : > { %12167 = vpow2.f32 %v11296_v61 }
 0xae3   : > { %12169 = vrcp.f32 %v8091_v60  ;;  %v8118_v0 = vand.u32 2147483648, %v8091_v60  ;;  %v8116_v25 = vand.u32 2147483647, %v8091_v60  ;;  %vm8112_vm4 = vweird.f32 %v8091_v60 }
 0xae5   : > { %v8008_v16 = vpop.f32.mrf.mxu1  ;;  %v8119_v58 = vor.u32 1.1754944e-38, %v8118_v0  ;;  %vm8117_vm6 = vcmp.eq.f32.partialorder %v8116_v25, 8.507059e+37 }
 0xae6   : > { %v8009_v57 = vadd.f32 %v16040_v2, %v8008_v16 }
 0xae8   : > { %v12168_v13 = vpop.eup %12167  ;;  %v11297_v45 = vmul.f32 -1.442695, %v8009_v57 }
 0xae9   : > { %v12170_v34 = vpop.eup %12169  ;;  %v8092_v40 = vadd.f32 1.0, %v12168_v13 }
 0xaea   : > { %v8108_v17 = vmul.f32 %v12170_v34, %v8091_v60  ;;  %12171 = vpow2.f32 %v11297_v45  ;;  %vm8113_vm3 = vweird.f32 %v12170_v34 }
 0xaeb   : > { %12173 = vrcp.f32 %v8092_v40  ;;  %vm8114_vm5 = vmor %vm8112_vm4, %vm8113_vm3  ;;  %v8131_v49 = vand.u32 2147483647, %v8092_v40  ;;  %v8133_v1 = vand.u32 2147483648, %v8092_v40  ;;  %vm8127_vm8 = vweird.f32 %v8092_v40 }
 0xaec   : > { %v8109_v50 = vsub.f32 1.0, %v8108_v17 }
 0xaed   : > { %v8010_v26 = vpop.f32.mrf.mxu1  ;;  %v8134_v63 = vor.u32 1.1754944e-38, %v8133_v1  ;;  %vm8132_vm10 = vcmp.eq.f32.partialorder %v8131_v49, 8.507059e+37 }
 0xaee   : > { %v8110_v8 = vmul.f32 %v12170_v34, %v8109_v50  ;;  %v8011_v59 = vadd.f32 %v16040_v2, %v8010_v26 }
 0xaf0   : > { %v12172_v24 = vpop.eup %12171  ;;  %v8111_v56 = vadd.f32 %v12170_v34, %v8110_v8  ;;  %v11298_v44 = vmul.f32 -1.442695, %v8011_v59 }
 0xaf1   : > { %v12174_v53 = vpop.eup %12173  ;;  %v8093_v15 = vadd.f32 1.0, %v12172_v24  ;;  %v8028_v21 = vpop.f32.mrf.mxu3 }
 0xaf2   : > { %v8115_v14 = vsel %vm8114_vm5, %v12170_v34, %v8111_v56  ;;  %v8123_v36 = vmul.f32 %v12174_v53, %v8092_v40  ;;  %12175 = vpow2.f32 %v11298_v44  ;;  %v8029_v22 = vadd.f32 %v16040_v2, %v8028_v21 }
 0xaf3   : > { %v8120_v12 = vsel %vm8117_vm6, %v8119_v58, %v8115_v14  ;;  %12177 = vrcp.f32 %v8093_v15  ;;  %vm8128_vm7 = vweird.f32 %v12174_v53  ;;  %v8146_v61 = vand.u32 2147483647, %v8093_v15 }
 0xaf4   : > { %v8347_v62 = vmul.f32 %v8120_v12, %v15923_v11  ;;  %v8124_v38 = vsub.f32 1.0, %v8123_v36  ;;  %v11305_v23 = vmul.f32 -1.442695, %v8029_v22  ;;  %vm8129_vm9 = vmor %vm8127_vm8, %vm8128_vm7  ;;  %v8148_v60 = vand.u32 2147483648, %v8093_v15 }
 0xaf5   : > { %v8013_v7 = vpop.f32.mrf.mxu1  ;;  %vm8142_vm12 = vweird.f32 %v8093_v15  ;;  %vm8147_vm14 = vcmp.eq.f32.partialorder %v8146_v61, 8.507059e+37 }
 0xaf6   : > { %8363 = vst [vmem:[#allocation2 + $0x30] sm:$0xff] %v8347_v62  ;;  %v8125_v42 = vmul.f32 %v12174_v53, %v8124_v38  ;;  %v8014_v4 = vadd.f32 %v16040_v2, %v8013_v7  ;;  %12179 = vpow2.f32 %v11305_v23  ;;  %v8149_v8 = vor.u32 1.1754944e-38, %v8148_v60 }
 0xaf8   : > { %v12176_v39 = vpop.eup %12175  ;;  %v8126_v18 = vadd.f32 %v12174_v53, %v8125_v42  ;;  %v11299_v3 = vmul.f32 -1.442695, %v8014_v4 }
 0xaf9   : > { %v12178_v55 = vpop.eup %12177  ;;  %v8094_v10 = vadd.f32 1.0, %v12176_v39  ;;  %v8030_v37 = vpop.f32.mrf.mxu3 }
 0xafa   : > { %v8130_v5 = vsel %vm8129_vm9, %v12174_v53, %v8126_v18  ;;  %v8138_v9 = vmul.f32 %v12178_v55, %v8093_v15  ;;  %12181 = vpow2.f32 %v11299_v3  ;;  %v8031_v27 = vadd.f32 %v16040_v2, %v8030_v37 }
 0xafb   : > { %v8135_v35 = vsel %vm8132_vm10, %v8134_v63, %v8130_v5  ;;  %12183 = vrcp.f32 %v8094_v10  ;;  %vm8143_vm11 = vweird.f32 %v12178_v55  ;;  %v8161_v53 = vand.u32 2147483647, %v8094_v10 }
 0xafc   : > { %v8348_v31 = vmul.f32 %v8135_v35, %v15925_v41  ;;  %v8139_v29 = vsub.f32 1.0, %v8138_v9  ;;  %v12180_v57 = vpop.eup %12179  ;;  %v11306_v45 = vmul.f32 -1.442695, %v8031_v27  ;;  %vm8144_vm13 = vmor %vm8142_vm12, %vm8143_vm11  ;;  %v8163_v15 = vand.u32 2147483648, %v8094_v10 }
 0xafd   : > { %v8015_v16 = vpop.f32.mrf.mxu1  ;;  %v16052_v40 = vadd.f32 1.0, %v12180_v57  ;;  %vm8157_vm0 = vweird.f32 %v8094_v10  ;;  %vm16061_vm1 = vcmp.eq.f32.partialorder %v8161_v53, 8.507059e+37 }
 0xafe   : > { %8364 = vst [vmem:[#allocation2] sm:$0xff] %v8348_v31  ;;  %v8140_v13 = vmul.f32 %v12178_v55, %v8139_v29  ;;  %v8016_v34 = vadd.f32 %v16040_v2, %v8015_v16  ;;  %12185 = vpow2.f32 %v11306_v45  ;;  %v8164_v23 = vor.u32 1.1754944e-38, %v8163_v15 }
 0xaff   : > { %12187 = vrcp.f32 %v16052_v40  ;;  %vm8262_vm2 = vweird.f32 %v16052_v40  ;;  %v8266_v18 = vand.u32 2147483647, %v16052_v40  ;;  %v8268_v3 = vand.u32 2147483648, %v16052_v40 }
 0xb00   : > { %v12182_v17 = vpop.eup %12181  ;;  %v8141_v50 = vadd.f32 %v12178_v55, %v8140_v13  ;;  %v11300_v0 = vmul.f32 -1.442695, %v8016_v34 }
 0xb01   : > { %v12184_v26 = vpop.eup %12183  ;;  %v8033_v25 = vpop.f32.mrf.mxu3  ;;  %v16055_v56 = vadd.f32 1.0, %v12182_v17  ;;  %vm16081_vm5 = vcmp.eq.f32.partialorder %v8266_v18, 8.507059e+37  ;;  %v8269_v57 = vor.u32 1.1754944e-38, %v8268_v3 }
 0xb02   : > { %v8145_v59 = vsel %vm8144_vm13, %v12178_v55, %v8141_v50  ;;  %v8153_v24 = vmul.f32 %v12184_v26, %v8094_v10  ;;  %12189 = vpow2.f32 %v11300_v0  ;;  %v8034_v14 = vadd.f32 %v16040_v2, %v8033_v25 }
 0xb03   : > { %v8150_v44 = vsel %vm8147_vm14, %v8149_v8, %v8145_v59  ;;  %12191 = vrcp.f32 %v16055_v56  ;;  %vm8158_vm15 = vweird.f32 %v12184_v26  ;;  %v8176_v29 = vand.u32 2147483647, %v16055_v56 }
 0xb04   : > { %v8349_v58 = vmul.f32 %v8150_v44, %v15929_v46  ;;  %v8154_v21 = vsub.f32 1.0, %v8153_v24  ;;  %v12186_v12 = vpop.eup %12185  ;;  %v11307_v7 = vmul.f32 -1.442695, %v8034_v14  ;;  %vm8159_vm3 = vmor %vm8157_vm0, %vm8158_vm15  ;;  %v8178_v27 = vand.u32 2147483648, %v16055_v56 }
 0xb05   : > { %v8018_v36 = vpop.f32.mrf.mxu1  ;;  %v12188_v22 = vpop.eup %12187  ;;  %v16065_v1 = vadd.f32 1.0, %v12186_v12  ;;  %vm8172_vm6 = vweird.f32 %v16055_v56  ;;  %vm16090_vm9 = vcmp.eq.f32.partialorder %v8176_v29, 8.507059e+37 }
 0xb06   : > { %8365 = vst [vmem:[#allocation2 + $0x58] sm:$0xff] %v8349_v58  ;;  %v8155_v62 = vmul.f32 %v12184_v26, %v8154_v21  ;;  %v8019_v38 = vadd.f32 %v16040_v2, %v8018_v36  ;;  %v8258_v4 = vmul.f32 %v12188_v22, %v16052_v40  ;;  %vm8263_vm4 = vweird.f32 %v12188_v22 }
 0xb07   : > { %12193 = vrcp.f32 %v16065_v1  ;;  %vm8264_vm7 = vmor %vm8262_vm2, %vm8263_vm4  ;;  %v8179_v25 = vor.u32 1.1754944e-38, %v8178_v27  ;;  %v8283_v53 = vand.u32 2147483648, %v16065_v1  ;;  %vm8277_vm11 = vweird.f32 %v16065_v1 }
 0xb08   : > { %v8156_v42 = vadd.f32 %v12184_v26, %v8155_v62  ;;  %v12190_v39 = vpop.eup %12189  ;;  %v11301_v55 = vmul.f32 -1.442695, %v8019_v38  ;;  %v8259_v5 = vsub.f32 1.0, %v8258_v4  ;;  %12195 = vpow2.f32 %v11307_v7 }
 0xb09   : > { %v8035_v63 = vpop.f32.mrf.mxu3  ;;  %v12192_v10 = vpop.eup %12191  ;;  %v16072_v9 = vadd.f32 1.0, %v12190_v39  ;;  %v8284_v18 = vor.u32 1.1754944e-38, %v8283_v53 }
 0xb0a   : > { %v8160_v37 = vsel %vm8159_vm3, %v12184_v26, %v8156_v42  ;;  %v8168_v31 = vmul.f32 %v12192_v10, %v16055_v56  ;;  %v8260_v60 = vmul.f32 %v12188_v22, %v8259_v5  ;;  %v8036_v17 = vadd.f32 %v16040_v2, %v8035_v63 }
 0xb0b   : > { %v8165_v35 = vsel %vm16061_vm1, %v8164_v23, %v8160_v37  ;;  %12197 = vrcp.f32 %v16072_v9  ;;  %vm8173_vm8 = vweird.f32 %v12192_v10  ;;  %v8281_v56 = vand.u32 2147483647, %v16065_v1 }
 0xb0c   : > { %v8350_v61 = vmul.f32 %v8165_v35, %v15931_v51  ;;  %v8169_v13 = vsub.f32 1.0, %v8168_v31  ;;  %v8261_v34 = vadd.f32 %v12188_v22, %v8260_v60  ;;  %12199 = vpow2.f32 %v11301_v55  ;;  %vm8174_vm10 = vmor %vm8172_vm6, %vm8173_vm8 }
 0xb0d   : > { %v8020_v45 = vpop.f32.mrf.mxu1  ;;  %v12194_v0 = vpop.eup %12193  ;;  %v11308_v58 = vmul.f32 -1.442695, %v8036_v17  ;;  %v8193_v37 = vand.u32 2147483648, %v16072_v9  ;;  %v8191_v31 = vand.u32 2147483647, %v16072_v9  ;;  %vm8282_vm15 = vcmp.eq.f32.partialorder %v8281_v56, 8.507059e+37 }
 0xb0e   : > { %8366 = vst [vmem:[#allocation2 + $0x18] sm:$0xff] %v8350_v61  ;;  %v8021_v50 = vadd.f32 %v16040_v2, %v8020_v45  ;;  %v8170_v26 = vmul.f32 %v12192_v10, %v8169_v13  ;;  %v12196_v59 = vpop.eup %12195  ;;  %v8265_v24 = vsel %vm8264_vm7, %v12188_v22, %v8261_v34  ;;  %v8273_v44 = vmul.f32 %v12194_v0, %v16065_v1 }
 0xb0f   : > { %v8270_v21 = vsel %vm16081_vm5, %v8269_v57, %v8265_v24  ;;  %v16098_v40 = vadd.f32 1.0, %v12196_v59  ;;  %12201 = vpow2.f32 %v11308_v58  ;;  %vm8278_vm12 = vweird.f32 %v12194_v0 }
 0xb10   : > { %v8171_v15 = vadd.f32 %v12192_v10, %v8170_v26  ;;  %v11302_v14 = vmul.f32 -1.442695, %v8021_v50  ;;  %v8357_v62 = vmul.f32 %v8270_v21, %v15953_v6  ;;  %v8274_v38 = vsub.f32 1.0, %v8273_v44  ;;  %vm8279_vm13 = vmor %vm8277_vm11, %vm8278_vm12 }
 0xb11   : > { %v8038_v36 = vpop.f32.mrf.mxu3  ;;  %v12198_v12 = vpop.eup %12197  ;;  %12203 = vrcp.f32 %v16098_v40  ;;  %vm8187_vm0 = vweird.f32 %v16072_v9  ;;  %v8194_v45 = vor.u32 1.1754944e-38, %v8193_v37  ;;  %vm8192_vm2 = vcmp.eq.f32.partialorder %v8191_v31, 8.507059e+37 }
 0xb12   : > { %v8039_v22 = vadd.f32 %v16040_v2, %v8038_v36  ;;  %v8175_v49 = vsel %vm8174_vm10, %v12192_v10, %v8171_v15  ;;  %v8183_v7 = vmul.f32 %v12198_v12, %v16072_v9  ;;  %v12200_v42 = vpop.eup %12199  ;;  %8373 = vst [vmem:[#allocation2 + $0x10] sm:$0xff] %v8357_v62  ;;  %v8275_v4 = vmul.f32 %v12194_v0, %v8274_v38 }
 0xb13   : > { %v8180_v23 = vsel %vm16090_vm9, %v8179_v25, %v8175_v49  ;;  %v16112_v55 = vadd.f32 1.0, %v12200_v42  ;;  %12205 = vpow2.f32 %v11302_v14  ;;  %vm8188_vm14 = vweird.f32 %v12198_v12 }
 0xb14   : > { %v8351_v39 = vmul.f32 %v8180_v23, %v15933_v20  ;;  %v8184_v3 = vsub.f32 1.0, %v8183_v7  ;;  %v8276_v10 = vadd.f32 %v12194_v0, %v8275_v4  ;;  %v11309_v5 = vmul.f32 -1.442695, %v8039_v22  ;;  %vm8189_vm1 = vmor %vm8187_vm0, %vm8188_vm14 }
 0xb15   : > { %v8023_v63 = vpop.f32.mrf.mxu1  ;;  %12207 = vrcp.f32 %v16112_v55  ;;  %v12202_v29 = vpop.eup %12201  ;;  %v8298_v25 = vand.u32 2147483648, %v16098_v40  ;;  %vm8292_vm4 = vweird.f32 %v16098_v40  ;;  %v8206_v62 = vand.u32 2147483647, %v16112_v55 }
 0xb16   : > { %8367 = vst [vmem:[#allocation2 + $0x50] sm:$0xff] %v8351_v39  ;;  %v8185_v35 = vmul.f32 %v12198_v12, %v8184_v3  ;;  %v8280_v27 = vsel %vm8279_vm13, %v12194_v0, %v8276_v10  ;;  %12209 = vpow2.f32 %v11309_v5  ;;  %v16120_v57 = vadd.f32 1.0, %v12202_v29 }
 0xb17   : > { %v12204_v61 = vpop.eup %12203  ;;  %v8285_v60 = vsel %vm8282_vm15, %v8284_v18, %v8280_v27  ;;  %v8024_v1 = vadd.f32 %v16040_v2, %v8023_v63  ;;  %v8296_v0 = vand.u32 2147483647, %v16098_v40  ;;  %v8208_v49 = vand.u32 2147483648, %v16112_v55 }
 0xb18   : > { %v8186_v16 = vadd.f32 %v12198_v12, %v8185_v35  ;;  %v8358_v13 = vmul.f32 %v8285_v60, %v15957_v52  ;;  %v8288_v34 = vmul.f32 %v12204_v61, %v16098_v40  ;;  %12211 = vrcp.f32 %v16120_v57 }
 0xb19   : > { %v8040_v17 = vpop.f32.mrf.mxu3  ;;  %v12206_v9 = vpop.eup %12205  ;;  %v11303_v53 = vmul.f32 -1.442695, %v8024_v1  ;;  %vm8293_vm3 = vweird.f32 %v12204_v61  ;;  %vm16134_vm5 = vcmp.eq.f32.partialorder %v8296_v0, 8.507059e+37  ;;  %v8299_v23 = vor.u32 1.1754944e-38, %v8298_v25 }
 0xb1a   : > { %v8190_v50 = vsel %vm8189_vm1, %v12198_v12, %v8186_v16  ;;  %8374 = vst [vmem:[#allocation2 + $0x38] sm:$0xff] %v8358_v13  ;;  %v8289_v8 = vsub.f32 1.0, %v8288_v34  ;;  %v16129_v44 = vadd.f32 1.0, %v12206_v9  ;;  %v8041_v58 = vadd.f32 %v16040_v2, %v8040_v17  ;;  %vm8294_vm6 = vmor %vm8292_vm4, %vm8293_vm3 }
 0xb1b   : > { %v8195_v26 = vsel %vm8192_vm2, %v8194_v45, %v8190_v50  ;;  %v12208_v59 = vpop.eup %12207  ;;  %vm8202_vm8 = vweird.f32 %v16112_v55  ;;  %vm16148_vm9 = vcmp.eq.f32.partialorder %v8206_v62, 8.507059e+37  ;;  %v8311_v31 = vand.u32 2147483647, %v16120_v57 }
 0xb1c   : > { %v8352_v24 = vmul.f32 %v8195_v26, %v15935_v30  ;;  %v12210_v21 = vpop.eup %12209  ;;  %v8290_v15 = vmul.f32 %v12204_v61, %v8289_v8  ;;  %v8198_v14 = vmul.f32 %v12208_v59, %v16112_v55  ;;  %12213 = vrcp.f32 %v16129_v44 }
 0xb1d   : > { %v8025_v36 = vpop.f32.mrf.mxu1  ;;  %v16141_v7 = vadd.f32 1.0, %v12210_v21  ;;  %12215 = vpow2.f32 %v11303_v53  ;;  %v11310_v4 = vmul.f32 -1.442695, %v8041_v58  ;;  %vm8203_vm7 = vweird.f32 %v12208_v59 }
 0xb1e   : > { %8368 = vst [vmem:[#allocation2 + $0x68] sm:$0xff] %v8352_v24  ;;  %v8291_v38 = vadd.f32 %v12204_v61, %v8290_v15  ;;  %v8199_v22 = vsub.f32 1.0, %v8198_v14  ;;  %v12212_v42 = vpop.eup %12211  ;;  %v8026_v40 = vadd.f32 %v16040_v2, %v8025_v36  ;;  %v8209_v2 = vor.u32 1.1754944e-38, %v8208_v49  ;;  %vm8204_vm10 = vmor %vm8202_vm8, %vm8203_vm7 }
 0xb1f   : > { %v8303_v18 = vmul.f32 %v12212_v42, %v16120_v57  ;;  %12217 = vrcp.f32 %v16141_v7  ;;  %v8313_v29 = vand.u32 2147483648, %v16120_v57  ;;  %vm8308_vm11 = vweird.f32 %v12212_v42 }
 0xb20   : > { %v8295_v56 = vsel %vm8294_vm6, %v12204_v61, %v8291_v38  ;;  %v8200_v39 = vmul.f32 %v12208_v59, %v8199_v22  ;;  %12219 = vpow2.f32 %v11310_v4  ;;  %v11304_v27 = vmul.f32 -1.442695, %v8026_v40 }
 0xb21   : > { %v8300_v3 = vsel %vm16134_vm5, %v8299_v23, %v8295_v56  ;;  %v8304_v5 = vsub.f32 1.0, %v8303_v18  ;;  %vm8307_vm12 = vweird.f32 %v16120_v57  ;;  %v8221_v13 = vand.u32 2147483647, %v16129_v44 }
 0xb22   : > { %v8359_v10 = vmul.f32 %v8300_v3, %v15961_v32  ;;  %v8201_v37 = vadd.f32 %v12208_v59, %v8200_v39  ;;  %v12214_v35 = vpop.eup %12213  ;;  %12221 = vpow2.f32 %v11304_v27  ;;  %vm8309_vm13 = vmor %vm8307_vm12, %vm8308_vm11  ;;  %vm8312_vm14 = vcmp.eq.f32.partialorder %v8311_v31, 8.507059e+37 }
 0xb23   : > { %v8305_v61 = vmul.f32 %v12212_v42, %v8304_v5  ;;  %v8213_v60 = vmul.f32 %v12214_v35, %v16129_v44  ;;  %v12216_v16 = vpop.eup %12215  ;;  %v8314_v9 = vor.u32 1.1754944e-38, %v8313_v29  ;;  %v8223_v26 = vand.u32 2147483648, %v16129_v44 }
 0xb24   : > { %8375 = vst [vmem:[#allocation2 + $0x60] sm:$0xff] %v8359_v10  ;;  %v8205_v55 = vsel %vm8204_vm10, %v12208_v59, %v8201_v37  ;;  %v8099_v50 = vadd.f32 1.0, %v12216_v16  ;;  %vm8218_vm15 = vweird.f32 %v12214_v35  ;;  %vm8217_vm0 = vweird.f32 %v16129_v44 }
 0xb25   : > { %v8210_v1 = vsel %vm16148_vm9, %v8209_v2, %v8205_v55  ;;  %v8306_v34 = vadd.f32 %v12212_v42, %v8305_v61  ;;  %v8214_v17 = vsub.f32 1.0, %v8213_v60  ;;  %v12218_v0 = vpop.eup %12217  ;;  %vm8222_vm1 = vcmp.eq.f32.partialorder %v8221_v13, 8.507059e+37  ;;  %vm8219_vm2 = vmor %vm8217_vm0, %vm8218_vm15 }
 0xb26   : > { %v8353_v45 = vmul.f32 %v8210_v1, %v15937_v33  ;;  %v8318_v57 = vmul.f32 %v12218_v0, %v16141_v7  ;;  %v12220_v59 = vpop.eup %12219  ;;  %12223 = vrcp.f32 %v8099_v50  ;;  %v8224_v14 = vor.u32 1.1754944e-38, %v8223_v26 }
 0xb27   : > { %v8310_v8 = vsel %vm8309_vm13, %v12212_v42, %v8306_v34  ;;  %v8215_v25 = vmul.f32 %v12214_v35, %v8214_v17  ;;  %v8326_v36 = vand.u32 2147483647, %v16141_v7  ;;  %v8328_v12 = vand.u32 2147483648, %v16141_v7 }
 0xb28   : > { %8369 = vst [vmem:[#allocation2 + $0x8] sm:$0xff] %v8353_v45  ;;  %v8315_v24 = vsel %vm8312_vm14, %v8314_v9, %v8310_v8  ;;  %v8319_v21 = vsub.f32 1.0, %v8318_v57  ;;  %v12222_v15 = vpop.eup %12221  ;;  %v8106_v62 = vadd.f32 1.0, %v12220_v59  ;;  %vm8323_vm3 = vweird.f32 %v12218_v0 }
 0xb29   : > { %v8360_v53 = vmul.f32 %v8315_v24, %v15965_v47  ;;  %v8216_v58 = vadd.f32 %v12214_v35, %v8215_v25  ;;  %v8100_v49 = vadd.f32 1.0, %v12222_v15  ;;  %vm8322_vm4 = vweird.f32 %v16141_v7 }
 0xb2a   : > { %v8320_v22 = vmul.f32 %v12218_v0, %v8319_v21  ;;  %12225 = vrcp.f32 %v8106_v62  ;;  %vm8324_vm5 = vmor %vm8322_vm4, %vm8323_vm3  ;;  %v8329_v40 = vor.u32 1.1754944e-38, %v8328_v12  ;;  %vm8327_vm6 = vcmp.eq.f32.partialorder %v8326_v36, 8.507059e+37 }
 0xb2b   : > { %8376 = vst [vmem:[#allocation2 + $0x70] sm:$0xff] %v8360_v53  ;;  %v8220_v38 = vsel %vm8219_vm2, %v12214_v35, %v8216_v58  ;;  %12227 = vrcp.f32 %v8100_v49  ;;  %v8236_v10 = vand.u32 2147483647, %v8099_v50  ;;  %v8238_v2 = vand.u32 2147483648, %v8099_v50 }
 0xb2c   : > { %v8225_v44 = vsel %vm8222_vm1, %v8224_v14, %v8220_v38  ;;  %v8321_v23 = vadd.f32 %v12218_v0, %v8320_v22  ;;  %v12224_v4 = vpop.eup %12223  ;;  %vm8232_vm8 = vweird.f32 %v8099_v50  ;;  %v8341_v61 = vand.u32 2147483647, %v8106_v62 }
 0xb2d   : > { %v8354_v42 = vmul.f32 %v8225_v44, %v15941_v28  ;;  %v8228_v39 = vmul.f32 %v12224_v4, %v8099_v50  ;;  %vm8233_vm7 = vweird.f32 %v12224_v4  ;;  %vm8237_vm9 = vcmp.eq.f32.partialorder %v8236_v10, 8.507059e+37 }
 0xb2e   : > { %v8325_v56 = vsel %vm8324_vm5, %v12218_v0, %v8321_v23  ;;  %vm8234_vm10 = vmor %vm8232_vm8, %vm8233_vm7  ;;  %v8239_v55 = vor.u32 1.1754944e-38, %v8238_v2  ;;  %v8343_v60 = vand.u32 2147483648, %v8106_v62  ;;  %v8253_v45 = vand.u32 2147483648, %v8100_v49 }
 0xb2f   : > { %8370 = vst [vmem:[#allocation2 + $0x48] sm:$0xff] %v8354_v42  ;;  %v8330_v18 = vsel %vm8327_vm6, %v8329_v40, %v8325_v56  ;;  %v8229_v63 = vsub.f32 1.0, %v8228_v39  ;;  %v8251_v0 = vand.u32 2147483647, %v8100_v49  ;;  %vm8337_vm13 = vweird.f32 %v8106_v62 }
 0xb30   : > { %v8361_v3 = vmul.f32 %v8330_v18, %v15969_v54  ;;  %v12226_v37 = vpop.eup %12225  ;;  %v8344_v50 = vor.u32 1.1754944e-38, %v8343_v60  ;;  %vm8247_vm15 = vweird.f32 %v8100_v49  ;;  %vm8342_vm0 = vcmp.eq.f32.partialorder %v8341_v61, 8.507059e+37 }
 0xb31   : > { %v12228_v5 = vpop.eup %12227  ;;  %v8230_v35 = vmul.f32 %v12224_v4, %v8229_v63  ;;  %v8333_v7 = vmul.f32 %v12226_v37, %v8106_v62  ;;  %vm8338_vm11 = vweird.f32 %v12226_v37  ;;  %v8254_v57 = vor.u32 1.1754944e-38, %v8253_v45 }
 0xb32   : > { %8377 = vst [vmem:[#allocation2 + $0x78] sm:$0xff] %v8361_v3  ;;  %v8243_v31 = vmul.f32 %v12228_v5, %v8100_v49  ;;  %vm8248_vm12 = vweird.f32 %v12228_v5  ;;  %vm8339_vm14 = vmor %vm8337_vm13, %vm8338_vm11  ;;  %vm8252_vm2 = vcmp.eq.f32.partialorder %v8251_v0, 8.507059e+37 }
 0xb33   : > { %v8231_v29 = vadd.f32 %v12224_v4, %v8230_v35  ;;  %v8334_v27 = vsub.f32 1.0, %v8333_v7  ;;  %vm8249_vm1 = vmor %vm8247_vm15, %vm8248_vm12 }
 0xb34   : > { %v8244_v16 = vsub.f32 1.0, %v8243_v31 }
 0xb35   : > { %v8235_v1 = vsel %vm8234_vm10, %v12224_v4, %v8231_v29  ;;  %v8335_v13 = vmul.f32 %v12226_v37, %v8334_v27 }
 0xb36   : > { %v8240_v34 = vsel %vm8237_vm9, %v8239_v55, %v8235_v1  ;;  %v8245_v17 = vmul.f32 %v12228_v5, %v8244_v16 }
 0xb37   : > { %v8355_v9 = vmul.f32 %v8240_v34, %v15945_v19  ;;  %v8336_v26 = vadd.f32 %v12226_v37, %v8335_v13 }
 0xb38   : > { %v8246_v8 = vadd.f32 %v12228_v5, %v8245_v17 }
 0xb39   : > { %8371 = vst [vmem:[#allocation2 + $0x40] sm:$0xff] %v8355_v9  ;;  %v8340_v25 = vsel %vm8339_vm14, %v12226_v37, %v8336_v26 }
 0xb3a   : > { %v8345_v59 = vsel %vm8342_vm0, %v8344_v50, %v8340_v25  ;;  %v8250_v24 = vsel %vm8249_vm1, %v12228_v5, %v8246_v8 }
 0xb3b   : > { %v8362_v53 = vmul.f32 %v8345_v59, %v15971_v48  ;;  %v8255_v58 = vsel %vm8252_vm2, %v8254_v57, %v8250_v24 }
 0xb3c   : > { %v8356_v21 = vmul.f32 %v8255_v58, %v15949_v43 }
 0xb3d   : > { %8378 = vst [vmem:[#allocation2 + $0x28] sm:$0xff] %v8362_v53 }
 0xb3e   : > { %8372 = vst [vmem:[#allocation2 + $0x20] sm:$0xff] %v8356_v21 }
 0xb3f PF: > { %s16845_s22 = sld [smem:[#allocation41_spill]] }
 0xb45   : > { %p11311_p2 = scmp.ne.s32.totalorder %s16845_s22, 3 }
 0xb46   : > { %s16846_s11 = sld [smem:[#allocation95_spill]] (!%p11311_p2) }
 0xb47   : > { %8382 = sbr.rel (%p11311_p2) target bundleno = 3547 (0xddb), region = 188 }
 0xb4c   : > { %v11867_v15 = vld [vmem:[%s16846_s11 + $0x38] sm:$0xff]  ;;  %v11866_v14 = vld [vmem:[%s16846_s11 + $0x30] sm:$0xff]  ;;  %v11865_v36 = vld [vmem:[%s16846_s11 + $0x28] sm:$0xff]  ;;  %v8399_v44 = vpack.c.bf16 %v15925_v41, %v15923_v11  ;;  %v8400_v42 = vpack.c.bf16 %v15931_v51, %v15929_v46  ;;  %v8401_v23 = vpack.c.bf16 %v15935_v30, %v15933_v20  ;;  %v8404_v4 = vpack.c.bf16 %v15957_v52, %v15953_v6 }
 0xb4d   : > { %8459 = vmatpush.bf16.msra.mxu0 %v11867_v15  ;;  %11883 = vmatpush.bf16.msra.mxu3 %v11867_v15  ;;  %v11864_v12 = vld [vmem:[%s16846_s11 + $0x20] sm:$0xff]  ;;  %v11863_v62 = vld [vmem:[%s16846_s11 + $0x18] sm:$0xff]  ;;  %v11862_v38 = vld [vmem:[%s16846_s11 + $0x10] sm:$0xff]  ;;  %v8402_v40 = vpack.c.bf16 %v15941_v28, %v15937_v33  ;;  %v8405_v56 = vpack.c.bf16 %v15965_v47, %v15961_v32  ;;  %v8403_v39 = vpack.c.bf16 %v15949_v43, %v15945_v19  ;;  %vm8562_vm3 = vcmask 1043456  }
 0xb4e   : > { %v11861_v22 = vld [vmem:[%s16846_s11 + $0x8] sm:$0xff]  ;;  %v11860_v49 = vld [vmem:[%s16846_s11] sm:$0xff]  ;;  %v8406_v18 = vpack.c.bf16 %v15971_v48, %v15969_v54  ;;  %v12230_v37 = vld [vmem:[#allocation21] ss:$0 sm:$0xff]  ;;  %vm8537_vm4 = vcmask 64512  }
 0xb4f   : > { %v8524_v3 = vld [vmem:[#allocation23] sm:$0xf] }
 0xb50   : > { %v8564_v63 = vsel %vm8562_vm3, %v8524_v3, 0 }
 0xb51   : > { %8460 = vmatpush.bf16.msra.mxu0 %v11866_v14  ;;  %11884 = vmatpush.bf16.msra.mxu3 %v11866_v14 }
 0xb52   : > { %8573 = vmatpush.bf16.msra.mxu1 %v8564_v63 }
 0xb55   : > { %8461 = vmatpush.bf16.msra.mxu0 %v11865_v36  ;;  %11885 = vmatpush.bf16.msra.mxu3 %v11865_v36 }
 0xb59   : > { %8462 = vmatpush.bf16.msra.mxu0 %v11864_v12  ;;  %11886 = vmatpush.bf16.msra.mxu3 %v11864_v12 }
 0xb5d   : > { %8463 = vmatpush.bf16.msra.mxu0 %v11863_v62  ;;  %11887 = vmatpush.bf16.msra.mxu3 %v11863_v62 }
 0xb61   : > { %8464 = vmatpush.bf16.msra.mxu0 %v11862_v38  ;;  %11888 = vmatpush.bf16.msra.mxu3 %v11862_v38 }
 0xb65   : > { %8465 = vmatpush.bf16.msra.mxu0 %v11861_v22  ;;  %11889 = vmatpush.bf16.msra.mxu3 %v11861_v22 }
 0xb69   : > { %8466 = vmatpush.bf16.msra.mxu0 %v11860_v49  ;;  %11890 = vmatpush.bf16.msra.mxu3 %v11860_v49 }
 0xb6c   : > { %8467 = vmatmul.bf16.vlgmr.msra.gmra.mxu0 %v8399_v44  ;;  %8492 = vmatmul.bf16.vlgmr.msra.gmra.mxu3 %v8404_v4 }
 0xb7c   : > { %8472 = vmatmul.bf16.gmra.mxu0 %v8400_v42  ;;  %8497 = vmatmul.bf16.gmra.mxu3 %v8405_v56 }
 0xb8c   : > { %8477 = vmatmul.bf16.gmra.mxu0 %v8401_v23  ;;  %8502 = vmatmul.bf16.gmra.mxu3 %v8406_v18 }
 0xb9c   : > { %8482 = vmatmul.bf16.gmra.mxu0 %v8402_v40 }
 0xbac   : > { %8487 = vmatmul.bf16.gmra.mxu0 %v8403_v39 }
 0xbe9   : > { %v8468_v10 = vpop.f32.mrf.mxu0 }
 0xbea   : > { %v8469_v2 = vadd.f32 %v12230_v37, %v8468_v10 }
 0xbec   : > { %v8508_v7 = vmax.f32 %v8469_v2, 0.0 }
 0xbef   : > { %v8493_v15 = vpop.f32.mrf.mxu3 }
 0xbf0   : > { %v8494_v42 = vadd.f32 %v12230_v37, %v8493_v15 }
 0xbf1   : > { %v8470_v5 = vpop.f32.mrf.mxu0 }
 0xbf2   : > { %v8471_v35 = vadd.f32 %v12230_v37, %v8470_v5  ;;  %v8518_v4 = vmax.f32 %v8494_v42, 0.0 }
 0xbf4   : > { %v8509_v31 = vmax.f32 %v8471_v35, 0.0 }
 0xbf6   : > { %v8525_v29 = vpack.c.bf16 %v8509_v31, %v8508_v7 }
 0xbf7   : > { %v8495_v62 = vpop.f32.mrf.mxu3 }
 0xbf8   : > { %11344 = vmatmul.msk.bf16.vlgmr.msra.gmra.mxu1 %vm8537_vm4, %v8525_v29  ;;  %v8496_v23 = vadd.f32 %v12230_v37, %v8495_v62 }
 0xbf9   : > { %v8473_v27 = vpop.f32.mrf.mxu0 }
 0xbfa   : > { %v8474_v55 = vadd.f32 %v12230_v37, %v8473_v27  ;;  %v8519_v40 = vmax.f32 %v8496_v23, 0.0 }
 0xbfc   : > { %v8510_v16 = vmax.f32 %v8474_v55, 0.0  ;;  %v8530_v56 = vpack.c.bf16 %v8519_v40, %v8518_v4 }
 0xbff   : > { %v8498_v44 = vpop.f32.mrf.mxu3 }
 0xc00   : > { %v8499_v18 = vadd.f32 %v12230_v37, %v8498_v44 }
 0xc01   : > { %v8475_v61 = vpop.f32.mrf.mxu0 }
 0xc02   : > { %v8476_v60 = vadd.f32 %v12230_v37, %v8475_v61  ;;  %v8520_v10 = vmax.f32 %v8499_v18, 0.0  ;;  %v16223_v61 = vld [vmem:[#allocation24] ss:$0 sm:$0xff] }
 0xc04   : > { %v8511_v1 = vmax.f32 %v8476_v60, 0.0 }
 0xc06   : > { %v8526_v13 = vpack.c.bf16 %v8511_v1, %v8510_v16 }
 0xc07   : > { %v8500_v39 = vpop.f32.mrf.mxu3 }
 0xc08   : > { %11345 = vmatmul.msk.bf16.gmra.mxu1 %vm8537_vm4, %v8526_v13  ;;  %v8501_v3 = vadd.f32 %v12230_v37, %v8500_v39 }
 0xc09   : > { %v8478_v45 = vpop.f32.mrf.mxu0 }
 0xc0a   : > { %v8479_v34 = vadd.f32 %v12230_v37, %v8478_v45  ;;  %v8521_v2 = vmax.f32 %v8501_v3, 0.0 }
 0xc0c   : > { %v8512_v9 = vmax.f32 %v8479_v34, 0.0  ;;  %v8531_v5 = vpack.c.bf16 %v8521_v2, %v8520_v10 }
 0xc0f   : > { %v8503_v63 = vpop.f32.mrf.mxu3 }
 0xc10   : > { %v8504_v7 = vadd.f32 %v12230_v37, %v8503_v63 }
 0xc11   : > { %v8480_v17 = vpop.f32.mrf.mxu0 }
 0xc12   : > { %v8481_v0 = vadd.f32 %v12230_v37, %v8480_v17  ;;  %v8522_v29 = vmax.f32 %v8504_v7, 0.0 }
 0xc14   : > { %v8513_v26 = vmax.f32 %v8481_v0, 0.0 }
 0xc16   : > { %v8527_v50 = vpack.c.bf16 %v8513_v26, %v8512_v9 }
 0xc17   : > { %v8505_v35 = vpop.f32.mrf.mxu3 }
 0xc18   : > { %11346 = vmatmul.msk.bf16.gmra.mxu1 %vm8537_vm4, %v8527_v50  ;;  %v8506_v31 = vadd.f32 %v12230_v37, %v8505_v35 }
 0xc19   : > { %v8483_v8 = vpop.f32.mrf.mxu0 }
 0xc1a   : > { %v8484_v25 = vadd.f32 %v12230_v37, %v8483_v8  ;;  %v8523_v27 = vmax.f32 %v8506_v31, 0.0 }
 0xc1c   : > { %v8514_v24 = vmax.f32 %v8484_v25, 0.0  ;;  %v8532_v55 = vpack.c.bf16 %v8523_v27, %v8522_v29 }
 0xc21   : > { %v8485_v57 = vpop.f32.mrf.mxu0 }
 0xc22   : > { %v8486_v59 = vadd.f32 %v12230_v37, %v8485_v57 }
 0xc24   : > { %v8515_v53 = vmax.f32 %v8486_v59, 0.0 }
 0xc26   : > { %v8528_v58 = vpack.c.bf16 %v8515_v53, %v8514_v24 }
 0xc28   : > { %11347 = vmatmul.msk.bf16.gmra.mxu1 %vm8537_vm4, %v8528_v58 }
 0xc29   : > { %v8488_v21 = vpop.f32.mrf.mxu0 }
 0xc2a   : > { %v8489_v14 = vadd.f32 %v12230_v37, %v8488_v21 }
 0xc2c   : > { %v8516_v38 = vmax.f32 %v8489_v14, 0.0 }
 0xc31   : > { %v8490_v36 = vpop.f32.mrf.mxu0 }
 0xc32   : > { %v8491_v12 = vadd.f32 %v12230_v37, %v8490_v36 }
 0xc34   : > { %v8517_v22 = vmax.f32 %v8491_v12, 0.0 }
 0xc36   : > { %v8529_v49 = vpack.c.bf16 %v8517_v22, %v8516_v38 }
 0xc38   : > { %11348 = vmatmul.msk.bf16.gmra.mxu1 %vm8537_vm4, %v8529_v49 }
 0xc48   : > { %11349 = vmatmul.msk.bf16.gmra.mxu1 %vm8537_vm4, %v8530_v56 }
 0xc58   : > { %11350 = vmatmul.msk.bf16.gmra.mxu1 %vm8537_vm4, %v8531_v5 }
 0xc68   : > { %11351 = vmatmul.msk.bf16.gmra.mxu1 %vm8537_vm4, %v8532_v55 }
 0xc75   : > { %v8575_v60 = vpop.f32.mrf.mxu1 }
 0xc76   : > { %v8576_v16 = vadd.f32 %v16223_v61, %v8575_v60 }
 0xc78   : > { %v11352_v1 = vmul.f32 -1.442695, %v8576_v16 }
 0xc7a   : > { %12232 = vpow2.f32 %v11352_v1 }
 0xc7d   : > { %v8577_v13 = vpop.f32.mrf.mxu1 }
 0xc7e   : > { %v8578_v45 = vadd.f32 %v16223_v61, %v8577_v13 }
 0xc80   : > { %v12233_v34 = vpop.eup %12232  ;;  %v11353_v17 = vmul.f32 -1.442695, %v8578_v45 }
 0xc81   : > { %v8663_v0 = vadd.f32 1.0, %v12233_v34 }
 0xc82   : > { %12234 = vpow2.f32 %v11353_v17 }
 0xc83   : > { %12236 = vrcp.f32 %v8663_v0  ;;  %v8690_v38 = vand.u32 2147483648, %v8663_v0  ;;  %vm8684_vm6 = vweird.f32 %v8663_v0  ;;  %v8688_v44 = vand.u32 2147483647, %v8663_v0 }
 0xc85   : > { %v8580_v37 = vpop.f32.mrf.mxu1  ;;  %v8691_v63 = vor.u32 1.1754944e-38, %v8690_v38  ;;  %vm8689_vm10 = vcmp.eq.f32.partialorder %v8688_v44, 8.507059e+37 }
 0xc86   : > { %v8581_v9 = vadd.f32 %v16223_v61, %v8580_v37 }
 0xc88   : > { %v12235_v26 = vpop.eup %12234  ;;  %v11354_v50 = vmul.f32 -1.442695, %v8581_v9 }
 0xc89   : > { %v12237_v8 = vpop.eup %12236  ;;  %v8664_v25 = vadd.f32 1.0, %v12235_v26 }
 0xc8a   : > { %12238 = vpow2.f32 %v11354_v50  ;;  %v8680_v57 = vmul.f32 %v12237_v8, %v8663_v0  ;;  %vm8685_vm5 = vweird.f32 %v12237_v8 }
 0xc8b   : > { %12240 = vrcp.f32 %v8664_v25  ;;  %v8705_v42 = vand.u32 2147483648, %v8664_v25  ;;  %vm16233_vm7 = vmor %vm8684_vm6, %vm8685_vm5  ;;  %v8703_v39 = vand.u32 2147483647, %v8664_v25  ;;  %vm8699_vm9 = vweird.f32 %v8664_v25 }
 0xc8c   : > { %v8681_v59 = vsub.f32 1.0, %v8680_v57 }
 0xc8d   : > { %v8582_v24 = vpop.f32.mrf.mxu1  ;;  %v8706_v35 = vor.u32 1.1754944e-38, %v8705_v42  ;;  %vm8704_vm12 = vcmp.eq.f32.partialorder %v8703_v39, 8.507059e+37 }
 0xc8e   : > { %v8583_v53 = vadd.f32 %v16223_v61, %v8582_v24  ;;  %v8682_v58 = vmul.f32 %v12237_v8, %v8681_v59 }
 0xc90   : > { %v12239_v21 = vpop.eup %12238  ;;  %v11355_v15 = vmul.f32 -1.442695, %v8583_v53  ;;  %v8683_v62 = vadd.f32 %v12237_v8, %v8682_v58 }
 0xc91   : > { %v12241_v14 = vpop.eup %12240  ;;  %v16229_v36 = vadd.f32 1.0, %v12239_v21 }
 0xc92   : > { %12242 = vpow2.f32 %v11355_v15  ;;  %v8695_v12 = vmul.f32 %v12241_v14, %v8664_v25  ;;  %vm8700_vm8 = vweird.f32 %v12241_v14  ;;  %v8687_v56 = vsel %vm16233_vm7, %v12237_v8, %v8683_v62 }
 0xc93   : > { %12244 = vrcp.f32 %v16229_v36  ;;  %vm8701_vm11 = vmor %vm8699_vm9, %vm8700_vm8  ;;  %v8692_v31 = vsel %vm8689_vm10, %v8691_v63, %v8687_v56  ;;  %vm8714_vm14 = vweird.f32 %v16229_v36  ;;  %v8718_v25 = vand.u32 2147483647, %v16229_v36 }
 0xc94   : > { %v8696_v22 = vsub.f32 1.0, %v8695_v12  ;;  %v16241_v16 = vmul.f32 %v8692_v31, %v15923_v11 }
 0xc95   : > { %v8585_v49 = vpop.f32.mrf.mxu1  ;;  %vm8719_vm2 = vcmp.eq.f32.partialorder %v8718_v25, 8.507059e+37 }
 0xc96   : > { %v8586_v23 = vadd.f32 %v16223_v61, %v8585_v49  ;;  %v8697_v40 = vmul.f32 %v12241_v14, %v8696_v22 }
 0xc98   : > { %v12243_v18 = vpop.eup %12242  ;;  %v11356_v3 = vmul.f32 -1.442695, %v8586_v23  ;;  %v8698_v10 = vadd.f32 %v12241_v14, %v8697_v40 }
 0xc99   : > { %v12245_v2 = vpop.eup %12244  ;;  %v8666_v5 = vadd.f32 1.0, %v12243_v18 }
 0xc9a   : > { %12246 = vpow2.f32 %v11356_v3  ;;  %v8710_v7 = vmul.f32 %v12245_v2, %v16229_v36  ;;  %v8702_v29 = vsel %vm8701_vm11, %v12241_v14, %v8698_v10  ;;  %vm8715_vm13 = vweird.f32 %v12245_v2 }
 0xc9b   : > { %12248 = vrcp.f32 %v8666_v5  ;;  %v8707_v55 = vsel %vm8704_vm12, %v8706_v35, %v8702_v29  ;;  %v8735_v57 = vand.u32 2147483648, %v8666_v5  ;;  %vm16256_vm15 = vmor %vm8714_vm14, %vm8715_vm13  ;;  %v8733_v21 = vand.u32 2147483647, %v8666_v5 }
 0xc9c   : > { %v8711_v27 = vsub.f32 1.0, %v8710_v7  ;;  %v16244_v1 = vmul.f32 %v8707_v55, %v15925_v41  ;;  %v8720_v41 = vand.u32 2147483648, %v16229_v36  ;;  %vm8729_vm1 = vweird.f32 %v8666_v5 }
 0xc9d   : > { %v8587_v60 = vpop.f32.mrf.mxu1  ;;  %v8736_v22 = vor.u32 1.1754944e-38, %v8735_v57  ;;  %vm8734_vm4 = vcmp.eq.f32.partialorder %v8733_v21, 8.507059e+37 }
 0xc9e   : > { %v8588_v13 = vadd.f32 %v16223_v61, %v8587_v60  ;;  %v8712_v45 = vmul.f32 %v12245_v2, %v8711_v27  ;;  %v8936_v34 = vpack.c.bf16 %v16244_v1, %v16241_v16  ;;  %v8721_v12 = vor.u32 1.1754944e-38, %v8720_v41 }
 0xca0   : > { %v12247_v17 = vpop.eup %12246  ;;  %v11357_v0 = vmul.f32 -1.442695, %v8588_v13  ;;  %v8713_v11 = vadd.f32 %v12245_v2, %v8712_v45 }
 0xca1   : > { %v12249_v37 = vpop.eup %12248  ;;  %v16249_v9 = vadd.f32 1.0, %v12247_v17 }
 0xca2   : > { %12250 = vpow2.f32 %v11357_v0  ;;  %v8725_v26 = vmul.f32 %v12249_v37, %v8666_v5  ;;  %vm8730_vm0 = vweird.f32 %v12249_v37  ;;  %v8717_v58 = vsel %vm16256_vm15, %v12245_v2, %v8713_v11 }
 0xca3   : > { %12252 = vrcp.f32 %v16249_v9  ;;  %vm8731_vm3 = vmor %vm8729_vm1, %vm8730_vm0  ;;  %v8722_v44 = vsel %vm8719_vm2, %v8721_v12, %v8717_v58  ;;  %vm8744_vm6 = vweird.f32 %v16249_v9  ;;  %v8748_v27 = vand.u32 2147483647, %v16249_v9 }
 0xca4   : > { %v8726_v50 = vsub.f32 1.0, %v8725_v26  ;;  %v16264_v56 = vmul.f32 %v8722_v44, %v15929_v46 }
 0xca5   : > { %v8590_v8 = vpop.f32.mrf.mxu1  ;;  %vm8749_vm10 = vcmp.eq.f32.partialorder %v8748_v27, 8.507059e+37 }
 0xca6   : > { %v8591_v59 = vadd.f32 %v16223_v61, %v8590_v8  ;;  %v8727_v53 = vmul.f32 %v12249_v37, %v8726_v50 }
 0xca8   : > { %v12251_v15 = vpop.eup %12250  ;;  %v11358_v14 = vmul.f32 -1.442695, %v8591_v59  ;;  %v8728_v62 = vadd.f32 %v12249_v37, %v8727_v53 }
 0xca9   : > { %v12253_v38 = vpop.eup %12252  ;;  %v8668_v36 = vadd.f32 1.0, %v12251_v15 }
 0xcaa   : > { %12254 = vpow2.f32 %v11358_v14  ;;  %v8740_v49 = vmul.f32 %v12253_v38, %v16249_v9  ;;  %v8732_v42 = vsel %vm8731_vm3, %v12249_v37, %v8728_v62  ;;  %vm8745_vm5 = vweird.f32 %v12253_v38 }
 0xcab   : > { %12256 = vrcp.f32 %v8668_v36  ;;  %v8737_v4 = vsel %vm8734_vm4, %v8736_v22, %v8732_v42  ;;  %v8765_v55 = vand.u32 2147483648, %v8668_v36  ;;  %vm16279_vm7 = vmor %vm8744_vm6, %vm8745_vm5  ;;  %v8763_v0 = vand.u32 2147483647, %v8668_v36 }
 0xcac   : > { %v8741_v23 = vsub.f32 1.0, %v8740_v49  ;;  %v16267_v39 = vmul.f32 %v8737_v4, %v15931_v51  ;;  %v8750_v51 = vand.u32 2147483648, %v16249_v9  ;;  %vm8759_vm9 = vweird.f32 %v8668_v36 }
 0xcad   : > { %v8592_v40 = vpop.f32.mrf.mxu1  ;;  %v8766_v8 = vor.u32 1.1754944e-38, %v8765_v55  ;;  %vm8764_vm12 = vcmp.eq.f32.partialorder %v8763_v0, 8.507059e+37 }
 0xcae   : > { %v8593_v18 = vadd.f32 %v16223_v61, %v8592_v40  ;;  %v8742_v3 = vmul.f32 %v12253_v38, %v8741_v23  ;;  %v8937_v63 = vpack.c.bf16 %v16267_v39, %v16264_v56  ;;  %v8751_v11 = vor.u32 1.1754944e-38, %v8750_v51 }
 0xcb0   : > { %v12255_v10 = vpop.eup %12254  ;;  %v11359_v2 = vmul.f32 -1.442695, %v8593_v18  ;;  %v8743_v46 = vadd.f32 %v12253_v38, %v8742_v3 }
 0xcb1   : > { %v12257_v5 = vpop.eup %12256  ;;  %v16272_v35 = vadd.f32 1.0, %v12255_v10 }
 0xcb2   : > { %12258 = vpow2.f32 %v11359_v2  ;;  %v8755_v7 = vmul.f32 %v12257_v5, %v8668_v36  ;;  %vm8760_vm8 = vweird.f32 %v12257_v5  ;;  %v8747_v17 = vsel %vm16279_vm7, %v12253_v38, %v8743_v46 }
 0xcb3   : > { %12260 = vrcp.f32 %v16272_v35  ;;  %vm8761_vm11 = vmor %vm8759_vm9, %vm8760_vm8  ;;  %v8752_v57 = vsel %vm8749_vm10, %v8751_v11, %v8747_v17  ;;  %vm8774_vm14 = vweird.f32 %v16272_v35  ;;  %v8778_v4 = vand.u32 2147483647, %v16272_v35 }
 0xcb4   : > { %v8756_v31 = vsub.f32 1.0, %v8755_v7  ;;  %v16287_v21 = vmul.f32 %v8752_v57, %v15933_v20  ;;  %v8780_v20 = vand.u32 2147483648, %v16272_v35 }
 0xcb5   : > { %v8595_v29 = vpop.f32.mrf.mxu1  ;;  %vm8779_vm2 = vcmp.eq.f32.partialorder %v8778_v4, 8.507059e+37 }
 0xcb6   : > { %v8596_v60 = vadd.f32 %v16223_v61, %v8595_v29  ;;  %v8757_v45 = vmul.f32 %v12257_v5, %v8756_v31  ;;  %v8781_v7 = vor.u32 1.1754944e-38, %v8780_v20 }
 0xcb8   : > { %v12259_v37 = vpop.eup %12258  ;;  %v11360_v26 = vmul.f32 -1.442695, %v8596_v60  ;;  %v8758_v41 = vadd.f32 %v12257_v5, %v8757_v45 }
 0xcb9   : > { %v12261_v50 = vpop.eup %12260  ;;  %v8670_v9 = vadd.f32 1.0, %v12259_v37 }
 0xcba   : > { %12262 = vpow2.f32 %v11360_v26  ;;  %v8770_v25 = vmul.f32 %v12261_v50, %v16272_v35  ;;  %v8762_v59 = vsel %vm8761_vm11, %v12257_v5, %v8758_v41  ;;  %vm8775_vm13 = vweird.f32 %v12261_v50 }
 0xcbb   : > { %12264 = vrcp.f32 %v8670_v9  ;;  %v8767_v53 = vsel %vm8764_vm12, %v8766_v8, %v8762_v59  ;;  %vm16298_vm15 = vmor %vm8774_vm14, %vm8775_vm13  ;;  %v8795_v3 = vand.u32 2147483648, %v8670_v9  ;;  %v8793_v2 = vand.u32 2147483647, %v8670_v9 }
 0xcbc   : > { %v8771_v24 = vsub.f32 1.0, %v8770_v25  ;;  %v16290_v15 = vmul.f32 %v8767_v53, %v15935_v30  ;;  %vm8789_vm1 = vweird.f32 %v8670_v9 }
 0xcbd   : > { %v8597_v58 = vpop.f32.mrf.mxu1  ;;  %v8796_v55 = vor.u32 1.1754944e-38, %v8795_v3  ;;  %vm8794_vm4 = vcmp.eq.f32.partialorder %v8793_v2, 8.507059e+37 }
 0xcbe   : > { %v8598_v14 = vadd.f32 %v16223_v61, %v8597_v58  ;;  %v8772_v12 = vmul.f32 %v12261_v50, %v8771_v24  ;;  %v8938_v62 = vpack.c.bf16 %v16290_v15, %v16287_v21 }
 0xcc0   : > { %v12263_v38 = vpop.eup %12262  ;;  %v11361_v36 = vmul.f32 -1.442695, %v8598_v14  ;;  %v8773_v42 = vadd.f32 %v12261_v50, %v8772_v12 }
 0xcc1   : > { %v12265_v22 = vpop.eup %12264  ;;  %v8671_v49 = vadd.f32 1.0, %v12263_v38 }
 0xcc2   : > { %12266 = vpow2.f32 %v11361_v36  ;;  %v8785_v44 = vmul.f32 %v12265_v22, %v8670_v9  ;;  %vm8790_vm0 = vweird.f32 %v12265_v22  ;;  %v8777_v10 = vsel %vm16298_vm15, %v12261_v50, %v8773_v42 }
 0xcc3   : > { %12268 = vrcp.f32 %v8671_v49  ;;  %vm8791_vm3 = vmor %vm8789_vm1, %vm8790_vm0  ;;  %v8782_v29 = vsel %vm8779_vm2, %v8781_v7, %v8777_v10  ;;  %v8810_v9 = vand.u32 2147483648, %v8671_v49  ;;  %vm8804_vm6 = vweird.f32 %v8671_v49 }
 0xcc4   : > { %v8786_v23 = vsub.f32 1.0, %v8785_v44  ;;  %v16305_v17 = vmul.f32 %v8782_v29, %v15937_v33  ;;  %v8808_v57 = vand.u32 2147483647, %v8671_v49 }
 0xcc5   : > { %v8600_v30 = vpop.f32.mrf.mxu1  ;;  %v8811_v53 = vor.u32 1.1754944e-38, %v8810_v9 }
 0xcc6   : > { %v8787_v18 = vmul.f32 %v12265_v22, %v8786_v23  ;;  %vm8809_vm10 = vcmp.eq.f32.partialorder %v8808_v57, 8.507059e+37  ;;  %v8601_v40 = vadd.f32 %v16223_v61, %v8600_v30 }
 0xcc8   : > { %v12267_v5 = vpop.eup %12266  ;;  %v8788_v46 = vadd.f32 %v12265_v22, %v8787_v18  ;;  %v11362_v2 = vmul.f32 -1.442695, %v8601_v40 }
 0xcc9   : > { %v12269_v51 = vpop.eup %12268  ;;  %v8672_v31 = vadd.f32 1.0, %v12267_v5 }
 0xcca   : > { %v8800_v35 = vmul.f32 %v12269_v51, %v8671_v49  ;;  %v8792_v27 = vsel %vm8791_vm3, %v12265_v22, %v8788_v46  ;;  %vm8805_vm5 = vweird.f32 %v12269_v51 }
 0xccb   : > { %12270 = vrcp.f32 %v8672_v31  ;;  %v8797_v13 = vsel %vm8794_vm4, %v8796_v55, %v8792_v27  ;;  %vm8806_vm7 = vmor %vm8804_vm6, %vm8805_vm5  ;;  %v8825_v33 = vand.u32 2147483648, %v8672_v31  ;;  %vm8819_vm9 = vweird.f32 %v8672_v31 }
 0xccc   : > { %v8801_v60 = vsub.f32 1.0, %v8800_v35  ;;  %v16308_v0 = vmul.f32 %v8797_v13, %v15941_v28  ;;  %v8823_v28 = vand.u32 2147483647, %v8672_v31 }
 0xccd   : > { %v8602_v45 = vpop.f32.mrf.mxu1  ;;  %v8826_v38 = vor.u32 1.1754944e-38, %v8825_v33 }
 0xcce   : > { %v8802_v37 = vmul.f32 %v12269_v51, %v8801_v60  ;;  %v8939_v26 = vpack.c.bf16 %v16308_v0, %v16305_v17  ;;  %vm8824_vm12 = vcmp.eq.f32.partialorder %v8823_v28, 8.507059e+37  ;;  %v8603_v3 = vadd.f32 %v16223_v61, %v8602_v45 }
 0xcd0   : > { %v8803_v50 = vadd.f32 %v12269_v51, %v8802_v37  ;;  %v11363_v5 = vmul.f32 -1.442695, %v8603_v3 }
 0xcd1   : > { %v12271_v11 = vpop.eup %12270 }
 0xcd2   : > { %v8815_v41 = vmul.f32 %v12271_v11, %v8672_v31  ;;  %vm8820_vm8 = vweird.f32 %v12271_v11  ;;  %v8807_v24 = vsel %vm8806_vm7, %v12269_v51, %v8803_v50 }
 0xcd3   : > { %vm8821_vm11 = vmor %vm8819_vm9, %vm8820_vm8  ;;  %v8812_v14 = vsel %vm8809_vm10, %v8811_v53, %v8807_v24 }
 0xcd4   : > { %v8816_v8 = vsub.f32 1.0, %v8815_v41  ;;  %v16313_v44 = vmul.f32 %v8812_v14, %v15945_v19 }
 0xcd5   : > { %v8605_v25 = vpop.f32.mrf.mxu1 }
 0xcd6   : > { %v8817_v59 = vmul.f32 %v12271_v11, %v8816_v8  ;;  %v8606_v20 = vadd.f32 %v16223_v61, %v8605_v25 }
 0xcd8   : > { %v8818_v58 = vadd.f32 %v12271_v11, %v8817_v59  ;;  %v11364_v18 = vmul.f32 -1.442695, %v8606_v20 }
 0xcda   : > { %v8822_v12 = vsel %vm8821_vm11, %v12271_v11, %v8818_v58 }
 0xcdb   : > { %v8827_v36 = vsel %vm8824_vm12, %v8826_v38, %v8822_v12 }
 0xcdc   : > { %v16316_v49 = vmul.f32 %v8827_v36, %v15949_v43 }
 0xcdd   : > { %v8607_v22 = vpop.f32.mrf.mxu1 }
 0xcde   : > { %v8608_v42 = vadd.f32 %v16223_v61, %v8607_v22  ;;  %v8940_v23 = vpack.c.bf16 %v16316_v49, %v16313_v44 }
 0xce0   : > { %v11365_v4 = vmul.f32 -1.442695, %v8608_v42 }
 0xce2   : > { %12272 = vpow2.f32 %v11365_v4 }
 0xce3   : > { %12274 = vpow2.f32 %v11364_v18 }
 0xce5   : > { %v8610_v10 = vpop.f32.mrf.mxu1 }
 0xce6   : > { %v8611_v19 = vadd.f32 %v16223_v61, %v8610_v10 }
 0xce8   : > { %v11366_v43 = vmul.f32 -1.442695, %v8611_v19  ;;  %v12273_v7 = vpop.eup %12272 }
 0xce9   : > { %v12275_v46 = vpop.eup %12274  ;;  %v16325_v51 = vadd.f32 1.0, %v12273_v7 }
 0xcea   : > { %12276 = vpow2.f32 %v11366_v43  ;;  %v16328_v29 = vadd.f32 1.0, %v12275_v46 }
 0xceb   : > { %12278 = vpow2.f32 %v11362_v2  ;;  %vm8879_vm6 = vweird.f32 %v16325_v51 }
 0xcec   : > { %12280 = vpow2.f32 %v11363_v5  ;;  %vm8864_vm8 = vweird.f32 %v16328_v29 }
 0xced   : > { %v8612_v31 = vpop.f32.mrf.mxu1  ;;  %12282 = vrcp.f32 %v16325_v51 }
 0xcee   : > { %v8613_v30 = vadd.f32 %v16223_v61, %v8612_v31 }
 0xcf0   : > { %v12277_v35 = vpop.eup %12276  ;;  %v11367_v27 = vmul.f32 -1.442695, %v8613_v30 }
 0xcf1   : > { %v12279_v55 = vpop.eup %12278  ;;  %v8677_v60 = vadd.f32 1.0, %v12277_v35 }
 0xcf2   : > { %12284 = vpow2.f32 %v11367_v27  ;;  %v12281_v13 = vpop.eup %12280  ;;  %v16331_v45 = vadd.f32 1.0, %v12279_v55  ;;  %v8885_v55 = vand.u32 2147483648, %v16325_v51 }
 0xcf3   : > { %12286 = vrcp.f32 %v8677_v60  ;;  %v16334_v37 = vadd.f32 1.0, %v12281_v13  ;;  %v16336_v11 = vpop.eup %12282  ;;  %v8900_v22 = vand.u32 2147483648, %v8677_v60  ;;  %vm8894_vm14 = vweird.f32 %v8677_v60 }
 0xcf4   : > { %12288 = vrcp.f32 %v16328_v29  ;;  %v8875_v57 = vmul.f32 %v16336_v11, %v16325_v51  ;;  %v8898_v20 = vand.u32 2147483647, %v8677_v60  ;;  %vm8880_vm2 = vweird.f32 %v16336_v11 }
 0xcf5   : > { %12290 = vrcp.f32 %v16331_v45  ;;  %v8901_v7 = vor.u32 1.1754944e-38, %v8900_v22  ;;  %vm8881_vm9 = vmor %vm8879_vm6, %vm8880_vm2  ;;  %v8840_v22 = vand.u32 2147483648, %v16331_v45 }
 0xcf6   : > { %12292 = vrcp.f32 %v16334_v37  ;;  %v8876_v53 = vsub.f32 1.0, %v8875_v57  ;;  %vm8899_vm3 = vcmp.eq.f32.partialorder %v8898_v20, 8.507059e+37  ;;  %v8838_v20 = vand.u32 2147483647, %v16331_v45 }
 0xcf8   : > { %v12285_v61 = vpop.eup %12284  ;;  %v8877_v40 = vmul.f32 %v16336_v11, %v8876_v53 }
 0xcf9   : > { %v12287_v41 = vpop.eup %12286  ;;  %v8678_v50 = vadd.f32 1.0, %v12285_v61  ;;  %v8883_v61 = vand.u32 2147483647, %v16325_v51  ;;  %v8886_v51 = vor.u32 1.1754944e-38, %v8885_v55 }
 0xcfa   : > { %v16339_v9 = vpop.eup %12288  ;;  %v8890_v8 = vmul.f32 %v12287_v41, %v8677_v60  ;;  %vm8895_vm13 = vweird.f32 %v12287_v41  ;;  %v8878_v30 = vadd.f32 %v16336_v11, %v8877_v40 }
 0xcfb   : > { %12294 = vrcp.f32 %v8678_v50  ;;  %v8860_v59 = vmul.f32 %v16339_v9, %v16328_v29  ;;  %v16346_v33 = vpop.eup %12290  ;;  %vm16355_vm15 = vmor %vm8894_vm14, %vm8895_vm13  ;;  %v8915_v3 = vand.u32 2147483648, %v8678_v50  ;;  %v8913_v5 = vand.u32 2147483647, %v8678_v50 }
 0xcfc   : > { %v8891_v25 = vsub.f32 1.0, %v8890_v8  ;;  %v16348_v28 = vpop.eup %12292  ;;  %v8830_v12 = vmul.f32 %v16346_v33, %v16331_v45  ;;  %vm8865_vm1 = vweird.f32 %v16339_v9  ;;  %vm8909_vm4 = vweird.f32 %v8678_v50 }
 0xcfd   : > { %v8861_v14 = vsub.f32 1.0, %v8860_v59  ;;  %v8845_v42 = vmul.f32 %v16348_v28, %v16334_v37  ;;  %v8916_v27 = vor.u32 1.1754944e-38, %v8915_v3  ;;  %vm8914_vm7 = vcmp.eq.f32.partialorder %v8913_v5, 8.507059e+37  ;;  %vm8866_vm10 = vmor %vm8864_vm8, %vm8865_vm1 }
 0xcfe   : > { %v8892_v24 = vmul.f32 %v12287_v41, %v8891_v25  ;;  %v8831_v19 = vsub.f32 1.0, %v8830_v12  ;;  %v8870_v8 = vand.u32 2147483648, %v16328_v29  ;;  %v8882_v59 = vsel %vm8881_vm9, %v16336_v11, %v8878_v30 }
 0xcff   : > { %v8862_v10 = vmul.f32 %v16339_v9, %v8861_v14  ;;  %v8846_v46 = vsub.f32 1.0, %v8845_v42  ;;  %vm8884_vm11 = vcmp.eq.f32.partialorder %v8883_v61, 8.507059e+37  ;;  %vm8850_vm13 = vweird.f32 %v16348_v28 }
 0xd00   : > { %v8893_v38 = vadd.f32 %v12287_v41, %v8892_v24  ;;  %v8871_v14 = vor.u32 1.1754944e-38, %v8870_v8  ;;  %v8887_v12 = vsel %vm8884_vm11, %v8886_v51, %v8882_v59  ;;  %vm8835_vm14 = vweird.f32 %v16346_v33 }
 0xd01   : > { %v12295_v58 = vpop.eup %12294  ;;  %v8863_v13 = vadd.f32 %v16339_v9, %v8862_v10  ;;  %v8847_v24 = vmul.f32 %v16348_v28, %v8846_v46  ;;  %v8855_v11 = vand.u32 2147483648, %v16334_v37  ;;  %vm8834_vm1 = vweird.f32 %v16331_v45  ;;  %v8944_v45 = vld [vmem:[#allocation3] sm:$0x1] }
 0xd02   : > { %v8905_v36 = vmul.f32 %v12295_v58, %v8678_v50  ;;  %v8897_v2 = vsel %vm16355_vm15, %v12287_v41, %v8893_v38  ;;  %vm8910_vm0 = vweird.f32 %v12295_v58  ;;  %v8868_v50 = vand.u32 2147483647, %v16328_v29  ;;  %vm8836_vm2 = vmor %vm8834_vm1, %vm8835_vm14 }
 0xd03   : > { %v8902_v35 = vsel %vm8899_vm3, %v8901_v7, %v8897_v2  ;;  %vm8911_vm5 = vmor %vm8909_vm4, %vm8910_vm0  ;;  %v8832_v29 = vmul.f32 %v16346_v33, %v8831_v19  ;;  %v8932_v38 = vmul.f32 %v8887_v12, %v15965_v47  ;;  %vm8849_vm15 = vweird.f32 %v16334_v37 }
 0xd04   : > { %v8906_v4 = vsub.f32 1.0, %v8905_v36  ;;  %v8933_v25 = vmul.f32 %v8902_v35, %v15969_v54  ;;  %vm8869_vm12 = vcmp.eq.f32.partialorder %v8868_v50, 8.507059e+37  ;;  %v8848_v54 = vadd.f32 %v16348_v28, %v8847_v24  ;;  %vm8851_vm0 = vmor %vm8849_vm15, %vm8850_vm13 }
 0xd05   : > { %v8853_v36 = vand.u32 2147483647, %v16334_v37  ;;  %v8856_v40 = vor.u32 1.1754944e-38, %v8855_v11  ;;  %v8841_v3 = vor.u32 1.1754944e-38, %v8840_v22  ;;  %vm8839_vm4 = vcmp.eq.f32.partialorder %v8838_v20, 8.507059e+37 }
 0xd06   : > { %v8907_v43 = vmul.f32 %v12295_v58, %v8906_v4  ;;  %v8852_v4 = vsel %vm8851_vm0, %v16348_v28, %v8848_v54 }
 0xd07   : > { %vm8854_vm3 = vcmp.eq.f32.partialorder %v8853_v36, 8.507059e+37 }
 0xd08   : > { %v8908_v31 = vadd.f32 %v12295_v58, %v8907_v43  ;;  %v8857_v10 = vsel %vm8854_vm3, %v8856_v40, %v8852_v4 }
 0xd09   : > { %v8930_v19 = vmul.f32 %v8857_v10, %v15957_v52 }
 0xd0a   : > { %v8912_v60 = vsel %vm8911_vm5, %v12295_v58, %v8908_v31  ;;  %v8867_v58 = vsel %vm8866_vm10, %v16339_v9, %v8863_v13  ;;  %v8833_v9 = vadd.f32 %v16346_v33, %v8832_v29 }
 0xd0b   : > { %v8917_v41 = vsel %vm8914_vm7, %v8916_v27, %v8912_v60 }
 0xd0c   : > { %v8934_v57 = vmul.f32 %v8917_v41, %v15971_v48  ;;  %v8872_v48 = vsel %vm8869_vm12, %v8871_v14, %v8867_v58  ;;  %v8837_v18 = vsel %vm8836_vm2, %v16346_v33, %v8833_v9  ;;  %v12967_v33 = vmov 0  }
 0xd0d   : > { %v8931_v42 = vmul.f32 %v8872_v48, %v15961_v32  ;;  %v8842_v37 = vsel %vm8839_vm4, %v8841_v3, %v8837_v18  ;;  %12229 = vset.pattern.permute.xlu0 %v12967_v33 }
 0xd0e   : > { %v8943_v53 = vpack.c.bf16 %v8934_v57, %v8933_v25  ;;  %v8929_v32 = vmul.f32 %v8842_v37, %v15953_v6  ;;  %8947 = vperm.xlu0 %12229, %v8944_v45   ;;  %v8935_v6 = vld [vmem:[#allocation26] sm:$0x1] }
 0xd0f   : > { %v8942_v47 = vpack.c.bf16 %v8932_v38, %v8931_v42 }
 0xd10   : > { %8951 = vmatpush.bf16.xpose.msra.mxu2 %v8943_v53  ;;  %v8941_v2 = vpack.c.bf16 %v8930_v19, %v8929_v32 }
 0xd18   : > { %8952 = vmatpush.bf16.xpose.msra.mxu2 %v8942_v47 }
 0xd20   : > { %8953 = vmatpush.bf16.xpose.msra.mxu2 %v8941_v2 }
 0xd28   : > { %8954 = vmatpush.bf16.xpose.msra.mxu2 %v8940_v23 }
 0xd30   : > { %8955 = vmatpush.bf16.xpose.msra.mxu2 %v8939_v26 }
 0xd38   : > { %8956 = vmatpush.bf16.xpose.msra.mxu2 %v8938_v62 }
 0xd40   : > { %8957 = vmatpush.bf16.xpose.msra.mxu2 %v8937_v63 }
 0xd48   : > { %8958 = vmatpush.bf16.xpose.msra.mxu2 %v8936_v34 }
 0xd4f   : > { %8959 = vmatmul.bf16.vlgmr.msra.gmra.mxu2 %v8935_v6 }
 0xd80   : > { %v8948_v52 = vpop.permute.xlu0 %8947 }
 0xd81   : > { %v8950_v17 = vperm.slane %v8948_v52, 0 }
 0xdd2   : > { %v8960_v0 = vpop.f32.mrf.mxu2 }
 0xdd3   : > { %v8961_v26 = vadd.f32 %v8960_v0, %v8950_v17 }
 0xdd5   : > { %8964 = vst [vmem:[%s13414_s29] sm:$0x1] %v8961_v26 }
 0xdda   : > { %v8962_v44 = vpop.f32.mrf.mxu2 }
 0xddb PF: > { %s16857_s3 = sld [smem:[#allocation42_spill]]  ;;  %s8976_s28 = sshll.u32 %s13414_s29, 4  ;;  %s8977_s28 = int_to_ptr.vmem [resolvable:$true] %s8976_s28 }
 0xddc   : > { %s16858_s0 = sld [smem:[#allocation98_spill]]  ;;  %s8966_s19 = scalar_lea.sflag [#allocation6], %s1091_s24 }
 0xde2   : > { %s16859_s23 = smov %s16858_s0  ;;  %s8974_s5 = scalar_lea.hbm %s16858_s0, %s16857_s3 }
 0xde3   : > { %s8978_s26 = sshll.u32 %s8974_s5, 4  ;;  %s12826_s4 = scalar_lea.hbm %s16859_s23, 2  ;;  %s8979_s26 = int_to_ptr.hbm [resolvable:$true] %s8978_s26 }
 0xde4   : > { %s12820_s2 = sshra.s32 %s8979_s26, 4  ;;  %s12821_s2 = int_to_ptr.hbm [resolvable:$true] %s12820_s2 }
 0xde5   : > { %s12822_s25 = scalar_lea.hbm %s12821_s2, 1  ;;  %p12827_p10 = scmp.lt.s32.totalorder %s12821_s2, %s16859_s23 }
 0xde6   : > { %p12823_p4 = scmp.ne.s32.totalorder %s12821_s2, %s12822_s25  ;;  %p12828_p12 = scmp.lt.s32.totalorder %s12826_s4, %s12822_s25 }
 0xde8   : > { %p12824_p6 = pnand %p12823_p4, %p13202_p7  ;;  %p12829_p3 = por %p12828_p12, %p12827_p10 }
 0xdea   : > { %p12825_p8 = pneg %p12824_p6 }
 0xdec   : > { %p12830_p5 = pnand %p12829_p3, %p12825_p8 }
 0xdee   : > { %12833 = shalt.err (!%p12830_p5)
}
 0xdef   : > { %11960 = dma.vmem_to_hbm [thread:$0]  (%p13202_p7), %s8977_s28, 16, %s8979_s26, %s8966_s19  }
 0xdf0 PF: > { %s16862_s24 = sld [smem:[#allocation44_spill]] }
 0xdf1   : > { %s16863_s29 = sld [smem:[#allocation36_spill]] }
 0xdf6   : > { %p12038_p1 = scmp.ge.s32.totalorder %s16862_s24, 2 }
 0xdf7   : > { %s8990_s22 = sand.u32 1, %s16863_s29  }
 0xdf8   : > { %p12016_p9 = pnand %p12038_p1, %p13208_p11  ;;  %s8991_s21 = scalar_lea.sflag [#allocation6], %s8990_s22 }
 0xdfa   : > { %p12017_p13 = pneg %p12016_p9 }
 0xdfc   : > { %12907 = dma.done.wait (%p12017_p13), %s8991_s21, 16  }
 0xdfd   : > { %12909 = vsyncadd (%p12017_p13), %s8991_s21, 4294967280  ;;  %s41_s22 = sadd.s32 1, %s16862_s24   ;;  %s16865_s26 = sld [smem:[#allocation37_spill]] }
 0xdfe   : > { %p38_p0 = scmp.ge.s32.totalorder %s41_s22, 10   ;;  %s16866_s27 = sld [smem:[#allocation38_spill]] }
 0xdff   : > { %s16867_s3 = sld [smem:[#allocation51_spill]]  ;;  %s16874_s20 = smov %s12944_s30 }
 0xe00   : > { %s16868_s28 = sld [smem:[#allocation39_spill]] }
 0xe01   : > { %s16869_s29 = sld [smem:[#allocation40_spill]] }
 0xe02   : > { %s16870_s0 = sld [smem:[#allocation49_spill]] }
 0xe03   : > { %s16871_s4 = sld [smem:[#allocation43_spill]] }
 0xe04   : > { %s16872_s5 = sld [smem:[#allocation47_spill]] }
 0xe05   : > { %s16873_s19 = sld [smem:[#allocation48_spill]] }
 0xe07   :  { %40 = sbr.rel (!%p38_p0) target bundleno = 26 (0x1a), region = 280 }
 0xe0a   : > { %s16875_s30 = smov %s16872_s5 }
 0xe0b   : > { %s16876_s5 = smov %s16873_s19 }
 0xe0c   :  { %8996 = vsyncpa [#allocation5], 1 }
 0xe0d   :  { %8998 = vsyncpa [#allocation5 + $0x1], 1 }
 0xe0e   :  { %8999 = vsyncpa [#allocation8], 1 }
 0xe0f   :  { %9000 = vsyncpa [#allocation19], 1 }
 0xe10   :  { %9001 = vsyncpa [#allocation22], 1 }
 0xe11   :  { %9002 = vsyncpa [#allocation25], 1 }
 0xe12   :  { %9003 = vsyncpa [#allocation6], 1 }
 0xe13   :  { %9005 = vsyncpa [#allocation6 + $0x1], 1 }

</bundles_post_ra>
